<compile_context>
chip_gen: v5e
topology: v5e:2x2
jax: 0.10.0
libtpu: 0.0.40
codegen_flags: <defaults>
</compile_context>

<pallas_src>
import jax
import jax.numpy as jnp
from jax import lax
from jax.experimental import pallas as pl
from jax.experimental.pallas import tpu as pltpu

GP = 128                        # per-gate lane pitch (3 streams * H must fit)
O_PAD = 128                     # classifier output padded to a full lane tile
STREAMS = ("fb", "doc", "occ")  # classifier concat order: cat(x_fb, x_doc, x_occ)
IN_SIZES = (113, 100, 5)        # per-stream layer-0 feature widths
IN_OFFSETS = (0, 113, 213)
DIN = sum(IN_SIZES)             # 218
DIN_PAD = 256                   # lane-aligned, padded layer-0 input width
GATE_PERM = (0, 1, 3, 2)        # packed gate order i|f|o|g <- PyTorch i|f|g|o


# ----------------------------------------------------------------------------
# Fused kernel: 3 streams x (num_layers x biLSTM) + classifier epilogue
# ----------------------------------------------------------------------------
def _make_fused_kernel(num_layers, T, B):
    def kernel(*refs):
        x_ref = refs[0]                        # (T*B, DIN_PAD)      bf16
        w_refs = refs[1:1 + 3 * num_layers]    # per layer: wih, whh, b
        wcls_ref = refs[1 + 3 * num_layers]    # (2, GP, O_PAD)      f32
        out_ref = refs[2 + 3 * num_layers]     # (B, O_PAD)          f32
        act_ref = refs[3 + 3 * num_layers]     # (T*B, 2*GP)         bf16

        hf_last = None      # fwd hidden after the full forward pass (t = T-1)
        hb_last = None      # bwd hidden emitted at output time t = T-1

        for layer in range(num_layers):
            wih_ref = w_refs[3 * layer + 0]    # (2, Din_pad, 4*GP)  bf16
            whh_ref = w_refs[3 * layer + 1]    # (2, GP, 4*GP)       bf16
            b_ref = w_refs[3 * layer + 2]      # (2, 1, 4*GP)        f32

            # ---- hoisted input projection: all timesteps, all streams ------
            xin = x_ref[...] if layer == 0 else act_ref[...]
            gxf = jnp.dot(xin, wih_ref[0],
                          preferred_element_type=jnp.float32) + b_ref[0]
            gxb = jnp.dot(xin, wih_ref[1],
                          preferred_element_type=jnp.float32) + b_ref[1]

            # recurrent weights: read once per layer (hoisted out of time loop)
            whh_f = whh_ref[0]
            whh_b = whh_ref[1]

            def cell(gates, c):
                # packed gate order i | f | o | g : 1 sigmoid + 1 tanh issue
                sig = jax.nn.sigmoid(gates[:, :3 * GP])
                i_g = sig[:, 0 * GP:1 * GP]
                f_g = sig[:, 1 * GP:2 * GP]
                o_g = sig[:, 2 * GP:3 * GP]
                g_g = jnp.tanh(gates[:, 3 * GP:])
                c = f_g * c + i_g * g_g
                h = o_g * jnp.tanh(c)
                return h, c

            z = jnp.zeros((B, GP), jnp.float32)
            h_f, c_f, h_b, c_b = z, z, z, z
            # fwd and bwd chains interleaved; fully unrolled (T is small).
            for t in range(T):
                tb = T - 1 - t
                gates_f = gxf[t * B:(t + 1) * B] + jnp.dot(
                    h_f.astype(jnp.bfloat16), whh_f,
                    preferred_element_type=jnp.float32)
                h_f, c_f = cell(gates_f, c_f)
                gates_b = gxb[tb * B:(tb + 1) * B] + jnp.dot(
                    h_b.astype(jnp.bfloat16), whh_b,
                    preferred_element_type=jnp.float32)
                h_b, c_b = cell(gates_b, c_b)
                if t == 0:
                    hb_last = h_b           # bwd state seen at output time T-1
                if layer < num_layers - 1:  # only needed as next layer's input
                    act_ref[t * B:(t + 1) * B, 0:GP] = h_f.astype(jnp.bfloat16)
                    act_ref[tb * B:(tb + 1) * B, GP:2 * GP] = (
                        h_b.astype(jnp.bfloat16))
            hf_last = h_f

        # ---- fused classifier epilogue (lane-dense: O padded to 128) -------
        out_ref[...] = (
            jnp.dot(hf_last, wcls_ref[0], preferred_element_type=jnp.float32)
            + jnp.dot(hb_last, wcls_ref[1], preferred_element_type=jnp.float32))

    return kernel


# ----------------------------------------------------------------------------
# pallas_call wrapper (single program, everything resident in VMEM)
# ----------------------------------------------------------------------------
def fused_bilstm_classifier(x_packed, params, *, num_layers, T, B):
    args = [x_packed]
    for l in range(num_layers):
        args += [params[f"wih{l}"], params[f"whh{l}"], params[f"b{l}"]]
    args.append(params["wcls"])

    vmem = pl.BlockSpec(memory_space=pltpu.MemorySpace.VMEM)
    return pl.pallas_call(
        _make_fused_kernel(num_layers, T, B),
        out_shape=jax.ShapeDtypeStruct((B, O_PAD), jnp.float32),
        in_specs=[vmem] * len(args),
        out_specs=vmem,
        scratch_shapes=[pltpu.VMEM((T * B, 2 * GP), jnp.bfloat16)],  # act slab
    )(*args)


def pack_inputs(x_fb, x_doc, x_occ):
    """(B,T,D) batch-first inputs -> (T*B, DIN_PAD) time-major, padded, bf16."""
    B, T, _ = x_fb.shape
    x = jnp.concatenate([x_fb, x_doc, x_occ], axis=-1)            # (B, T, 218)
    x = jnp.transpose(x, (1, 0, 2)).reshape(T * B, DIN)
    x = jnp.pad(x, ((0, 0), (0, DIN_PAD - DIN)))
    return x.astype(jnp.bfloat16)


def twmodel_forward(params, x_fb, x_doc, x_occ):
    """Matches TWModel.forward: 3 biLSTMs, last timestep, concat, linear."""
    num_layers = sum(1 for name in params if name.startswith("wih"))
    B, T, _ = x_fb.shape
    O = params["lin_b"].shape[0]
    logits_pad = fused_bilstm_classifier(
        pack_inputs(x_fb, x_doc, x_occ), params, num_layers=num_layers, T=T, B=B)
    return logits_pad[:, :O] + params["lin_b"]                    # (B, O)


# ----------------------------------------------------------------------------
# Parameter init (PyTorch U(-1/sqrt(H), 1/sqrt(H))) + packing into kernel layout
# ----------------------------------------------------------------------------
def _place(dst, d, row_sl, w_t, s, H):
    """Scatter (rows, 4H) PyTorch-gate-order columns into packed i|f|o|g layout,
    into stream s's 32-lane sub-block of each 128-lane gate pitch."""
    for g_out, g_in in enumerate(GATE_PERM):
        c0 = g_out * GP + s * H
        dst = dst.at[d, row_sl, c0:c0 + H].set(w_t[:, g_in * H:(g_in + 1) * H])
    return dst


def init_twmodel_params(key, hidden_size, num_layers, output_size):
    """Returns (packed kernel params, raw PyTorch-layout weights)."""
    H = hidden_size
    assert 3 * H <= GP and output_size <= O_PAD
    k = 1.0 / H ** 0.5
    raw = {}
    for name, d_in0 in zip(STREAMS, IN_SIZES):
        layers = []
        for l in range(num_layers):
            d_in = d_in0 if l == 0 else 2 * H
            dirs = []
            for _ in range(2):                       # forward, backward
                key, k1, k2, k3, k4 = jax.random.split(key, 5)
                dirs.append(dict(
                    wih=jax.random.uniform(k1, (4 * H, d_in), jnp.float32, -k, k),
                    whh=jax.random.uniform(k2, (4 * H, H), jnp.float32, -k, k),
                    b_ih=jax.random.uniform(k3, (4 * H,), jnp.float32, -k, k),
                    b_hh=jax.random.uniform(k4, (4 * H,), jnp.float32, -k, k)))
            layers.append(dirs)
        raw[name] = layers
    d_lin = 6 * H
    kl = 1.0 / d_lin ** 0.5
    key, k1, k2 = jax.random.split(key, 3)
    raw["lin_w"] = jax.random.uniform(k1, (output_size, d_lin), jnp.float32, -kl, kl)
    raw["lin_b"] = jax.random.uniform(k2, (output_size,), jnp.float32, -kl, kl)

    # Pack into the fused block-diagonal / lane-padded layout.
    # NOTE: padded rows/cols/bias lanes must stay exactly 0 (padded-lane
    # invariant of the recurrence).
    params = {}
    for l in range(num_layers):
        din = DIN_PAD if l == 0 else 2 * GP
        wih = jnp.zeros((2, din, 4 * GP), jnp.float32)
        whh = jnp.zeros((2, GP, 4 * GP), jnp.float32)
        b = jnp.zeros((2, 1, 4 * GP), jnp.float32)
        for s, name in enumerate(STREAMS):
            for d in range(2):
                rd = raw[name][l][d]
                wih_t = rd["wih"].T                  # (Din, 4H)
                whh_t = rd["whh"].T                  # (H, 4H)
                bias = (rd["b_ih"] + rd["b_hh"]).reshape(1, 4 * H)
                if l == 0:
                    off, n = IN_OFFSETS[s], IN_SIZES[s]
                    wih = _place(wih, d, slice(off, off + n), wih_t, s, H)
                else:   # layer input lanes = [fwd h (GP) | bwd h (GP)]
                    wih = _place(wih, d, slice(s * H, s * H + H), wih_t[:H], s, H)
                    wih = _place(wih, d, slice(GP + s * H, GP + s * H + H),
                                 wih_t[H:2 * H], s, H)
                whh = _place(whh, d, slice(s * H, s * H + H), whh_t, s, H)
                b = _place(b, d, slice(0, 1), bias, s, H)
        params[f"wih{l}"] = wih.astype(jnp.bfloat16)
        params[f"whh{l}"] = whh.astype(jnp.bfloat16)
        params[f"b{l}"] = b
    wcls = jnp.zeros((2, GP, O_PAD), jnp.float32)
    for s in range(3):
        fwd_blk = raw["lin_w"][:, (2 * s) * H:(2 * s + 1) * H].T      # (H, O)
        bwd_blk = raw["lin_w"][:, (2 * s + 1) * H:(2 * s + 2) * H].T  # (H, O)
        wcls = wcls.at[0, s * H:(s + 1) * H, :output_size].set(fwd_blk)
        wcls = wcls.at[1, s * H:(s + 1) * H, :output_size].set(bwd_blk)
    params["wcls"] = wcls
    params["lin_b"] = raw["lin_b"]
    return params, raw


# ----------------------------------------------------------------------------
# Pure-JAX f32 reference (PyTorch nn.LSTM semantics) for validation
# ----------------------------------------------------------------------------
def _ref_bilstm_layer(x, layer_dirs, H):
    def run(d, xs):
        wih_t, whh_t = d["wih"].T, d["whh"].T
        bias = d["b_ih"] + d["b_hh"]

        def step(carry, x_t):
            h, c = carry
            g = x_t @ wih_t + h @ whh_t + bias
            i = jax.nn.sigmoid(g[:, 0 * H:1 * H])
            f = jax.nn.sigmoid(g[:, 1 * H:2 * H])
            gg = jnp.tanh(g[:, 2 * H:3 * H])
            o = jax.nn.sigmoid(g[:, 3 * H:4 * H])
            c = f * c + i * gg
            h = o * jnp.tanh(c)
            return (h, c), h

        z = jnp.zeros((xs.shape[0], H), jnp.float32)
        _, hs = lax.scan(step, (z, z), jnp.transpose(xs, (1, 0, 2)))
        return jnp.transpose(hs, (1, 0, 2))

    h_f = run(layer_dirs[0], x)
    h_b = run(layer_dirs[1], x[:, ::-1, :])[:, ::-1, :]
    return jnp.concatenate([h_f, h_b], axis=-1)


def twmodel_reference(raw, x_fb, x_doc, x_occ, H, num_layers):
    outs = []
    for name, x in zip(STREAMS, (x_fb, x_doc, x_occ)):
        h = x
        for l in range(num_layers):
            h = _ref_bilstm_layer(h, raw[name][l], H)
        outs.append(h[:, -1, :])
    return jnp.concatenate(outs, axis=1) @ raw["lin_w"].T + raw["lin_b"]


# ----------------------------------------------------------------------------
if __name__ == "__main__":
    HIDDEN, NUM_LAYERS, OUTPUT = 32, 2, 10
    B, T = 2, 8

    params, raw = init_twmodel_params(
        jax.random.PRNGKey(0), HIDDEN, NUM_LAYERS, OUTPUT)

    k_fb, k_doc, k_occ = jax.random.split(jax.random.PRNGKey(0), 3)
    x_fb = jax.random.normal(k_fb, (B, T, 113), dtype=jnp.float32)
    x_doc = jax.random.normal(k_doc, (B, T, 100), dtype=jnp.float32)
    x_occ = jax.random.normal(k_occ, (B, T, 5), dtype=jnp.float32)

    fwd = jax.jit(twmodel_forward)
    out = jax.block_until_ready(fwd(params, x_fb, x_doc, x_occ))
    assert out.shape == (B, OUTPUT), out.shape

    # Validate against an f32 pure-JAX reference (bf16 matmul operands in the
    # kernel => loose tolerance, not exact match).
    ref = twmodel_reference(raw, x_fb, x_doc, x_occ, HIDDEN, NUM_LAYERS)
    max_err = float(jnp.max(jnp.abs(out - ref)))
    assert max_err < 1e-1, max_err

    print("KERNEL_OK")
</pallas_src>

<mosaic_0001>
module attributes {stable_mosaic.version = 11 : i64} {
  func.func @kernel(%arg0: memref<16x256xbf16, #tpu.memory_space<vmem>>, %arg1: memref<2x256x512xbf16, #tpu.memory_space<vmem>>, %arg2: memref<2x128x512xbf16, #tpu.memory_space<vmem>>, %arg3: memref<2x1x512xf32, #tpu.memory_space<vmem>>, %arg4: memref<2x256x512xbf16, #tpu.memory_space<vmem>>, %arg5: memref<2x128x512xbf16, #tpu.memory_space<vmem>>, %arg6: memref<2x1x512xf32, #tpu.memory_space<vmem>>, %arg7: memref<2x128x128xf32, #tpu.memory_space<vmem>>, %arg8: memref<2x128xf32, #tpu.memory_space<vmem>>, %arg9: memref<16x256xbf16, #tpu.memory_space<vmem>>) attributes {dimension_semantics = [], scalar_prefetch = 0 : i64, scratch_operands = 1 : i64, tpu.core_type = #tpu.core_type<tc>} {
    %c0 = arith.constant 0 : index
    %c0_0 = arith.constant 0 : index
    %0 = vector.load %arg0[%c0, %c0_0] : memref<16x256xbf16, #tpu.memory_space<vmem>>, vector<16x256xbf16>
    %c0_1 = arith.constant 0 : index
    %c0_2 = arith.constant 0 : index
    %c0_3 = arith.constant 0 : index
    %1 = vector.load %arg1[%c0_1, %c0_2, %c0_3] : memref<2x256x512xbf16, #tpu.memory_space<vmem>>, vector<1x256x512xbf16>
    %2 = vector.shape_cast %1 : vector<1x256x512xbf16> to vector<256x512xbf16>
    %cst = arith.constant dense<0.000000e+00> : vector<16x512xf32>
    %3 = tpu.matmul %0, %2, %cst {dimension_numbers = #tpu.dot_dimension_numbers<[1], [0], [0], [1], [0, 0, 1, 1], [], []>} : vector<16x256xbf16>, vector<256x512xbf16>, vector<16x512xf32> -> vector<16x512xf32>
    %c0_4 = arith.constant 0 : index
    %c0_5 = arith.constant 0 : index
    %c0_6 = arith.constant 0 : index
    %4 = vector.load %arg3[%c0_4, %c0_5, %c0_6] : memref<2x1x512xf32, #tpu.memory_space<vmem>>, vector<1x1x512xf32>
    %5 = vector.shape_cast %4 : vector<1x1x512xf32> to vector<1x512xf32>
    %6 = vector.broadcast %5 : vector<1x512xf32> to vector<16x512xf32>
    %7 = arith.addf %3, %6 : vector<16x512xf32>
    %c1 = arith.constant 1 : index
    %c0_7 = arith.constant 0 : index
    %c0_8 = arith.constant 0 : index
    %8 = vector.load %arg1[%c1, %c0_7, %c0_8] : memref<2x256x512xbf16, #tpu.memory_space<vmem>>, vector<1x256x512xbf16>
    %9 = vector.shape_cast %8 : vector<1x256x512xbf16> to vector<256x512xbf16>
    %cst_9 = arith.constant dense<0.000000e+00> : vector<16x512xf32>
    %10 = tpu.matmul %0, %9, %cst_9 {dimension_numbers = #tpu.dot_dimension_numbers<[1], [0], [0], [1], [0, 0, 1, 1], [], []>} : vector<16x256xbf16>, vector<256x512xbf16>, vector<16x512xf32> -> vector<16x512xf32>
    %c1_10 = arith.constant 1 : index
    %c0_11 = arith.constant 0 : index
    %c0_12 = arith.constant 0 : index
    %11 = vector.load %arg3[%c1_10, %c0_11, %c0_12] : memref<2x1x512xf32, #tpu.memory_space<vmem>>, vector<1x1x512xf32>
    %12 = vector.shape_cast %11 : vector<1x1x512xf32> to vector<1x512xf32>
    %13 = vector.broadcast %12 : vector<1x512xf32> to vector<16x512xf32>
    %14 = arith.addf %10, %13 : vector<16x512xf32>
    %c0_13 = arith.constant 0 : index
    %c0_14 = arith.constant 0 : index
    %c0_15 = arith.constant 0 : index
    %15 = vector.load %arg2[%c0_13, %c0_14, %c0_15] : memref<2x128x512xbf16, #tpu.memory_space<vmem>>, vector<1x128x512xbf16>
    %16 = vector.shape_cast %15 : vector<1x128x512xbf16> to vector<128x512xbf16>
    %c1_16 = arith.constant 1 : index
    %c0_17 = arith.constant 0 : index
    %c0_18 = arith.constant 0 : index
    %17 = vector.load %arg2[%c1_16, %c0_17, %c0_18] : memref<2x128x512xbf16, #tpu.memory_space<vmem>>, vector<1x128x512xbf16>
    %18 = vector.shape_cast %17 : vector<1x128x512xbf16> to vector<128x512xbf16>
    %cst_19 = arith.constant 0.000000e+00 : f32
    %19 = vector.broadcast %cst_19 : f32 to vector<2x128xf32>
    %20 = vector.extract_strided_slice %7 {offsets = [0, 0], sizes = [2, 512], strides = [1, 1]} : vector<16x512xf32> to vector<2x512xf32>
    %21 = arith.truncf %19 : vector<2x128xf32> to vector<2x128xbf16>
    %cst_20 = arith.constant dense<0.000000e+00> : vector<2x512xf32>
    %22 = tpu.matmul %21, %16, %cst_20 {dimension_numbers = #tpu.dot_dimension_numbers<[1], [0], [0], [1], [0, 0, 1, 1], [], []>} : vector<2x128xbf16>, vector<128x512xbf16>, vector<2x512xf32> -> vector<2x512xf32>
    %23 = arith.addf %20, %22 : vector<2x512xf32>
    %24 = vector.extract_strided_slice %23 {offsets = [0, 0], sizes = [2, 384], strides = [1, 1]} : vector<2x512xf32> to vector<2x384xf32>
    %25 = arith.negf %24 : vector<2x384xf32>
    %26 = math.exp %25 : vector<2x384xf32>
    %cst_21 = arith.constant 1.000000e+00 : f32
    %27 = vector.broadcast %cst_21 : f32 to vector<2x384xf32>
    %28 = arith.addf %27, %26 : vector<2x384xf32>
    %29 = arith.divf %27, %28 : vector<2x384xf32>
    %30 = vector.extract_strided_slice %29 {offsets = [0, 0], sizes = [2, 128], strides = [1, 1]} : vector<2x384xf32> to vector<2x128xf32>
    %31 = vector.extract_strided_slice %29 {offsets = [0, 128], sizes = [2, 128], strides = [1, 1]} : vector<2x384xf32> to vector<2x128xf32>
    %32 = vector.extract_strided_slice %29 {offsets = [0, 256], sizes = [2, 128], strides = [1, 1]} : vector<2x384xf32> to vector<2x128xf32>
    %33 = vector.extract_strided_slice %23 {offsets = [0, 384], sizes = [2, 128], strides = [1, 1]} : vector<2x512xf32> to vector<2x128xf32>
    %34 = math.tanh %33 : vector<2x128xf32>
    %35 = arith.mulf %31, %19 : vector<2x128xf32>
    %36 = arith.mulf %30, %34 : vector<2x128xf32>
    %37 = arith.addf %35, %36 : vector<2x128xf32>
    %38 = math.tanh %37 : vector<2x128xf32>
    %39 = arith.mulf %32, %38 : vector<2x128xf32>
    %40 = vector.extract_strided_slice %14 {offsets = [14, 0], sizes = [2, 512], strides = [1, 1]} : vector<16x512xf32> to vector<2x512xf32>
    %41 = arith.truncf %19 : vector<2x128xf32> to vector<2x128xbf16>
    %cst_22 = arith.constant dense<0.000000e+00> : vector<2x512xf32>
    %42 = tpu.matmul %41, %18, %cst_22 {dimension_numbers = #tpu.dot_dimension_numbers<[1], [0], [0], [1], [0, 0, 1, 1], [], []>} : vector<2x128xbf16>, vector<128x512xbf16>, vector<2x512xf32> -> vector<2x512xf32>
    %43 = arith.addf %40, %42 : vector<2x512xf32>
    %44 = vector.extract_strided_slice %43 {offsets = [0, 0], sizes = [2, 384], strides = [1, 1]} : vector<2x512xf32> to vector<2x384xf32>
    %45 = arith.negf %44 : vector<2x384xf32>
    %46 = math.exp %45 : vector<2x384xf32>
    %cst_23 = arith.constant 1.000000e+00 : f32
    %47 = vector.broadcast %cst_23 : f32 to vector<2x384xf32>
    %48 = arith.addf %47, %46 : vector<2x384xf32>
    %49 = arith.divf %47, %48 : vector<2x384xf32>
    %50 = vector.extract_strided_slice %49 {offsets = [0, 0], sizes = [2, 128], strides = [1, 1]} : vector<2x384xf32> to vector<2x128xf32>
    %51 = vector.extract_strided_slice %49 {offsets = [0, 128], sizes = [2, 128], strides = [1, 1]} : vector<2x384xf32> to vector<2x128xf32>
    %52 = vector.extract_strided_slice %49 {offsets = [0, 256], sizes = [2, 128], strides = [1, 1]} : vector<2x384xf32> to vector<2x128xf32>
    %53 = vector.extract_strided_slice %43 {offsets = [0, 384], sizes = [2, 128], strides = [1, 1]} : vector<2x512xf32> to vector<2x128xf32>
    %54 = math.tanh %53 : vector<2x128xf32>
    %55 = arith.mulf %51, %19 : vector<2x128xf32>
    %56 = arith.mulf %50, %54 : vector<2x128xf32>
    %57 = arith.addf %55, %56 : vector<2x128xf32>
    %58 = math.tanh %57 : vector<2x128xf32>
    %59 = arith.mulf %52, %58 : vector<2x128xf32>
    %60 = arith.truncf %39 : vector<2x128xf32> to vector<2x128xbf16>
    %c0_24 = arith.constant 0 : index
    %c0_25 = arith.constant 0 : index
    %61 = vector.load %arg9[%c0_24, %c0_25] : memref<16x256xbf16, #tpu.memory_space<vmem>>, vector<2x128xbf16>
    tpu.vector_store %arg9[%c0_24, %c0_25], %60 {strides = array<i32>} : memref<16x256xbf16, #tpu.memory_space<vmem>>, vector<2x128xbf16>,
    %62 = arith.truncf %59 : vector<2x128xf32> to vector<2x128xbf16>
    %c14 = arith.constant 14 : index
    %c128 = arith.constant 128 : index
    %63 = vector.load %arg9[%c14, %c128] : memref<16x256xbf16, #tpu.memory_space<vmem>>, vector<2x128xbf16>
    tpu.vector_store %arg9[%c14, %c128], %62 {strides = array<i32>} : memref<16x256xbf16, #tpu.memory_space<vmem>>, vector<2x128xbf16>,
    %64 = vector.extract_strided_slice %7 {offsets = [2, 0], sizes = [2, 512], strides = [1, 1]} : vector<16x512xf32> to vector<2x512xf32>
    %65 = arith.truncf %39 : vector<2x128xf32> to vector<2x128xbf16>
    %cst_26 = arith.constant dense<0.000000e+00> : vector<2x512xf32>
    %66 = tpu.matmul %65, %16, %cst_26 {dimension_numbers = #tpu.dot_dimension_numbers<[1], [0], [0], [1], [0, 0, 1, 1], [], []>} : vector<2x128xbf16>, vector<128x512xbf16>, vector<2x512xf32> -> vector<2x512xf32>
    %67 = arith.addf %64, %66 : vector<2x512xf32>
    %68 = vector.extract_strided_slice %67 {offsets = [0, 0], sizes = [2, 384], strides = [1, 1]} : vector<2x512xf32> to vector<2x384xf32>
    %69 = arith.negf %68 : vector<2x384xf32>
    %70 = math.exp %69 : vector<2x384xf32>
    %cst_27 = arith.constant 1.000000e+00 : f32
    %71 = vector.broadcast %cst_27 : f32 to vector<2x384xf32>
    %72 = arith.addf %71, %70 : vector<2x384xf32>
    %73 = arith.divf %71, %72 : vector<2x384xf32>
    %74 = vector.extract_strided_slice %73 {offsets = [0, 0], sizes = [2, 128], strides = [1, 1]} : vector<2x384xf32> to vector<2x128xf32>
    %75 = vector.extract_strided_slice %73 {offsets = [0, 128], sizes = [2, 128], strides = [1, 1]} : vector<2x384xf32> to vector<2x128xf32>
    %76 = vector.extract_strided_slice %73 {offsets = [0, 256], sizes = [2, 128], strides = [1, 1]} : vector<2x384xf32> to vector<2x128xf32>
    %77 = vector.extract_strided_slice %67 {offsets = [0, 384], sizes = [2, 128], strides = [1, 1]} : vector<2x512xf32> to vector<2x128xf32>
    %78 = math.tanh %77 : vector<2x128xf32>
    %79 = arith.mulf %75, %37 : vector<2x128xf32>
    %80 = arith.mulf %74, %78 : vector<2x128xf32>
    %81 = arith.addf %79, %80 : vector<2x128xf32>
    %82 = math.tanh %81 : vector<2x128xf32>
    %83 = arith.mulf %76, %82 : vector<2x128xf32>
    %84 = vector.extract_strided_slice %14 {offsets = [12, 0], sizes = [2, 512], strides = [1, 1]} : vector<16x512xf32> to vector<2x512xf32>
    %85 = arith.truncf %59 : vector<2x128xf32> to vector<2x128xbf16>
    %cst_28 = arith.constant dense<0.000000e+00> : vector<2x512xf32>
    %86 = tpu.matmul %85, %18, %cst_28 {dimension_numbers = #tpu.dot_dimension_numbers<[1], [0], [0], [1], [0, 0, 1, 1], [], []>} : vector<2x128xbf16>, vector<128x512xbf16>, vector<2x512xf32> -> vector<2x512xf32>
    %87 = arith.addf %84, %86 : vector<2x512xf32>
    %88 = vector.extract_strided_slice %87 {offsets = [0, 0], sizes = [2, 384], strides = [1, 1]} : vector<2x512xf32> to vector<2x384xf32>
    %89 = arith.negf %88 : vector<2x384xf32>
    %90 = math.exp %89 : vector<2x384xf32>
    %cst_29 = arith.constant 1.000000e+00 : f32
    %91 = vector.broadcast %cst_29 : f32 to vector<2x384xf32>
    %92 = arith.addf %91, %90 : vector<2x384xf32>
    %93 = arith.divf %91, %92 : vector<2x384xf32>
    %94 = vector.extract_strided_slice %93 {offsets = [0, 0], sizes = [2, 128], strides = [1, 1]} : vector<2x384xf32> to vector<2x128xf32>
    %95 = vector.extract_strided_slice %93 {offsets = [0, 128], sizes = [2, 128], strides = [1, 1]} : vector<2x384xf32> to vector<2x128xf32>
    %96 = vector.extract_strided_slice %93 {offsets = [0, 256], sizes = [2, 128], strides = [1, 1]} : vector<2x384xf32> to vector<2x128xf32>
    %97 = vector.extract_strided_slice %87 {offsets = [0, 384], sizes = [2, 128], strides = [1, 1]} : vector<2x512xf32> to vector<2x128xf32>
    %98 = math.tanh %97 : vector<2x128xf32>
    %99 = arith.mulf %95, %57 : vector<2x128xf32>
    %100 = arith.mulf %94, %98 : vector<2x128xf32>
    %101 = arith.addf %99, %100 : vector<2x128xf32>
    %102 = math.tanh %101 : vector<2x128xf32>
    %103 = arith.mulf %96, %102 : vector<2x128xf32>
    %104 = arith.truncf %83 : vector<2x128xf32> to vector<2x128xbf16>
    %c2 = arith.constant 2 : index
    %c0_30 = arith.constant 0 : index
    %105 = vector.load %arg9[%c2, %c0_30] : memref<16x256xbf16, #tpu.memory_space<vmem>>, vector<2x128xbf16>
    tpu.vector_store %arg9[%c2, %c0_30], %104 {strides = array<i32>} : memref<16x256xbf16, #tpu.memory_space<vmem>>, vector<2x128xbf16>,
    %106 = arith.truncf %103 : vector<2x128xf32> to vector<2x128xbf16>
    %c12 = arith.constant 12 : index
    %c128_31 = arith.constant 128 : index
    %107 = vector.load %arg9[%c12, %c128_31] : memref<16x256xbf16, #tpu.memory_space<vmem>>, vector<2x128xbf16>
    tpu.vector_store %arg9[%c12, %c128_31], %106 {strides = array<i32>} : memref<16x256xbf16, #tpu.memory_space<vmem>>, vector<2x128xbf16>,
    %108 = vector.extract_strided_slice %7 {offsets = [4, 0], sizes = [2, 512], strides = [1, 1]} : vector<16x512xf32> to vector<2x512xf32>
    %109 = arith.truncf %83 : vector<2x128xf32> to vector<2x128xbf16>
    %cst_32 = arith.constant dense<0.000000e+00> : vector<2x512xf32>
    %110 = tpu.matmul %109, %16, %cst_32 {dimension_numbers = #tpu.dot_dimension_numbers<[1], [0], [0], [1], [0, 0, 1, 1], [], []>} : vector<2x128xbf16>, vector<128x512xbf16>, vector<2x512xf32> -> vector<2x512xf32>
    %111 = arith.addf %108, %110 : vector<2x512xf32>
    %112 = vector.extract_strided_slice %111 {offsets = [0, 0], sizes = [2, 384], strides = [1, 1]} : vector<2x512xf32> to vector<2x384xf32>
    %113 = arith.negf %112 : vector<2x384xf32>
    %114 = math.exp %113 : vector<2x384xf32>
    %cst_33 = arith.constant 1.000000e+00 : f32
    %115 = vector.broadcast %cst_33 : f32 to vector<2x384xf32>
    %116 = arith.addf %115, %114 : vector<2x384xf32>
    %117 = arith.divf %115, %116 : vector<2x384xf32>
    %118 = vector.extract_strided_slice %117 {offsets = [0, 0], sizes = [2, 128], strides = [1, 1]} : vector<2x384xf32> to vector<2x128xf32>
    %119 = vector.extract_strided_slice %117 {offsets = [0, 128], sizes = [2, 128], strides = [1, 1]} : vector<2x384xf32> to vector<2x128xf32>
    %120 = vector.extract_strided_slice %117 {offsets = [0, 256], sizes = [2, 128], strides = [1, 1]} : vector<2x384xf32> to vector<2x128xf32>
    %121 = vector.extract_strided_slice %111 {offsets = [0, 384], sizes = [2, 128], strides = [1, 1]} : vector<2x512xf32> to vector<2x128xf32>
    %122 = math.tanh %121 : vector<2x128xf32>
    %123 = arith.mulf %119, %81 : vector<2x128xf32>
    %124 = arith.mulf %118, %122 : vector<2x128xf32>
    %125 = arith.addf %123, %124 : vector<2x128xf32>
    %126 = math.tanh %125 : vector<2x128xf32>
    %127 = arith.mulf %120, %126 : vector<2x128xf32>
    %128 = vector.extract_strided_slice %14 {offsets = [10, 0], sizes = [2, 512], strides = [1, 1]} : vector<16x512xf32> to vector<2x512xf32>
    %129 = arith.truncf %103 : vector<2x128xf32> to vector<2x128xbf16>
    %cst_34 = arith.constant dense<0.000000e+00> : vector<2x512xf32>
    %130 = tpu.matmul %129, %18, %cst_34 {dimension_numbers = #tpu.dot_dimension_numbers<[1], [0], [0], [1], [0, 0, 1, 1], [], []>} : vector<2x128xbf16>, vector<128x512xbf16>, vector<2x512xf32> -> vector<2x512xf32>
    %131 = arith.addf %128, %130 : vector<2x512xf32>
    %132 = vector.extract_strided_slice %131 {offsets = [0, 0], sizes = [2, 384], strides = [1, 1]} : vector<2x512xf32> to vector<2x384xf32>
    %133 = arith.negf %132 : vector<2x384xf32>
    %134 = math.exp %133 : vector<2x384xf32>
    %cst_35 = arith.constant 1.000000e+00 : f32
    %135 = vector.broadcast %cst_35 : f32 to vector<2x384xf32>
    %136 = arith.addf %135, %134 : vector<2x384xf32>
    %137 = arith.divf %135, %136 : vector<2x384xf32>
    %138 = vector.extract_strided_slice %137 {offsets = [0, 0], sizes = [2, 128], strides = [1, 1]} : vector<2x384xf32> to vector<2x128xf32>
    %139 = vector.extract_strided_slice %137 {offsets = [0, 128], sizes = [2, 128], strides = [1, 1]} : vector<2x384xf32> to vector<2x128xf32>
    %140 = vector.extract_strided_slice %137 {offsets = [0, 256], sizes = [2, 128], strides = [1, 1]} : vector<2x384xf32> to vector<2x128xf32>
    %141 = vector.extract_strided_slice %131 {offsets = [0, 384], sizes = [2, 128], strides = [1, 1]} : vector<2x512xf32> to vector<2x128xf32>
    %142 = math.tanh %141 : vector<2x128xf32>
    %143 = arith.mulf %139, %101 : vector<2x128xf32>
    %144 = arith.mulf %138, %142 : vector<2x128xf32>
    %145 = arith.addf %143, %144 : vector<2x128xf32>
    %146 = math.tanh %145 : vector<2x128xf32>
    %147 = arith.mulf %140, %146 : vector<2x128xf32>
    %148 = arith.truncf %127 : vector<2x128xf32> to vector<2x128xbf16>
    %c4 = arith.constant 4 : index
    %c0_36 = arith.constant 0 : index
    %149 = vector.load %arg9[%c4, %c0_36] : memref<16x256xbf16, #tpu.memory_space<vmem>>, vector<2x128xbf16>
    tpu.vector_store %arg9[%c4, %c0_36], %148 {strides = array<i32>} : memref<16x256xbf16, #tpu.memory_space<vmem>>, vector<2x128xbf16>,
    %150 = arith.truncf %147 : vector<2x128xf32> to vector<2x128xbf16>
    %c10 = arith.constant 10 : index
    %c128_37 = arith.constant 128 : index
    %151 = vector.load %arg9[%c10, %c128_37] : memref<16x256xbf16, #tpu.memory_space<vmem>>, vector<2x128xbf16>
    tpu.vector_store %arg9[%c10, %c128_37], %150 {strides = array<i32>} : memref<16x256xbf16, #tpu.memory_space<vmem>>, vector<2x128xbf16>,
    %152 = vector.extract_strided_slice %7 {offsets = [6, 0], sizes = [2, 512], strides = [1, 1]} : vector<16x512xf32> to vector<2x512xf32>
    %153 = arith.truncf %127 : vector<2x128xf32> to vector<2x128xbf16>
    %cst_38 = arith.constant dense<0.000000e+00> : vector<2x512xf32>
    %154 = tpu.matmul %153, %16, %cst_38 {dimension_numbers = #tpu.dot_dimension_numbers<[1], [0], [0], [1], [0, 0, 1, 1], [], []>} : vector<2x128xbf16>, vector<128x512xbf16>, vector<2x512xf32> -> vector<2x512xf32>
    %155 = arith.addf %152, %154 : vector<2x512xf32>
    %156 = vector.extract_strided_slice %155 {offsets = [0, 0], sizes = [2, 384], strides = [1, 1]} : vector<2x512xf32> to vector<2x384xf32>
    %157 = arith.negf %156 : vector<2x384xf32>
    %158 = math.exp %157 : vector<2x384xf32>
    %cst_39 = arith.constant 1.000000e+00 : f32
    %159 = vector.broadcast %cst_39 : f32 to vector<2x384xf32>
    %160 = arith.addf %159, %158 : vector<2x384xf32>
    %161 = arith.divf %159, %160 : vector<2x384xf32>
    %162 = vector.extract_strided_slice %161 {offsets = [0, 0], sizes = [2, 128], strides = [1, 1]} : vector<2x384xf32> to vector<2x128xf32>
    %163 = vector.extract_strided_slice %161 {offsets = [0, 128], sizes = [2, 128], strides = [1, 1]} : vector<2x384xf32> to vector<2x128xf32>
    %164 = vector.extract_strided_slice %161 {offsets = [0, 256], sizes = [2, 128], strides = [1, 1]} : vector<2x384xf32> to vector<2x128xf32>
    %165 = vector.extract_strided_slice %155 {offsets = [0, 384], sizes = [2, 128], strides = [1, 1]} : vector<2x512xf32> to vector<2x128xf32>
    %166 = math.tanh %165 : vector<2x128xf32>
    %167 = arith.mulf %163, %125 : vector<2x128xf32>
    %168 = arith.mulf %162, %166 : vector<2x128xf32>
    %169 = arith.addf %167, %168 : vector<2x128xf32>
    %170 = math.tanh %169 : vector<2x128xf32>
    %171 = arith.mulf %164, %170 : vector<2x128xf32>
    %172 = vector.extract_strided_slice %14 {offsets = [8, 0], sizes = [2, 512], strides = [1, 1]} : vector<16x512xf32> to vector<2x512xf32>
    %173 = arith.truncf %147 : vector<2x128xf32> to vector<2x128xbf16>
    %cst_40 = arith.constant dense<0.000000e+00> : vector<2x512xf32>
    %174 = tpu.matmul %173, %18, %cst_40 {dimension_numbers = #tpu.dot_dimension_numbers<[1], [0], [0], [1], [0, 0, 1, 1], [], []>} : vector<2x128xbf16>, vector<128x512xbf16>, vector<2x512xf32> -> vector<2x512xf32>
    %175 = arith.addf %172, %174 : vector<2x512xf32>
    %176 = vector.extract_strided_slice %175 {offsets = [0, 0], sizes = [2, 384], strides = [1, 1]} : vector<2x512xf32> to vector<2x384xf32>
    %177 = arith.negf %176 : vector<2x384xf32>
    %178 = math.exp %177 : vector<2x384xf32>
    %cst_41 = arith.constant 1.000000e+00 : f32
    %179 = vector.broadcast %cst_41 : f32 to vector<2x384xf32>
    %180 = arith.addf %179, %178 : vector<2x384xf32>
    %181 = arith.divf %179, %180 : vector<2x384xf32>
    %182 = vector.extract_strided_slice %181 {offsets = [0, 0], sizes = [2, 128], strides = [1, 1]} : vector<2x384xf32> to vector<2x128xf32>
    %183 = vector.extract_strided_slice %181 {offsets = [0, 128], sizes = [2, 128], strides = [1, 1]} : vector<2x384xf32> to vector<2x128xf32>
    %184 = vector.extract_strided_slice %181 {offsets = [0, 256], sizes = [2, 128], strides = [1, 1]} : vector<2x384xf32> to vector<2x128xf32>
    %185 = vector.extract_strided_slice %175 {offsets = [0, 384], sizes = [2, 128], strides = [1, 1]} : vector<2x512xf32> to vector<2x128xf32>
    %186 = math.tanh %185 : vector<2x128xf32>
    %187 = arith.mulf %183, %145 : vector<2x128xf32>
    %188 = arith.mulf %182, %186 : vector<2x128xf32>
    %189 = arith.addf %187, %188 : vector<2x128xf32>
    %190 = math.tanh %189 : vector<2x128xf32>
    %191 = arith.mulf %184, %190 : vector<2x128xf32>
    %192 = arith.truncf %171 : vector<2x128xf32> to vector<2x128xbf16>
    %c6 = arith.constant 6 : index
    %c0_42 = arith.constant 0 : index
    %193 = vector.load %arg9[%c6, %c0_42] : memref<16x256xbf16, #tpu.memory_space<vmem>>, vector<2x128xbf16>
    tpu.vector_store %arg9[%c6, %c0_42], %192 {strides = array<i32>} : memref<16x256xbf16, #tpu.memory_space<vmem>>, vector<2x128xbf16>,
    %194 = arith.truncf %191 : vector<2x128xf32> to vector<2x128xbf16>
    %c8 = arith.constant 8 : index
    %c128_43 = arith.constant 128 : index
    %195 = vector.load %arg9[%c8, %c128_43] : memref<16x256xbf16, #tpu.memory_space<vmem>>, vector<2x128xbf16>
    tpu.vector_store %arg9[%c8, %c128_43], %194 {strides = array<i32>} : memref<16x256xbf16, #tpu.memory_space<vmem>>, vector<2x128xbf16>,
    %196 = vector.extract_strided_slice %7 {offsets = [8, 0], sizes = [2, 512], strides = [1, 1]} : vector<16x512xf32> to vector<2x512xf32>
    %197 = arith.truncf %171 : vector<2x128xf32> to vector<2x128xbf16>
    %cst_44 = arith.constant dense<0.000000e+00> : vector<2x512xf32>
    %198 = tpu.matmul %197, %16, %cst_44 {dimension_numbers = #tpu.dot_dimension_numbers<[1], [0], [0], [1], [0, 0, 1, 1], [], []>} : vector<2x128xbf16>, vector<128x512xbf16>, vector<2x512xf32> -> vector<2x512xf32>
    %199 = arith.addf %196, %198 : vector<2x512xf32>
    %200 = vector.extract_strided_slice %199 {offsets = [0, 0], sizes = [2, 384], strides = [1, 1]} : vector<2x512xf32> to vector<2x384xf32>
    %201 = arith.negf %200 : vector<2x384xf32>
    %202 = math.exp %201 : vector<2x384xf32>
    %cst_45 = arith.constant 1.000000e+00 : f32
    %203 = vector.broadcast %cst_45 : f32 to vector<2x384xf32>
    %204 = arith.addf %203, %202 : vector<2x384xf32>
    %205 = arith.divf %203, %204 : vector<2x384xf32>
    %206 = vector.extract_strided_slice %205 {offsets = [0, 0], sizes = [2, 128], strides = [1, 1]} : vector<2x384xf32> to vector<2x128xf32>
    %207 = vector.extract_strided_slice %205 {offsets = [0, 128], sizes = [2, 128], strides = [1, 1]} : vector<2x384xf32> to vector<2x128xf32>
    %208 = vector.extract_strided_slice %205 {offsets = [0, 256], sizes = [2, 128], strides = [1, 1]} : vector<2x384xf32> to vector<2x128xf32>
    %209 = vector.extract_strided_slice %199 {offsets = [0, 384], sizes = [2, 128], strides = [1, 1]} : vector<2x512xf32> to vector<2x128xf32>
    %210 = math.tanh %209 : vector<2x128xf32>
    %211 = arith.mulf %207, %169 : vector<2x128xf32>
    %212 = arith.mulf %206, %210 : vector<2x128xf32>
    %213 = arith.addf %211, %212 : vector<2x128xf32>
    %214 = math.tanh %213 : vector<2x128xf32>
    %215 = arith.mulf %208, %214 : vector<2x128xf32>
    %216 = vector.extract_strided_slice %14 {offsets = [6, 0], sizes = [2, 512], strides = [1, 1]} : vector<16x512xf32> to vector<2x512xf32>
    %217 = arith.truncf %191 : vector<2x128xf32> to vector<2x128xbf16>
    %cst_46 = arith.constant dense<0.000000e+00> : vector<2x512xf32>
    %218 = tpu.matmul %217, %18, %cst_46 {dimension_numbers = #tpu.dot_dimension_numbers<[1], [0], [0], [1], [0, 0, 1, 1], [], []>} : vector<2x128xbf16>, vector<128x512xbf16>, vector<2x512xf32> -> vector<2x512xf32>
    %219 = arith.addf %216, %218 : vector<2x512xf32>
    %220 = vector.extract_strided_slice %219 {offsets = [0, 0], sizes = [2, 384], strides = [1, 1]} : vector<2x512xf32> to vector<2x384xf32>
    %221 = arith.negf %220 : vector<2x384xf32>
    %222 = math.exp %221 : vector<2x384xf32>
    %cst_47 = arith.constant 1.000000e+00 : f32
    %223 = vector.broadcast %cst_47 : f32 to vector<2x384xf32>
    %224 = arith.addf %223, %222 : vector<2x384xf32>
    %225 = arith.divf %223, %224 : vector<2x384xf32>
    %226 = vector.extract_strided_slice %225 {offsets = [0, 0], sizes = [2, 128], strides = [1, 1]} : vector<2x384xf32> to vector<2x128xf32>
    %227 = vector.extract_strided_slice %225 {offsets = [0, 128], sizes = [2, 128], strides = [1, 1]} : vector<2x384xf32> to vector<2x128xf32>
    %228 = vector.extract_strided_slice %225 {offsets = [0, 256], sizes = [2, 128], strides = [1, 1]} : vector<2x384xf32> to vector<2x128xf32>
    %229 = vector.extract_strided_slice %219 {offsets = [0, 384], sizes = [2, 128], strides = [1, 1]} : vector<2x512xf32> to vector<2x128xf32>
    %230 = math.tanh %229 : vector<2x128xf32>
    %231 = arith.mulf %227, %189 : vector<2x128xf32>
    %232 = arith.mulf %226, %230 : vector<2x128xf32>
    %233 = arith.addf %231, %232 : vector<2x128xf32>
    %234 = math.tanh %233 : vector<2x128xf32>
    %235 = arith.mulf %228, %234 : vector<2x128xf32>
    %236 = arith.truncf %215 : vector<2x128xf32> to vector<2x128xbf16>
    %c8_48 = arith.constant 8 : index
    %c0_49 = arith.constant 0 : index
    %237 = vector.load %arg9[%c8_48, %c0_49] : memref<16x256xbf16, #tpu.memory_space<vmem>>, vector<2x128xbf16>
    tpu.vector_store %arg9[%c8_48, %c0_49], %236 {strides = array<i32>} : memref<16x256xbf16, #tpu.memory_space<vmem>>, vector<2x128xbf16>,
    %238 = arith.truncf %235 : vector<2x128xf32> to vector<2x128xbf16>
    %c6_50 = arith.constant 6 : index
    %c128_51 = arith.constant 128 : index
    %239 = vector.load %arg9[%c6_50, %c128_51] : memref<16x256xbf16, #tpu.memory_space<vmem>>, vector<2x128xbf16>
    tpu.vector_store %arg9[%c6_50, %c128_51], %238 {strides = array<i32>} : memref<16x256xbf16, #tpu.memory_space<vmem>>, vector<2x128xbf16>,
    %240 = vector.extract_strided_slice %7 {offsets = [10, 0], sizes = [2, 512], strides = [1, 1]} : vector<16x512xf32> to vector<2x512xf32>
    %241 = arith.truncf %215 : vector<2x128xf32> to vector<2x128xbf16>
    %cst_52 = arith.constant dense<0.000000e+00> : vector<2x512xf32>
    %242 = tpu.matmul %241, %16, %cst_52 {dimension_numbers = #tpu.dot_dimension_numbers<[1], [0], [0], [1], [0, 0, 1, 1], [], []>} : vector<2x128xbf16>, vector<128x512xbf16>, vector<2x512xf32> -> vector<2x512xf32>
    %243 = arith.addf %240, %242 : vector<2x512xf32>
    %244 = vector.extract_strided_slice %243 {offsets = [0, 0], sizes = [2, 384], strides = [1, 1]} : vector<2x512xf32> to vector<2x384xf32>
    %245 = arith.negf %244 : vector<2x384xf32>
    %246 = math.exp %245 : vector<2x384xf32>
    %cst_53 = arith.constant 1.000000e+00 : f32
    %247 = vector.broadcast %cst_53 : f32 to vector<2x384xf32>
    %248 = arith.addf %247, %246 : vector<2x384xf32>
    %249 = arith.divf %247, %248 : vector<2x384xf32>
    %250 = vector.extract_strided_slice %249 {offsets = [0, 0], sizes = [2, 128], strides = [1, 1]} : vector<2x384xf32> to vector<2x128xf32>
    %251 = vector.extract_strided_slice %249 {offsets = [0, 128], sizes = [2, 128], strides = [1, 1]} : vector<2x384xf32> to vector<2x128xf32>
    %252 = vector.extract_strided_slice %249 {offsets = [0, 256], sizes = [2, 128], strides = [1, 1]} : vector<2x384xf32> to vector<2x128xf32>
    %253 = vector.extract_strided_slice %243 {offsets = [0, 384], sizes = [2, 128], strides = [1, 1]} : vector<2x512xf32> to vector<2x128xf32>
    %254 = math.tanh %253 : vector<2x128xf32>
    %255 = arith.mulf %251, %213 : vector<2x128xf32>
    %256 = arith.mulf %250, %254 : vector<2x128xf32>
    %257 = arith.addf %255, %256 : vector<2x128xf32>
    %258 = math.tanh %257 : vector<2x128xf32>
    %259 = arith.mulf %252, %258 : vector<2x128xf32>
    %260 = vector.extract_strided_slice %14 {offsets = [4, 0], sizes = [2, 512], strides = [1, 1]} : vector<16x512xf32> to vector<2x512xf32>
    %261 = arith.truncf %235 : vector<2x128xf32> to vector<2x128xbf16>
    %cst_54 = arith.constant dense<0.000000e+00> : vector<2x512xf32>
    %262 = tpu.matmul %261, %18, %cst_54 {dimension_numbers = #tpu.dot_dimension_numbers<[1], [0], [0], [1], [0, 0, 1, 1], [], []>} : vector<2x128xbf16>, vector<128x512xbf16>, vector<2x512xf32> -> vector<2x512xf32>
    %263 = arith.addf %260, %262 : vector<2x512xf32>
    %264 = vector.extract_strided_slice %263 {offsets = [0, 0], sizes = [2, 384], strides = [1, 1]} : vector<2x512xf32> to vector<2x384xf32>
    %265 = arith.negf %264 : vector<2x384xf32>
    %266 = math.exp %265 : vector<2x384xf32>
    %cst_55 = arith.constant 1.000000e+00 : f32
    %267 = vector.broadcast %cst_55 : f32 to vector<2x384xf32>
    %268 = arith.addf %267, %266 : vector<2x384xf32>
    %269 = arith.divf %267, %268 : vector<2x384xf32>
    %270 = vector.extract_strided_slice %269 {offsets = [0, 0], sizes = [2, 128], strides = [1, 1]} : vector<2x384xf32> to vector<2x128xf32>
    %271 = vector.extract_strided_slice %269 {offsets = [0, 128], sizes = [2, 128], strides = [1, 1]} : vector<2x384xf32> to vector<2x128xf32>
    %272 = vector.extract_strided_slice %269 {offsets = [0, 256], sizes = [2, 128], strides = [1, 1]} : vector<2x384xf32> to vector<2x128xf32>
    %273 = vector.extract_strided_slice %263 {offsets = [0, 384], sizes = [2, 128], strides = [1, 1]} : vector<2x512xf32> to vector<2x128xf32>
    %274 = math.tanh %273 : vector<2x128xf32>
    %275 = arith.mulf %271, %233 : vector<2x128xf32>
    %276 = arith.mulf %270, %274 : vector<2x128xf32>
    %277 = arith.addf %275, %276 : vector<2x128xf32>
    %278 = math.tanh %277 : vector<2x128xf32>
    %279 = arith.mulf %272, %278 : vector<2x128xf32>
    %280 = arith.truncf %259 : vector<2x128xf32> to vector<2x128xbf16>
    %c10_56 = arith.constant 10 : index
    %c0_57 = arith.constant 0 : index
    %281 = vector.load %arg9[%c10_56, %c0_57] : memref<16x256xbf16, #tpu.memory_space<vmem>>, vector<2x128xbf16>
    tpu.vector_store %arg9[%c10_56, %c0_57], %280 {strides = array<i32>} : memref<16x256xbf16, #tpu.memory_space<vmem>>, vector<2x128xbf16>,
    %282 = arith.truncf %279 : vector<2x128xf32> to vector<2x128xbf16>
    %c4_58 = arith.constant 4 : index
    %c128_59 = arith.constant 128 : index
    %283 = vector.load %arg9[%c4_58, %c128_59] : memref<16x256xbf16, #tpu.memory_space<vmem>>, vector<2x128xbf16>
    tpu.vector_store %arg9[%c4_58, %c128_59], %282 {strides = array<i32>} : memref<16x256xbf16, #tpu.memory_space<vmem>>, vector<2x128xbf16>,
    %284 = vector.extract_strided_slice %7 {offsets = [12, 0], sizes = [2, 512], strides = [1, 1]} : vector<16x512xf32> to vector<2x512xf32>
    %285 = arith.truncf %259 : vector<2x128xf32> to vector<2x128xbf16>
    %cst_60 = arith.constant dense<0.000000e+00> : vector<2x512xf32>
    %286 = tpu.matmul %285, %16, %cst_60 {dimension_numbers = #tpu.dot_dimension_numbers<[1], [0], [0], [1], [0, 0, 1, 1], [], []>} : vector<2x128xbf16>, vector<128x512xbf16>, vector<2x512xf32> -> vector<2x512xf32>
    %287 = arith.addf %284, %286 : vector<2x512xf32>
    %288 = vector.extract_strided_slice %287 {offsets = [0, 0], sizes = [2, 384], strides = [1, 1]} : vector<2x512xf32> to vector<2x384xf32>
    %289 = arith.negf %288 : vector<2x384xf32>
    %290 = math.exp %289 : vector<2x384xf32>
    %cst_61 = arith.constant 1.000000e+00 : f32
    %291 = vector.broadcast %cst_61 : f32 to vector<2x384xf32>
    %292 = arith.addf %291, %290 : vector<2x384xf32>
    %293 = arith.divf %291, %292 : vector<2x384xf32>
    %294 = vector.extract_strided_slice %293 {offsets = [0, 0], sizes = [2, 128], strides = [1, 1]} : vector<2x384xf32> to vector<2x128xf32>
    %295 = vector.extract_strided_slice %293 {offsets = [0, 128], sizes = [2, 128], strides = [1, 1]} : vector<2x384xf32> to vector<2x128xf32>
    %296 = vector.extract_strided_slice %293 {offsets = [0, 256], sizes = [2, 128], strides = [1, 1]} : vector<2x384xf32> to vector<2x128xf32>
    %297 = vector.extract_strided_slice %287 {offsets = [0, 384], sizes = [2, 128], strides = [1, 1]} : vector<2x512xf32> to vector<2x128xf32>
    %298 = math.tanh %297 : vector<2x128xf32>
    %299 = arith.mulf %295, %257 : vector<2x128xf32>
    %300 = arith.mulf %294, %298 : vector<2x128xf32>
    %301 = arith.addf %299, %300 : vector<2x128xf32>
    %302 = math.tanh %301 : vector<2x128xf32>
    %303 = arith.mulf %296, %302 : vector<2x128xf32>
    %304 = vector.extract_strided_slice %14 {offsets = [2, 0], sizes = [2, 512], strides = [1, 1]} : vector<16x512xf32> to vector<2x512xf32>
    %305 = arith.truncf %279 : vector<2x128xf32> to vector<2x128xbf16>
    %cst_62 = arith.constant dense<0.000000e+00> : vector<2x512xf32>
    %306 = tpu.matmul %305, %18, %cst_62 {dimension_numbers = #tpu.dot_dimension_numbers<[1], [0], [0], [1], [0, 0, 1, 1], [], []>} : vector<2x128xbf16>, vector<128x512xbf16>, vector<2x512xf32> -> vector<2x512xf32>
    %307 = arith.addf %304, %306 : vector<2x512xf32>
    %308 = vector.extract_strided_slice %307 {offsets = [0, 0], sizes = [2, 384], strides = [1, 1]} : vector<2x512xf32> to vector<2x384xf32>
    %309 = arith.negf %308 : vector<2x384xf32>
    %310 = math.exp %309 : vector<2x384xf32>
    %cst_63 = arith.constant 1.000000e+00 : f32
    %311 = vector.broadcast %cst_63 : f32 to vector<2x384xf32>
    %312 = arith.addf %311, %310 : vector<2x384xf32>
    %313 = arith.divf %311, %312 : vector<2x384xf32>
    %314 = vector.extract_strided_slice %313 {offsets = [0, 0], sizes = [2, 128], strides = [1, 1]} : vector<2x384xf32> to vector<2x128xf32>
    %315 = vector.extract_strided_slice %313 {offsets = [0, 128], sizes = [2, 128], strides = [1, 1]} : vector<2x384xf32> to vector<2x128xf32>
    %316 = vector.extract_strided_slice %313 {offsets = [0, 256], sizes = [2, 128], strides = [1, 1]} : vector<2x384xf32> to vector<2x128xf32>
    %317 = vector.extract_strided_slice %307 {offsets = [0, 384], sizes = [2, 128], strides = [1, 1]} : vector<2x512xf32> to vector<2x128xf32>
    %318 = math.tanh %317 : vector<2x128xf32>
    %319 = arith.mulf %315, %277 : vector<2x128xf32>
    %320 = arith.mulf %314, %318 : vector<2x128xf32>
    %321 = arith.addf %319, %320 : vector<2x128xf32>
    %322 = math.tanh %321 : vector<2x128xf32>
    %323 = arith.mulf %316, %322 : vector<2x128xf32>
    %324 = arith.truncf %303 : vector<2x128xf32> to vector<2x128xbf16>
    %c12_64 = arith.constant 12 : index
    %c0_65 = arith.constant 0 : index
    %325 = vector.load %arg9[%c12_64, %c0_65] : memref<16x256xbf16, #tpu.memory_space<vmem>>, vector<2x128xbf16>
    tpu.vector_store %arg9[%c12_64, %c0_65], %324 {strides = array<i32>} : memref<16x256xbf16, #tpu.memory_space<vmem>>, vector<2x128xbf16>,
    %326 = arith.truncf %323 : vector<2x128xf32> to vector<2x128xbf16>
    %c2_66 = arith.constant 2 : index
    %c128_67 = arith.constant 128 : index
    %327 = vector.load %arg9[%c2_66, %c128_67] : memref<16x256xbf16, #tpu.memory_space<vmem>>, vector<2x128xbf16>
    tpu.vector_store %arg9[%c2_66, %c128_67], %326 {strides = array<i32>} : memref<16x256xbf16, #tpu.memory_space<vmem>>, vector<2x128xbf16>,
    %328 = vector.extract_strided_slice %7 {offsets = [14, 0], sizes = [2, 512], strides = [1, 1]} : vector<16x512xf32> to vector<2x512xf32>
    %329 = arith.truncf %303 : vector<2x128xf32> to vector<2x128xbf16>
    %cst_68 = arith.constant dense<0.000000e+00> : vector<2x512xf32>
    %330 = tpu.matmul %329, %16, %cst_68 {dimension_numbers = #tpu.dot_dimension_numbers<[1], [0], [0], [1], [0, 0, 1, 1], [], []>} : vector<2x128xbf16>, vector<128x512xbf16>, vector<2x512xf32> -> vector<2x512xf32>
    %331 = arith.addf %328, %330 : vector<2x512xf32>
    %332 = vector.extract_strided_slice %331 {offsets = [0, 0], sizes = [2, 384], strides = [1, 1]} : vector<2x512xf32> to vector<2x384xf32>
    %333 = arith.negf %332 : vector<2x384xf32>
    %334 = math.exp %333 : vector<2x384xf32>
    %cst_69 = arith.constant 1.000000e+00 : f32
    %335 = vector.broadcast %cst_69 : f32 to vector<2x384xf32>
    %336 = arith.addf %335, %334 : vector<2x384xf32>
    %337 = arith.divf %335, %336 : vector<2x384xf32>
    %338 = vector.extract_strided_slice %337 {offsets = [0, 0], sizes = [2, 128], strides = [1, 1]} : vector<2x384xf32> to vector<2x128xf32>
    %339 = vector.extract_strided_slice %337 {offsets = [0, 128], sizes = [2, 128], strides = [1, 1]} : vector<2x384xf32> to vector<2x128xf32>
    %340 = vector.extract_strided_slice %337 {offsets = [0, 256], sizes = [2, 128], strides = [1, 1]} : vector<2x384xf32> to vector<2x128xf32>
    %341 = vector.extract_strided_slice %331 {offsets = [0, 384], sizes = [2, 128], strides = [1, 1]} : vector<2x512xf32> to vector<2x128xf32>
    %342 = math.tanh %341 : vector<2x128xf32>
    %343 = arith.mulf %339, %301 : vector<2x128xf32>
    %344 = arith.mulf %338, %342 : vector<2x128xf32>
    %345 = arith.addf %343, %344 : vector<2x128xf32>
    %346 = math.tanh %345 : vector<2x128xf32>
    %347 = arith.mulf %340, %346 : vector<2x128xf32>
    %348 = vector.extract_strided_slice %14 {offsets = [0, 0], sizes = [2, 512], strides = [1, 1]} : vector<16x512xf32> to vector<2x512xf32>
    %349 = arith.truncf %323 : vector<2x128xf32> to vector<2x128xbf16>
    %cst_70 = arith.constant dense<0.000000e+00> : vector<2x512xf32>
    %350 = tpu.matmul %349, %18, %cst_70 {dimension_numbers = #tpu.dot_dimension_numbers<[1], [0], [0], [1], [0, 0, 1, 1], [], []>} : vector<2x128xbf16>, vector<128x512xbf16>, vector<2x512xf32> -> vector<2x512xf32>
    %351 = arith.addf %348, %350 : vector<2x512xf32>
    %352 = vector.extract_strided_slice %351 {offsets = [0, 0], sizes = [2, 384], strides = [1, 1]} : vector<2x512xf32> to vector<2x384xf32>
    %353 = arith.negf %352 : vector<2x384xf32>
    %354 = math.exp %353 : vector<2x384xf32>
    %cst_71 = arith.constant 1.000000e+00 : f32
    %355 = vector.broadcast %cst_71 : f32 to vector<2x384xf32>
    %356 = arith.addf %355, %354 : vector<2x384xf32>
    %357 = arith.divf %355, %356 : vector<2x384xf32>
    %358 = vector.extract_strided_slice %357 {offsets = [0, 0], sizes = [2, 128], strides = [1, 1]} : vector<2x384xf32> to vector<2x128xf32>
    %359 = vector.extract_strided_slice %357 {offsets = [0, 128], sizes = [2, 128], strides = [1, 1]} : vector<2x384xf32> to vector<2x128xf32>
    %360 = vector.extract_strided_slice %357 {offsets = [0, 256], sizes = [2, 128], strides = [1, 1]} : vector<2x384xf32> to vector<2x128xf32>
    %361 = vector.extract_strided_slice %351 {offsets = [0, 384], sizes = [2, 128], strides = [1, 1]} : vector<2x512xf32> to vector<2x128xf32>
    %362 = math.tanh %361 : vector<2x128xf32>
    %363 = arith.mulf %359, %321 : vector<2x128xf32>
    %364 = arith.mulf %358, %362 : vector<2x128xf32>
    %365 = arith.addf %363, %364 : vector<2x128xf32>
    %366 = math.tanh %365 : vector<2x128xf32>
    %367 = arith.mulf %360, %366 : vector<2x128xf32>
    %368 = arith.truncf %347 : vector<2x128xf32> to vector<2x128xbf16>
    %c14_72 = arith.constant 14 : index
    %c0_73 = arith.constant 0 : index
    %369 = vector.load %arg9[%c14_72, %c0_73] : memref<16x256xbf16, #tpu.memory_space<vmem>>, vector<2x128xbf16>
    tpu.vector_store %arg9[%c14_72, %c0_73], %368 {strides = array<i32>} : memref<16x256xbf16, #tpu.memory_space<vmem>>, vector<2x128xbf16>,
    %370 = arith.truncf %367 : vector<2x128xf32> to vector<2x128xbf16>
    %c0_74 = arith.constant 0 : index
    %c128_75 = arith.constant 128 : index
    %371 = vector.load %arg9[%c0_74, %c128_75] : memref<16x256xbf16, #tpu.memory_space<vmem>>, vector<2x128xbf16>
    tpu.vector_store %arg9[%c0_74, %c128_75], %370 {strides = array<i32>} : memref<16x256xbf16, #tpu.memory_space<vmem>>, vector<2x128xbf16>,
    %c0_76 = arith.constant 0 : index
    %c0_77 = arith.constant 0 : index
    %372 = vector.load %arg9[%c0_76, %c0_77] : memref<16x256xbf16, #tpu.memory_space<vmem>>, vector<16x256xbf16>
    %c0_78 = arith.constant 0 : index
    %c0_79 = arith.constant 0 : index
    %c0_80 = arith.constant 0 : index
    %373 = vector.load %arg4[%c0_78, %c0_79, %c0_80] : memref<2x256x512xbf16, #tpu.memory_space<vmem>>, vector<1x256x512xbf16>
    %374 = vector.shape_cast %373 : vector<1x256x512xbf16> to vector<256x512xbf16>
    %cst_81 = arith.constant dense<0.000000e+00> : vector<16x512xf32>
    %375 = tpu.matmul %372, %374, %cst_81 {dimension_numbers = #tpu.dot_dimension_numbers<[1], [0], [0], [1], [0, 0, 1, 1], [], []>} : vector<16x256xbf16>, vector<256x512xbf16>, vector<16x512xf32> -> vector<16x512xf32>
    %c0_82 = arith.constant 0 : index
    %c0_83 = arith.constant 0 : index
    %c0_84 = arith.constant 0 : index
    %376 = vector.load %arg6[%c0_82, %c0_83, %c0_84] : memref<2x1x512xf32, #tpu.memory_space<vmem>>, vector<1x1x512xf32>
    %377 = vector.shape_cast %376 : vector<1x1x512xf32> to vector<1x512xf32>
    %378 = vector.broadcast %377 : vector<1x512xf32> to vector<16x512xf32>
    %379 = arith.addf %375, %378 : vector<16x512xf32>
    %c1_85 = arith.constant 1 : index
    %c0_86 = arith.constant 0 : index
    %c0_87 = arith.constant 0 : index
    %380 = vector.load %arg4[%c1_85, %c0_86, %c0_87] : memref<2x256x512xbf16, #tpu.memory_space<vmem>>, vector<1x256x512xbf16>
    %381 = vector.shape_cast %380 : vector<1x256x512xbf16> to vector<256x512xbf16>
    %cst_88 = arith.constant dense<0.000000e+00> : vector<16x512xf32>
    %382 = tpu.matmul %372, %381, %cst_88 {dimension_numbers = #tpu.dot_dimension_numbers<[1], [0], [0], [1], [0, 0, 1, 1], [], []>} : vector<16x256xbf16>, vector<256x512xbf16>, vector<16x512xf32> -> vector<16x512xf32>
    %c1_89 = arith.constant 1 : index
    %c0_90 = arith.constant 0 : index
    %c0_91 = arith.constant 0 : index
    %383 = vector.load %arg6[%c1_89, %c0_90, %c0_91] : memref<2x1x512xf32, #tpu.memory_space<vmem>>, vector<1x1x512xf32>
    %384 = vector.shape_cast %383 : vector<1x1x512xf32> to vector<1x512xf32>
    %385 = vector.broadcast %384 : vector<1x512xf32> to vector<16x512xf32>
    %386 = arith.addf %382, %385 : vector<16x512xf32>
    %c0_92 = arith.constant 0 : index
    %c0_93 = arith.constant 0 : index
    %c0_94 = arith.constant 0 : index
    %387 = vector.load %arg5[%c0_92, %c0_93, %c0_94] : memref<2x128x512xbf16, #tpu.memory_space<vmem>>, vector<1x128x512xbf16>
    %388 = vector.shape_cast %387 : vector<1x128x512xbf16> to vector<128x512xbf16>
    %c1_95 = arith.constant 1 : index
    %c0_96 = arith.constant 0 : index
    %c0_97 = arith.constant 0 : index
    %389 = vector.load %arg5[%c1_95, %c0_96, %c0_97] : memref<2x128x512xbf16, #tpu.memory_space<vmem>>, vector<1x128x512xbf16>
    %390 = vector.shape_cast %389 : vector<1x128x512xbf16> to vector<128x512xbf16>
    %cst_98 = arith.constant 0.000000e+00 : f32
    %391 = vector.broadcast %cst_98 : f32 to vector<2x128xf32>
    %392 = vector.extract_strided_slice %379 {offsets = [0, 0], sizes = [2, 512], strides = [1, 1]} : vector<16x512xf32> to vector<2x512xf32>
    %393 = arith.truncf %391 : vector<2x128xf32> to vector<2x128xbf16>
    %cst_99 = arith.constant dense<0.000000e+00> : vector<2x512xf32>
    %394 = tpu.matmul %393, %388, %cst_99 {dimension_numbers = #tpu.dot_dimension_numbers<[1], [0], [0], [1], [0, 0, 1, 1], [], []>} : vector<2x128xbf16>, vector<128x512xbf16>, vector<2x512xf32> -> vector<2x512xf32>
    %395 = arith.addf %392, %394 : vector<2x512xf32>
    %396 = vector.extract_strided_slice %395 {offsets = [0, 0], sizes = [2, 384], strides = [1, 1]} : vector<2x512xf32> to vector<2x384xf32>
    %397 = arith.negf %396 : vector<2x384xf32>
    %398 = math.exp %397 : vector<2x384xf32>
    %cst_100 = arith.constant 1.000000e+00 : f32
    %399 = vector.broadcast %cst_100 : f32 to vector<2x384xf32>
    %400 = arith.addf %399, %398 : vector<2x384xf32>
    %401 = arith.divf %399, %400 : vector<2x384xf32>
    %402 = vector.extract_strided_slice %401 {offsets = [0, 0], sizes = [2, 128], strides = [1, 1]} : vector<2x384xf32> to vector<2x128xf32>
    %403 = vector.extract_strided_slice %401 {offsets = [0, 128], sizes = [2, 128], strides = [1, 1]} : vector<2x384xf32> to vector<2x128xf32>
    %404 = vector.extract_strided_slice %401 {offsets = [0, 256], sizes = [2, 128], strides = [1, 1]} : vector<2x384xf32> to vector<2x128xf32>
    %405 = vector.extract_strided_slice %395 {offsets = [0, 384], sizes = [2, 128], strides = [1, 1]} : vector<2x512xf32> to vector<2x128xf32>
    %406 = math.tanh %405 : vector<2x128xf32>
    %407 = arith.mulf %403, %391 : vector<2x128xf32>
    %408 = arith.mulf %402, %406 : vector<2x128xf32>
    %409 = arith.addf %407, %408 : vector<2x128xf32>
    %410 = math.tanh %409 : vector<2x128xf32>
    %411 = arith.mulf %404, %410 : vector<2x128xf32>
    %412 = vector.extract_strided_slice %386 {offsets = [14, 0], sizes = [2, 512], strides = [1, 1]} : vector<16x512xf32> to vector<2x512xf32>
    %413 = arith.truncf %391 : vector<2x128xf32> to vector<2x128xbf16>
    %cst_101 = arith.constant dense<0.000000e+00> : vector<2x512xf32>
    %414 = tpu.matmul %413, %390, %cst_101 {dimension_numbers = #tpu.dot_dimension_numbers<[1], [0], [0], [1], [0, 0, 1, 1], [], []>} : vector<2x128xbf16>, vector<128x512xbf16>, vector<2x512xf32> -> vector<2x512xf32>
    %415 = arith.addf %412, %414 : vector<2x512xf32>
    %416 = vector.extract_strided_slice %415 {offsets = [0, 0], sizes = [2, 384], strides = [1, 1]} : vector<2x512xf32> to vector<2x384xf32>
    %417 = arith.negf %416 : vector<2x384xf32>
    %418 = math.exp %417 : vector<2x384xf32>
    %cst_102 = arith.constant 1.000000e+00 : f32
    %419 = vector.broadcast %cst_102 : f32 to vector<2x384xf32>
    %420 = arith.addf %419, %418 : vector<2x384xf32>
    %421 = arith.divf %419, %420 : vector<2x384xf32>
    %422 = vector.extract_strided_slice %421 {offsets = [0, 0], sizes = [2, 128], strides = [1, 1]} : vector<2x384xf32> to vector<2x128xf32>
    %423 = vector.extract_strided_slice %421 {offsets = [0, 128], sizes = [2, 128], strides = [1, 1]} : vector<2x384xf32> to vector<2x128xf32>
    %424 = vector.extract_strided_slice %421 {offsets = [0, 256], sizes = [2, 128], strides = [1, 1]} : vector<2x384xf32> to vector<2x128xf32>
    %425 = vector.extract_strided_slice %415 {offsets = [0, 384], sizes = [2, 128], strides = [1, 1]} : vector<2x512xf32> to vector<2x128xf32>
    %426 = math.tanh %425 : vector<2x128xf32>
    %427 = arith.mulf %423, %391 : vector<2x128xf32>
    %428 = arith.mulf %422, %426 : vector<2x128xf32>
    %429 = arith.addf %427, %428 : vector<2x128xf32>
    %430 = math.tanh %429 : vector<2x128xf32>
    %431 = arith.mulf %424, %430 : vector<2x128xf32>
    %432 = vector.extract_strided_slice %379 {offsets = [2, 0], sizes = [2, 512], strides = [1, 1]} : vector<16x512xf32> to vector<2x512xf32>
    %433 = arith.truncf %411 : vector<2x128xf32> to vector<2x128xbf16>
    %cst_103 = arith.constant dense<0.000000e+00> : vector<2x512xf32>
    %434 = tpu.matmul %433, %388, %cst_103 {dimension_numbers = #tpu.dot_dimension_numbers<[1], [0], [0], [1], [0, 0, 1, 1], [], []>} : vector<2x128xbf16>, vector<128x512xbf16>, vector<2x512xf32> -> vector<2x512xf32>
    %435 = arith.addf %432, %434 : vector<2x512xf32>
    %436 = vector.extract_strided_slice %435 {offsets = [0, 0], sizes = [2, 384], strides = [1, 1]} : vector<2x512xf32> to vector<2x384xf32>
    %437 = arith.negf %436 : vector<2x384xf32>
    %438 = math.exp %437 : vector<2x384xf32>
    %cst_104 = arith.constant 1.000000e+00 : f32
    %439 = vector.broadcast %cst_104 : f32 to vector<2x384xf32>
    %440 = arith.addf %439, %438 : vector<2x384xf32>
    %441 = arith.divf %439, %440 : vector<2x384xf32>
    %442 = vector.extract_strided_slice %441 {offsets = [0, 0], sizes = [2, 128], strides = [1, 1]} : vector<2x384xf32> to vector<2x128xf32>
    %443 = vector.extract_strided_slice %441 {offsets = [0, 128], sizes = [2, 128], strides = [1, 1]} : vector<2x384xf32> to vector<2x128xf32>
    %444 = vector.extract_strided_slice %441 {offsets = [0, 256], sizes = [2, 128], strides = [1, 1]} : vector<2x384xf32> to vector<2x128xf32>
    %445 = vector.extract_strided_slice %435 {offsets = [0, 384], sizes = [2, 128], strides = [1, 1]} : vector<2x512xf32> to vector<2x128xf32>
    %446 = math.tanh %445 : vector<2x128xf32>
    %447 = arith.mulf %443, %409 : vector<2x128xf32>
    %448 = arith.mulf %442, %446 : vector<2x128xf32>
    %449 = arith.addf %447, %448 : vector<2x128xf32>
    %450 = math.tanh %449 : vector<2x128xf32>
    %451 = arith.mulf %444, %450 : vector<2x128xf32>
    %452 = vector.extract_strided_slice %379 {offsets = [4, 0], sizes = [2, 512], strides = [1, 1]} : vector<16x512xf32> to vector<2x512xf32>
    %453 = arith.truncf %451 : vector<2x128xf32> to vector<2x128xbf16>
    %cst_105 = arith.constant dense<0.000000e+00> : vector<2x512xf32>
    %454 = tpu.matmul %453, %388, %cst_105 {dimension_numbers = #tpu.dot_dimension_numbers<[1], [0], [0], [1], [0, 0, 1, 1], [], []>} : vector<2x128xbf16>, vector<128x512xbf16>, vector<2x512xf32> -> vector<2x512xf32>
    %455 = arith.addf %452, %454 : vector<2x512xf32>
    %456 = vector.extract_strided_slice %455 {offsets = [0, 0], sizes = [2, 384], strides = [1, 1]} : vector<2x512xf32> to vector<2x384xf32>
    %457 = arith.negf %456 : vector<2x384xf32>
    %458 = math.exp %457 : vector<2x384xf32>
    %cst_106 = arith.constant 1.000000e+00 : f32
    %459 = vector.broadcast %cst_106 : f32 to vector<2x384xf32>
    %460 = arith.addf %459, %458 : vector<2x384xf32>
    %461 = arith.divf %459, %460 : vector<2x384xf32>
    %462 = vector.extract_strided_slice %461 {offsets = [0, 0], sizes = [2, 128], strides = [1, 1]} : vector<2x384xf32> to vector<2x128xf32>
    %463 = vector.extract_strided_slice %461 {offsets = [0, 128], sizes = [2, 128], strides = [1, 1]} : vector<2x384xf32> to vector<2x128xf32>
    %464 = vector.extract_strided_slice %461 {offsets = [0, 256], sizes = [2, 128], strides = [1, 1]} : vector<2x384xf32> to vector<2x128xf32>
    %465 = vector.extract_strided_slice %455 {offsets = [0, 384], sizes = [2, 128], strides = [1, 1]} : vector<2x512xf32> to vector<2x128xf32>
    %466 = math.tanh %465 : vector<2x128xf32>
    %467 = arith.mulf %463, %449 : vector<2x128xf32>
    %468 = arith.mulf %462, %466 : vector<2x128xf32>
    %469 = arith.addf %467, %468 : vector<2x128xf32>
    %470 = math.tanh %469 : vector<2x128xf32>
    %471 = arith.mulf %464, %470 : vector<2x128xf32>
    %472 = vector.extract_strided_slice %379 {offsets = [6, 0], sizes = [2, 512], strides = [1, 1]} : vector<16x512xf32> to vector<2x512xf32>
    %473 = arith.truncf %471 : vector<2x128xf32> to vector<2x128xbf16>
    %cst_107 = arith.constant dense<0.000000e+00> : vector<2x512xf32>
    %474 = tpu.matmul %473, %388, %cst_107 {dimension_numbers = #tpu.dot_dimension_numbers<[1], [0], [0], [1], [0, 0, 1, 1], [], []>} : vector<2x128xbf16>, vector<128x512xbf16>, vector<2x512xf32> -> vector<2x512xf32>
    %475 = arith.addf %472, %474 : vector<2x512xf32>
    %476 = vector.extract_strided_slice %475 {offsets = [0, 0], sizes = [2, 384], strides = [1, 1]} : vector<2x512xf32> to vector<2x384xf32>
    %477 = arith.negf %476 : vector<2x384xf32>
    %478 = math.exp %477 : vector<2x384xf32>
    %cst_108 = arith.constant 1.000000e+00 : f32
    %479 = vector.broadcast %cst_108 : f32 to vector<2x384xf32>
    %480 = arith.addf %479, %478 : vector<2x384xf32>
    %481 = arith.divf %479, %480 : vector<2x384xf32>
    %482 = vector.extract_strided_slice %481 {offsets = [0, 0], sizes = [2, 128], strides = [1, 1]} : vector<2x384xf32> to vector<2x128xf32>
    %483 = vector.extract_strided_slice %481 {offsets = [0, 128], sizes = [2, 128], strides = [1, 1]} : vector<2x384xf32> to vector<2x128xf32>
    %484 = vector.extract_strided_slice %481 {offsets = [0, 256], sizes = [2, 128], strides = [1, 1]} : vector<2x384xf32> to vector<2x128xf32>
    %485 = vector.extract_strided_slice %475 {offsets = [0, 384], sizes = [2, 128], strides = [1, 1]} : vector<2x512xf32> to vector<2x128xf32>
    %486 = math.tanh %485 : vector<2x128xf32>
    %487 = arith.mulf %483, %469 : vector<2x128xf32>
    %488 = arith.mulf %482, %486 : vector<2x128xf32>
    %489 = arith.addf %487, %488 : vector<2x128xf32>
    %490 = math.tanh %489 : vector<2x128xf32>
    %491 = arith.mulf %484, %490 : vector<2x128xf32>
    %492 = vector.extract_strided_slice %379 {offsets = [8, 0], sizes = [2, 512], strides = [1, 1]} : vector<16x512xf32> to vector<2x512xf32>
    %493 = arith.truncf %491 : vector<2x128xf32> to vector<2x128xbf16>
    %cst_109 = arith.constant dense<0.000000e+00> : vector<2x512xf32>
    %494 = tpu.matmul %493, %388, %cst_109 {dimension_numbers = #tpu.dot_dimension_numbers<[1], [0], [0], [1], [0, 0, 1, 1], [], []>} : vector<2x128xbf16>, vector<128x512xbf16>, vector<2x512xf32> -> vector<2x512xf32>
    %495 = arith.addf %492, %494 : vector<2x512xf32>
    %496 = vector.extract_strided_slice %495 {offsets = [0, 0], sizes = [2, 384], strides = [1, 1]} : vector<2x512xf32> to vector<2x384xf32>
    %497 = arith.negf %496 : vector<2x384xf32>
    %498 = math.exp %497 : vector<2x384xf32>
    %cst_110 = arith.constant 1.000000e+00 : f32
    %499 = vector.broadcast %cst_110 : f32 to vector<2x384xf32>
    %500 = arith.addf %499, %498 : vector<2x384xf32>
    %501 = arith.divf %499, %500 : vector<2x384xf32>
    %502 = vector.extract_strided_slice %501 {offsets = [0, 0], sizes = [2, 128], strides = [1, 1]} : vector<2x384xf32> to vector<2x128xf32>
    %503 = vector.extract_strided_slice %501 {offsets = [0, 128], sizes = [2, 128], strides = [1, 1]} : vector<2x384xf32> to vector<2x128xf32>
    %504 = vector.extract_strided_slice %501 {offsets = [0, 256], sizes = [2, 128], strides = [1, 1]} : vector<2x384xf32> to vector<2x128xf32>
    %505 = vector.extract_strided_slice %495 {offsets = [0, 384], sizes = [2, 128], strides = [1, 1]} : vector<2x512xf32> to vector<2x128xf32>
    %506 = math.tanh %505 : vector<2x128xf32>
    %507 = arith.mulf %503, %489 : vector<2x128xf32>
    %508 = arith.mulf %502, %506 : vector<2x128xf32>
    %509 = arith.addf %507, %508 : vector<2x128xf32>
    %510 = math.tanh %509 : vector<2x128xf32>
    %511 = arith.mulf %504, %510 : vector<2x128xf32>
    %512 = vector.extract_strided_slice %379 {offsets = [10, 0], sizes = [2, 512], strides = [1, 1]} : vector<16x512xf32> to vector<2x512xf32>
    %513 = arith.truncf %511 : vector<2x128xf32> to vector<2x128xbf16>
    %cst_111 = arith.constant dense<0.000000e+00> : vector<2x512xf32>
    %514 = tpu.matmul %513, %388, %cst_111 {dimension_numbers = #tpu.dot_dimension_numbers<[1], [0], [0], [1], [0, 0, 1, 1], [], []>} : vector<2x128xbf16>, vector<128x512xbf16>, vector<2x512xf32> -> vector<2x512xf32>
    %515 = arith.addf %512, %514 : vector<2x512xf32>
    %516 = vector.extract_strided_slice %515 {offsets = [0, 0], sizes = [2, 384], strides = [1, 1]} : vector<2x512xf32> to vector<2x384xf32>
    %517 = arith.negf %516 : vector<2x384xf32>
    %518 = math.exp %517 : vector<2x384xf32>
    %cst_112 = arith.constant 1.000000e+00 : f32
    %519 = vector.broadcast %cst_112 : f32 to vector<2x384xf32>
    %520 = arith.addf %519, %518 : vector<2x384xf32>
    %521 = arith.divf %519, %520 : vector<2x384xf32>
    %522 = vector.extract_strided_slice %521 {offsets = [0, 0], sizes = [2, 128], strides = [1, 1]} : vector<2x384xf32> to vector<2x128xf32>
    %523 = vector.extract_strided_slice %521 {offsets = [0, 128], sizes = [2, 128], strides = [1, 1]} : vector<2x384xf32> to vector<2x128xf32>
    %524 = vector.extract_strided_slice %521 {offsets = [0, 256], sizes = [2, 128], strides = [1, 1]} : vector<2x384xf32> to vector<2x128xf32>
    %525 = vector.extract_strided_slice %515 {offsets = [0, 384], sizes = [2, 128], strides = [1, 1]} : vector<2x512xf32> to vector<2x128xf32>
    %526 = math.tanh %525 : vector<2x128xf32>
    %527 = arith.mulf %523, %509 : vector<2x128xf32>
    %528 = arith.mulf %522, %526 : vector<2x128xf32>
    %529 = arith.addf %527, %528 : vector<2x128xf32>
    %530 = math.tanh %529 : vector<2x128xf32>
    %531 = arith.mulf %524, %530 : vector<2x128xf32>
    %532 = vector.extract_strided_slice %379 {offsets = [12, 0], sizes = [2, 512], strides = [1, 1]} : vector<16x512xf32> to vector<2x512xf32>
    %533 = arith.truncf %531 : vector<2x128xf32> to vector<2x128xbf16>
    %cst_113 = arith.constant dense<0.000000e+00> : vector<2x512xf32>
    %534 = tpu.matmul %533, %388, %cst_113 {dimension_numbers = #tpu.dot_dimension_numbers<[1], [0], [0], [1], [0, 0, 1, 1], [], []>} : vector<2x128xbf16>, vector<128x512xbf16>, vector<2x512xf32> -> vector<2x512xf32>
    %535 = arith.addf %532, %534 : vector<2x512xf32>
    %536 = vector.extract_strided_slice %535 {offsets = [0, 0], sizes = [2, 384], strides = [1, 1]} : vector<2x512xf32> to vector<2x384xf32>
    %537 = arith.negf %536 : vector<2x384xf32>
    %538 = math.exp %537 : vector<2x384xf32>
    %cst_114 = arith.constant 1.000000e+00 : f32
    %539 = vector.broadcast %cst_114 : f32 to vector<2x384xf32>
    %540 = arith.addf %539, %538 : vector<2x384xf32>
    %541 = arith.divf %539, %540 : vector<2x384xf32>
    %542 = vector.extract_strided_slice %541 {offsets = [0, 0], sizes = [2, 128], strides = [1, 1]} : vector<2x384xf32> to vector<2x128xf32>
    %543 = vector.extract_strided_slice %541 {offsets = [0, 128], sizes = [2, 128], strides = [1, 1]} : vector<2x384xf32> to vector<2x128xf32>
    %544 = vector.extract_strided_slice %541 {offsets = [0, 256], sizes = [2, 128], strides = [1, 1]} : vector<2x384xf32> to vector<2x128xf32>
    %545 = vector.extract_strided_slice %535 {offsets = [0, 384], sizes = [2, 128], strides = [1, 1]} : vector<2x512xf32> to vector<2x128xf32>
    %546 = math.tanh %545 : vector<2x128xf32>
    %547 = arith.mulf %543, %529 : vector<2x128xf32>
    %548 = arith.mulf %542, %546 : vector<2x128xf32>
    %549 = arith.addf %547, %548 : vector<2x128xf32>
    %550 = math.tanh %549 : vector<2x128xf32>
    %551 = arith.mulf %544, %550 : vector<2x128xf32>
    %552 = vector.extract_strided_slice %379 {offsets = [14, 0], sizes = [2, 512], strides = [1, 1]} : vector<16x512xf32> to vector<2x512xf32>
    %553 = arith.truncf %551 : vector<2x128xf32> to vector<2x128xbf16>
    %cst_115 = arith.constant dense<0.000000e+00> : vector<2x512xf32>
    %554 = tpu.matmul %553, %388, %cst_115 {dimension_numbers = #tpu.dot_dimension_numbers<[1], [0], [0], [1], [0, 0, 1, 1], [], []>} : vector<2x128xbf16>, vector<128x512xbf16>, vector<2x512xf32> -> vector<2x512xf32>
    %555 = arith.addf %552, %554 : vector<2x512xf32>
    %556 = vector.extract_strided_slice %555 {offsets = [0, 0], sizes = [2, 384], strides = [1, 1]} : vector<2x512xf32> to vector<2x384xf32>
    %557 = arith.negf %556 : vector<2x384xf32>
    %558 = math.exp %557 : vector<2x384xf32>
    %cst_116 = arith.constant 1.000000e+00 : f32
    %559 = vector.broadcast %cst_116 : f32 to vector<2x384xf32>
    %560 = arith.addf %559, %558 : vector<2x384xf32>
    %561 = arith.divf %559, %560 : vector<2x384xf32>
    %562 = vector.extract_strided_slice %561 {offsets = [0, 0], sizes = [2, 128], strides = [1, 1]} : vector<2x384xf32> to vector<2x128xf32>
    %563 = vector.extract_strided_slice %561 {offsets = [0, 128], sizes = [2, 128], strides = [1, 1]} : vector<2x384xf32> to vector<2x128xf32>
    %564 = vector.extract_strided_slice %561 {offsets = [0, 256], sizes = [2, 128], strides = [1, 1]} : vector<2x384xf32> to vector<2x128xf32>
    %565 = vector.extract_strided_slice %555 {offsets = [0, 384], sizes = [2, 128], strides = [1, 1]} : vector<2x512xf32> to vector<2x128xf32>
    %566 = math.tanh %565 : vector<2x128xf32>
    %567 = arith.mulf %563, %549 : vector<2x128xf32>
    %568 = arith.mulf %562, %566 : vector<2x128xf32>
    %569 = arith.addf %567, %568 : vector<2x128xf32>
    %570 = math.tanh %569 : vector<2x128xf32>
    %571 = arith.mulf %564, %570 : vector<2x128xf32>
    %c0_117 = arith.constant 0 : index
    %c0_118 = arith.constant 0 : index
    %c0_119 = arith.constant 0 : index
    %572 = vector.load %arg7[%c0_117, %c0_118, %c0_119] : memref<2x128x128xf32, #tpu.memory_space<vmem>>, vector<1x128x128xf32>
    %573 = vector.shape_cast %572 : vector<1x128x128xf32> to vector<128x128xf32>
    %cst_120 = arith.constant dense<0.000000e+00> : vector<2x128xf32>
    %574 = tpu.matmul %571, %573, %cst_120 {dimension_numbers = #tpu.dot_dimension_numbers<[1], [0], [0], [1], [0, 0, 1, 1], [], []>} : vector<2x128xf32>, vector<128x128xf32>, vector<2x128xf32> -> vector<2x128xf32>
    %c1_121 = arith.constant 1 : index
    %c0_122 = arith.constant 0 : index
    %c0_123 = arith.constant 0 : index
    %575 = vector.load %arg7[%c1_121, %c0_122, %c0_123] : memref<2x128x128xf32, #tpu.memory_space<vmem>>, vector<1x128x128xf32>
    %576 = vector.shape_cast %575 : vector<1x128x128xf32> to vector<128x128xf32>
    %cst_124 = arith.constant dense<0.000000e+00> : vector<2x128xf32>
    %577 = tpu.matmul %431, %576, %cst_124 {dimension_numbers = #tpu.dot_dimension_numbers<[1], [0], [0], [1], [0, 0, 1, 1], [], []>} : vector<2x128xf32>, vector<128x128xf32>, vector<2x128xf32> -> vector<2x128xf32>
    %578 = arith.addf %574, %577 : vector<2x128xf32>
    %c0_125 = arith.constant 0 : index
    %c0_126 = arith.constant 0 : index
    %579 = vector.load %arg8[%c0_125, %c0_126] : memref<2x128xf32, #tpu.memory_space<vmem>>, vector<2x128xf32>
    tpu.vector_store %arg8[%c0_125, %c0_126], %578 {strides = array<i32>} : memref<2x128xf32, #tpu.memory_space<vmem>>, vector<2x128xf32>,
    return
  }
}

</mosaic_0001>

<bundles_post_ra>
// kernel: twmodel_forward.1
= control target key start
LH: loop header
LB: loop body
LE: loop exit
PB: predicated region body
PF: predicated region fallthrough
CT: control target
= control target key end

     0   :  { %13 = vsyncpa [#allocation4], 0  ;;  %s10677_s0 = inlined_call_operand.vmem [shape: bf16[16,256], index: 0, kind: input, shape index: {}]   ;;  %s10678_s1 = inlined_call_operand.hbm [shape: bf16[2,256,512], index: 1, kind: input, shape index: {}]   ;;  %s10679_s2 = inlined_call_operand.hbm [shape: bf16[2,128,512], index: 2, kind: input, shape index: {}]   ;;  %s10680_s3 = inlined_call_operand.vmem [shape: f32[2,1,512], index: 3, kind: input, shape index: {}]   ;;  %s10681_s4 = inlined_call_operand.hbm [shape: bf16[2,256,512], index: 4, kind: input, shape index: {}]   ;;  %s10682_s5 = inlined_call_operand.hbm [shape: bf16[2,128,512], index: 5, kind: input, shape index: {}]   ;;  %s10683_s6 = inlined_call_operand.vmem [shape: f32[2,1,512], index: 6, kind: input, shape index: {}]   ;;  %s10684_s7 = inlined_call_operand.hbm [shape: f32[2,128,128], index: 7, kind: input, shape index: {}]   ;;  %s10685_s8 = inlined_call_operand.vmem [shape: f32[2,128], index: 8, kind: output, shape index: {}]  }
   0x1   :  { %14 = vsyncpa [#allocation6], 0 }
   0x2   :  { %15 = vsyncpa [#allocation9], 0  ;;  %s35_s29 = sshll.u32 %s10679_s2, 4  ;;  %s8937_s30 = smov [#allocation5]   ;;  %s36_s29 = int_to_ptr.hbm [resolvable:$true] %s35_s29 }
   0x3   :  { %s37_s9 = sshll.u32 %s8937_s30, 4  ;;  %s63_s12 = sshll.u32 %s10682_s5, 4  ;;  %s38_s9 = int_to_ptr.vmem [resolvable:$true] %s37_s9  ;;  %s64_s12 = int_to_ptr.hbm [resolvable:$true] %s63_s12 }
   0x4   :  { %s8938_s13 = smov 256   ;;  %s8939_s14 = smov 16  }
   0x5   :  { %43 = dma.hbm_to_vmem [thread:$0]  %s36_s29, 8192, %s38_s9, [#allocation6], %s8938_s13, %s8938_s13, %s8939_s14  }
   0x6   :  { %s8940_s15 = smov [#allocation8]   ;;  %s22_s19 = sshll.u32 %s10678_s1, 4  ;;  %s23_s19 = int_to_ptr.hbm [resolvable:$true] %s22_s19 }
   0x7   :  { %s65_s16 = sshll.u32 %s8940_s15, 4  ;;  %s50_s21 = sshll.u32 %s10681_s4, 4  ;;  %s66_s16 = int_to_ptr.vmem [resolvable:$true] %s65_s16  ;;  %s51_s21 = int_to_ptr.hbm [resolvable:$true] %s50_s21 }
   0x8   :  { %71 = dma.hbm_to_vmem [thread:$0]  %s64_s12, 8192, %s66_s16, [#allocation9], %s8938_s13, %s8938_s13, %s8939_s14  }
   0x9   :  { %s8941_s22 = smov [#allocation3]   ;;  %s8942_s5 = smov [#allocation7]  }
   0xa   :  { %s24_s23 = sshll.u32 %s8941_s22, 4  ;;  %s52_s24 = sshll.u32 %s8942_s5, 4  ;;  %s25_s23 = int_to_ptr.vmem [resolvable:$true] %s24_s23  ;;  %s53_s24 = int_to_ptr.vmem [resolvable:$true] %s52_s24 }
   0xb   :  { %30 = dma.hbm_to_vmem [thread:$0]  %s23_s19, 16384, %s25_s23, [#allocation4], %s8938_s13, %s8938_s13, %s8939_s14  }
   0xc   :  { %s78_s27 = sshll.u32 %s10684_s7, 4  ;;  %s8943_s1 = smov [#allocation10]   ;;  %s79_s27 = int_to_ptr.hbm [resolvable:$true] %s78_s27 }
   0xd   :  { %58 = dma.hbm_to_vmem [thread:$0]  %s51_s21, 16384, %s53_s24, [#allocation6], %s8938_s13, %s8938_s13, %s8939_s14  }
   0xe   :  { %s80_s28 = sshll.u32 %s8943_s1, 4  ;;  %s8944_s29 = smov 128   ;;  %s81_s28 = int_to_ptr.vmem [resolvable:$true] %s80_s28 }
   0xf   :  { %s8945_s30 = smov 8  }
  0x10   :  { %86 = dma.hbm_to_vmem [thread:$0]  %s79_s27, 4096, %s81_s28, [#allocation9], %s8944_s29, %s8944_s29, %s8945_s30  }
  0x11   :  { %8931 = dma.done.wait [#allocation4], 16384  }
  0x12   :  { %8932 = vsyncadd [#allocation4], 4294950912 }
  0x13   :  { %8933 = dma.done.wait [#allocation6], 24576  }
  0x14   :  { %8934 = vsyncadd [#allocation6], 4294942720 }
  0x15   :  { %8935 = dma.done.wait [#allocation9], 12288  }
  0x16   :  { %8936 = vsyncadd [#allocation9], 4294955008  ;;  %v6506_v0 = vld [vmem:[#allocation3 + $0xe0] sm:$0xf]  ;;  %v8045_v1 = vld [vmem:[#allocation3 + $0xec] sm:$0xf0] }
  0x17   :  { %v6634_v2 = vld [vmem:[#allocation3 + $0x1e0] sm:$0xf]  ;;  %v6507_v3 = vor.u32 %v8045_v1, %v6506_v0  ;;  %v8077_v4 = vld [vmem:[#allocation3 + $0x1ec] sm:$0xf0]  ;;  %v8043_v5 = vld [vmem:[#allocation3 + $0xe4] sm:$0xf] }
  0x18   :  { %v6508_v6 = vld [vmem:[#allocation3 + $0xf0] sm:$0xf0]  ;;  %v6635_v7 = vor.u32 %v8077_v4, %v6634_v2  ;;  %v8075_v9 = vld [vmem:[#allocation3 + $0x1e4] sm:$0xf]  ;;  %v6490_v11 = vld [vmem:[#allocation3 + $0xc0] sm:$0xf] }
  0x19   :  { %v6511_v8 = vor.u32 %v8043_v5, %v6508_v6  ;;  %v6636_v10 = vld [vmem:[#allocation3 + $0x1f0] sm:$0xf0]  ;;  %514 = vmatpush.bf16.msra.mxu0 %v6507_v3  ;;  %v8041_v13 = vld [vmem:[#allocation3 + $0xcc] sm:$0xf0]  ;;  %v6618_v14 = vld [vmem:[#allocation3 + $0x1c0] sm:$0xf] }
  0x1a   :  { %v6639_v12 = vor.u32 %v8075_v9, %v6636_v10  ;;  %v8073_v15 = vld [vmem:[#allocation3 + $0x1cc] sm:$0xf0]  ;;  %528 = vmatpush.bf16.msra.mxu1 %v6635_v7  ;;  %v6491_v16 = vor.u32 %v8041_v13, %v6490_v11  ;;  %v8039_v18 = vld [vmem:[#allocation3 + $0xc4] sm:$0xf]  ;;  %v6492_v19 = vld [vmem:[#allocation3 + $0xd0] sm:$0xf0] }
  0x1b   :  { %542 = vmatpush.bf16.msra.mxu2 %v6511_v8  ;;  %v6619_v17 = vor.u32 %v8073_v15, %v6618_v14  ;;  %v8071_v20 = vld [vmem:[#allocation3 + $0x1c4] sm:$0xf]  ;;  %v6495_v21 = vor.u32 %v8039_v18, %v6492_v19  ;;  %v6620_v22 = vld [vmem:[#allocation3 + $0x1d0] sm:$0xf0]  ;;  %v6474_v23 = vld [vmem:[#allocation3 + $0xa0] sm:$0xf] }
  0x1c   :  { %556 = vmatpush.bf16.msra.mxu3 %v6639_v12  ;;  %v8037_v24 = vld [vmem:[#allocation3 + $0xac] sm:$0xf0]  ;;  %v6623_v25 = vor.u32 %v8071_v20, %v6620_v22  ;;  %v6602_v26 = vld [vmem:[#allocation3 + $0x1a0] sm:$0xf]  ;;  %v8035_v28 = vld [vmem:[#allocation3 + $0xa4] sm:$0xf] }
  0x1d   :  { %v8069_v27 = vld [vmem:[#allocation3 + $0x1ac] sm:$0xf0]  ;;  %515 = vmatpush.bf16.msra.mxu0 %v6491_v16  ;;  %v6475_v29 = vor.u32 %v8037_v24, %v6474_v23  ;;  %v6476_v30 = vld [vmem:[#allocation3 + $0xb0] sm:$0xf0]  ;;  %v8067_v31 = vld [vmem:[#allocation3 + $0x1a4] sm:$0xf] }
  0x1e   :  { %v6604_v32 = vld [vmem:[#allocation3 + $0x1b0] sm:$0xf0]  ;;  %529 = vmatpush.bf16.msra.mxu1 %v6619_v17  ;;  %v6603_v33 = vor.u32 %v8069_v27, %v6602_v26  ;;  %v6479_v34 = vor.u32 %v8035_v28, %v6476_v30  ;;  %v6458_v35 = vld [vmem:[#allocation3 + $0x80] sm:$0xf]  ;;  %v8033_v36 = vld [vmem:[#allocation3 + $0x8c] sm:$0xf0] }
  0x1f   :  { %543 = vmatpush.bf16.msra.mxu2 %v6495_v21  ;;  %v6586_v37 = vld [vmem:[#allocation3 + $0x180] sm:$0xf]  ;;  %v6607_v38 = vor.u32 %v8067_v31, %v6604_v32  ;;  %v8065_v39 = vld [vmem:[#allocation3 + $0x18c] sm:$0xf0]  ;;  %v8031_v40 = vld [vmem:[#allocation3 + $0x84] sm:$0xf]  ;;  %v6459_v44 = vor.u32 %v8033_v36, %v6458_v35 }
  0x20   :  { %557 = vmatpush.bf16.msra.mxu3 %v6623_v25  ;;  %v6460_v41 = vld [vmem:[#allocation3 + $0x90] sm:$0xf0]  ;;  %v8063_v42 = vld [vmem:[#allocation3 + $0x184] sm:$0xf]  ;;  %v6587_v45 = vor.u32 %v8065_v39, %v6586_v37  ;;  %v6442_v47 = vld [vmem:[#allocation3 + $0x60] sm:$0xf] }
  0x21   :  { %v6588_v43 = vld [vmem:[#allocation3 + $0x190] sm:$0xf0]  ;;  %516 = vmatpush.bf16.msra.mxu0 %v6475_v29  ;;  %v6463_v46 = vor.u32 %v8031_v40, %v6460_v41  ;;  %v8029_v48 = vld [vmem:[#allocation3 + $0x6c] sm:$0xf0]  ;;  %v6570_v49 = vld [vmem:[#allocation3 + $0x160] sm:$0xf] }
  0x22   :  { %530 = vmatpush.bf16.msra.mxu1 %v6603_v33  ;;  %v6591_v50 = vor.u32 %v8063_v42, %v6588_v43  ;;  %v8061_v51 = vld [vmem:[#allocation3 + $0x16c] sm:$0xf0]  ;;  %v8027_v52 = vld [vmem:[#allocation3 + $0x64] sm:$0xf]  ;;  %v6444_v53 = vld [vmem:[#allocation3 + $0x70] sm:$0xf0]  ;;  %v6443_v56 = vor.u32 %v8029_v48, %v6442_v47 }
  0x23   :  { %544 = vmatpush.bf16.msra.mxu2 %v6479_v34  ;;  %v8059_v54 = vld [vmem:[#allocation3 + $0x164] sm:$0xf]  ;;  %v6572_v55 = vld [vmem:[#allocation3 + $0x170] sm:$0xf0]  ;;  %v6571_v57 = vor.u32 %v8061_v51, %v6570_v49  ;;  %v6447_v58 = vor.u32 %v8027_v52, %v6444_v53  ;;  %v6426_v59 = vld [vmem:[#allocation3 + $0x40] sm:$0xf] }
  0x24   :  { %558 = vmatpush.bf16.msra.mxu3 %v6607_v38  ;;  %v8025_v60 = vld [vmem:[#allocation3 + $0x4c] sm:$0xf0]  ;;  %v6554_v61 = vld [vmem:[#allocation3 + $0x140] sm:$0xf]  ;;  %v6575_v62 = vor.u32 %v8059_v54, %v6572_v55  ;;  %v8023_v0 = vld [vmem:[#allocation3 + $0x44] sm:$0xf] }
  0x25   :  { %517 = vmatpush.bf16.msra.mxu0 %v6459_v44  ;;  %v8057_v63 = vld [vmem:[#allocation3 + $0x14c] sm:$0xf0]  ;;  %v6428_v1 = vld [vmem:[#allocation3 + $0x50] sm:$0xf0]  ;;  %v8055_v2 = vld [vmem:[#allocation3 + $0x144] sm:$0xf]  ;;  %v6427_v4 = vor.u32 %v8025_v60, %v6426_v59 }
  0x26   :  { %531 = vmatpush.bf16.msra.mxu1 %v6587_v45  ;;  %v6556_v3 = vld [vmem:[#allocation3 + $0x150] sm:$0xf0]  ;;  %v6555_v5 = vor.u32 %v8057_v63, %v6554_v61  ;;  %v6431_v6 = vor.u32 %v8023_v0, %v6428_v1  ;;  %v6410_v7 = vld [vmem:[#allocation3 + $0x20] sm:$0xf]  ;;  %v8021_v8 = vld [vmem:[#allocation3 + $0x2c] sm:$0xf0] }
  0x27   :  { %545 = vmatpush.bf16.msra.mxu2 %v6463_v46  ;;  %v6538_v9 = vld [vmem:[#allocation3 + $0x120] sm:$0xf]  ;;  %v6559_v10 = vor.u32 %v8055_v2, %v6556_v3  ;;  %v8053_v11 = vld [vmem:[#allocation3 + $0x12c] sm:$0xf0]  ;;  %v8019_v12 = vld [vmem:[#allocation3 + $0x24] sm:$0xf]  ;;  %v6411_v16 = vor.u32 %v8021_v8, %v6410_v7 }
  0x28   :  { %559 = vmatpush.bf16.msra.mxu3 %v6591_v50  ;;  %v6412_v13 = vld [vmem:[#allocation3 + $0x30] sm:$0xf0]  ;;  %v8051_v14 = vld [vmem:[#allocation3 + $0x124] sm:$0xf]  ;;  %v6394_v17 = vld [vmem:[#allocation3] sm:$0xf]  ;;  %v6539_v19 = vor.u32 %v8053_v11, %v6538_v9 }
  0x29   :  { %518 = vmatpush.bf16.msra.mxu0 %v6443_v56  ;;  %v6540_v15 = vld [vmem:[#allocation3 + $0x130] sm:$0xf0]  ;;  %v8017_v18 = vld [vmem:[#allocation3 + $0xc] sm:$0xf0]  ;;  %v6415_v20 = vor.u32 %v8019_v12, %v6412_v13  ;;  %v6522_v21 = vld [vmem:[#allocation3 + $0x100] sm:$0xf] }
  0x2a   :  { %532 = vmatpush.bf16.msra.mxu1 %v6571_v57  ;;  %v8049_v22 = vld [vmem:[#allocation3 + $0x10c] sm:$0xf0]  ;;  %v8015_v23 = vld [vmem:[#allocation3 + $0x4] sm:$0xf]  ;;  %v6543_v24 = vor.u32 %v8051_v14, %v6540_v15  ;;  %v6396_v25 = vld [vmem:[#allocation3 + $0x10] sm:$0xf0]  ;;  %v6395_v31 = vor.u32 %v8017_v18, %v6394_v17 }
  0x2b   :  { %546 = vmatpush.bf16.msra.mxu2 %v6447_v58  ;;  %v8047_v26 = vld [vmem:[#allocation3 + $0x104] sm:$0xf]  ;;  %v6524_v27 = vld [vmem:[#allocation3 + $0x110] sm:$0xf0]  ;;  %v6514_v28 = vld [vmem:[#allocation3 + $0xe8] sm:$0xf]  ;;  %v6523_v35 = vor.u32 %v8049_v22, %v6522_v21  ;;  %v6399_v36 = vor.u32 %v8015_v23, %v6396_v25 }
  0x2c   :  { %560 = vmatpush.bf16.msra.mxu3 %v6575_v62  ;;  %v8046_v29 = vld [vmem:[#allocation3 + $0xf4] sm:$0xf0]  ;;  %v6642_v30 = vld [vmem:[#allocation3 + $0x1e8] sm:$0xf]  ;;  %v8044_v33 = vld [vmem:[#allocation3 + $0xec] sm:$0xf]  ;;  %v6527_v39 = vor.u32 %v8047_v26, %v6524_v27 }
  0x2d   :  { %519 = vmatpush.bf16.msra.mxu0 %v6427_v4  ;;  %v8078_v32 = vld [vmem:[#allocation3 + $0x1f4] sm:$0xf0]  ;;  %v6516_v34 = vld [vmem:[#allocation3 + $0xf8] sm:$0xf0]  ;;  %v8076_v37 = vld [vmem:[#allocation3 + $0x1ec] sm:$0xf]  ;;  %v6515_v40 = vor.u32 %v8046_v29, %v6514_v28 }
  0x2e   :  { %533 = vmatpush.bf16.msra.mxu1 %v6555_v5  ;;  %v6644_v38 = vld [vmem:[#allocation3 + $0x1f8] sm:$0xf0]  ;;  %v6643_v41 = vor.u32 %v8078_v32, %v6642_v30  ;;  %v6519_v42 = vor.u32 %v8044_v33, %v6516_v34  ;;  %v6498_v43 = vld [vmem:[#allocation3 + $0xc8] sm:$0xf]  ;;  %v8042_v44 = vld [vmem:[#allocation3 + $0xd4] sm:$0xf0] }
  0x2f   :  { %547 = vmatpush.bf16.msra.mxu2 %v6431_v6  ;;  %v6626_v45 = vld [vmem:[#allocation3 + $0x1c8] sm:$0xf]  ;;  %v6647_v46 = vor.u32 %v8076_v37, %v6644_v38  ;;  %v8074_v47 = vld [vmem:[#allocation3 + $0x1d4] sm:$0xf0]  ;;  %v8040_v48 = vld [vmem:[#allocation3 + $0xcc] sm:$0xf]  ;;  %v6499_v52 = vor.u32 %v8042_v44, %v6498_v43 }
  0x30   :  { %561 = vmatpush.bf16.msra.mxu3 %v6559_v10  ;;  %v6500_v49 = vld [vmem:[#allocation3 + $0xd8] sm:$0xf0]  ;;  %v8072_v50 = vld [vmem:[#allocation3 + $0x1cc] sm:$0xf]  ;;  %v6482_v53 = vld [vmem:[#allocation3 + $0xa8] sm:$0xf]  ;;  %v6627_v55 = vor.u32 %v8074_v47, %v6626_v45 }
  0x31   :  { %520 = vmatpush.bf16.msra.mxu0 %v6411_v16  ;;  %v6628_v51 = vld [vmem:[#allocation3 + $0x1d8] sm:$0xf0]  ;;  %v8038_v54 = vld [vmem:[#allocation3 + $0xb4] sm:$0xf0]  ;;  %v6503_v56 = vor.u32 %v8040_v48, %v6500_v49  ;;  %v6610_v57 = vld [vmem:[#allocation3 + $0x1a8] sm:$0xf] }
  0x32   :  { %534 = vmatpush.bf16.msra.mxu1 %v6539_v19  ;;  %v8070_v58 = vld [vmem:[#allocation3 + $0x1b4] sm:$0xf0]  ;;  %v6386_v59 = vld [vmem:[%s10677_s0] sm:$0xf]  ;;  %v6631_v60 = vor.u32 %v8072_v50, %v6628_v51  ;;  %v8036_v61 = vld [vmem:[#allocation3 + $0xac] sm:$0xf]  ;;  %v6483_v3 = vor.u32 %v8038_v54, %v6482_v53 }
  0x33   :  { %548 = vmatpush.bf16.msra.mxu2 %v6415_v20  ;;  %v6484_v62 = vld [vmem:[#allocation3 + $0xb8] sm:$0xf0]  ;;  %v8014_v63 = vld [vmem:[%s10677_s0 + $0x4] sm:$0xf0]  ;;  %v8068_v0 = vld [vmem:[#allocation3 + $0x1ac] sm:$0xf]  ;;  %v6611_v6 = vor.u32 %v8070_v58, %v6610_v57 }
  0x34   :  { %562 = vmatpush.bf16.msra.mxu3 %v6543_v24  ;;  %v6612_v1 = vld [vmem:[#allocation3 + $0x1b8] sm:$0xf0]  ;;  %v9013_v2 = vor.u32 %v8014_v63, %v6386_v59  ;;  %v6466_v4 = vld [vmem:[#allocation3 + $0x88] sm:$0xf]  ;;  %v8034_v5 = vld [vmem:[#allocation3 + $0x94] sm:$0xf0]  ;;  %v6487_v7 = vor.u32 %v8036_v61, %v6484_v62 }
  0x35   :  { %521 = vmatpush.bf16.msra.mxu0 %v6395_v31  ;;  %v6594_v8 = vld [vmem:[#allocation3 + $0x188] sm:$0xf]  ;;  %v8013_v9 = vld [vmem:[%s10677_s0 + $0x4] sm:$0xf]  ;;  %v6388_v10 = vld [vmem:[%s10677_s0 + $0x8] sm:$0xf0]  ;;  %v6615_v11 = vor.u32 %v8068_v0, %v6612_v1  ;;  %v6467_v18 = vor.u32 %v8034_v5, %v6466_v4 }
  0x36   :  { %535 = vmatpush.bf16.msra.mxu1 %v6523_v35  ;;  %v8066_v12 = vld [vmem:[#allocation3 + $0x194] sm:$0xf0]  ;;  %v8032_v13 = vld [vmem:[#allocation3 + $0x8c] sm:$0xf]  ;;  %v6468_v14 = vld [vmem:[#allocation3 + $0x98] sm:$0xf0]  ;;  %v9022_v15 = vor.u32 %v8013_v9, %v6388_v10 }
  0x37   :  { %549 = vmatpush.bf16.msra.mxu2 %v6399_v36  ;;  %v8064_v16 = vld [vmem:[#allocation3 + $0x18c] sm:$0xf]  ;;  %v6596_v17 = vld [vmem:[#allocation3 + $0x198] sm:$0xf0]  ;;  %v6595_v19 = vor.u32 %v8066_v12, %v6594_v8  ;;  %v6471_v20 = vor.u32 %v8032_v13, %v6468_v14  ;;  %v6450_v21 = vld [vmem:[#allocation3 + $0x68] sm:$0xf] }
  0x38   :  { %563 = vmatpush.bf16.msra.mxu3 %v6527_v39  ;;  %522 = vmatmul.bf16.vlgmr.msra.gmra.mxu0 %v9013_v2  ;;  %v8030_v22 = vld [vmem:[#allocation3 + $0x74] sm:$0xf0]  ;;  %v6578_v23 = vld [vmem:[#allocation3 + $0x168] sm:$0xf]  ;;  %v6599_v24 = vor.u32 %v8064_v16, %v6596_v17  ;;  %v8028_v26 = vld [vmem:[#allocation3 + $0x6c] sm:$0xf] }
  0x39   :  { %570 = vmatpush.bf16.msrb.mxu0 %v6515_v40  ;;  %536 = vmatmul.bf16.vlgmr.msra.gmra.mxu1 %v9022_v15  ;;  %v8062_v25 = vld [vmem:[#allocation3 + $0x174] sm:$0xf0]  ;;  %v6452_v27 = vld [vmem:[#allocation3 + $0x78] sm:$0xf0]  ;;  %v8060_v28 = vld [vmem:[#allocation3 + $0x16c] sm:$0xf]  ;;  %v6451_v30 = vor.u32 %v8030_v22, %v6450_v21 }
  0x3a   :  { %584 = vmatpush.bf16.msrb.mxu1 %v6643_v41  ;;  %550 = vmatmul.bf16.vlgmr.msra.gmra.mxu2 %v9013_v2  ;;  %v6580_v29 = vld [vmem:[#allocation3 + $0x178] sm:$0xf0]  ;;  %v6579_v31 = vor.u32 %v8062_v25, %v6578_v23  ;;  %v6455_v32 = vor.u32 %v8028_v26, %v6452_v27  ;;  %v6434_v33 = vld [vmem:[#allocation3 + $0x48] sm:$0xf]  ;;  %v8026_v34 = vld [vmem:[#allocation3 + $0x54] sm:$0xf0] }
  0x3b   :  { %598 = vmatpush.bf16.msrb.mxu2 %v6519_v42  ;;  %564 = vmatmul.bf16.vlgmr.msra.gmra.mxu3 %v9022_v15  ;;  %v6562_v35 = vld [vmem:[#allocation3 + $0x148] sm:$0xf]  ;;  %v6583_v36 = vor.u32 %v8060_v28, %v6580_v29  ;;  %v8058_v37 = vld [vmem:[#allocation3 + $0x154] sm:$0xf0]  ;;  %v8024_v38 = vld [vmem:[#allocation3 + $0x4c] sm:$0xf]  ;;  %v6435_v42 = vor.u32 %v8026_v34, %v6434_v33 }
  0x3c   :  { %612 = vmatpush.bf16.msrb.mxu3 %v6647_v46  ;;  %v6436_v39 = vld [vmem:[#allocation3 + $0x58] sm:$0xf0]  ;;  %v8056_v40 = vld [vmem:[#allocation3 + $0x14c] sm:$0xf]  ;;  %v6563_v43 = vor.u32 %v8058_v37, %v6562_v35  ;;  %v6418_v45 = vld [vmem:[#allocation3 + $0x28] sm:$0xf] }
  0x3d   :  { %571 = vmatpush.bf16.msrb.mxu0 %v6499_v52  ;;  %v6564_v41 = vld [vmem:[#allocation3 + $0x158] sm:$0xf0]  ;;  %v6439_v44 = vor.u32 %v8024_v38, %v6436_v39  ;;  %v8022_v46 = vld [vmem:[#allocation3 + $0x34] sm:$0xf0]  ;;  %v6546_v47 = vld [vmem:[#allocation3 + $0x128] sm:$0xf] }
  0x3e   :  { %585 = vmatpush.bf16.msrb.mxu1 %v6627_v55  ;;  %v6567_v48 = vor.u32 %v8056_v40, %v6564_v41  ;;  %v8054_v49 = vld [vmem:[#allocation3 + $0x134] sm:$0xf0]  ;;  %v8020_v50 = vld [vmem:[#allocation3 + $0x2c] sm:$0xf]  ;;  %v6420_v51 = vld [vmem:[#allocation3 + $0x38] sm:$0xf0]  ;;  %v6419_v54 = vor.u32 %v8022_v46, %v6418_v45 }
  0x3f   :  { %599 = vmatpush.bf16.msrb.mxu2 %v6503_v56  ;;  %v8052_v52 = vld [vmem:[#allocation3 + $0x12c] sm:$0xf]  ;;  %v6548_v53 = vld [vmem:[#allocation3 + $0x138] sm:$0xf0]  ;;  %v6402_v55 = vld [vmem:[#allocation3 + $0x8] sm:$0xf]  ;;  %v6547_v57 = vor.u32 %v8054_v49, %v6546_v47  ;;  %v6423_v58 = vor.u32 %v8020_v50, %v6420_v51 }
  0x40   :  { %613 = vmatpush.bf16.msrb.mxu3 %v6631_v60  ;;  %v8018_v56 = vld [vmem:[#allocation3 + $0x14] sm:$0xf0]  ;;  %v6530_v59 = vld [vmem:[#allocation3 + $0x108] sm:$0xf]  ;;  %v8016_v61 = vld [vmem:[#allocation3 + $0xc] sm:$0xf]  ;;  %v6551_v62 = vor.u32 %v8052_v52, %v6548_v53 }
  0x41   :  { %572 = vmatpush.bf16.msrb.mxu0 %v6483_v3  ;;  %v8050_v60 = vld [vmem:[#allocation3 + $0x114] sm:$0xf0]  ;;  %v6404_v63 = vld [vmem:[#allocation3 + $0x18] sm:$0xf0]  ;;  %v8048_v0 = vld [vmem:[#allocation3 + $0x10c] sm:$0xf] }
  0x42   :  { %586 = vmatpush.bf16.msrb.mxu1 %v6611_v6  ;;  %v6532_v1 = vld [vmem:[#allocation3 + $0x118] sm:$0xf0]  ;;  %v6763_v3 = vld [vmem:[#allocation3 + $0x2e0] sm:$0xf]  ;;  %v8109_v4 = vld [vmem:[#allocation3 + $0x2ec] sm:$0xf0]  ;;  %v6403_v6 = vor.u32 %v8018_v56, %v6402_v55  ;;  %v6531_v10 = vor.u32 %v8050_v60, %v6530_v59 }
  0x43   :  { %600 = vmatpush.bf16.msrb.mxu2 %v6487_v7  ;;  %v6891_v5 = vld [vmem:[#allocation3 + $0x3e0] sm:$0xf]  ;;  %v8141_v7 = vld [vmem:[#allocation3 + $0x3ec] sm:$0xf0]  ;;  %v8107_v8 = vld [vmem:[#allocation3 + $0x2e4] sm:$0xf]  ;;  %v6535_v14 = vor.u32 %v8048_v0, %v6532_v1  ;;  %v6764_v16 = vor.u32 %v8109_v4, %v6763_v3 }
  0x44   :  { %614 = vmatpush.bf16.msrb.mxu3 %v6615_v11  ;;  %v6765_v9 = vld [vmem:[#allocation3 + $0x2f0] sm:$0xf0]  ;;  %v6407_v11 = vor.u32 %v8016_v61, %v6404_v63  ;;  %v8139_v12 = vld [vmem:[#allocation3 + $0x3e4] sm:$0xf]  ;;  %v6892_v17 = vor.u32 %v8141_v7, %v6891_v5  ;;  %v6875_v21 = vld [vmem:[#allocation3 + $0x3c0] sm:$0xf] }
  0x45   :  { %573 = vmatpush.bf16.msrb.mxu0 %v6467_v18  ;;  %v6893_v13 = vld [vmem:[#allocation3 + $0x3f0] sm:$0xf0]  ;;  %v6768_v18 = vor.u32 %v8107_v8, %v6765_v9  ;;  %v8137_v23 = vld [vmem:[#allocation3 + $0x3cc] sm:$0xf0]  ;;  %v8135_v26 = vld [vmem:[#allocation3 + $0x3c4] sm:$0xf] }
  0x46   :  { %587 = vmatpush.bf16.msrb.mxu1 %v6595_v19  ;;  %v6747_v19 = vld [vmem:[#allocation3 + $0x2c0] sm:$0xf]  ;;  %v6896_v22 = vor.u32 %v8139_v12, %v6893_v13  ;;  %v6749_v25 = vld [vmem:[#allocation3 + $0x2d0] sm:$0xf0]  ;;  %v6876_v29 = vor.u32 %v8137_v23, %v6875_v21  ;;  %v8133_v35 = vld [vmem:[#allocation3 + $0x3ac] sm:$0xf0] }
  0x47   :  { %601 = vmatpush.bf16.msrb.mxu2 %v6471_v20  ;;  %v8105_v20 = vld [vmem:[#allocation3 + $0x2cc] sm:$0xf0]  ;;  %v6877_v27 = vld [vmem:[#allocation3 + $0x3d0] sm:$0xf0]  ;;  %v6859_v33 = vld [vmem:[#allocation3 + $0x3a0] sm:$0xf] }
  0x48   :  { %615 = vmatpush.bf16.msrb.mxu3 %v6599_v24  ;;  %v8103_v24 = vld [vmem:[#allocation3 + $0x2c4] sm:$0xf]  ;;  %v6748_v28 = vor.u32 %v8105_v20, %v6747_v19  ;;  %v6880_v34 = vor.u32 %v8135_v26, %v6877_v27  ;;  %v6733_v37 = vld [vmem:[#allocation3 + $0x2b0] sm:$0xf0]  ;;  %v6860_v41 = vor.u32 %v8133_v35, %v6859_v33  ;;  %v6843_v45 = vld [vmem:[#allocation3 + $0x380] sm:$0xf] }
  0x49   :  { %574 = vmatpush.bf16.msrb.mxu0 %v6451_v30  ;;  %v6752_v30 = vor.u32 %v8103_v24, %v6749_v25  ;;  %v8131_v38 = vld [vmem:[#allocation3 + $0x3a4] sm:$0xf]  ;;  %v6861_v39 = vld [vmem:[#allocation3 + $0x3b0] sm:$0xf0]  ;;  %v8129_v47 = vld [vmem:[#allocation3 + $0x38c] sm:$0xf0] }
  0x4a   :  { %588 = vmatpush.bf16.msrb.mxu1 %v6579_v31  ;;  %v6731_v31 = vld [vmem:[#allocation3 + $0x2a0] sm:$0xf]  ;;  %v6864_v46 = vor.u32 %v8131_v38, %v6861_v39  ;;  %v6717_v49 = vld [vmem:[#allocation3 + $0x290] sm:$0xf0]  ;;  %v8127_v50 = vld [vmem:[#allocation3 + $0x384] sm:$0xf]  ;;  %v6844_v53 = vor.u32 %v8129_v47, %v6843_v45 }
  0x4b   :  { %602 = vmatpush.bf16.msrb.mxu2 %v6455_v32  ;;  %v8101_v32 = vld [vmem:[#allocation3 + $0x2ac] sm:$0xf0]  ;;  %v6845_v51 = vld [vmem:[#allocation3 + $0x390] sm:$0xf0]  ;;  %v6699_v55 = vld [vmem:[#allocation3 + $0x260] sm:$0xf] }
  0x4c   :  { %616 = vmatpush.bf16.msrb.mxu3 %v6583_v36  ;;  %v8099_v36 = vld [vmem:[#allocation3 + $0x2a4] sm:$0xf]  ;;  %v6732_v40 = vor.u32 %v8101_v32, %v6731_v31  ;;  %v8093_v56 = vld [vmem:[#allocation3 + $0x26c] sm:$0xf0]  ;;  %v6701_v61 = vld [vmem:[#allocation3 + $0x270] sm:$0xf0] }
  0x4d   :  { %575 = vmatpush.bf16.msrb.mxu0 %v6435_v42  ;;  %v6736_v42 = vor.u32 %v8099_v36, %v6733_v37  ;;  %v8125_v59 = vld [vmem:[#allocation3 + $0x36c] sm:$0xf0]  ;;  %v8091_v60 = vld [vmem:[#allocation3 + $0x264] sm:$0xf]  ;;  %v6829_v63 = vld [vmem:[#allocation3 + $0x370] sm:$0xf0]  ;;  %v6700_v0 = vor.u32 %v8093_v56, %v6699_v55 }
  0x4e   :  { %589 = vmatpush.bf16.msrb.mxu1 %v6563_v43  ;;  %v6715_v43 = vld [vmem:[#allocation3 + $0x280] sm:$0xf]  ;;  %v6704_v3 = vor.u32 %v8091_v60, %v6701_v61  ;;  %v8089_v5 = vld [vmem:[#allocation3 + $0x24c] sm:$0xf0]  ;;  %v8087_v9 = vld [vmem:[#allocation3 + $0x244] sm:$0xf] }
  0x4f   :  { %603 = vmatpush.bf16.msrb.mxu2 %v6439_v44  ;;  %v8097_v44 = vld [vmem:[#allocation3 + $0x28c] sm:$0xf0]  ;;  %v6683_v4 = vld [vmem:[#allocation3 + $0x240] sm:$0xf]  ;;  %v6813_v12 = vld [vmem:[#allocation3 + $0x350] sm:$0xf0] }
  0x50   :  { %617 = vmatpush.bf16.msrb.mxu3 %v6567_v48  ;;  %v8095_v48 = vld [vmem:[#allocation3 + $0x284] sm:$0xf]  ;;  %v6716_v52 = vor.u32 %v8097_v44, %v6715_v43  ;;  %v8121_v8 = vld [vmem:[#allocation3 + $0x34c] sm:$0xf0]  ;;  %v6684_v13 = vor.u32 %v8089_v5, %v6683_v4  ;;  %v6795_v19 = vld [vmem:[#allocation3 + $0x320] sm:$0xf] }
  0x51   :  { %576 = vmatpush.bf16.msrb.mxu0 %v6419_v54  ;;  %v6720_v54 = vor.u32 %v8095_v48, %v6717_v49  ;;  %v8117_v21 = vld [vmem:[#allocation3 + $0x32c] sm:$0xf0]  ;;  %v6669_v23 = vld [vmem:[#allocation3 + $0x230] sm:$0xf0]  ;;  %v8115_v24 = vld [vmem:[#allocation3 + $0x324] sm:$0xf] }
  0x52   :  { %590 = vmatpush.bf16.msrb.mxu1 %v6547_v57  ;;  %v6827_v57 = vld [vmem:[#allocation3 + $0x360] sm:$0xf]  ;;  %v6797_v25 = vld [vmem:[#allocation3 + $0x330] sm:$0xf0]  ;;  %v8113_v32 = vld [vmem:[#allocation3 + $0x30c] sm:$0xf0] }
  0x53   :  { %604 = vmatpush.bf16.msrb.mxu2 %v6423_v58  ;;  %v6848_v58 = vor.u32 %v8127_v50, %v6845_v51  ;;  %v6828_v1 = vor.u32 %v8125_v59, %v6827_v57  ;;  %v6651_v27 = vld [vmem:[#allocation3 + $0x200] sm:$0xf]  ;;  %v8079_v33 = vld [vmem:[#allocation3 + $0x204] sm:$0xf]  ;;  %v6653_v35 = vld [vmem:[#allocation3 + $0x210] sm:$0xf0] }
  0x54   :  { %618 = vmatpush.bf16.msrb.mxu3 %v6551_v62  ;;  %v8123_v62 = vld [vmem:[#allocation3 + $0x364] sm:$0xf]  ;;  %v6779_v31 = vld [vmem:[#allocation3 + $0x300] sm:$0xf]  ;;  %v6781_v37 = vld [vmem:[#allocation3 + $0x310] sm:$0xf0] }
  0x55   :  { %577 = vmatpush.bf16.msrb.mxu0 %v6403_v6  ;;  %v6811_v6 = vld [vmem:[#allocation3 + $0x340] sm:$0xf]  ;;  %v6832_v7 = vor.u32 %v8123_v62, %v6829_v63  ;;  %v8111_v36 = vld [vmem:[#allocation3 + $0x304] sm:$0xf]  ;;  %v6771_v38 = vld [vmem:[#allocation3 + $0x2e8] sm:$0xf]  ;;  %v6780_v45 = vor.u32 %v8113_v32, %v6779_v31 }
  0x56   :  { %591 = vmatpush.bf16.msrb.mxu1 %v6531_v10  ;;  %v6685_v10 = vld [vmem:[#allocation3 + $0x250] sm:$0xf0]  ;;  %v8110_v39 = vld [vmem:[#allocation3 + $0x2f4] sm:$0xf0]  ;;  %v8108_v43 = vld [vmem:[#allocation3 + $0x2ec] sm:$0xf]  ;;  %v6784_v49 = vor.u32 %v8111_v36, %v6781_v37 }
  0x57   :  { %605 = vmatpush.bf16.msrb.mxu2 %v6407_v11  ;;  %v8119_v11 = vld [vmem:[#allocation3 + $0x344] sm:$0xf]  ;;  %v6773_v44 = vld [vmem:[#allocation3 + $0x2f8] sm:$0xf0]  ;;  %v8140_v47 = vld [vmem:[#allocation3 + $0x3ec] sm:$0xf]  ;;  %v6772_v50 = vor.u32 %v8110_v39, %v6771_v38 }
  0x58   :  { %619 = vmatpush.bf16.msrb.mxu3 %v6535_v14  ;;  %578 = vmatmul.bf16.vlgmr.msrb.gmra.mxu0 %v9013_v2  ;;  %v6812_v14 = vor.u32 %v8121_v8, %v6811_v6  ;;  %v6816_v20 = vor.u32 %v8119_v11, %v6813_v12  ;;  %v6901_v48 = vld [vmem:[#allocation3 + $0x3f8] sm:$0xf0]  ;;  %v6883_v55 = vld [vmem:[#allocation3 + $0x3c8] sm:$0xf]  ;;  %v8138_v57 = vld [vmem:[#allocation3 + $0x3d4] sm:$0xf0] }
  0x59   :  { %1022 = vmatpush.bf16.msra.mxu0 %v6764_v16  ;;  %592 = vmatmul.bf16.vlgmr.msrb.gmra.mxu1 %v9022_v15  ;;  %v6688_v16 = vor.u32 %v8087_v9, %v6685_v10  ;;  %v6904_v56 = vor.u32 %v8140_v47, %v6901_v48  ;;  %v6757_v59 = vld [vmem:[#allocation3 + $0x2d8] sm:$0xf0]  ;;  %v8136_v60 = vld [vmem:[#allocation3 + $0x3cc] sm:$0xf]  ;;  %v6884_v63 = vor.u32 %v8138_v57, %v6883_v55  ;;  %v6867_v4 = vld [vmem:[#allocation3 + $0x3a8] sm:$0xf] }
  0x5a   :  { %1036 = vmatpush.bf16.msra.mxu1 %v6892_v17  ;;  %606 = vmatmul.bf16.vlgmr.msrb.gmra.mxu2 %v9013_v2  ;;  %v6667_v17 = vld [vmem:[#allocation3 + $0x220] sm:$0xf]  ;;  %v6885_v61 = vld [vmem:[#allocation3 + $0x3d8] sm:$0xf0]  ;;  %v8134_v6 = vld [vmem:[#allocation3 + $0x3b4] sm:$0xf0] }
  0x5b   :  { %1050 = vmatpush.bf16.msra.mxu2 %v6768_v18  ;;  %620 = vmatmul.bf16.vlgmr.msrb.gmra.mxu3 %v9022_v15  ;;  %v8085_v18 = vld [vmem:[#allocation3 + $0x22c] sm:$0xf0]  ;;  %v6888_v5 = vor.u32 %v8136_v60, %v6885_v61  ;;  %v6741_v8 = vld [vmem:[#allocation3 + $0x2b8] sm:$0xf0]  ;;  %v8132_v9 = vld [vmem:[#allocation3 + $0x3ac] sm:$0xf]  ;;  %v6868_v12 = vor.u32 %v8134_v6, %v6867_v4 }
  0x5c   :  { %1064 = vmatpush.bf16.msra.mxu3 %v6896_v22  ;;  %v8083_v22 = vld [vmem:[#allocation3 + $0x224] sm:$0xf]  ;;  %v6668_v26 = vor.u32 %v8085_v18, %v6667_v17  ;;  %v6869_v10 = vld [vmem:[#allocation3 + $0x3b8] sm:$0xf0]  ;;  %v6851_v17 = vld [vmem:[#allocation3 + $0x388] sm:$0xf] }
  0x5d   :  { %1023 = vmatpush.bf16.msra.mxu0 %v6748_v28  ;;  %v8081_v28 = vld [vmem:[#allocation3 + $0x20c] sm:$0xf0]  ;;  %v6872_v18 = vor.u32 %v8132_v9, %v6869_v10  ;;  %v8126_v31 = vld [vmem:[#allocation3 + $0x374] sm:$0xf0]  ;;  %v8092_v32 = vld [vmem:[#allocation3 + $0x26c] sm:$0xf] }
  0x5e   :  { %1037 = vmatpush.bf16.msra.mxu1 %v6876_v29  ;;  %v6796_v29 = vor.u32 %v8117_v21, %v6795_v19  ;;  %v8130_v19 = vld [vmem:[#allocation3 + $0x394] sm:$0xf0]  ;;  %v6725_v21 = vld [vmem:[#allocation3 + $0x298] sm:$0xf0]  ;;  %v6691_v39 = vld [vmem:[#allocation3 + $0x248] sm:$0xf] }
  0x5f   :  { %1051 = vmatpush.bf16.msra.mxu2 %v6752_v30  ;;  %v6672_v30 = vor.u32 %v8083_v22, %v6669_v23  ;;  %v8128_v22 = vld [vmem:[#allocation3 + $0x38c] sm:$0xf]  ;;  %v6853_v23 = vld [vmem:[#allocation3 + $0x398] sm:$0xf0]  ;;  %v8118_v55 = vld [vmem:[#allocation3 + $0x334] sm:$0xf0] }
  0x60   :  { %1065 = vmatpush.bf16.msra.mxu3 %v6880_v34  ;;  %v6800_v34 = vor.u32 %v8115_v24, %v6797_v25  ;;  %v6852_v25 = vor.u32 %v8130_v19, %v6851_v17  ;;  %v6821_v47 = vld [vmem:[#allocation3 + $0x358] sm:$0xf0]  ;;  %v6659_v61 = vld [vmem:[#allocation3 + $0x208] sm:$0xf]  ;;  %v8080_v4 = vld [vmem:[#allocation3 + $0x20c] sm:$0xf] }
  0x61   :  { %1024 = vmatpush.bf16.msra.mxu0 %v6732_v40  ;;  %v6899_v40 = vld [vmem:[#allocation3 + $0x3e8] sm:$0xf]  ;;  %v6677_v57 = vld [vmem:[#allocation3 + $0x238] sm:$0xf0]  ;;  %v7019_v9 = vld [vmem:[#allocation5 + $0xe0] sm:$0xf] }
  0x62   :  { %1038 = vmatpush.bf16.msra.mxu1 %v6860_v41  ;;  %v6652_v41 = vor.u32 %v8081_v28, %v6651_v27  ;;  %v6707_v27 = vld [vmem:[#allocation3 + $0x268] sm:$0xf]  ;;  %v8094_v28 = vld [vmem:[#allocation3 + $0x274] sm:$0xf0]  ;;  %v6661_v6 = vld [vmem:[#allocation3 + $0x218] sm:$0xf0] }
  0x63   :  { %1052 = vmatpush.bf16.msra.mxu2 %v6736_v42  ;;  %v8142_v42 = vld [vmem:[#allocation3 + $0x3f4] sm:$0xf0]  ;;  %v6708_v36 = vor.u32 %v8094_v28, %v6707_v27  ;;  %v8173_v10 = vld [vmem:[#allocation5 + $0xec] sm:$0xf0]  ;;  %v8172_v19 = vld [vmem:[#allocation5 + $0xec] sm:$0xf] }
  0x64   :  { %1066 = vmatpush.bf16.msra.mxu3 %v6864_v46  ;;  %v6656_v46 = vor.u32 %v8079_v33, %v6653_v35  ;;  %v6900_v51 = vor.u32 %v8142_v42, %v6899_v40  ;;  %v6709_v33 = vld [vmem:[#allocation3 + $0x278] sm:$0xf0]  ;;  %v8090_v40 = vld [vmem:[#allocation3 + $0x254] sm:$0xf0]  ;;  %v8167_v27 = vld [vmem:[#allocation5 + $0xc4] sm:$0xf] }
  0x65   :  { %1025 = vmatpush.bf16.msra.mxu0 %v6716_v52  ;;  %v6776_v52 = vor.u32 %v8108_v43, %v6773_v44  ;;  %v6837_v35 = vld [vmem:[#allocation3 + $0x378] sm:$0xf0]  ;;  %v6712_v38 = vor.u32 %v8092_v32, %v6709_v33  ;;  %v8122_v43 = vld [vmem:[#allocation3 + $0x354] sm:$0xf0]  ;;  %v8088_v44 = vld [vmem:[#allocation3 + $0x24c] sm:$0xf]  ;;  %v6692_v48 = vor.u32 %v8090_v40, %v6691_v39 }
  0x66   :  { %1039 = vmatpush.bf16.msra.mxu1 %v6844_v53  ;;  %v6755_v53 = vld [vmem:[#allocation3 + $0x2c8] sm:$0xf]  ;;  %v8168_v32 = vld [vmem:[#allocation5 + $0xcc] sm:$0xf]  ;;  %v7013_v33 = vld [vmem:[#allocation5 + $0xd8] sm:$0xf0] }
  0x67   :  { %1053 = vmatpush.bf16.msra.mxu2 %v6720_v54  ;;  %v8106_v54 = vld [vmem:[#allocation3 + $0x2d4] sm:$0xf0]  ;;  %v8163_v39 = vld [vmem:[#allocation5 + $0xa4] sm:$0xf]  ;;  %v9053_v40 = vor.u32 %v8168_v32, %v7013_v33  ;;  %v8148_v32 = vld [vmem:[#allocation5 + $0x2c] sm:$0xf] }
  0x68   :  { %1067 = vmatpush.bf16.msra.mxu3 %v6848_v58  ;;  %v8104_v58 = vld [vmem:[#allocation3 + $0x2cc] sm:$0xf]  ;;  %v6756_v62 = vor.u32 %v8106_v54, %v6755_v53  ;;  %v6803_v53 = vld [vmem:[#allocation3 + $0x328] sm:$0xf]  ;;  %v6933_v33 = vld [vmem:[#allocation5 + $0x38] sm:$0xf0] }
  0x69   :  { %1026 = vmatpush.bf16.msra.mxu0 %v6700_v0  ;;  %v6760_v0 = vor.u32 %v8104_v58, %v6757_v59  ;;  %v8116_v58 = vld [vmem:[#allocation3 + $0x32c] sm:$0xf]  ;;  %v6805_v59 = vld [vmem:[#allocation3 + $0x338] sm:$0xf0] }
  0x6a   :  { %1040 = vmatpush.bf16.msra.mxu1 %v6828_v1  ;;  %v6739_v1 = vld [vmem:[#allocation3 + $0x2a8] sm:$0xf] }
  0x6b   :  { %1054 = vmatpush.bf16.msra.mxu2 %v6704_v3  ;;  %v8102_v3 = vld [vmem:[#allocation3 + $0x2b4] sm:$0xf0] }
  0x6c   :  { %1068 = vmatpush.bf16.msra.mxu3 %v6832_v7  ;;  %v8100_v7 = vld [vmem:[#allocation3 + $0x2ac] sm:$0xf]  ;;  %v6740_v11 = vor.u32 %v8102_v3, %v6739_v1  ;;  %v6787_v1 = vld [vmem:[#allocation3 + $0x308] sm:$0xf]  ;;  %v8114_v3 = vld [vmem:[#allocation3 + $0x314] sm:$0xf0] }
  0x6d   :  { %1027 = vmatpush.bf16.msra.mxu0 %v6684_v13  ;;  %v6744_v13 = vor.u32 %v8100_v7, %v6741_v8  ;;  %v8112_v7 = vld [vmem:[#allocation3 + $0x30c] sm:$0xf]  ;;  %v6789_v8 = vld [vmem:[#allocation3 + $0x318] sm:$0xf0]  ;;  %v6788_v17 = vor.u32 %v8114_v3, %v6787_v1  ;;  %v8158_v1 = vld [vmem:[#allocation5 + $0x74] sm:$0xf0] }
  0x6e   :  { %1041 = vmatpush.bf16.msra.mxu1 %v6812_v14  ;;  %v6723_v14 = vld [vmem:[#allocation3 + $0x288] sm:$0xf]  ;;  %v8156_v3 = vld [vmem:[#allocation5 + $0x6c] sm:$0xf] }
  0x6f   :  { %1055 = vmatpush.bf16.msra.mxu2 %v6688_v16  ;;  %v8098_v16 = vld [vmem:[#allocation3 + $0x294] sm:$0xf0] }
  0x70   :  { %1069 = vmatpush.bf16.msra.mxu3 %v6816_v20  ;;  %v8096_v20 = vld [vmem:[#allocation3 + $0x28c] sm:$0xf]  ;;  %v6724_v24 = vor.u32 %v8098_v16, %v6723_v14  ;;  %v7027_v14 = vld [vmem:[#allocation5 + $0xe8] sm:$0xf]  ;;  %v8174_v16 = vld [vmem:[#allocation5 + $0xf4] sm:$0xf0] }
  0x71   :  { %1028 = vmatpush.bf16.msra.mxu0 %v6668_v26  ;;  %v6728_v26 = vor.u32 %v8096_v20, %v6725_v21  ;;  %v7029_v20 = vld [vmem:[#allocation5 + $0xf8] sm:$0xf0]  ;;  %v6792_v21 = vor.u32 %v8112_v7, %v6789_v8  ;;  %v6939_v8 = vld [vmem:[#allocation5 + $0x40] sm:$0xf] }
  0x72   :  { %1042 = vmatpush.bf16.msra.mxu1 %v6796_v29  ;;  %v6835_v29 = vld [vmem:[#allocation3 + $0x368] sm:$0xf]  ;;  %v9041_v28 = vor.u32 %v8172_v19, %v7029_v20 }
  0x73   :  { %1056 = vmatpush.bf16.msra.mxu2 %v6672_v30  ;;  %v6856_v30 = vor.u32 %v8128_v22, %v6853_v23  ;;  %v6836_v37 = vor.u32 %v8126_v31, %v6835_v29  ;;  %v9035_v22 = vor.u32 %v8173_v10, %v7019_v9  ;;  %v7005_v29 = vld [vmem:[#allocation5 + $0xd0] sm:$0xf0]  ;;  %v8170_v31 = vld [vmem:[#allocation5 + $0xd4] sm:$0xf0]  ;;  %v8153_v9 = vld [vmem:[#allocation5 + $0x4c] sm:$0xf0] }
  0x74   :  { %1070 = vmatpush.bf16.msra.mxu3 %v6800_v34  ;;  %v8124_v34 = vld [vmem:[#allocation3 + $0x36c] sm:$0xf]  ;;  %v8151_v10 = vld [vmem:[#allocation5 + $0x44] sm:$0xf] }
  0x75   :  { %1029 = vmatpush.bf16.msra.mxu0 %v6652_v41  ;;  %v6819_v41 = vld [vmem:[#allocation3 + $0x348] sm:$0xf]  ;;  %v6840_v42 = vor.u32 %v8124_v34, %v6837_v35  ;;  %v9048_v35 = vor.u32 %v8167_v27, %v7005_v29  ;;  %v6925_v29 = vld [vmem:[#allocation5 + $0x30] sm:$0xf0] }
  0x76   :  { %1043 = vmatpush.bf16.msra.mxu1 %v6780_v45  ;;  %v6693_v45 = vld [vmem:[#allocation3 + $0x258] sm:$0xf0] }
  0x77   :  { %1057 = vmatpush.bf16.msra.mxu2 %v6656_v46  ;;  %v8120_v46 = vld [vmem:[#allocation3 + $0x34c] sm:$0xf] }
  0x78   :  { %1071 = vmatpush.bf16.msra.mxu3 %v6784_v49  ;;  %1030 = vmatmul.bf16.vlgmr.msra.gmra.mxu0 %v9013_v2  ;;  %v6820_v49 = vor.u32 %v8122_v43, %v6819_v41  ;;  %v6824_v54 = vor.u32 %v8120_v46, %v6821_v47  ;;  %v6989_v41 = vld [vmem:[#allocation5 + $0xb0] sm:$0xf0]  ;;  %v8166_v43 = vld [vmem:[#allocation5 + $0xb4] sm:$0xf0] }
  0x79   :  { %1078 = vmatpush.bf16.msrb.mxu0 %v6772_v50  ;;  %1044 = vmatmul.bf16.vlgmr.msra.gmra.mxu1 %v9022_v15  ;;  %v6696_v50 = vor.u32 %v8088_v44, %v6693_v45  ;;  %v8164_v44 = vld [vmem:[#allocation5 + $0xac] sm:$0xf]  ;;  %v6997_v45 = vld [vmem:[#allocation5 + $0xb8] sm:$0xf0]  ;;  %v9064_v47 = vor.u32 %v8163_v39, %v6989_v41  ;;  %v8145_v39 = vld [vmem:[#allocation5 + $0xc] sm:$0xf0] }
  0x7a   :  { %1092 = vmatpush.bf16.msrb.mxu1 %v6900_v51  ;;  %1058 = vmatmul.bf16.vlgmr.msra.gmra.mxu2 %v9013_v2  ;;  %v6675_v51 = vld [vmem:[#allocation3 + $0x228] sm:$0xf] }
  0x7b   :  { %1106 = vmatpush.bf16.msrb.mxu2 %v6776_v52  ;;  %1072 = vmatmul.bf16.vlgmr.msra.gmra.mxu3 %v9022_v15  ;;  %v8086_v52 = vld [vmem:[#allocation3 + $0x234] sm:$0xf0] }
  0x7c   :  { %1120 = vmatpush.bf16.msrb.mxu3 %v6904_v56  ;;  %v8084_v56 = vld [vmem:[#allocation3 + $0x22c] sm:$0xf]  ;;  %v6676_v60 = vor.u32 %v8086_v52, %v6675_v51  ;;  %v8159_v51 = vld [vmem:[#allocation5 + $0x84] sm:$0xf]  ;;  %v6973_v52 = vld [vmem:[#allocation5 + $0x90] sm:$0xf0] }
  0x7d   :  { %1079 = vmatpush.bf16.msrb.mxu0 %v6756_v62  ;;  %v8082_v62 = vld [vmem:[#allocation3 + $0x214] sm:$0xf0] }
  0x7e   :  { %1093 = vmatpush.bf16.msrb.mxu1 %v6884_v63  ;;  %v6804_v63 = vor.u32 %v8118_v55, %v6803_v53  ;;  %v6979_v53 = vld [vmem:[#allocation5 + $0x88] sm:$0xf]  ;;  %v8160_v55 = vld [vmem:[#allocation5 + $0x8c] sm:$0xf] }
  0x7f   :  { %1107 = vmatpush.bf16.msrb.mxu2 %v6760_v0  ;;  %v6680_v0 = vor.u32 %v8084_v56, %v6677_v57  ;;  %v9076_v57 = vor.u32 %v8159_v51, %v6973_v52  ;;  %v8144_v51 = vld [vmem:[#allocation5 + $0xc] sm:$0xf]  ;;  %v6917_v52 = vld [vmem:[#allocation5 + $0x18] sm:$0xf0] }
  0x80   :  { %1121 = vmatpush.bf16.msrb.mxu3 %v6888_v5  ;;  %v6808_v5 = vor.u32 %v8116_v58, %v6805_v59  ;;  %v6955_v59 = vld [vmem:[#allocation5 + $0x60] sm:$0xf] }
  0x81   :  { %1080 = vmatpush.bf16.msrb.mxu0 %v6740_v11  ;;  %v8171_v11 = vld [vmem:[#allocation5 + $0xe4] sm:$0xf] }
  0x82   :  { %1094 = vmatpush.bf16.msrb.mxu1 %v6868_v12  ;;  %v6660_v12 = vor.u32 %v8082_v62, %v6659_v61  ;;  %v8155_v61 = vld [vmem:[#allocation5 + $0x64] sm:$0xf] }
  0x83   :  { %1108 = vmatpush.bf16.msrb.mxu2 %v6744_v13  ;;  %v7021_v13 = vld [vmem:[#allocation5 + $0xf0] sm:$0xf0] }
  0x84   :  { %1122 = vmatpush.bf16.msrb.mxu3 %v6872_v18  ;;  %v6664_v18 = vor.u32 %v8080_v4, %v6661_v6  ;;  %v9037_v23 = vor.u32 %v8171_v11, %v7021_v13  ;;  %v6965_v4 = vld [vmem:[#allocation5 + $0x78] sm:$0xf0]  ;;  %v6947_v13 = vld [vmem:[#allocation5 + $0x48] sm:$0xf] }
  0x85   :  { %1081 = vmatpush.bf16.msrb.mxu0 %v6724_v24  ;;  %v9039_v24 = vor.u32 %v8174_v16, %v7027_v14  ;;  %v9093_v11 = vor.u32 %v8156_v3, %v6965_v4  ;;  %v8154_v14 = vld [vmem:[#allocation5 + $0x54] sm:$0xf0]  ;;  %v8152_v16 = vld [vmem:[#allocation5 + $0x4c] sm:$0xf]  ;;  %v7160_v3 = vld [vmem:[#allocation5 + $0x1f8] sm:$0xf0]  ;;  %v9129_v4 = vor.u32 %v8144_v51, %v6917_v52 }
  0x86   :  { %1095 = vmatpush.bf16.msrb.mxu1 %v6852_v25  ;;  %v7003_v25 = vld [vmem:[#allocation5 + $0xc0] sm:$0xf]  ;;  %v9102_v20 = vor.u32 %v8154_v14, %v6947_v13  ;;  %v8201_v13 = vld [vmem:[#allocation5 + $0x1cc] sm:$0xf0]  ;;  %v8199_v14 = vld [vmem:[#allocation5 + $0x1c4] sm:$0xf] }
  0x87   :  { %1109 = vmatpush.bf16.msrb.mxu2 %v6728_v26  ;;  %v8169_v26 = vld [vmem:[#allocation5 + $0xcc] sm:$0xf0]  ;;  %10802 = vst [vmem:[#allocation15_spill] sm:$0xff] %v9129_v4  ;;  %v8198_v51 = vld [vmem:[#allocation5 + $0x1b4] sm:$0xf0] }
  0x88   :  { %1123 = vmatpush.bf16.msrb.mxu3 %v6856_v30  ;;  %v7011_v30 = vld [vmem:[#allocation5 + $0xc8] sm:$0xf]  ;;  %v9044_v34 = vor.u32 %v8169_v26, %v7003_v25  ;;  %v8149_v25 = vld [vmem:[#allocation5 + $0x2c] sm:$0xf0]  ;;  %v8147_v26 = vld [vmem:[#allocation5 + $0x24] sm:$0xf] }
  0x89   :  { %1082 = vmatpush.bf16.msrb.mxu0 %v6708_v36  ;;  %v9050_v36 = vor.u32 %v8170_v31, %v7011_v30  ;;  %v6931_v30 = vld [vmem:[#allocation5 + $0x28] sm:$0xf]  ;;  %v8150_v31 = vld [vmem:[#allocation5 + $0x34] sm:$0xf0]  ;;  %v9112_v41 = vor.u32 %v8147_v26, %v6925_v29  ;;  %v8200_v26 = vld [vmem:[#allocation5 + $0x1cc] sm:$0xf] }
  0x8a   :  { %1096 = vmatpush.bf16.msrb.mxu1 %v6836_v37  ;;  %v6987_v37 = vld [vmem:[#allocation5 + $0xa0] sm:$0xf]  ;;  %v7144_v29 = vld [vmem:[#allocation5 + $0x1d8] sm:$0xf0]  ;;  %v8196_v52 = vld [vmem:[#allocation5 + $0x1ac] sm:$0xf] }
  0x8b   :  { %1110 = vmatpush.bf16.msrb.mxu2 %v6712_v38  ;;  %v8165_v38 = vld [vmem:[#allocation5 + $0xac] sm:$0xf0] }
  0x8c   :  { %1124 = vmatpush.bf16.msrb.mxu3 %v6840_v42  ;;  %v6995_v42 = vld [vmem:[#allocation5 + $0xa8] sm:$0xf]  ;;  %v9059_v46 = vor.u32 %v8165_v38, %v6987_v37  ;;  %v6907_v38 = vld [vmem:[#allocation5] sm:$0xf] }
  0x8d   :  { %1083 = vmatpush.bf16.msrb.mxu0 %v6692_v48  ;;  %v9066_v48 = vor.u32 %v8166_v43, %v6995_v42  ;;  %v9114_v42 = vor.u32 %v8150_v31, %v6931_v30  ;;  %v8143_v43 = vld [vmem:[#allocation5 + $0x4] sm:$0xf] }
  0x8e   :  { %1097 = vmatpush.bf16.msrb.mxu1 %v6820_v49  ;;  %v6971_v49 = vld [vmem:[#allocation5 + $0x80] sm:$0xf] }
  0x8f   :  { %1111 = vmatpush.bf16.msrb.mxu2 %v6696_v50  ;;  %v8161_v50 = vld [vmem:[#allocation5 + $0x8c] sm:$0xf0] }
  0x90   :  { %1125 = vmatpush.bf16.msrb.mxu3 %v6824_v54  ;;  %v8162_v54 = vld [vmem:[#allocation5 + $0x94] sm:$0xf0]  ;;  %v9072_v56 = vor.u32 %v8161_v50, %v6971_v49  ;;  %v9117_v49 = vor.u32 %v8148_v32, %v6933_v33  ;;  %v7118_v33 = vld [vmem:[#allocation5 + $0x1a0] sm:$0xf] }
  0x91   :  { %1084 = vmatpush.bf16.msrb.mxu0 %v6676_v60  ;;  %v9078_v58 = vor.u32 %v8162_v54, %v6979_v53  ;;  %v8157_v60 = vld [vmem:[#allocation5 + $0x6c] sm:$0xf0]  ;;  %v8146_v50 = vld [vmem:[#allocation5 + $0x14] sm:$0xf0]  ;;  %v7150_v53 = vld [vmem:[#allocation5 + $0x1e0] sm:$0xf] }
  0x92   :  { %1098 = vmatpush.bf16.msrb.mxu1 %v6804_v63  ;;  %v6957_v63 = vld [vmem:[#allocation5 + $0x70] sm:$0xf0]  ;;  %v8205_v54 = vld [vmem:[#allocation5 + $0x1ec] sm:$0xf0] }
  0x93   :  { %1112 = vmatpush.bf16.msrb.mxu2 %v6680_v0  ;;  %v6963_v0 = vld [vmem:[#allocation5 + $0x68] sm:$0xf]  ;;  %v9088_v6 = vor.u32 %v8155_v61, %v6957_v63  ;;  %v8206_v61 = vld [vmem:[#allocation5 + $0x1f4] sm:$0xf0] }
  0x94   :  { %1126 = vmatpush.bf16.msrb.mxu3 %v6808_v5  ;;  %v9084_v5 = vor.u32 %v8157_v60, %v6955_v59  ;;  %v9090_v7 = vor.u32 %v8158_v1, %v6963_v0  ;;  %v7152_v59 = vld [vmem:[#allocation5 + $0x1f0] sm:$0xf0]  ;;  %v7158_v60 = vld [vmem:[#allocation5 + $0x1e8] sm:$0xf]  ;;  %v8204_v1 = vld [vmem:[#allocation5 + $0x1ec] sm:$0xf] }
  0x95   :  { %1085 = vmatpush.bf16.msrb.mxu0 %v6660_v12  ;;  %v6941_v12 = vld [vmem:[#allocation5 + $0x50] sm:$0xf0] }
  0x96   :  { %1099 = vmatpush.bf16.msrb.mxu1 %v6788_v17  ;;  %v6949_v17 = vld [vmem:[#allocation5 + $0x58] sm:$0xf0]  ;;  %v9100_v19 = vor.u32 %v8151_v10, %v6941_v12  ;;  %v9135_v10 = vor.u32 %v8206_v61, %v7158_v60  ;;  %v7134_v12 = vld [vmem:[#allocation5 + $0x1c0] sm:$0xf]  ;;  %v8193_v61 = vld [vmem:[#allocation5 + $0x18c] sm:$0xf0] }
  0x97   :  { %1113 = vmatpush.bf16.msrb.mxu2 %v6664_v18  ;;  %v9096_v18 = vor.u32 %v8153_v9, %v6939_v8  ;;  %v9105_v27 = vor.u32 %v8152_v16, %v6949_v17  ;;  %v9131_v8 = vor.u32 %v8205_v54, %v7150_v53  ;;  %v9138_v16 = vor.u32 %v8204_v1, %v7160_v3  ;;  %v7136_v17 = vld [vmem:[#allocation5 + $0x1d0] sm:$0xf0]  ;;  %v7128_v53 = vld [vmem:[#allocation5 + $0x1b8] sm:$0xf0]  ;;  %v7102_v60 = vld [vmem:[#allocation5 + $0x180] sm:$0xf] }
  0x98   :  { %1127 = vmatpush.bf16.msrb.mxu3 %v6792_v21  ;;  %1086 = vmatmul.bf16.vlgmr.msrb.gmra.mxu0 %v9013_v2  ;;  %v6923_v21 = vld [vmem:[#allocation5 + $0x20] sm:$0xf]  ;;  %10805 = vst [vmem:[#allocation18_spill] sm:$0xff] %v9135_v10  ;;  %v9144_v30 = vor.u32 %v8201_v13, %v7134_v12  ;;  %v9148_v31 = vor.u32 %v8199_v14, %v7136_v17  ;;  %v8191_v1 = vld [vmem:[#allocation5 + $0x184] sm:$0xf] }
  0x99   :  { %1359 = vmatpush.bf16.msra.mxu0 %v9035_v22  ;;  %1100 = vmatmul.bf16.vlgmr.msrb.gmra.mxu1 %v9022_v15  ;;  %v9108_v37 = vor.u32 %v8149_v25, %v6923_v21  ;;  %10803 = vst [vmem:[#allocation16_spill] sm:$0xff] %v9131_v8  ;;  %v7142_v21 = vld [vmem:[#allocation5 + $0x1c8] sm:$0xf]  ;;  %v8202_v25 = vld [vmem:[#allocation5 + $0x1d4] sm:$0xf0]  ;;  %v9169_v3 = vor.u32 %v8196_v52, %v7128_v53 }
  0x9a   :  { %1372 = vmatpush.bf16.msra.mxu1 %v9037_v23  ;;  %1114 = vmatmul.bf16.vlgmr.msrb.gmra.mxu2 %v9013_v2  ;;  %v9069_v2 = vor.u32 %v8164_v44, %v6997_v45  ;;  %v6909_v44 = vld [vmem:[#allocation5 + $0x10] sm:$0xf0]  ;;  %v6915_v45 = vld [vmem:[#allocation5 + $0x8] sm:$0xf]  ;;  %10806 = vst [vmem:[#allocation19_spill] sm:$0xff] %v9138_v16  ;;  %v9150_v32 = vor.u32 %v8202_v25, %v7142_v21 }
  0x9b   :  { %1385 = vmatpush.bf16.msra.mxu2 %v9039_v24  ;;  %1128 = vmatmul.bf16.vlgmr.msrb.gmra.mxu3 %v9022_v15  ;;  %v6981_v15 = vld [vmem:[#allocation5 + $0x98] sm:$0xf0]  ;;  %v9124_v63 = vor.u32 %v8143_v43, %v6909_v44  ;;  %v9126_v0 = vor.u32 %v8146_v50, %v6915_v45  ;;  %10807 = vst [vmem:[#allocation20_spill] sm:$0xff] %v9144_v30  ;;  %v10686_v43 = vmov 0   ;;  %v7120_v45 = vld [vmem:[#allocation5 + $0x1b0] sm:$0xf0] }
  0x9c   :  { %1398 = vmatpush.bf16.msra.mxu3 %v9041_v28  ;;  %v9081_v62 = vor.u32 %v8160_v55, %v6981_v15  ;;  %v8203_v55 = vld [vmem:[#allocation5 + $0x1e4] sm:$0xf]  ;;  %v9120_v15 = vor.u32 %v8145_v39, %v6907_v38  ;;  %10808 = vst [vmem:[#allocation21_spill] sm:$0xff] %v9148_v31  ;;  %v8197_v38 = vld [vmem:[#allocation5 + $0x1ac] sm:$0xf0]  ;;  %v9154_v44 = vor.u32 %v8200_v26, %v7144_v29 }
  0x9d   :  { %1360 = vmatpush.bf16.msra.mxu0 %v9044_v34  ;;  %10801 = vst [vmem:[#allocation14_spill] sm:$0xff] %v9126_v0  ;;  %v9133_v9 = vor.u32 %v8203_v55, %v7152_v59  ;;  %v8195_v39 = vld [vmem:[#allocation5 + $0x1a4] sm:$0xf]  ;;  %v7126_v50 = vld [vmem:[#allocation5 + $0x1a8] sm:$0xf]  ;;  %v9160_v54 = vor.u32 %v8197_v38, %v7118_v33  ;;  %v9172_v25 = vor.u32 %v8193_v61, %v7102_v60 }
  0x9e   :  { %1373 = vmatpush.bf16.msra.mxu1 %v9048_v35  ;;  %10809 = vst [vmem:[#allocation22_spill] sm:$0xff] %v9150_v32  ;;  %v9164_v55 = vor.u32 %v8195_v39, %v7120_v45  ;;  %v9166_v59 = vor.u32 %v8198_v51, %v7126_v50  ;;  %v7104_v12 = vld [vmem:[#allocation5 + $0x190] sm:$0xf0]  ;;  %v7110_v13 = vld [vmem:[#allocation5 + $0x188] sm:$0xf] }
  0x9f   :  { %1386 = vmatpush.bf16.msra.mxu2 %v9050_v36  ;;  %10804 = vst [vmem:[#allocation17_spill] sm:$0xff] %v9133_v9  ;;  %v8194_v14 = vld [vmem:[#allocation5 + $0x194] sm:$0xf0]  ;;  %v8192_v17 = vld [vmem:[#allocation5 + $0x18c] sm:$0xf]  ;;  %v9176_v26 = vor.u32 %v8191_v1, %v7104_v12 }
  0xa0   :  { %1399 = vmatpush.bf16.msra.mxu3 %v9053_v40  ;;  %10810 = vst [vmem:[#allocation23_spill] sm:$0xff] %v9154_v44  ;;  %v7112_v21 = vld [vmem:[#allocation5 + $0x198] sm:$0xf0]  ;;  %v9178_v29 = vor.u32 %v8194_v14, %v7110_v13  ;;  %v7086_v33 = vld [vmem:[#allocation5 + $0x160] sm:$0xf] }
  0xa1   :  { %1361 = vmatpush.bf16.msra.mxu0 %v9059_v46  ;;  %10811 = vst [vmem:[#allocation24_spill] sm:$0xff] %v9160_v54  ;;  %v8189_v38 = vld [vmem:[#allocation5 + $0x16c] sm:$0xf0]  ;;  %v8187_v39 = vld [vmem:[#allocation5 + $0x164] sm:$0xf]  ;;  %v9181_v45 = vor.u32 %v8192_v17, %v7112_v21 }
  0xa2   :  { %1374 = vmatpush.bf16.msra.mxu1 %v9064_v47  ;;  %10812 = vst [vmem:[#allocation25_spill] sm:$0xff] %v9164_v55  ;;  %v7088_v50 = vld [vmem:[#allocation5 + $0x170] sm:$0xf0]  ;;  %v7094_v51 = vld [vmem:[#allocation5 + $0x168] sm:$0xf]  ;;  %v9184_v61 = vor.u32 %v8189_v38, %v7086_v33 }
  0xa3   :  { %1387 = vmatpush.bf16.msra.mxu2 %v9066_v48  ;;  %10813 = vst [vmem:[#allocation26_spill] sm:$0xff] %v9166_v59  ;;  %v8190_v52 = vld [vmem:[#allocation5 + $0x174] sm:$0xf0]  ;;  %v8188_v53 = vld [vmem:[#allocation5 + $0x16c] sm:$0xf]  ;;  %v9188_v1 = vor.u32 %v8187_v39, %v7088_v50 }
  0xa4   :  { %1400 = vmatpush.bf16.msra.mxu3 %v9069_v2  ;;  %10814 = vst [vmem:[#allocation27_spill] sm:$0xff] %v9169_v3  ;;  %v7096_v60 = vld [vmem:[#allocation5 + $0x178] sm:$0xf0]  ;;  %v9190_v12 = vor.u32 %v8190_v52, %v7094_v51  ;;  %v7070_v13 = vld [vmem:[#allocation5 + $0x140] sm:$0xf] }
  0xa5   :  { %1362 = vmatpush.bf16.msra.mxu0 %v9072_v56  ;;  %10815 = vst [vmem:[#allocation28_spill] sm:$0xff] %v9172_v25  ;;  %v8185_v14 = vld [vmem:[#allocation5 + $0x14c] sm:$0xf0]  ;;  %v8183_v17 = vld [vmem:[#allocation5 + $0x144] sm:$0xf]  ;;  %v9193_v21 = vor.u32 %v8188_v53, %v7096_v60 }
  0xa6   :  { %1375 = vmatpush.bf16.msra.mxu1 %v9076_v57  ;;  %10816 = vst [vmem:[#allocation29_spill] sm:$0xff] %v9176_v26  ;;  %v8184_v33 = vld [vmem:[#allocation5 + $0x14c] sm:$0xf]  ;;  %v7080_v38 = vld [vmem:[#allocation5 + $0x158] sm:$0xf0] }
  0xa7   :  { %1388 = vmatpush.bf16.msra.mxu2 %v9078_v58  ;;  %10817 = vst [vmem:[#allocation30_spill] sm:$0xff] %v9178_v29  ;;  %v7054_v51 = vld [vmem:[#allocation5 + $0x120] sm:$0xf]  ;;  %v8181_v52 = vld [vmem:[#allocation5 + $0x12c] sm:$0xf0]  ;;  %v9205_v60 = vor.u32 %v8184_v33, %v7080_v38 }
  0xa8   :  { %1401 = vmatpush.bf16.msra.mxu3 %v9081_v62  ;;  %10818 = vst [vmem:[#allocation31_spill] sm:$0xff] %v9181_v45  ;;  %v8179_v53 = vld [vmem:[#allocation5 + $0x124] sm:$0xf] }
  0xa9   :  { %1363 = vmatpush.bf16.msra.mxu0 %v9084_v5  ;;  %10819 = vst [vmem:[#allocation32_spill] sm:$0xff] %v9184_v61  ;;  %v8175_v33 = vld [vmem:[#allocation5 + $0x104] sm:$0xf] }
  0xaa   :  { %1376 = vmatpush.bf16.msra.mxu1 %v9088_v6  ;;  %10820 = vst [vmem:[#allocation33_spill] sm:$0xff] %v9188_v1 }
  0xab   :  { %1389 = vmatpush.bf16.msra.mxu2 %v9090_v7  ;;  %10821 = vst [vmem:[#allocation34_spill] sm:$0xff] %v9190_v12 }
  0xac   :  { %1402 = vmatpush.bf16.msra.mxu3 %v9093_v11  ;;  %10822 = vst [vmem:[#allocation35_spill] sm:$0xff] %v9193_v21 }
  0xad   :  { %1364 = vmatpush.bf16.msra.mxu0 %v9096_v18  ;;  %10826 = vst [vmem:[#allocation39_spill] sm:$0xff] %v9205_v60 }
  0xae   :  { %1377 = vmatpush.bf16.msra.mxu1 %v9100_v19 }
  0xaf   :  { %1390 = vmatpush.bf16.msra.mxu2 %v9102_v20 }
  0xb0   :  { %1403 = vmatpush.bf16.msra.mxu3 %v9105_v27 }
  0xb1   :  { %1365 = vmatpush.bf16.msra.mxu0 %v9108_v37 }
  0xb2   :  { %1378 = vmatpush.bf16.msra.mxu1 %v9112_v41 }
  0xb3   :  { %1391 = vmatpush.bf16.msra.mxu2 %v9114_v42 }
  0xb4   :  { %1404 = vmatpush.bf16.msra.mxu3 %v9117_v49 }
  0xb5   :  { %1366 = vmatpush.bf16.msra.mxu0 %v9120_v15 }
  0xb6   :  { %1379 = vmatpush.bf16.msra.mxu1 %v9124_v63 }
  0xb7   :  { %1392 = vmatpush.bf16.msra.mxu2 %v9126_v0 }
  0xb8   :  { %1405 = vmatpush.bf16.msra.mxu3 %v9129_v4  ;;  %1367 = vmatmul.bf16.vlgmr.msra.gmra.mxu0 %v10686_v43 }
  0xb9   :  { %1638 = vmatpush.bf16.msrb.mxu0 %v9131_v8  ;;  %1380 = vmatmul.bf16.vlgmr.msra.gmra.mxu1 %v10686_v43 }
  0xba   :  { %1651 = vmatpush.bf16.msrb.mxu1 %v9133_v9  ;;  %1393 = vmatmul.bf16.vlgmr.msra.gmra.mxu2 %v10686_v43 }
  0xbb   :  { %1664 = vmatpush.bf16.msrb.mxu2 %v9135_v10  ;;  %1406 = vmatmul.bf16.vlgmr.msra.gmra.mxu3 %v10686_v43  ;;  %v7072_v43 = vld [vmem:[#allocation5 + $0x150] sm:$0xf0] }
  0xbc   :  { %1677 = vmatpush.bf16.msrb.mxu3 %v9138_v16  ;;  %v9200_v39 = vor.u32 %v8183_v17, %v7072_v43  ;;  %v8177_v17 = vld [vmem:[#allocation5 + $0x10c] sm:$0xf0] }
  0xbd   :  { %1639 = vmatpush.bf16.msrb.mxu0 %v9144_v30 }
  0xbe   :  { %1652 = vmatpush.bf16.msrb.mxu1 %v9148_v31  ;;  %10824 = vst [vmem:[#allocation37_spill] sm:$0xff] %v9200_v39 }
  0xbf   :  { %1665 = vmatpush.bf16.msrb.mxu2 %v9150_v32 }
  0xc0   :  { %1678 = vmatpush.bf16.msrb.mxu3 %v9154_v44 }
  0xc1   :  { %1640 = vmatpush.bf16.msrb.mxu0 %v9160_v54 }
  0xc2   :  { %1653 = vmatpush.bf16.msrb.mxu1 %v9164_v55 }
  0xc3   :  { %1666 = vmatpush.bf16.msrb.mxu2 %v9166_v59 }
  0xc4   :  { %1679 = vmatpush.bf16.msrb.mxu3 %v9169_v3  ;;  %v7078_v3 = vld [vmem:[#allocation5 + $0x148] sm:$0xf] }
  0xc5   :  { %1641 = vmatpush.bf16.msrb.mxu0 %v9172_v25  ;;  %v8186_v25 = vld [vmem:[#allocation5 + $0x154] sm:$0xf0] }
  0xc6   :  { %1654 = vmatpush.bf16.msrb.mxu1 %v9176_v26  ;;  %v9196_v26 = vor.u32 %v8185_v14, %v7070_v13  ;;  %v9202_v50 = vor.u32 %v8186_v25, %v7078_v3  ;;  %v8180_v13 = vld [vmem:[#allocation5 + $0x12c] sm:$0xf]  ;;  %v7064_v14 = vld [vmem:[#allocation5 + $0x138] sm:$0xf0]  ;;  %v7038_v25 = vld [vmem:[#allocation5 + $0x100] sm:$0xf] }
  0xc7   :  { %1667 = vmatpush.bf16.msrb.mxu2 %v9178_v29  ;;  %v7062_v29 = vld [vmem:[#allocation5 + $0x128] sm:$0xf]  ;;  %v9217_v38 = vor.u32 %v8180_v13, %v7064_v14  ;;  %v9255_v13 = vpop.f32.mrf.mxu3 }
  0xc8   :  { %1680 = vmatpush.bf16.msrb.mxu3 %v9181_v45  ;;  %10823 = vst [vmem:[#allocation36_spill] sm:$0xff] %v9196_v26  ;;  %v7056_v45 = vld [vmem:[#allocation5 + $0x130] sm:$0xf0] }
  0xc9   :  { %1642 = vmatpush.bf16.msrb.mxu0 %v9184_v61  ;;  %10825 = vst [vmem:[#allocation38_spill] sm:$0xff] %v9202_v50  ;;  %v8182_v61 = vld [vmem:[#allocation5 + $0x134] sm:$0xf0]  ;;  %v9212_v43 = vor.u32 %v8179_v53, %v7056_v45  ;;  %v9236_v53 = vpop.f32.mrf.mxu0 }
  0xca   :  { %1655 = vmatpush.bf16.msrb.mxu1 %v9188_v1  ;;  %v9208_v1 = vor.u32 %v8181_v52, %v7054_v51  ;;  %v9214_v3 = vor.u32 %v8182_v61, %v7062_v29  ;;  %10830 = vst [vmem:[#allocation43_spill] sm:$0xff] %v9217_v38  ;;  %v8176_v51 = vld [vmem:[#allocation5 + $0x10c] sm:$0xf]  ;;  %v7048_v52 = vld [vmem:[#allocation5 + $0x118] sm:$0xf0] }
  0xcb   :  { %1668 = vmatpush.bf16.msrb.mxu2 %v9190_v12  ;;  %10828 = vst [vmem:[#allocation41_spill] sm:$0xff] %v9212_v43  ;;  %v7046_v12 = vld [vmem:[#allocation5 + $0x108] sm:$0xf]  ;;  %v9229_v61 = vor.u32 %v8176_v51, %v7048_v52 }
  0xcc   :  { %1681 = vmatpush.bf16.msrb.mxu3 %v9193_v21  ;;  %10827 = vst [vmem:[#allocation40_spill] sm:$0xff] %v9208_v1  ;;  %v7040_v21 = vld [vmem:[#allocation5 + $0x110] sm:$0xf0] }
  0xcd   :  { %1643 = vmatpush.bf16.msrb.mxu0 %v9196_v26  ;;  %10829 = vst [vmem:[#allocation42_spill] sm:$0xff] %v9214_v3  ;;  %v8178_v26 = vld [vmem:[#allocation5 + $0x114] sm:$0xf0]  ;;  %v9224_v29 = vor.u32 %v8175_v33, %v7040_v21  ;;  %v10835_v21 = vmov 0  }
  0xce   :  { %1656 = vmatpush.bf16.msrb.mxu1 %v9200_v39  ;;  %v9220_v39 = vor.u32 %v8177_v17, %v7038_v25  ;;  %v9226_v45 = vor.u32 %v8178_v26, %v7046_v12  ;;  %10834 = vst [vmem:[#allocation47_spill] sm:$0xff] %v9229_v61  ;;  %v9242_v26 = vpop.f32.mrf.mxu1  ;;  %v9250_v12 = vpop.f32.mrf.mxu2 }
  0xcf   :  { %1669 = vmatpush.bf16.msrb.mxu2 %v9202_v50  ;;  %10832 = vst [vmem:[#allocation45_spill] sm:$0xff] %v9224_v29  ;;  %v9274_v51 = vpop.f32.mrf.mxu3 }
  0xd0   :  { %1682 = vmatpush.bf16.msrb.mxu3 %v9205_v60  ;;  %10831 = vst [vmem:[#allocation44_spill] sm:$0xff] %v9220_v39 }
  0xd1   :  { %1644 = vmatpush.bf16.msrb.mxu0 %v9208_v1  ;;  %10833 = vst [vmem:[#allocation46_spill] sm:$0xff] %v9226_v45  ;;  %v9257_v14 = vpop.f32.mrf.mxu0 }
  0xd2   :  { %1657 = vmatpush.bf16.msrb.mxu1 %v9212_v43  ;;  %10836 = vst [vmem:[#allocation48_spill] sm:$0xff] %v9257_v14  ;;  %v9302_v14 = vld [vmem:[%s10680_s3 + $0x4] sm:$0xf] }
  0xd3   :  { %1670 = vmatpush.bf16.msrb.mxu2 %v9214_v3  ;;  %10839 = vst [vmem:[#allocation51_spill] sm:$0xff] %v9274_v51 }
  0xd4   :  { %1683 = vmatpush.bf16.msrb.mxu3 %v9217_v38 }
  0xd5   :  { %1645 = vmatpush.bf16.msrb.mxu0 %v9220_v39 }
  0xd6   :  { %1658 = vmatpush.bf16.msrb.mxu1 %v9224_v29  ;;  %v9262_v25 = vpop.f32.mrf.mxu1  ;;  %v9269_v17 = vpop.f32.mrf.mxu2 }
  0xd7   :  { %1671 = vmatpush.bf16.msrb.mxu2 %v9226_v45  ;;  %10837 = vst [vmem:[#allocation49_spill] sm:$0xff] %v9262_v25 }
  0xd8   :  { %1684 = vmatpush.bf16.msrb.mxu3 %v9229_v61  ;;  %1646 = vmatmul.bf16.vlgmr.msrb.gmra.mxu0 %v10835_v21  ;;  %10838 = vst [vmem:[#allocation50_spill] sm:$0xff] %v9269_v17 }
  0xd9   :  { %1773 = vmatpush.bf16.msra.mxu0 %v9035_v22  ;;  %1659 = vmatmul.bf16.vlgmr.msrb.gmra.mxu1 %v10835_v21  ;;  %v9271_v33 = vpop.f32.mrf.mxu0 }
  0xda   :  { %1786 = vmatpush.bf16.msra.mxu1 %v9037_v23  ;;  %1672 = vmatmul.bf16.vlgmr.msrb.gmra.mxu2 %v10835_v21 }
  0xdb   :  { %1685 = vmatmul.bf16.vlgmr.msrb.gmra.mxu3 %v10835_v21  ;;  %1799 = vmatpush.bf16.msra.mxu2 %v9039_v24 }
  0xdc   :  { %1812 = vmatpush.bf16.msra.mxu3 %v9041_v28 }
  0xdd   :  { %1774 = vmatpush.bf16.msra.mxu0 %v9044_v34 }
  0xde   :  { %1787 = vmatpush.bf16.msra.mxu1 %v9048_v35  ;;  %v9278_v52 = vpop.f32.mrf.mxu1  ;;  %v9285_v21 = vpop.f32.mrf.mxu2 }
  0xdf   :  { %1800 = vmatpush.bf16.msra.mxu2 %v9050_v36  ;;  %v9288_v51 = vpop.f32.mrf.mxu3 }
  0xe0   :  { %1813 = vmatpush.bf16.msra.mxu3 %v9053_v40 }
  0xe1   :  { %1775 = vmatpush.bf16.msra.mxu0 %v9059_v46  ;;  %v9292_v25 = vpop.f32.mrf.mxu0 }
  0xe2   :  { %1788 = vmatpush.bf16.msra.mxu1 %v9064_v47  ;;  %10840 = vst [vmem:[#allocation52_spill] sm:$0xff] %v9292_v25  ;;  %v10729_v25 = vperm.slane %v9302_v14, 0 }
  0xe3   :  { %1801 = vmatpush.bf16.msra.mxu2 %v9066_v48 }
  0xe4   :  { %1814 = vmatpush.bf16.msra.mxu3 %v9069_v2 }
  0xe5   :  { %1776 = vmatpush.bf16.msra.mxu0 %v9072_v56 }
  0xe6   :  { %1789 = vmatpush.bf16.msra.mxu1 %v9076_v57  ;;  %v9297_v17 = vpop.f32.mrf.mxu1 }
  0xe7   :  { %1802 = vmatpush.bf16.msra.mxu2 %v9078_v58  ;;  %10841 = vst [vmem:[#allocation53_spill] sm:$0xff] %v9297_v17  ;;  %v9311_v17 = vpop.f32.mrf.mxu2 }
  0xe8   :  { %1815 = vmatpush.bf16.msra.mxu3 %v9081_v62  ;;  %10842 = vst [vmem:[#allocation54_spill] sm:$0xff] %v9311_v17  ;;  %v10735_v17 = vperm.slane %v9302_v14, 1 }
  0xe9   :  { %1777 = vmatpush.bf16.msra.mxu0 %v9084_v5 }
  0xea   :  { %1790 = vmatpush.bf16.msra.mxu1 %v9088_v6 }
  0xeb   :  { %1803 = vmatpush.bf16.msra.mxu2 %v9090_v7 }
  0xec   :  { %1816 = vmatpush.bf16.msra.mxu3 %v9093_v11 }
  0xed   :  { %1778 = vmatpush.bf16.msra.mxu0 %v9096_v18 }
  0xee   :  { %1791 = vmatpush.bf16.msra.mxu1 %v9100_v19 }
  0xef   :  { %1804 = vmatpush.bf16.msra.mxu2 %v9102_v20 }
  0xf0   :  { %1817 = vmatpush.bf16.msra.mxu3 %v9105_v27 }
  0xf1   :  { %1779 = vmatpush.bf16.msra.mxu0 %v9108_v37 }
  0xf2   :  { %1792 = vmatpush.bf16.msra.mxu1 %v9112_v41 }
  0xf3   :  { %1805 = vmatpush.bf16.msra.mxu2 %v9114_v42 }
  0xf4   :  { %1818 = vmatpush.bf16.msra.mxu3 %v9117_v49 }
  0xf5   :  { %1780 = vmatpush.bf16.msra.mxu0 %v9120_v15 }
  0xf6   :  { %1793 = vmatpush.bf16.msra.mxu1 %v9124_v63 }
  0xf7   :  { %1806 = vmatpush.bf16.msra.mxu2 %v9126_v0 }
  0xf8   :  { %1819 = vmatpush.bf16.msra.mxu3 %v9129_v4 }
  0xf9   :  { %1912 = vmatpush.bf16.msrb.mxu0 %v9131_v8  ;;  %v9316_v8 = vpop.f32.mrf.mxu3 }
  0xfa   :  { %1925 = vmatpush.bf16.msrb.mxu1 %v9133_v9  ;;  %v1031_v9 = vpop.f32.mrf.mxu0  ;;  %10843 = vst [vmem:[#allocation55_spill] sm:$0xff] %v9316_v8  ;;  %v10848_v8 = vld [vmem:[#allocation30_spill] sm:$0xff] }
  0xfb   :  { %1938 = vmatpush.bf16.msrb.mxu2 %v9135_v10 }
  0xfc   :  { %1951 = vmatpush.bf16.msrb.mxu3 %v9138_v16  ;;  %v1032_v16 = vadd.f32 %v1031_v9, %v10729_v25  ;;  %v10849_v25 = vld [vmem:[#allocation31_spill] sm:$0xff] }
  0xfd   :  { %1913 = vmatpush.bf16.msrb.mxu0 %v9144_v30  ;;  %v1045_v30 = vpop.f32.mrf.mxu1 }
  0xfe   :  { %1926 = vmatpush.bf16.msrb.mxu1 %v9148_v31  ;;  %v9321_v10 = vadd.f32 %v1045_v30, %v1032_v16  ;;  %v10846_v31 = vld [vmem:[#allocation28_spill] sm:$0xff] }
  0xff   :  { %1939 = vmatpush.bf16.msrb.mxu2 %v9150_v32  ;;  %v10845_v32 = vld [vmem:[#allocation27_spill] sm:$0xff]  ;;  %v10850_v16 = vld [vmem:[#allocation32_spill] sm:$0xff] }
 0x100   :  { %1952 = vmatpush.bf16.msrb.mxu3 %v9154_v44  ;;  %10844 = vst [vmem:[#allocation56_spill] sm:$0xff] %v9321_v10  ;;  %v10847_v44 = vld [vmem:[#allocation29_spill] sm:$0xff] }
 0x101   :  { %1914 = vmatpush.bf16.msrb.mxu0 %v9160_v54  ;;  %v1059_v54 = vpop.f32.mrf.mxu2  ;;  %v1073_v30 = vpop.f32.mrf.mxu3  ;;  %v10851_v10 = vld [vmem:[#allocation33_spill] sm:$0xff] }
 0x102   :  { %1927 = vmatpush.bf16.msrb.mxu1 %v9164_v55  ;;  %v1060_v9 = vadd.f32 %v1059_v54, %v10735_v17  ;;  %v10856_v55 = vld [vmem:[#allocation37_spill] sm:$0xff]  ;;  %v9348_v54 = vpop.f32.mrf.mxu0 }
 0x103   :  { %1940 = vmatpush.bf16.msrb.mxu2 %v9166_v59 }
 0x104   :  { %1953 = vmatpush.bf16.msrb.mxu3 %v10845_v32  ;;  %v9334_v59 = vadd.f32 %v1073_v30, %v1060_v9  ;;  %v10853_v32 = vld [vmem:[#allocation34_spill] sm:$0xff]  ;;  %v10758_v30 = vperm.slane %v9302_v14, 2 }
 0x105   :  { %1915 = vmatpush.bf16.msrb.mxu0 %v10846_v31  ;;  %v10854_v31 = vld [vmem:[#allocation35_spill] sm:$0xff]  ;;  %v9351_v9 = vpop.f32.mrf.mxu1 }
 0x106   :  { %1928 = vmatpush.bf16.msrb.mxu1 %v10847_v44  ;;  %10852 = vst [vmem:[#allocation57_spill] sm:$0xff] %v9334_v59  ;;  %v10855_v44 = vld [vmem:[#allocation36_spill] sm:$0xff] }
 0x107   :  { %1941 = vmatpush.bf16.msrb.mxu2 %v10848_v8 }
 0x108   :  { %1954 = vmatpush.bf16.msrb.mxu3 %v10849_v25 }
 0x109   :  { %1916 = vmatpush.bf16.msrb.mxu0 %v10850_v16  ;;  %v9355_v17 = vpop.f32.mrf.mxu2  ;;  %v9357_v59 = vpop.f32.mrf.mxu3 }
 0x10a   :  { %1929 = vmatpush.bf16.msrb.mxu1 %v10851_v10 }
 0x10b   :  { %1942 = vmatpush.bf16.msrb.mxu2 %v10853_v32 }
 0x10c   :  { %1955 = vmatpush.bf16.msrb.mxu3 %v10854_v31 }
 0x10d   :  { %1917 = vmatpush.bf16.msrb.mxu0 %v10855_v44 }
 0x10e   :  { %1930 = vmatpush.bf16.msrb.mxu1 %v10856_v55 }
 0x10f   :  { %1943 = vmatpush.bf16.msrb.mxu2 %v9202_v50  ;;  %v9371_v50 = vld [vmem:[%s10680_s3] sm:$0xf] }
 0x110   :  { %1956 = vmatpush.bf16.msrb.mxu3 %v9205_v60  ;;  %10859 = vst [vmem:[#allocation60_spill] sm:$0xff] %v9371_v50 }
 0x111   :  { %1918 = vmatpush.bf16.msrb.mxu0 %v9208_v1 }
 0x112   :  { %1931 = vmatpush.bf16.msrb.mxu1 %v9212_v43  ;;  %v10757_v43 = vperm.slane %v9302_v14, 3 }
 0x113   :  { %1944 = vmatpush.bf16.msrb.mxu2 %v9214_v3 }
 0x114   :  { %1957 = vmatpush.bf16.msrb.mxu3 %v9217_v38 }
 0x115   :  { %1919 = vmatpush.bf16.msrb.mxu0 %v9220_v39  ;;  %v1087_v3 = vpop.f32.mrf.mxu0 }
 0x116   :  { %1932 = vmatpush.bf16.msrb.mxu1 %v9224_v29  ;;  %v1088_v39 = vadd.f32 %v1087_v3, %v10758_v30  ;;  %v1101_v38 = vpop.f32.mrf.mxu1  ;;  %v10762_v3 = vperm.slane %v9371_v50, 0 }
 0x117   :  { %1945 = vmatpush.bf16.msrb.mxu2 %v9226_v45 }
 0x118   :  { %1958 = vmatpush.bf16.msrb.mxu3 %v9229_v61  ;;  %v9361_v29 = vadd.f32 %v1101_v38, %v1088_v39  ;;  %v10761_v38 = vperm.slane %v9371_v50, 1 }
 0x11a   :  { %10857 = vst [vmem:[#allocation58_spill] sm:$0xff] %v9361_v29 }
 0x11d   :  { %v1115_v45 = vpop.f32.mrf.mxu2  ;;  %v9373_v55 = vpop.f32.mrf.mxu0 }
 0x11e   :  { %v1116_v1 = vadd.f32 %v1115_v45, %v10757_v43  ;;  %v1129_v61 = vpop.f32.mrf.mxu3  ;;  %v9376_v39 = vpop.f32.mrf.mxu1  ;;  %v524_v45 = vadd.f32 %v9236_v53, %v10762_v3  ;;  %v10765_v43 = vperm.slane %v9371_v50, 2 }
 0x120   :  { %v9366_v60 = vadd.f32 %v1129_v61, %v1116_v1  ;;  %v552_v1 = vadd.f32 %v9250_v12, %v10761_v38  ;;  %v580_v12 = vadd.f32 %v9271_v33, %v10765_v43 }
 0x122   :  { %10858 = vst [vmem:[#allocation59_spill] sm:$0xff] %v9366_v60  ;;  %v9391_v60 = vadd.f32 %v9242_v26, %v524_v45  ;;  %v9394_v29 = vadd.f32 %v9255_v13, %v552_v1  ;;  %v9402_v10 = vadd.f32 %v9278_v52, %v580_v12 }
 0x124   :  { %10860 = vst [vmem:[#allocation61_spill] sm:$0xff] %v9391_v60 }
 0x125   :  { %v9385_v61 = vpop.f32.mrf.mxu2  ;;  %10861 = vst [vmem:[#allocation62_spill] sm:$0xff] %v9394_v29 }
 0x126   :  { %v9388_v30 = vpop.f32.mrf.mxu3  ;;  %10862 = vst [vmem:[#allocation63_spill] sm:$0xff] %v9402_v10 }
 0x135   :  { %v1368_v44 = vpop.f32.mrf.mxu0 }
 0x136   :  { %v1411_v31 = vadd.f32 %v1368_v44, %v9391_v60  ;;  %v1381_v53 = vpop.f32.mrf.mxu1  ;;  %v10766_v60 = vperm.slane %v9371_v50, 3 }
 0x137   :  { %v1412_v38 = vadd.f32 %v1381_v53, %v9394_v29 }
 0x138   :  { %v7033_v3 = vmul.f32 -1.442695, %v1411_v31  ;;  %v608_v52 = vadd.f32 %v9285_v21, %v10766_v60  ;;  %v10864_v21 = vperm.slane %v9302_v14, 0 }
 0x139   :  { %v7034_v32 = vmul.f32 -1.442695, %v1412_v38 }
 0x13a   :  { %8411 = vpow2.f32 %v7033_v3  ;;  %v9410_v53 = vadd.f32 %v9288_v51, %v608_v52 }
 0x13b   :  { %8413 = vpow2.f32 %v7034_v32 }
 0x13c   :  { %10863 = vst [vmem:[#allocation64_spill] sm:$0xff] %v9410_v53 }
 0x13d   :  { %v1394_v26 = vpop.f32.mrf.mxu2  ;;  %v1370_v1 = vpop.f32.mrf.mxu0 }
 0x13e   :  { %v1413_v13 = vadd.f32 %v1394_v26, %v9402_v10  ;;  %v1407_v45 = vpop.f32.mrf.mxu3  ;;  %v1383_v44 = vpop.f32.mrf.mxu1  ;;  %v10865_v10 = vperm.slane %v9302_v14, 1 }
 0x13f   :  { %v1034_v44 = vadd.f32 %v9348_v54, %v10864_v21 }
 0x140   :  { %v7035_v16 = vmul.f32 -1.442695, %v1413_v13  ;;  %v8412_v25 = vpop.eup %8411  ;;  %v1414_v13 = vadd.f32 %v1407_v45, %v9410_v53  ;;  %v1062_v29 = vadd.f32 %v9355_v17, %v10865_v10 }
 0x141   :  { %v8414_v33 = vpop.eup %8413  ;;  %v1424_v43 = vadd.f32 1.0, %v8412_v25  ;;  %v9420_v53 = vadd.f32 %v9351_v9, %v1034_v44 }
 0x142   :  { %8415 = vpow2.f32 %v7035_v16  ;;  %v1425_v31 = vadd.f32 1.0, %v8414_v33 }
 0x143   :  { %8417 = vrcp.f32 %v1424_v43  ;;  %v1438_v60 = vand.u32 2147483648, %v1424_v43  ;;  %vm1432_vm2 = vweird.f32 %v1424_v43 }
 0x144   :  { %8419 = vrcp.f32 %v1425_v31  ;;  %v1453_v51 = vand.u32 2147483648, %v1425_v31  ;;  %vm1447_vm3 = vweird.f32 %v1425_v31 }
 0x145   :  { %v1396_v32 = vpop.f32.mrf.mxu2 }
 0x146   :  { %v1409_v3 = vpop.f32.mrf.mxu3  ;;  %v1454_v21 = vor.u32 1.1754944e-38, %v1453_v51 }
 0x147   :  { %v1436_v3 = vand.u32 2147483647, %v1424_v43 }
 0x148   :  { %v8416_v38 = vpop.eup %8415 }
 0x149   :  { %v9412_v12 = vadd.f32 1.0, %v8416_v38  ;;  %v8418_v26 = vpop.eup %8417  ;;  %v1451_v38 = vand.u32 2147483647, %v1425_v31  ;;  %vm1437_vm5 = vcmp.eq.f32.partialorder %v1436_v3, 8.507059e+37 }
 0x14a   :  { %v8420_v25 = vpop.eup %8419  ;;  %v1428_v16 = vmul.f32 %v8418_v26, %v1424_v43  ;;  %vm1433_vm0 = vweird.f32 %v8418_v26  ;;  %v9427_v43 = vadd.f32 %v9357_v59, %v1062_v29 }
 0x14b   :  { %8421 = vrcp.f32 %v9412_v12  ;;  %v1443_v1 = vmul.f32 %v8420_v25, %v1425_v31  ;;  %vm1448_vm1 = vweird.f32 %v8420_v25  ;;  %vm1434_vm4 = vmor %vm1432_vm2, %vm1433_vm0  ;;  %vm1452_vm7 = vcmp.eq.f32.partialorder %v1451_v38, 8.507059e+37 }
 0x14c   :  { %v1429_v33 = vsub.f32 1.0, %v1428_v16  ;;  %8423 = vtanh.f32 %v1414_v13  ;;  %v1439_v13 = vor.u32 1.1754944e-38, %v1438_v60  ;;  %vm1449_vm6 = vmor %vm1447_vm3, %vm1448_vm1  ;;  %vm1462_vm9 = vweird.f32 %v9412_v12 }
 0x14d   :  { %v1444_v32 = vsub.f32 1.0, %v1443_v1 }
 0x14e   :  { %v1430_v52 = vmul.f32 %v8418_v26, %v1429_v33 }
 0x14f   :  { %v1445_v50 = vmul.f32 %v8420_v25, %v1444_v32 }
 0x150   :  { %v1431_v54 = vadd.f32 %v8418_v26, %v1430_v52 }
 0x151   :  { %v8422_v45 = vpop.eup %8421  ;;  %v1446_v1 = vadd.f32 %v8420_v25, %v1445_v50  ;;  %v10866_v50 = vperm.slane %v9302_v14, 2 }
 0x152   :  { %v1458_v16 = vmul.f32 %v8422_v45, %v9412_v12  ;;  %v1435_v33 = vsel %vm1434_vm4, %v8418_v26, %v1431_v54  ;;  %v8424_v9 = vpop.eup %8423  ;;  %vm1463_vm8 = vweird.f32 %v8422_v45 }
 0x153   :  { %v1440_v8 = vsel %vm1437_vm5, %v1439_v13, %v1435_v33  ;;  %v1450_v4 = vsel %vm1449_vm6, %v8420_v25, %v1446_v1  ;;  %v1090_v60 = vadd.f32 %v9373_v55, %v10866_v50  ;;  %vm1464_vm10 = vmor %vm1462_vm9, %vm1463_vm8 }
 0x154   :  { %v1459_v44 = vsub.f32 1.0, %v1458_v16  ;;  %v1455_v17 = vsel %vm1452_vm7, %v1454_v21, %v1450_v4  ;;  %v1474_v31 = vmul.f32 %v8424_v9, %v1440_v8  ;;  %v1468_v8 = vand.u32 2147483648, %v9412_v12 }
 0x155   :  { %v1647_v32 = vpop.f32.mrf.mxu0  ;;  %v1473_v3 = vmul.f32 0.0, %v1455_v17  ;;  %v9437_v4 = vadd.f32 %v9376_v39, %v1090_v60 }
 0x156   :  { %v1694_v0 = vrot.slane %v1647_v32, 2  ;;  %v1660_v10 = vpop.f32.mrf.mxu1  ;;  %v1460_v26 = vmul.f32 %v8422_v45, %v1459_v44  ;;  %v1469_v32 = vor.u32 1.1754944e-38, %v1468_v8 }
 0x157   :  { %v1695_v52 = vrot.slane %v1660_v10, 2  ;;  %v9434_v54 = vadd.f32 %v1474_v31, %v1473_v3 }
 0x158   :  { %v1702_v51 = vadd.f32 %v1694_v0, %v9420_v53  ;;  %v1461_v59 = vadd.f32 %v8422_v45, %v1460_v26  ;;  %v1466_v0 = vand.u32 2147483647, %v9412_v12 }
 0x159   :  { %v1703_v38 = vadd.f32 %v1695_v52, %v9427_v43  ;;  %8425 = vtanh.f32 %v9434_v54 }
 0x15a   :  { %v7164_v25 = vmul.f32 -1.442695, %v1702_v51  ;;  %v1465_v39 = vsel %vm1464_vm10, %v8422_v45, %v1461_v59  ;;  %vm1467_vm11 = vcmp.eq.f32.partialorder %v1466_v0, 8.507059e+37  ;;  %v10867_v51 = vperm.slane %v9302_v14, 3 }
 0x15b   :  { %v7165_v16 = vmul.f32 -1.442695, %v1703_v38  ;;  %v1470_v10 = vsel %vm1467_vm11, %v1469_v32, %v1465_v39 }
 0x15c   :  { %8427 = vpow2.f32 %v7164_v25  ;;  %v1118_v38 = vadd.f32 %v9385_v61, %v10867_v51 }
 0x15d   :  { %v1673_v55 = vpop.f32.mrf.mxu2  ;;  %v1649_v1 = vpop.f32.mrf.mxu0  ;;  %8429 = vpow2.f32 %v7165_v16 }
 0x15e   :  { %v1696_v29 = vrot.slane %v1673_v55, 2  ;;  %v1686_v13 = vpop.f32.mrf.mxu3  ;;  %v1662_v21 = vpop.f32.mrf.mxu1  ;;  %v9453_v16 = vadd.f32 %v9388_v30, %v1118_v38 }
 0x15f   :  { %v8426_v44 = vpop.eup %8425  ;;  %v1697_v45 = vrot.slane %v1686_v13, 2 }
 0x160   :  { %v1704_v33 = vadd.f32 %v1696_v29, %v9437_v4  ;;  %v1477_v31 = vmul.f32 %v8426_v44, %v1470_v10 }
 0x161   :  { %v1705_v59 = vadd.f32 %v1697_v45, %v9453_v16 }
 0x162   :  { %v7166_v9 = vmul.f32 -1.442695, %v1704_v33  ;;  %v8428_v17 = vpop.eup %8427  ;;  %v1769_v26 = vpack.c.bf16 %v1477_v31, %v1477_v31 }
 0x163   :  { %v8430_v52 = vpop.eup %8429  ;;  %v1715_v12 = vadd.f32 1.0, %v8428_v17 }
 0x164   :  { %8431 = vpow2.f32 %v7166_v9  ;;  %v9444_v60 = vadd.f32 1.0, %v8430_v52  ;;  %1770 = vst [vmem:[#allocation2] sm:$0x1] %v1769_v26  ;;  %1781 = vmatmul.bf16.vlgmr.msra.gmra.mxu0 %v1769_v26  ;;  %1794 = vmatmul.bf16.vlgmr.msra.gmra.mxu1 %v1769_v26 }
 0x165   :  { %v1675_v50 = vpop.f32.mrf.mxu2  ;;  %8433 = vrcp.f32 %v1715_v12  ;;  %1807 = vmatmul.bf16.vlgmr.msra.gmra.mxu2 %v1769_v26  ;;  %1820 = vmatmul.bf16.vlgmr.msra.gmra.mxu3 %v1769_v26  ;;  %v1729_v13 = vand.u32 2147483648, %v1715_v12  ;;  %v1727_v33 = vand.u32 2147483647, %v1715_v12  ;;  %vm1723_vm14 = vweird.f32 %v1715_v12 }
 0x166   :  { %v1688_v3 = vpop.f32.mrf.mxu3  ;;  %8435 = vrcp.f32 %v9444_v60  ;;  %2055 = vmatpush.bf16.msra.mxu0 %v9035_v22  ;;  %2068 = vmatpush.bf16.msra.mxu1 %v9037_v23  ;;  %v1744_v1 = vand.u32 2147483648, %v9444_v60  ;;  %v1742_v9 = vand.u32 2147483647, %v9444_v60  ;;  %vm1738_vm15 = vweird.f32 %v9444_v60 }
 0x167   :  { %2081 = vmatpush.bf16.msra.mxu2 %v9039_v24  ;;  %2094 = vmatpush.bf16.msra.mxu3 %v9041_v28  ;;  %v1730_v17 = vor.u32 1.1754944e-38, %v1729_v13  ;;  %vm1728_vm1 = vcmp.eq.f32.partialorder %v1727_v33, 8.507059e+37  ;;  %v10869_v33 = vld [vmem:[#allocation15_spill] sm:$0xff] }
 0x168   :  { %v1745_v52 = vor.u32 1.1754944e-38, %v1744_v1  ;;  %vm1743_vm3 = vcmp.eq.f32.partialorder %v1742_v9, 8.507059e+37 }
 0x16a   :  { %v8432_v25 = vpop.eup %8431  ;;  %2056 = vmatpush.bf16.msra.mxu0 %v9044_v34  ;;  %2069 = vmatpush.bf16.msra.mxu1 %v9048_v35 }
 0x16b   :  { %v9455_v14 = vadd.f32 1.0, %v8432_v25  ;;  %v8434_v61 = vpop.eup %8433  ;;  %2082 = vmatpush.bf16.msra.mxu2 %v9050_v36  ;;  %2095 = vmatpush.bf16.msra.mxu3 %v9053_v40 }
 0x16c   :  { %v8436_v8 = vpop.eup %8435  ;;  %v1719_v55 = vmul.f32 %v8434_v61, %v1715_v12  ;;  %vm1724_vm12 = vweird.f32 %v8434_v61 }
 0x16d   :  { %8437 = vrcp.f32 %v9455_v14  ;;  %v1734_v30 = vmul.f32 %v8436_v8, %v9444_v60  ;;  %vm1739_vm13 = vweird.f32 %v8436_v8  ;;  %vm1725_vm0 = vmor %vm1723_vm14, %vm1724_vm12  ;;  %vm1753_vm5 = vweird.f32 %v9455_v14 }
 0x16e   :  { %v1720_v0 = vsub.f32 1.0, %v1719_v55  ;;  %8439 = vtanh.f32 %v1705_v59  ;;  %2057 = vmatpush.bf16.msra.mxu0 %v9059_v46  ;;  %2070 = vmatpush.bf16.msra.mxu1 %v9064_v47  ;;  %vm1740_vm2 = vmor %vm1738_vm15, %vm1739_vm13  ;;  %v1757_v55 = vand.u32 2147483647, %v9455_v14 }
 0x16f   :  { %v1735_v29 = vsub.f32 1.0, %v1734_v30  ;;  %2083 = vmatpush.bf16.msra.mxu2 %v9066_v48  ;;  %2096 = vmatpush.bf16.msra.mxu3 %v9069_v2 }
 0x170   :  { %v1721_v21 = vmul.f32 %v8434_v61, %v1720_v0  ;;  %vm1758_vm7 = vcmp.eq.f32.partialorder %v1757_v55, 8.507059e+37  ;;  %v10886_v55 = vld [vmem:[#allocation32_spill] sm:$0xff] }
 0x171   :  { %v1736_v32 = vmul.f32 %v8436_v8, %v1735_v29 }
 0x172   :  { %v1722_v10 = vadd.f32 %v8434_v61, %v1721_v21  ;;  %2058 = vmatpush.bf16.msra.mxu0 %v9072_v56  ;;  %2071 = vmatpush.bf16.msra.mxu1 %v9076_v57  ;;  %v10868_v21 = vld [vmem:[#allocation14_spill] sm:$0xff] }
 0x173   :  { %v8438_v39 = vpop.eup %8437  ;;  %v1737_v31 = vadd.f32 %v8436_v8, %v1736_v32  ;;  %2084 = vmatpush.bf16.msra.mxu2 %v9078_v58  ;;  %2097 = vmatpush.bf16.msra.mxu3 %v9081_v62 }
 0x174   :  { %v1749_v44 = vmul.f32 %v8438_v39, %v9455_v14  ;;  %v1726_v26 = vsel %vm1725_vm0, %v8434_v61, %v1722_v10  ;;  %v8440_v3 = vpop.eup %8439  ;;  %vm1754_vm4 = vweird.f32 %v8438_v39  ;;  %v10871_v10 = vld [vmem:[#allocation17_spill] sm:$0xff] }
 0x175   :  { %v1731_v51 = vsel %vm1728_vm1, %v1730_v17, %v1726_v26  ;;  %v1741_v38 = vsel %vm1740_vm2, %v8436_v8, %v1737_v31  ;;  %v1759_v8 = vand.u32 2147483648, %v9455_v14  ;;  %vm1755_vm6 = vmor %vm1753_vm5, %vm1754_vm4  ;;  %v10872_v17 = vld [vmem:[#allocation18_spill] sm:$0xff]  ;;  %v10873_v31 = vld [vmem:[#allocation19_spill] sm:$0xff] }
 0x176   :  { %v1750_v50 = vsub.f32 1.0, %v1749_v44  ;;  %v1746_v60 = vsel %vm1743_vm3, %v1745_v52, %v1741_v38  ;;  %v1765_v45 = vmul.f32 %v8440_v3, %v1731_v51  ;;  %2059 = vmatpush.bf16.msra.mxu0 %v9084_v5  ;;  %2072 = vmatpush.bf16.msra.mxu1 %v9088_v6  ;;  %v10870_v44 = vld [vmem:[#allocation16_spill] sm:$0xff]  ;;  %v10876_v26 = vld [vmem:[#allocation22_spill] sm:$0xff]  ;;  %v10877_v3 = vld [vmem:[#allocation23_spill] sm:$0xff] }
 0x177   :  { %v1764_v25 = vmul.f32 0.0, %v1746_v60  ;;  %2085 = vmatpush.bf16.msra.mxu2 %v9090_v7  ;;  %2098 = vmatpush.bf16.msra.mxu3 %v9093_v11  ;;  %v1760_v0 = vor.u32 1.1754944e-38, %v1759_v8  ;;  %v10874_v52 = vld [vmem:[#allocation20_spill] sm:$0xff]  ;;  %v10879_v38 = vld [vmem:[#allocation25_spill] sm:$0xff]  ;;  %v10881_v60 = vld [vmem:[#allocation27_spill] sm:$0xff] }
 0x178   :  { %v1751_v12 = vmul.f32 %v8438_v39, %v1750_v50  ;;  %v10875_v50 = vld [vmem:[#allocation21_spill] sm:$0xff]  ;;  %v10878_v51 = vld [vmem:[#allocation24_spill] sm:$0xff]  ;;  %v10885_v8 = vld [vmem:[#allocation31_spill] sm:$0xff] }
 0x179   :  { %v9481_v61 = vadd.f32 %v1765_v45, %v1764_v25  ;;  %v10882_v45 = vld [vmem:[#allocation28_spill] sm:$0xff]  ;;  %v10883_v25 = vld [vmem:[#allocation29_spill] sm:$0xff] }
 0x17a   :  { %v1752_v59 = vadd.f32 %v8438_v39, %v1751_v12  ;;  %2060 = vmatpush.bf16.msra.mxu0 %v9096_v18  ;;  %2073 = vmatpush.bf16.msra.mxu1 %v9100_v19  ;;  %v10880_v12 = vld [vmem:[#allocation26_spill] sm:$0xff] }
 0x17b   :  { %8441 = vtanh.f32 %v9481_v61  ;;  %2086 = vmatpush.bf16.msra.mxu2 %v9102_v20  ;;  %2099 = vmatpush.bf16.msra.mxu3 %v9105_v27 }
 0x17c   :  { %v1756_v30 = vsel %vm1755_vm6, %v8438_v39, %v1752_v59  ;;  %v10884_v59 = vld [vmem:[#allocation30_spill] sm:$0xff] }
 0x17d   :  { %v1761_v13 = vsel %vm1758_vm7, %v1760_v0, %v1756_v30  ;;  %v10887_v30 = vld [vmem:[#allocation33_spill] sm:$0xff]  ;;  %v10888_v0 = vld [vmem:[#allocation34_spill] sm:$0xff] }
 0x17e   :  { %2061 = vmatpush.bf16.msra.mxu0 %v9108_v37  ;;  %2074 = vmatpush.bf16.msra.mxu1 %v9112_v41 }
 0x17f   :  { %2087 = vmatpush.bf16.msra.mxu2 %v9114_v42  ;;  %2100 = vmatpush.bf16.msra.mxu3 %v9117_v49 }
 0x181   :  { %v8442_v29 = vpop.eup %8441 }
 0x182   :  { %v1768_v14 = vmul.f32 %v8442_v29, %v1761_v13  ;;  %2062 = vmatpush.bf16.msra.mxu0 %v9120_v15  ;;  %2075 = vmatpush.bf16.msra.mxu1 %v9124_v63  ;;  %v10889_v29 = vld [vmem:[#allocation35_spill] sm:$0xff]  ;;  %v10890_v13 = vld [vmem:[#allocation36_spill] sm:$0xff] }
 0x183   :  { %2088 = vmatpush.bf16.msra.mxu2 %v10868_v21  ;;  %2101 = vmatpush.bf16.msra.mxu3 %v10869_v33 }
 0x184   :  { %v1771_v1 = vpack.c.bf16 %v1768_v14, %v1768_v14  ;;  %v10891_v14 = vld [vmem:[#allocation37_spill] sm:$0xff] }
 0x186   :  { %1772 = vst [vmem:[#allocation2 + $0xc] sm:$0x8] %v1771_v1  ;;  %v1908_v39 = vunpack.c.l.b16 %v1771_v1  ;;  %v10892_v1 = vld [vmem:[#allocation38_spill] sm:$0xff] }
 0x188   :  { %v1909_v32 = vpack.c.b16 %v1908_v39, %v1908_v39  ;;  %v10893_v39 = vld [vmem:[#allocation39_spill] sm:$0xff] }
 0x18a   :  { %v1910_v9 = vrot.slane %v1909_v32, 3  ;;  %v10894_v32 = vld [vmem:[#allocation40_spill] sm:$0xff] }
 0x18c   :  { %1920 = vmatmul.bf16.vlgmr.msrb.gmra.mxu0 %v1910_v9  ;;  %1933 = vmatmul.bf16.vlgmr.msrb.gmra.mxu1 %v1910_v9 }
 0x18d   :  { %1946 = vmatmul.bf16.vlgmr.msrb.gmra.mxu2 %v1910_v9  ;;  %1959 = vmatmul.bf16.vlgmr.msrb.gmra.mxu3 %v1910_v9  ;;  %v10895_v9 = vld [vmem:[#allocation41_spill] sm:$0xff] }
 0x18e   :  { %2194 = vmatpush.bf16.msrb.mxu0 %v10870_v44  ;;  %2207 = vmatpush.bf16.msrb.mxu1 %v10871_v10 }
 0x18f   :  { %2220 = vmatpush.bf16.msrb.mxu2 %v10872_v17  ;;  %2233 = vmatpush.bf16.msrb.mxu3 %v10873_v31 }
 0x192   :  { %2195 = vmatpush.bf16.msrb.mxu0 %v10874_v52  ;;  %2208 = vmatpush.bf16.msrb.mxu1 %v10875_v50 }
 0x193   :  { %2221 = vmatpush.bf16.msrb.mxu2 %v10876_v26  ;;  %2234 = vmatpush.bf16.msrb.mxu3 %v10877_v3 }
 0x196   :  { %2196 = vmatpush.bf16.msrb.mxu0 %v10878_v51  ;;  %2209 = vmatpush.bf16.msrb.mxu1 %v10879_v38 }
 0x197   :  { %2222 = vmatpush.bf16.msrb.mxu2 %v10880_v12  ;;  %2235 = vmatpush.bf16.msrb.mxu3 %v10881_v60 }
 0x19a   :  { %2197 = vmatpush.bf16.msrb.mxu0 %v10882_v45  ;;  %2210 = vmatpush.bf16.msrb.mxu1 %v10883_v25  ;;  %v10902_v25 = vld [vmem:[#allocation61_spill] sm:$0xff]  ;;  %v10903_v45 = vld [vmem:[#allocation62_spill] sm:$0xff] }
 0x19b   :  { %2223 = vmatpush.bf16.msrb.mxu2 %v10884_v59  ;;  %2236 = vmatpush.bf16.msrb.mxu3 %v10885_v8  ;;  %v10896_v8 = vld [vmem:[#allocation42_spill] sm:$0xff] }
 0x19e   :  { %2198 = vmatpush.bf16.msrb.mxu0 %v10886_v55  ;;  %2211 = vmatpush.bf16.msrb.mxu1 %v10887_v30  ;;  %v10897_v55 = vld [vmem:[#allocation43_spill] sm:$0xff]  ;;  %v10898_v30 = vld [vmem:[#allocation44_spill] sm:$0xff] }
 0x19f   :  { %2224 = vmatpush.bf16.msrb.mxu2 %v10888_v0  ;;  %2237 = vmatpush.bf16.msrb.mxu3 %v10889_v29  ;;  %v10899_v0 = vld [vmem:[#allocation45_spill] sm:$0xff]  ;;  %v10900_v29 = vld [vmem:[#allocation46_spill] sm:$0xff] }
 0x1a2   :  { %2199 = vmatpush.bf16.msrb.mxu0 %v10890_v13  ;;  %2212 = vmatpush.bf16.msrb.mxu1 %v10891_v14  ;;  %v10901_v13 = vld [vmem:[#allocation47_spill] sm:$0xff] }
 0x1a3   :  { %2225 = vmatpush.bf16.msrb.mxu2 %v10892_v1  ;;  %2238 = vmatpush.bf16.msrb.mxu3 %v10893_v39 }
 0x1a6   :  { %2200 = vmatpush.bf16.msrb.mxu0 %v10894_v32  ;;  %2213 = vmatpush.bf16.msrb.mxu1 %v10895_v9 }
 0x1a7   :  { %2226 = vmatpush.bf16.msrb.mxu2 %v10896_v8  ;;  %2239 = vmatpush.bf16.msrb.mxu3 %v10897_v55 }
 0x1aa   :  { %2201 = vmatpush.bf16.msrb.mxu0 %v10898_v30  ;;  %2214 = vmatpush.bf16.msrb.mxu1 %v10899_v0 }
 0x1ab   :  { %2227 = vmatpush.bf16.msrb.mxu2 %v10900_v29  ;;  %2240 = vmatpush.bf16.msrb.mxu3 %v10901_v13  ;;  %v10904_v29 = vld [vmem:[#allocation63_spill] sm:$0xff] }
 0x1e1   :  { %v1782_v14 = vpop.f32.mrf.mxu0  ;;  %v1795_v1 = vpop.f32.mrf.mxu1 }
 0x1e2   :  { %v1829_v59 = vrot.slane %v1782_v14, 6  ;;  %v1830_v39 = vrot.slane %v1795_v1, 6 }
 0x1e4   :  { %v1837_v32 = vadd.f32 %v1829_v59, %v10902_v25  ;;  %v1838_v9 = vadd.f32 %v1830_v39, %v10903_v45 }
 0x1e6   :  { %v7167_v60 = vmul.f32 -1.442695, %v1837_v32  ;;  %v7168_v8 = vmul.f32 -1.442695, %v1838_v9 }
 0x1e8   :  { %8443 = vpow2.f32 %v7167_v60  ;;  %v1808_v55 = vpop.f32.mrf.mxu2  ;;  %v1821_v12 = vpop.f32.mrf.mxu3 }
 0x1e9   :  { %8445 = vpow2.f32 %v7168_v8  ;;  %v1831_v30 = vrot.slane %v1808_v55, 6  ;;  %v1784_v0 = vpop.f32.mrf.mxu0  ;;  %v1797_v38 = vpop.f32.mrf.mxu1  ;;  %v1832_v39 = vrot.slane %v1821_v12, 6  ;;  %v10905_v8 = vld [vmem:[#allocation64_spill] sm:$0xff] }
 0x1eb   :  { %v1839_v51 = vadd.f32 %v1831_v30, %v10904_v29  ;;  %v1840_v55 = vadd.f32 %v1832_v39, %v10905_v8 }
 0x1ed   :  { %v7169_v13 = vmul.f32 -1.442695, %v1839_v51 }
 0x1ee   :  { %v8444_v3 = vpop.eup %8443 }
 0x1ef   :  { %v8446_v26 = vpop.eup %8445  ;;  %v1850_v14 = vadd.f32 1.0, %v8444_v3  ;;  %8447 = vpow2.f32 %v7169_v13 }
 0x1f0   :  { %v1851_v1 = vadd.f32 1.0, %v8446_v26  ;;  %v1810_v59 = vpop.f32.mrf.mxu2  ;;  %v1823_v25 = vpop.f32.mrf.mxu3 }
 0x1f1   :  { %8449 = vrcp.f32 %v1850_v14  ;;  %v1864_v45 = vand.u32 2147483648, %v1850_v14  ;;  %v1862_v25 = vand.u32 2147483647, %v1850_v14  ;;  %vm1858_vm10 = vweird.f32 %v1850_v14 }
 0x1f2   :  { %8451 = vrcp.f32 %v1851_v1  ;;  %v1879_v3 = vand.u32 2147483648, %v1851_v1  ;;  %v1877_v12 = vand.u32 2147483647, %v1851_v1  ;;  %vm1873_vm11 = vweird.f32 %v1851_v1 }
 0x1f3   :  { %v1865_v8 = vor.u32 1.1754944e-38, %v1864_v45  ;;  %vm1863_vm14 = vcmp.eq.f32.partialorder %v1862_v25, 8.507059e+37 }
 0x1f4   :  { %vm1878_vm15 = vcmp.eq.f32.partialorder %v1877_v12, 8.507059e+37 }
 0x1f5   :  { %v8448_v60 = vpop.eup %8447 }
 0x1f6   :  { %v1852_v32 = vadd.f32 1.0, %v8448_v60 }
 0x1f7   :  { %v8450_v9 = vpop.eup %8449 }
 0x1f8   :  { %v8452_v0 = vpop.eup %8451  ;;  %v1854_v38 = vmul.f32 %v8450_v9, %v1850_v14  ;;  %8453 = vrcp.f32 %v1852_v32  ;;  %vm1859_vm8 = vweird.f32 %v8450_v9  ;;  %vm1888_vm1 = vweird.f32 %v1852_v32 }
 0x1f9   :  { %v1869_v30 = vmul.f32 %v8452_v0, %v1851_v1  ;;  %8455 = vtanh.f32 %v1840_v55  ;;  %vm1874_vm9 = vweird.f32 %v8452_v0  ;;  %vm1860_vm12 = vmor %vm1858_vm10, %vm1859_vm8 }
 0x1fa   :  { %v1855_v51 = vsub.f32 1.0, %v1854_v38  ;;  %v1900_v38 = vrot.slane %v9434_v54, 6  ;;  %vm1875_vm13 = vmor %vm1873_vm11, %vm1874_vm9 }
 0x1fb   :  { %v1870_v29 = vsub.f32 1.0, %v1869_v30  ;;  %v1880_v30 = vor.u32 1.1754944e-38, %v1879_v3  ;;  %v1894_v3 = vand.u32 2147483648, %v1852_v32 }
 0x1fc   :  { %v1856_v26 = vmul.f32 %v8450_v9, %v1855_v51 }
 0x1fd   :  { %v1871_v13 = vmul.f32 %v8452_v0, %v1870_v29 }
 0x1fe   :  { %v8454_v59 = vpop.eup %8453  ;;  %v1857_v60 = vadd.f32 %v8450_v9, %v1856_v26 }
 0x1ff   :  { %v1884_v39 = vmul.f32 %v8454_v59, %v1852_v32  ;;  %v1872_v50 = vadd.f32 %v8452_v0, %v1871_v13  ;;  %v8456_v51 = vpop.eup %8455  ;;  %vm1889_vm0 = vweird.f32 %v8454_v59  ;;  %v1892_v13 = vand.u32 2147483647, %v1852_v32 }
 0x200   :  { %v1861_v55 = vsel %vm1860_vm12, %v8450_v9, %v1857_v60  ;;  %vm1890_vm2 = vmor %vm1888_vm1, %vm1889_vm0 }
 0x201   :  { %v1885_v52 = vsub.f32 1.0, %v1884_v39  ;;  %v1866_v31 = vsel %vm1863_vm14, %v1865_v8, %v1861_v55  ;;  %v1876_v29 = vsel %vm1875_vm13, %v8452_v0, %v1872_v50  ;;  %vm1893_vm3 = vcmp.eq.f32.partialorder %v1892_v13, 8.507059e+37 }
 0x202   :  { %v1881_v17 = vsel %vm1878_vm15, %v1880_v30, %v1876_v29  ;;  %v1903_v10 = vmul.f32 %v8456_v51, %v1866_v31 }
 0x203   :  { %v1886_v26 = vmul.f32 %v8454_v59, %v1885_v52  ;;  %v1902_v14 = vmul.f32 %v1900_v38, %v1881_v17  ;;  %v1895_v17 = vor.u32 1.1754944e-38, %v1894_v3 }
 0x205   :  { %v9538_v1 = vadd.f32 %v1903_v10, %v1902_v14  ;;  %v1887_v44 = vadd.f32 %v8454_v59, %v1886_v26 }
 0x207   :  { %8457 = vtanh.f32 %v9538_v1  ;;  %v1891_v52 = vsel %vm1890_vm2, %v8454_v59, %v1887_v44 }
 0x208   :  { %v1896_v12 = vsel %vm1893_vm3, %v1895_v17, %v1891_v52 }
 0x209   :  { %v1921_v54 = vpop.f32.mrf.mxu0  ;;  %v1934_v45 = vpop.f32.mrf.mxu1 }
 0x20a   :  { %v1968_v9 = vrot.slane %v1921_v54, 4  ;;  %v1969_v25 = vrot.slane %v1934_v45, 4 }
 0x20c   :  { %v1976_v50 = vadd.f32 %v1968_v9, %v9420_v53  ;;  %v1977_v31 = vadd.f32 %v1969_v25, %v9427_v43 }
 0x20d   :  { %v8458_v0 = vpop.eup %8457 }
 0x20e   :  { %v7170_v10 = vmul.f32 -1.442695, %v1976_v50  ;;  %v7171_v8 = vmul.f32 -1.442695, %v1977_v31  ;;  %v1906_v38 = vmul.f32 %v8458_v0, %v1896_v12 }
 0x210   :  { %8459 = vpow2.f32 %v7170_v10  ;;  %v1947_v60 = vpop.f32.mrf.mxu2  ;;  %v1960_v39 = vpop.f32.mrf.mxu3  ;;  %v2046_v51 = vpack.c.bf16 %v1906_v38, %v1906_v38 }
 0x211   :  { %8461 = vpow2.f32 %v7171_v8  ;;  %v1970_v30 = vrot.slane %v1947_v60, 4  ;;  %v1923_v55 = vpop.f32.mrf.mxu0  ;;  %v1936_v32 = vpop.f32.mrf.mxu1  ;;  %v1971_v50 = vrot.slane %v1960_v39, 4 }
 0x212   :  { %2047 = vst [vmem:[#allocation2] sm:$0x2] %v2046_v51  ;;  %v2051_v26 = vunpack.c.l.b16 %v2046_v51 }
 0x213   :  { %v1978_v29 = vadd.f32 %v1970_v30, %v9437_v4  ;;  %v1979_v10 = vadd.f32 %v1971_v50, %v9453_v16 }
 0x214   :  { %v2052_v14 = vpack.c.b16 %v2051_v26, %v2051_v26 }
 0x215   :  { %v7172_v44 = vmul.f32 -1.442695, %v1978_v29 }
 0x216   :  { %v8460_v59 = vpop.eup %8459  ;;  %v2053_v13 = vrot.slane %v2052_v14, 1 }
 0x217   :  { %v8462_v54 = vpop.eup %8461  ;;  %v1989_v45 = vadd.f32 1.0, %v8460_v59  ;;  %8463 = vpow2.f32 %v7172_v44 }
 0x218   :  { %v1990_v3 = vadd.f32 1.0, %v8462_v54  ;;  %v1949_v9 = vpop.f32.mrf.mxu2  ;;  %v1962_v25 = vpop.f32.mrf.mxu3  ;;  %2063 = vmatmul.bf16.vlgmr.msra.gmra.mxu0 %v2053_v13  ;;  %2076 = vmatmul.bf16.vlgmr.msra.gmra.mxu1 %v2053_v13 }
 0x219   :  { %8465 = vrcp.f32 %v1989_v45  ;;  %2089 = vmatmul.bf16.vlgmr.msra.gmra.mxu2 %v2053_v13  ;;  %2102 = vmatmul.bf16.vlgmr.msra.gmra.mxu3 %v2053_v13  ;;  %v2003_v38 = vand.u32 2147483648, %v1989_v45  ;;  %v2001_v32 = vand.u32 2147483647, %v1989_v45  ;;  %vm1997_vm6 = vweird.f32 %v1989_v45 }
 0x21a   :  { %8467 = vrcp.f32 %v1990_v3  ;;  %2337 = vmatpush.bf16.msra.mxu0 %v9035_v22  ;;  %2350 = vmatpush.bf16.msra.mxu1 %v9037_v23  ;;  %v2018_v30 = vand.u32 2147483648, %v1990_v3  ;;  %v2016_v29 = vand.u32 2147483647, %v1990_v3  ;;  %vm2012_vm7 = vweird.f32 %v1990_v3 }
 0x21b   :  { %2363 = vmatpush.bf16.msra.mxu2 %v9039_v24  ;;  %2376 = vmatpush.bf16.msra.mxu3 %v9041_v28  ;;  %v2004_v14 = vor.u32 1.1754944e-38, %v2003_v38  ;;  %v2039_v9 = vrot.slane %v9481_v61, 2  ;;  %vm2002_vm10 = vcmp.eq.f32.partialorder %v2001_v32, 8.507059e+37 }
 0x21c   :  { %v2019_v25 = vor.u32 1.1754944e-38, %v2018_v30  ;;  %vm2017_vm11 = vcmp.eq.f32.partialorder %v2016_v29, 8.507059e+37 }
 0x21d   :  { %v8464_v31 = vpop.eup %8463 }
 0x21e   :  { %v9548_v52 = vadd.f32 1.0, %v8464_v31  ;;  %2338 = vmatpush.bf16.msra.mxu0 %v9044_v34  ;;  %2351 = vmatpush.bf16.msra.mxu1 %v9048_v35 }
 0x21f   :  { %v8466_v17 = vpop.eup %8465  ;;  %2364 = vmatpush.bf16.msra.mxu2 %v9050_v36  ;;  %2377 = vmatpush.bf16.msra.mxu3 %v9053_v40 }
 0x220   :  { %v8468_v8 = vpop.eup %8467  ;;  %v1993_v0 = vmul.f32 %v8466_v17, %v1989_v45  ;;  %8469 = vrcp.f32 %v9548_v52  ;;  %vm1998_vm4 = vweird.f32 %v8466_v17  ;;  %vm2027_vm13 = vweird.f32 %v9548_v52 }
 0x221   :  { %v2008_v12 = vmul.f32 %v8468_v8, %v1990_v3  ;;  %8471 = vtanh.f32 %v1979_v10  ;;  %vm2013_vm5 = vweird.f32 %v8468_v8  ;;  %vm1999_vm8 = vmor %vm1997_vm6, %vm1998_vm4 }
 0x222   :  { %v1994_v60 = vsub.f32 1.0, %v1993_v0  ;;  %2339 = vmatpush.bf16.msra.mxu0 %v9059_v46  ;;  %2352 = vmatpush.bf16.msra.mxu1 %v9064_v47  ;;  %vm2014_vm9 = vmor %vm2012_vm7, %vm2013_vm5 }
 0x223   :  { %v2009_v39 = vsub.f32 1.0, %v2008_v12  ;;  %2365 = vmatpush.bf16.msra.mxu2 %v9066_v48  ;;  %2378 = vmatpush.bf16.msra.mxu3 %v9069_v2 }
 0x224   :  { %v1995_v55 = vmul.f32 %v8466_v17, %v1994_v60  ;;  %v2033_v60 = vand.u32 2147483648, %v9548_v52 }
 0x225   :  { %v2010_v51 = vmul.f32 %v8468_v8, %v2009_v39  ;;  %v2031_v39 = vand.u32 2147483647, %v9548_v52 }
 0x226   :  { %v8470_v26 = vpop.eup %8469  ;;  %v1996_v44 = vadd.f32 %v8466_v17, %v1995_v55  ;;  %2340 = vmatpush.bf16.msra.mxu0 %v9072_v56  ;;  %2353 = vmatpush.bf16.msra.mxu1 %v9076_v57  ;;  %v2034_v30 = vor.u32 1.1754944e-38, %v2033_v60  ;;  %v10921_v60 = vld [vmem:[#allocation31_spill] sm:$0xff] }
 0x227   :  { %v2023_v59 = vmul.f32 %v8470_v26, %v9548_v52  ;;  %v2011_v54 = vadd.f32 %v8468_v8, %v2010_v51  ;;  %v8472_v50 = vpop.eup %8471  ;;  %2366 = vmatpush.bf16.msra.mxu2 %v9078_v58  ;;  %2379 = vmatpush.bf16.msra.mxu3 %v9081_v62  ;;  %vm2028_vm12 = vweird.f32 %v8470_v26  ;;  %vm2032_vm15 = vcmp.eq.f32.partialorder %v2031_v39, 8.507059e+37  ;;  %v10922_v39 = vld [vmem:[#allocation32_spill] sm:$0xff] }
 0x228   :  { %v2000_v13 = vsel %vm1999_vm8, %v8466_v17, %v1996_v44  ;;  %vm2029_vm14 = vmor %vm2027_vm13, %vm2028_vm12 }
 0x229   :  { %v2024_v31 = vsub.f32 1.0, %v2023_v59  ;;  %v2005_v10 = vsel %vm2002_vm10, %v2004_v14, %v2000_v13  ;;  %v2015_v45 = vsel %vm2014_vm9, %v8468_v8, %v2011_v54  ;;  %v10906_v59 = vld [vmem:[#allocation16_spill] sm:$0xff]  ;;  %v10907_v14 = vld [vmem:[#allocation17_spill] sm:$0xff]  ;;  %v10908_v54 = vld [vmem:[#allocation18_spill] sm:$0xff] }
 0x22a   :  { %v2020_v3 = vsel %vm2017_vm11, %v2019_v25, %v2015_v45  ;;  %v2042_v0 = vmul.f32 %v8472_v50, %v2005_v10  ;;  %2341 = vmatpush.bf16.msra.mxu0 %v9084_v5  ;;  %2354 = vmatpush.bf16.msra.mxu1 %v9088_v6  ;;  %v10910_v25 = vld [vmem:[#allocation20_spill] sm:$0xff]  ;;  %v10911_v13 = vld [vmem:[#allocation21_spill] sm:$0xff]  ;;  %v10912_v50 = vld [vmem:[#allocation22_spill] sm:$0xff] }
 0x22b   :  { %v2025_v61 = vmul.f32 %v8470_v26, %v2024_v31  ;;  %v2041_v12 = vmul.f32 %v2039_v9, %v2020_v3  ;;  %2367 = vmatpush.bf16.msra.mxu2 %v9090_v7  ;;  %2380 = vmatpush.bf16.msra.mxu3 %v9093_v11  ;;  %v10909_v9 = vld [vmem:[#allocation19_spill] sm:$0xff]  ;;  %v10914_v10 = vld [vmem:[#allocation24_spill] sm:$0xff]  ;;  %v10915_v45 = vld [vmem:[#allocation25_spill] sm:$0xff] }
 0x22c   :  { %v10913_v31 = vld [vmem:[#allocation23_spill] sm:$0xff]  ;;  %v10916_v3 = vld [vmem:[#allocation26_spill] sm:$0xff] }
 0x22d   :  { %v9568_v17 = vadd.f32 %v2042_v0, %v2041_v12  ;;  %v2026_v8 = vadd.f32 %v8470_v26, %v2025_v61  ;;  %v10917_v0 = vld [vmem:[#allocation27_spill] sm:$0xff]  ;;  %v10918_v61 = vld [vmem:[#allocation28_spill] sm:$0xff]  ;;  %v10919_v12 = vld [vmem:[#allocation29_spill] sm:$0xff] }
 0x22e   :  { %2342 = vmatpush.bf16.msra.mxu0 %v9096_v18  ;;  %2355 = vmatpush.bf16.msra.mxu1 %v9100_v19 }
 0x22f   :  { %8473 = vtanh.f32 %v9568_v17  ;;  %2368 = vmatpush.bf16.msra.mxu2 %v9102_v20  ;;  %2381 = vmatpush.bf16.msra.mxu3 %v9105_v27  ;;  %v2030_v38 = vsel %vm2029_vm14, %v8470_v26, %v2026_v8  ;;  %v10920_v8 = vld [vmem:[#allocation30_spill] sm:$0xff] }
 0x230   :  { %v2035_v32 = vsel %vm2032_vm15, %v2034_v30, %v2030_v38  ;;  %v10923_v38 = vld [vmem:[#allocation33_spill] sm:$0xff]  ;;  %v10924_v30 = vld [vmem:[#allocation34_spill] sm:$0xff] }
 0x232   :  { %2343 = vmatpush.bf16.msra.mxu0 %v9108_v37  ;;  %2356 = vmatpush.bf16.msra.mxu1 %v9112_v41 }
 0x233   :  { %2369 = vmatpush.bf16.msra.mxu2 %v9114_v42  ;;  %2382 = vmatpush.bf16.msra.mxu3 %v9117_v49 }
 0x235   :  { %v8474_v55 = vpop.eup %8473 }
 0x236   :  { %v2045_v52 = vmul.f32 %v8474_v55, %v2035_v32  ;;  %2344 = vmatpush.bf16.msra.mxu0 %v9120_v15  ;;  %2357 = vmatpush.bf16.msra.mxu1 %v9124_v63  ;;  %v10925_v55 = vld [vmem:[#allocation35_spill] sm:$0xff]  ;;  %v10926_v32 = vld [vmem:[#allocation36_spill] sm:$0xff] }
 0x237   :  { %2370 = vmatpush.bf16.msra.mxu2 %v10868_v21  ;;  %2383 = vmatpush.bf16.msra.mxu3 %v10869_v33 }
 0x238   :  { %v2048_v51 = vpack.c.bf16 %v2045_v52, %v2045_v52  ;;  %v10927_v52 = vld [vmem:[#allocation37_spill] sm:$0xff] }
 0x23a   :  { %2049 = vst [vmem:[#allocation2 + $0xc] sm:$0x4] %v2048_v51  ;;  %v2190_v29 = vunpack.c.l.b16 %v2048_v51  ;;  %v10928_v51 = vld [vmem:[#allocation38_spill] sm:$0xff] }
 0x23c   :  { %v2191_v26 = vpack.c.b16 %v2190_v29, %v2190_v29  ;;  %v10929_v29 = vld [vmem:[#allocation39_spill] sm:$0xff] }
 0x23e   :  { %v2192_v44 = vrot.slane %v2191_v26, 2  ;;  %v10930_v26 = vld [vmem:[#allocation40_spill] sm:$0xff] }
 0x240   :  { %2202 = vmatmul.bf16.vlgmr.msrb.gmra.mxu0 %v2192_v44  ;;  %2215 = vmatmul.bf16.vlgmr.msrb.gmra.mxu1 %v2192_v44 }
 0x241   :  { %2228 = vmatmul.bf16.vlgmr.msrb.gmra.mxu2 %v2192_v44  ;;  %2241 = vmatmul.bf16.vlgmr.msrb.gmra.mxu3 %v2192_v44  ;;  %v10931_v44 = vld [vmem:[#allocation41_spill] sm:$0xff] }
 0x242   :  { %2476 = vmatpush.bf16.msrb.mxu0 %v10906_v59  ;;  %2489 = vmatpush.bf16.msrb.mxu1 %v10907_v14 }
 0x243   :  { %2502 = vmatpush.bf16.msrb.mxu2 %v10908_v54  ;;  %2515 = vmatpush.bf16.msrb.mxu3 %v10909_v9 }
 0x246   :  { %2477 = vmatpush.bf16.msrb.mxu0 %v10910_v25  ;;  %2490 = vmatpush.bf16.msrb.mxu1 %v10911_v13 }
 0x247   :  { %2503 = vmatpush.bf16.msrb.mxu2 %v10912_v50  ;;  %2516 = vmatpush.bf16.msrb.mxu3 %v10913_v31 }
 0x24a   :  { %2478 = vmatpush.bf16.msrb.mxu0 %v10914_v10  ;;  %2491 = vmatpush.bf16.msrb.mxu1 %v10915_v45 }
 0x24b   :  { %2504 = vmatpush.bf16.msrb.mxu2 %v10916_v3  ;;  %2517 = vmatpush.bf16.msrb.mxu3 %v10917_v0 }
 0x24e   :  { %2479 = vmatpush.bf16.msrb.mxu0 %v10918_v61  ;;  %2492 = vmatpush.bf16.msrb.mxu1 %v10919_v12  ;;  %v10938_v12 = vld [vmem:[#allocation61_spill] sm:$0xff]  ;;  %v10939_v61 = vld [vmem:[#allocation62_spill] sm:$0xff] }
 0x24f   :  { %2505 = vmatpush.bf16.msrb.mxu2 %v10920_v8  ;;  %2518 = vmatpush.bf16.msrb.mxu3 %v10921_v60  ;;  %v10932_v60 = vld [vmem:[#allocation42_spill] sm:$0xff] }
 0x252   :  { %2480 = vmatpush.bf16.msrb.mxu0 %v10922_v39  ;;  %2493 = vmatpush.bf16.msrb.mxu1 %v10923_v38  ;;  %v10933_v39 = vld [vmem:[#allocation43_spill] sm:$0xff]  ;;  %v10934_v38 = vld [vmem:[#allocation44_spill] sm:$0xff] }
 0x253   :  { %2506 = vmatpush.bf16.msrb.mxu2 %v10924_v30  ;;  %2519 = vmatpush.bf16.msrb.mxu3 %v10925_v55  ;;  %v10935_v30 = vld [vmem:[#allocation45_spill] sm:$0xff]  ;;  %v10936_v55 = vld [vmem:[#allocation46_spill] sm:$0xff] }
 0x256   :  { %2481 = vmatpush.bf16.msrb.mxu0 %v10926_v32  ;;  %2494 = vmatpush.bf16.msrb.mxu1 %v10927_v52  ;;  %v10937_v32 = vld [vmem:[#allocation47_spill] sm:$0xff] }
 0x257   :  { %2507 = vmatpush.bf16.msrb.mxu2 %v10928_v51  ;;  %2520 = vmatpush.bf16.msrb.mxu3 %v10929_v29 }
 0x25a   :  { %2482 = vmatpush.bf16.msrb.mxu0 %v10930_v26  ;;  %2495 = vmatpush.bf16.msrb.mxu1 %v10931_v44 }
 0x25b   :  { %2508 = vmatpush.bf16.msrb.mxu2 %v10932_v60  ;;  %2521 = vmatpush.bf16.msrb.mxu3 %v10933_v39 }
 0x25e   :  { %2483 = vmatpush.bf16.msrb.mxu0 %v10934_v38  ;;  %2496 = vmatpush.bf16.msrb.mxu1 %v10935_v30 }
 0x25f   :  { %2509 = vmatpush.bf16.msrb.mxu2 %v10936_v55  ;;  %2522 = vmatpush.bf16.msrb.mxu3 %v10937_v32  ;;  %v10940_v55 = vld [vmem:[#allocation63_spill] sm:$0xff] }
 0x295   :  { %v2064_v52 = vpop.f32.mrf.mxu0  ;;  %v2077_v51 = vpop.f32.mrf.mxu1 }
 0x296   :  { %v2111_v8 = vrot.slane %v2064_v52, 4  ;;  %v2112_v29 = vrot.slane %v2077_v51, 4 }
 0x298   :  { %v2119_v26 = vadd.f32 %v2111_v8, %v10938_v12  ;;  %v2120_v44 = vadd.f32 %v2112_v29, %v10939_v61 }
 0x29a   :  { %v7173_v0 = vmul.f32 -1.442695, %v2119_v26  ;;  %v7174_v60 = vmul.f32 -1.442695, %v2120_v44 }
 0x29c   :  { %8475 = vpow2.f32 %v7173_v0  ;;  %v2090_v39 = vpop.f32.mrf.mxu2  ;;  %v2103_v3 = vpop.f32.mrf.mxu3 }
 0x29d   :  { %8477 = vpow2.f32 %v7174_v60  ;;  %v2113_v38 = vrot.slane %v2090_v39, 4  ;;  %v2066_v30 = vpop.f32.mrf.mxu0  ;;  %v2079_v45 = vpop.f32.mrf.mxu1  ;;  %v2114_v29 = vrot.slane %v2103_v3, 4  ;;  %v10941_v60 = vld [vmem:[#allocation64_spill] sm:$0xff] }
 0x29f   :  { %v2121_v10 = vadd.f32 %v2113_v38, %v10940_v55  ;;  %v2122_v39 = vadd.f32 %v2114_v29, %v10941_v60 }
 0x2a1   :  { %v7175_v32 = vmul.f32 -1.442695, %v2121_v10 }
 0x2a2   :  { %v8476_v31 = vpop.eup %8475 }
 0x2a3   :  { %v8478_v50 = vpop.eup %8477  ;;  %v2132_v52 = vadd.f32 1.0, %v8476_v31  ;;  %8479 = vpow2.f32 %v7175_v32 }
 0x2a4   :  { %v2133_v51 = vadd.f32 1.0, %v8478_v50  ;;  %v2092_v8 = vpop.f32.mrf.mxu2  ;;  %v2105_v12 = vpop.f32.mrf.mxu3 }
 0x2a5   :  { %8481 = vrcp.f32 %v2132_v52  ;;  %v2146_v61 = vand.u32 2147483648, %v2132_v52  ;;  %v2144_v12 = vand.u32 2147483647, %v2132_v52  ;;  %vm2140_vm2 = vweird.f32 %v2132_v52 }
 0x2a6   :  { %8483 = vrcp.f32 %v2133_v51  ;;  %v2161_v31 = vand.u32 2147483648, %v2133_v51  ;;  %v2159_v3 = vand.u32 2147483647, %v2133_v51  ;;  %vm2155_vm3 = vweird.f32 %v2133_v51 }
 0x2a7   :  { %v2147_v60 = vor.u32 1.1754944e-38, %v2146_v61  ;;  %vm2145_vm6 = vcmp.eq.f32.partialorder %v2144_v12, 8.507059e+37 }
 0x2a8   :  { %vm2160_vm7 = vcmp.eq.f32.partialorder %v2159_v3, 8.507059e+37 }
 0x2a9   :  { %v8480_v0 = vpop.eup %8479 }
 0x2aa   :  { %v2134_v26 = vadd.f32 1.0, %v8480_v0 }
 0x2ab   :  { %v8482_v44 = vpop.eup %8481 }
 0x2ac   :  { %v8484_v30 = vpop.eup %8483  ;;  %v2136_v45 = vmul.f32 %v8482_v44, %v2132_v52  ;;  %8485 = vrcp.f32 %v2134_v26  ;;  %vm2141_vm0 = vweird.f32 %v8482_v44  ;;  %vm2170_vm9 = vweird.f32 %v2134_v26 }
 0x2ad   :  { %v2151_v38 = vmul.f32 %v8484_v30, %v2133_v51  ;;  %8487 = vtanh.f32 %v2122_v39  ;;  %vm2156_vm1 = vweird.f32 %v8484_v30  ;;  %vm2142_vm4 = vmor %vm2140_vm2, %vm2141_vm0 }
 0x2ae   :  { %v2137_v10 = vsub.f32 1.0, %v2136_v45  ;;  %v2182_v45 = vrot.slane %v9538_v1, 6  ;;  %vm2157_vm5 = vmor %vm2155_vm3, %vm2156_vm1 }
 0x2af   :  { %v2152_v55 = vsub.f32 1.0, %v2151_v38  ;;  %v2162_v38 = vor.u32 1.1754944e-38, %v2161_v31  ;;  %v2176_v31 = vand.u32 2147483648, %v2134_v26 }
 0x2b0   :  { %v2138_v50 = vmul.f32 %v8482_v44, %v2137_v10 }
 0x2b1   :  { %v2153_v32 = vmul.f32 %v8484_v30, %v2152_v55 }
 0x2b2   :  { %v8486_v8 = vpop.eup %8485  ;;  %v2139_v0 = vadd.f32 %v8482_v44, %v2138_v50 }
 0x2b3   :  { %v2166_v29 = vmul.f32 %v8486_v8, %v2134_v26  ;;  %v2154_v13 = vadd.f32 %v8484_v30, %v2153_v32  ;;  %v8488_v10 = vpop.eup %8487  ;;  %vm2171_vm8 = vweird.f32 %v8486_v8  ;;  %v2174_v32 = vand.u32 2147483647, %v2134_v26 }
 0x2b4   :  { %v2143_v39 = vsel %vm2142_vm4, %v8482_v44, %v2139_v0  ;;  %vm2172_vm10 = vmor %vm2170_vm9, %vm2171_vm8 }
 0x2b5   :  { %v2167_v25 = vsub.f32 1.0, %v2166_v29  ;;  %v2148_v9 = vsel %vm2145_vm6, %v2147_v60, %v2143_v39  ;;  %v2158_v55 = vsel %vm2157_vm5, %v8484_v30, %v2154_v13  ;;  %vm2175_vm11 = vcmp.eq.f32.partialorder %v2174_v32, 8.507059e+37 }
 0x2b6   :  { %v2163_v54 = vsel %vm2160_vm7, %v2162_v38, %v2158_v55  ;;  %v2185_v14 = vmul.f32 %v8488_v10, %v2148_v9 }
 0x2b7   :  { %v2168_v50 = vmul.f32 %v8486_v8, %v2167_v25  ;;  %v2184_v52 = vmul.f32 %v2182_v45, %v2163_v54  ;;  %v2177_v54 = vor.u32 1.1754944e-38, %v2176_v31 }
 0x2b9   :  { %v9625_v51 = vadd.f32 %v2185_v14, %v2184_v52  ;;  %v2169_v59 = vadd.f32 %v8486_v8, %v2168_v50 }
 0x2bb   :  { %8489 = vtanh.f32 %v9625_v51  ;;  %v2173_v25 = vsel %vm2172_vm10, %v8486_v8, %v2169_v59 }
 0x2bc   :  { %v2178_v3 = vsel %vm2175_vm11, %v2177_v54, %v2173_v25 }
 0x2bd   :  { %v2203_v1 = vpop.f32.mrf.mxu0  ;;  %v2216_v61 = vpop.f32.mrf.mxu1 }
 0x2be   :  { %v2250_v44 = vrot.slane %v2203_v1, 6  ;;  %v2251_v12 = vrot.slane %v2216_v61, 6 }
 0x2c0   :  { %v2258_v13 = vadd.f32 %v2250_v44, %v9420_v53  ;;  %v2259_v9 = vadd.f32 %v2251_v12, %v9427_v43 }
 0x2c1   :  { %v8490_v30 = vpop.eup %8489 }
 0x2c2   :  { %v7176_v14 = vmul.f32 -1.442695, %v2258_v13  ;;  %v7177_v60 = vmul.f32 -1.442695, %v2259_v9  ;;  %v2188_v45 = vmul.f32 %v8490_v30, %v2178_v3 }
 0x2c4   :  { %8491 = vpow2.f32 %v7176_v14  ;;  %v2229_v0 = vpop.f32.mrf.mxu2  ;;  %v2242_v29 = vpop.f32.mrf.mxu3  ;;  %v2328_v10 = vpack.c.bf16 %v2188_v45, %v2188_v45 }
 0x2c5   :  { %8493 = vpow2.f32 %v7177_v60  ;;  %v2252_v38 = vrot.slane %v2229_v0, 6  ;;  %v2205_v39 = vpop.f32.mrf.mxu0  ;;  %v2218_v26 = vpop.f32.mrf.mxu1  ;;  %v2253_v13 = vrot.slane %v2242_v29, 6 }
 0x2c6   :  { %2329 = vst [vmem:[#allocation2] sm:$0x4] %v2328_v10  ;;  %v2333_v50 = vunpack.c.l.b16 %v2328_v10 }
 0x2c7   :  { %v2260_v55 = vadd.f32 %v2252_v38, %v9437_v4  ;;  %v2261_v14 = vadd.f32 %v2253_v13, %v9453_v16 }
 0x2c8   :  { %v2334_v52 = vpack.c.b16 %v2333_v50, %v2333_v50 }
 0x2c9   :  { %v7178_v59 = vmul.f32 -1.442695, %v2260_v55 }
 0x2ca   :  { %v8492_v8 = vpop.eup %8491  ;;  %v2335_v32 = vrot.slane %v2334_v52, 2 }
 0x2cb   :  { %v8494_v1 = vpop.eup %8493  ;;  %v2271_v61 = vadd.f32 1.0, %v8492_v8  ;;  %8495 = vpow2.f32 %v7178_v59 }
 0x2cc   :  { %v2272_v31 = vadd.f32 1.0, %v8494_v1  ;;  %v2231_v44 = vpop.f32.mrf.mxu2  ;;  %v2244_v12 = vpop.f32.mrf.mxu3  ;;  %2345 = vmatmul.bf16.vlgmr.msra.gmra.mxu0 %v2335_v32  ;;  %2358 = vmatmul.bf16.vlgmr.msra.gmra.mxu1 %v2335_v32 }
 0x2cd   :  { %8497 = vrcp.f32 %v2271_v61  ;;  %2371 = vmatmul.bf16.vlgmr.msra.gmra.mxu2 %v2335_v32  ;;  %2384 = vmatmul.bf16.vlgmr.msra.gmra.mxu3 %v2335_v32  ;;  %v2285_v45 = vand.u32 2147483648, %v2271_v61  ;;  %v2283_v26 = vand.u32 2147483647, %v2271_v61  ;;  %vm2279_vm14 = vweird.f32 %v2271_v61 }
 0x2ce   :  { %8499 = vrcp.f32 %v2272_v31  ;;  %2607 = vmatpush.bf16.msra.mxu0 %v9035_v22  ;;  %2620 = vmatpush.bf16.msra.mxu1 %v9037_v23  ;;  %v2300_v38 = vand.u32 2147483648, %v2272_v31  ;;  %v2298_v55 = vand.u32 2147483647, %v2272_v31  ;;  %vm2294_vm15 = vweird.f32 %v2272_v31 }
 0x2cf   :  { %2633 = vmatpush.bf16.msra.mxu2 %v9039_v24  ;;  %2646 = vmatpush.bf16.msra.mxu3 %v9041_v28  ;;  %v2286_v52 = vor.u32 1.1754944e-38, %v2285_v45  ;;  %v2321_v44 = vrot.slane %v9568_v17, 2  ;;  %vm2284_vm2 = vcmp.eq.f32.partialorder %v2283_v26, 8.507059e+37 }
 0x2d0   :  { %v2301_v12 = vor.u32 1.1754944e-38, %v2300_v38  ;;  %vm2299_vm3 = vcmp.eq.f32.partialorder %v2298_v55, 8.507059e+37 }
 0x2d1   :  { %v8496_v9 = vpop.eup %8495 }
 0x2d2   :  { %v9635_v25 = vadd.f32 1.0, %v8496_v9  ;;  %2608 = vmatpush.bf16.msra.mxu0 %v9044_v34  ;;  %2621 = vmatpush.bf16.msra.mxu1 %v9048_v35 }
 0x2d3   :  { %v8498_v54 = vpop.eup %8497  ;;  %2634 = vmatpush.bf16.msra.mxu2 %v9050_v36  ;;  %2647 = vmatpush.bf16.msra.mxu3 %v9053_v40 }
 0x2d4   :  { %v8500_v60 = vpop.eup %8499  ;;  %v2275_v30 = vmul.f32 %v8498_v54, %v2271_v61  ;;  %8501 = vrcp.f32 %v9635_v25  ;;  %vm2280_vm12 = vweird.f32 %v8498_v54  ;;  %vm2309_vm5 = vweird.f32 %v9635_v25 }
 0x2d5   :  { %v2290_v3 = vmul.f32 %v8500_v60, %v2272_v31  ;;  %8503 = vtanh.f32 %v2261_v14  ;;  %vm2295_vm13 = vweird.f32 %v8500_v60  ;;  %vm2281_vm0 = vmor %vm2279_vm14, %vm2280_vm12 }
 0x2d6   :  { %v2276_v0 = vsub.f32 1.0, %v2275_v30  ;;  %2609 = vmatpush.bf16.msra.mxu0 %v9059_v46  ;;  %2622 = vmatpush.bf16.msra.mxu1 %v9064_v47  ;;  %vm2296_vm1 = vmor %vm2294_vm15, %vm2295_vm13 }
 0x2d7   :  { %v2291_v29 = vsub.f32 1.0, %v2290_v3  ;;  %2635 = vmatpush.bf16.msra.mxu2 %v9066_v48  ;;  %2648 = vmatpush.bf16.msra.mxu3 %v9069_v2 }
 0x2d8   :  { %v2277_v39 = vmul.f32 %v8498_v54, %v2276_v0  ;;  %v2315_v0 = vand.u32 2147483648, %v9635_v25 }
 0x2d9   :  { %v2292_v10 = vmul.f32 %v8500_v60, %v2291_v29  ;;  %v2313_v29 = vand.u32 2147483647, %v9635_v25 }
 0x2da   :  { %v8502_v50 = vpop.eup %8501  ;;  %v2278_v59 = vadd.f32 %v8498_v54, %v2277_v39  ;;  %2610 = vmatpush.bf16.msra.mxu0 %v9072_v56  ;;  %2623 = vmatpush.bf16.msra.mxu1 %v9076_v57  ;;  %v2316_v38 = vor.u32 1.1754944e-38, %v2315_v0  ;;  %v10957_v0 = vld [vmem:[#allocation31_spill] sm:$0xff] }
 0x2db   :  { %v2305_v8 = vmul.f32 %v8502_v50, %v9635_v25  ;;  %v2293_v1 = vadd.f32 %v8500_v60, %v2292_v10  ;;  %v8504_v13 = vpop.eup %8503  ;;  %2636 = vmatpush.bf16.msra.mxu2 %v9078_v58  ;;  %2649 = vmatpush.bf16.msra.mxu3 %v9081_v62  ;;  %vm2310_vm4 = vweird.f32 %v8502_v50  ;;  %vm2314_vm7 = vcmp.eq.f32.partialorder %v2313_v29, 8.507059e+37  ;;  %v10958_v29 = vld [vmem:[#allocation32_spill] sm:$0xff] }
 0x2dc   :  { %v2282_v32 = vsel %vm2281_vm0, %v8498_v54, %v2278_v59  ;;  %vm2311_vm6 = vmor %vm2309_vm5, %vm2310_vm4 }
 0x2dd   :  { %v2306_v9 = vsub.f32 1.0, %v2305_v8  ;;  %v2287_v14 = vsel %vm2284_vm2, %v2286_v52, %v2282_v32  ;;  %v2297_v61 = vsel %vm2296_vm1, %v8500_v60, %v2293_v1  ;;  %v10942_v8 = vld [vmem:[#allocation16_spill] sm:$0xff]  ;;  %v10943_v52 = vld [vmem:[#allocation17_spill] sm:$0xff]  ;;  %v10944_v1 = vld [vmem:[#allocation18_spill] sm:$0xff] }
 0x2de   :  { %v2302_v31 = vsel %vm2299_vm3, %v2301_v12, %v2297_v61  ;;  %v2324_v30 = vmul.f32 %v8504_v13, %v2287_v14  ;;  %2611 = vmatpush.bf16.msra.mxu0 %v9084_v5  ;;  %2624 = vmatpush.bf16.msra.mxu1 %v9088_v6  ;;  %v10946_v12 = vld [vmem:[#allocation20_spill] sm:$0xff]  ;;  %v10947_v32 = vld [vmem:[#allocation21_spill] sm:$0xff]  ;;  %v10948_v13 = vld [vmem:[#allocation22_spill] sm:$0xff] }
 0x2df   :  { %v2307_v17 = vmul.f32 %v8502_v50, %v2306_v9  ;;  %v2323_v3 = vmul.f32 %v2321_v44, %v2302_v31  ;;  %2637 = vmatpush.bf16.msra.mxu2 %v9090_v7  ;;  %2650 = vmatpush.bf16.msra.mxu3 %v9093_v11  ;;  %v10945_v44 = vld [vmem:[#allocation19_spill] sm:$0xff]  ;;  %v10950_v14 = vld [vmem:[#allocation24_spill] sm:$0xff]  ;;  %v10951_v61 = vld [vmem:[#allocation25_spill] sm:$0xff] }
 0x2e0   :  { %v10949_v9 = vld [vmem:[#allocation23_spill] sm:$0xff]  ;;  %v10952_v31 = vld [vmem:[#allocation26_spill] sm:$0xff] }
 0x2e1   :  { %v9655_v54 = vadd.f32 %v2324_v30, %v2323_v3  ;;  %v2308_v60 = vadd.f32 %v8502_v50, %v2307_v17  ;;  %v10953_v30 = vld [vmem:[#allocation27_spill] sm:$0xff]  ;;  %v10954_v17 = vld [vmem:[#allocation28_spill] sm:$0xff]  ;;  %v10955_v3 = vld [vmem:[#allocation29_spill] sm:$0xff] }
 0x2e2   :  { %2612 = vmatpush.bf16.msra.mxu0 %v9096_v18  ;;  %2625 = vmatpush.bf16.msra.mxu1 %v9100_v19 }
 0x2e3   :  { %8505 = vtanh.f32 %v9655_v54  ;;  %2638 = vmatpush.bf16.msra.mxu2 %v9102_v20  ;;  %2651 = vmatpush.bf16.msra.mxu3 %v9105_v27  ;;  %v2312_v45 = vsel %vm2311_vm6, %v8502_v50, %v2308_v60  ;;  %v10956_v60 = vld [vmem:[#allocation30_spill] sm:$0xff] }
 0x2e4   :  { %v2317_v26 = vsel %vm2314_vm7, %v2316_v38, %v2312_v45  ;;  %v10959_v45 = vld [vmem:[#allocation33_spill] sm:$0xff]  ;;  %v10960_v38 = vld [vmem:[#allocation34_spill] sm:$0xff] }
 0x2e6   :  { %2613 = vmatpush.bf16.msra.mxu0 %v9108_v37  ;;  %2626 = vmatpush.bf16.msra.mxu1 %v9112_v41 }
 0x2e7   :  { %2639 = vmatpush.bf16.msra.mxu2 %v9114_v42  ;;  %2652 = vmatpush.bf16.msra.mxu3 %v9117_v49 }
 0x2e9   :  { %v8506_v39 = vpop.eup %8505 }
 0x2ea   :  { %v2327_v25 = vmul.f32 %v8506_v39, %v2317_v26  ;;  %2614 = vmatpush.bf16.msra.mxu0 %v9120_v15  ;;  %2627 = vmatpush.bf16.msra.mxu1 %v9124_v63  ;;  %v10961_v39 = vld [vmem:[#allocation35_spill] sm:$0xff]  ;;  %v10962_v26 = vld [vmem:[#allocation36_spill] sm:$0xff] }
 0x2eb   :  { %2640 = vmatpush.bf16.msra.mxu2 %v10868_v21  ;;  %2653 = vmatpush.bf16.msra.mxu3 %v10869_v33 }
 0x2ec   :  { %v2330_v10 = vpack.c.bf16 %v2327_v25, %v2327_v25  ;;  %v10963_v25 = vld [vmem:[#allocation37_spill] sm:$0xff] }
 0x2ee   :  { %2331 = vst [vmem:[#allocation2 + $0xc] sm:$0x2] %v2330_v10  ;;  %v2472_v55 = vunpack.c.l.b16 %v2330_v10  ;;  %v10964_v10 = vld [vmem:[#allocation38_spill] sm:$0xff] }
 0x2f0   :  { %v2473_v50 = vpack.c.b16 %v2472_v55, %v2472_v55  ;;  %v10965_v55 = vld [vmem:[#allocation39_spill] sm:$0xff] }
 0x2f2   :  { %v2474_v59 = vrot.slane %v2473_v50, 1  ;;  %v10966_v50 = vld [vmem:[#allocation40_spill] sm:$0xff] }
 0x2f4   :  { %2484 = vmatmul.bf16.vlgmr.msrb.gmra.mxu0 %v2474_v59  ;;  %2497 = vmatmul.bf16.vlgmr.msrb.gmra.mxu1 %v2474_v59 }
 0x2f5   :  { %2510 = vmatmul.bf16.vlgmr.msrb.gmra.mxu2 %v2474_v59  ;;  %2523 = vmatmul.bf16.vlgmr.msrb.gmra.mxu3 %v2474_v59  ;;  %v10967_v59 = vld [vmem:[#allocation41_spill] sm:$0xff] }
 0x2f6   :  { %2729 = vmatpush.bf16.msrb.mxu0 %v10942_v8  ;;  %2742 = vmatpush.bf16.msrb.mxu1 %v10943_v52 }
 0x2f7   :  { %2755 = vmatpush.bf16.msrb.mxu2 %v10944_v1  ;;  %2768 = vmatpush.bf16.msrb.mxu3 %v10945_v44 }
 0x2fa   :  { %2730 = vmatpush.bf16.msrb.mxu0 %v10946_v12  ;;  %2743 = vmatpush.bf16.msrb.mxu1 %v10947_v32 }
 0x2fb   :  { %2756 = vmatpush.bf16.msrb.mxu2 %v10948_v13  ;;  %2769 = vmatpush.bf16.msrb.mxu3 %v10949_v9 }
 0x2fe   :  { %2731 = vmatpush.bf16.msrb.mxu0 %v10950_v14  ;;  %2744 = vmatpush.bf16.msrb.mxu1 %v10951_v61 }
 0x2ff   :  { %2757 = vmatpush.bf16.msrb.mxu2 %v10952_v31  ;;  %2770 = vmatpush.bf16.msrb.mxu3 %v10953_v30 }
 0x302   :  { %2732 = vmatpush.bf16.msrb.mxu0 %v10954_v17  ;;  %2745 = vmatpush.bf16.msrb.mxu1 %v10955_v3  ;;  %v10974_v3 = vld [vmem:[#allocation61_spill] sm:$0xff]  ;;  %v10975_v17 = vld [vmem:[#allocation62_spill] sm:$0xff] }
 0x303   :  { %2758 = vmatpush.bf16.msrb.mxu2 %v10956_v60  ;;  %2771 = vmatpush.bf16.msrb.mxu3 %v10957_v0  ;;  %v10968_v0 = vld [vmem:[#allocation42_spill] sm:$0xff] }
 0x306   :  { %2733 = vmatpush.bf16.msrb.mxu0 %v10958_v29  ;;  %2746 = vmatpush.bf16.msrb.mxu1 %v10959_v45  ;;  %v10969_v29 = vld [vmem:[#allocation43_spill] sm:$0xff]  ;;  %v10970_v45 = vld [vmem:[#allocation44_spill] sm:$0xff] }
 0x307   :  { %2759 = vmatpush.bf16.msrb.mxu2 %v10960_v38  ;;  %2772 = vmatpush.bf16.msrb.mxu3 %v10961_v39  ;;  %v10971_v38 = vld [vmem:[#allocation45_spill] sm:$0xff]  ;;  %v10972_v39 = vld [vmem:[#allocation46_spill] sm:$0xff] }
 0x30a   :  { %2734 = vmatpush.bf16.msrb.mxu0 %v10962_v26  ;;  %2747 = vmatpush.bf16.msrb.mxu1 %v10963_v25  ;;  %v10973_v26 = vld [vmem:[#allocation47_spill] sm:$0xff] }
 0x30b   :  { %2760 = vmatpush.bf16.msrb.mxu2 %v10964_v10  ;;  %2773 = vmatpush.bf16.msrb.mxu3 %v10965_v55 }
 0x30e   :  { %2735 = vmatpush.bf16.msrb.mxu0 %v10966_v50  ;;  %2748 = vmatpush.bf16.msrb.mxu1 %v10967_v59 }
 0x30f   :  { %2761 = vmatpush.bf16.msrb.mxu2 %v10968_v0  ;;  %2774 = vmatpush.bf16.msrb.mxu3 %v10969_v29 }
 0x312   :  { %2736 = vmatpush.bf16.msrb.mxu0 %v10970_v45  ;;  %2749 = vmatpush.bf16.msrb.mxu1 %v10971_v38 }
 0x313   :  { %2762 = vmatpush.bf16.msrb.mxu2 %v10972_v39  ;;  %2775 = vmatpush.bf16.msrb.mxu3 %v10973_v26  ;;  %v10976_v39 = vld [vmem:[#allocation63_spill] sm:$0xff] }
 0x349   :  { %v2346_v25 = vpop.f32.mrf.mxu0  ;;  %v2359_v10 = vpop.f32.mrf.mxu1 }
 0x34a   :  { %v2393_v60 = vrot.slane %v2346_v25, 2  ;;  %v2394_v55 = vrot.slane %v2359_v10, 2 }
 0x34c   :  { %v2401_v50 = vadd.f32 %v2393_v60, %v10974_v3  ;;  %v2402_v59 = vadd.f32 %v2394_v55, %v10975_v17 }
 0x34e   :  { %v7179_v30 = vmul.f32 -1.442695, %v2401_v50  ;;  %v7180_v0 = vmul.f32 -1.442695, %v2402_v59 }
 0x350   :  { %8507 = vpow2.f32 %v7179_v30  ;;  %v2372_v29 = vpop.f32.mrf.mxu2  ;;  %v2385_v31 = vpop.f32.mrf.mxu3 }
 0x351   :  { %8509 = vpow2.f32 %v7180_v0  ;;  %v2395_v45 = vrot.slane %v2372_v29, 2  ;;  %v2348_v38 = vpop.f32.mrf.mxu0  ;;  %v2361_v61 = vpop.f32.mrf.mxu1  ;;  %v2396_v17 = vrot.slane %v2385_v31, 2  ;;  %v10977_v0 = vld [vmem:[#allocation64_spill] sm:$0xff] }
 0x353   :  { %v2403_v14 = vadd.f32 %v2395_v45, %v10976_v39  ;;  %v2404_v29 = vadd.f32 %v2396_v17, %v10977_v0 }
 0x355   :  { %v7181_v26 = vmul.f32 -1.442695, %v2403_v14 }
 0x356   :  { %v8508_v9 = vpop.eup %8507 }
 0x357   :  { %v8510_v13 = vpop.eup %8509  ;;  %v2414_v25 = vadd.f32 1.0, %v8508_v9  ;;  %8511 = vpow2.f32 %v7181_v26 }
 0x358   :  { %v2415_v10 = vadd.f32 1.0, %v8510_v13  ;;  %v2374_v3 = vpop.f32.mrf.mxu2  ;;  %v2387_v60 = vpop.f32.mrf.mxu3 }
 0x359   :  { %8513 = vrcp.f32 %v2414_v25  ;;  %v2428_v59 = vand.u32 2147483648, %v2414_v25  ;;  %v2426_v26 = vand.u32 2147483647, %v2414_v25  ;;  %vm2422_vm10 = vweird.f32 %v2414_v25 }
 0x35a   :  { %8515 = vrcp.f32 %v2415_v10  ;;  %v2443_v9 = vand.u32 2147483648, %v2415_v10  ;;  %v2441_v31 = vand.u32 2147483647, %v2415_v10  ;;  %vm2437_vm11 = vweird.f32 %v2415_v10 }
 0x35b   :  { %v2429_v0 = vor.u32 1.1754944e-38, %v2428_v59  ;;  %vm2427_vm14 = vcmp.eq.f32.partialorder %v2426_v26, 8.507059e+37 }
 0x35c   :  { %vm2442_vm15 = vcmp.eq.f32.partialorder %v2441_v31, 8.507059e+37 }
 0x35d   :  { %v8512_v30 = vpop.eup %8511 }
 0x35e   :  { %v2416_v55 = vadd.f32 1.0, %v8512_v30 }
 0x35f   :  { %v8514_v50 = vpop.eup %8513 }
 0x360   :  { %v8516_v38 = vpop.eup %8515  ;;  %v2418_v61 = vmul.f32 %v8514_v50, %v2414_v25  ;;  %8517 = vrcp.f32 %v2416_v55  ;;  %vm2423_vm8 = vweird.f32 %v8514_v50  ;;  %v2458_v59 = vand.u32 2147483648, %v2416_v55 }
 0x361   :  { %v2433_v45 = vmul.f32 %v8516_v38, %v2415_v10  ;;  %8519 = vtanh.f32 %v2404_v29  ;;  %vm2438_vm9 = vweird.f32 %v8516_v38  ;;  %vm2424_vm12 = vmor %vm2422_vm10, %vm2423_vm8  ;;  %vm2452_vm1 = vweird.f32 %v2416_v55 }
 0x362   :  { %v2419_v14 = vsub.f32 1.0, %v2418_v61  ;;  %v2464_v61 = vrot.slane %v9625_v51, 6  ;;  %vm2439_vm13 = vmor %vm2437_vm11, %vm2438_vm9 }
 0x363   :  { %v2434_v39 = vsub.f32 1.0, %v2433_v45  ;;  %v2444_v45 = vor.u32 1.1754944e-38, %v2443_v9 }
 0x364   :  { %v2420_v13 = vmul.f32 %v8514_v50, %v2419_v14 }
 0x365   :  { %v2435_v3 = vmul.f32 %v8516_v38, %v2434_v39 }
 0x366   :  { %v8518_v60 = vpop.eup %8517  ;;  %v2421_v30 = vadd.f32 %v8514_v50, %v2420_v13 }
 0x367   :  { %v2448_v17 = vmul.f32 %v8518_v60, %v2416_v55  ;;  %v2436_v32 = vadd.f32 %v8516_v38, %v2435_v3  ;;  %v8520_v14 = vpop.eup %8519  ;;  %vm2453_vm0 = vweird.f32 %v8518_v60 }
 0x368   :  { %v2425_v29 = vsel %vm2424_vm12, %v8514_v50, %v2421_v30  ;;  %v2456_v50 = vand.u32 2147483647, %v2416_v55  ;;  %vm2454_vm2 = vmor %vm2452_vm1, %vm2453_vm0 }
 0x369   :  { %v2449_v12 = vsub.f32 1.0, %v2448_v17  ;;  %v2430_v44 = vsel %vm2427_vm14, %v2429_v0, %v2425_v29  ;;  %v2440_v39 = vsel %vm2439_vm13, %v8516_v38, %v2436_v32 }
 0x36a   :  { %v2445_v1 = vsel %vm2442_vm15, %v2444_v45, %v2440_v39  ;;  %v2467_v52 = vmul.f32 %v8520_v14, %v2430_v44  ;;  %vm2457_vm3 = vcmp.eq.f32.partialorder %v2456_v50, 8.507059e+37 }
 0x36b   :  { %v2450_v13 = vmul.f32 %v8518_v60, %v2449_v12  ;;  %v2466_v25 = vmul.f32 %v2464_v61, %v2445_v1  ;;  %v2459_v1 = vor.u32 1.1754944e-38, %v2458_v59 }
 0x36d   :  { %v9712_v10 = vadd.f32 %v2467_v52, %v2466_v25  ;;  %v2451_v8 = vadd.f32 %v8518_v60, %v2450_v13 }
 0x36f   :  { %8521 = vtanh.f32 %v9712_v10  ;;  %v2455_v12 = vsel %vm2454_vm2, %v8518_v60, %v2451_v8 }
 0x370   :  { %v2460_v3 = vsel %vm2457_vm3, %v2459_v1, %v2455_v12 }
 0x371   :  { %v2485_v51 = vpop.f32.mrf.mxu0  ;;  %v2498_v9 = vpop.f32.mrf.mxu1 }
 0x372   :  { %v2528_v26 = vadd.f32 %v2485_v51, %v9420_v53  ;;  %v2529_v32 = vadd.f32 %v2498_v9, %v9427_v43 }
 0x374   :  { %v7182_v38 = vmul.f32 -1.442695, %v2528_v26  ;;  %v7183_v44 = vmul.f32 -1.442695, %v2529_v32 }
 0x375   :  { %v8522_v52 = vpop.eup %8521 }
 0x376   :  { %8523 = vpow2.f32 %v7182_v38  ;;  %v2470_v17 = vmul.f32 %v8522_v52, %v2460_v3 }
 0x377   :  { %8525 = vpow2.f32 %v7183_v44 }
 0x378   :  { %v2511_v31 = vpop.f32.mrf.mxu2  ;;  %v2524_v30 = vpop.f32.mrf.mxu3  ;;  %v2598_v53 = vpack.c.bf16 %v2470_v17, %v2470_v17 }
 0x379   :  { %v2530_v0 = vadd.f32 %v2511_v31, %v9437_v4  ;;  %v2487_v55 = vpop.f32.mrf.mxu0  ;;  %v2500_v61 = vpop.f32.mrf.mxu1  ;;  %v2531_v50 = vadd.f32 %v2524_v30, %v9453_v16 }
 0x37a   :  { %2599 = vst [vmem:[#allocation2] sm:$0x8] %v2598_v53  ;;  %v2603_v29 = vunpack.c.l.b16 %v2598_v53 }
 0x37b   :  { %v7184_v45 = vmul.f32 -1.442695, %v2530_v0 }
 0x37c   :  { %v8524_v43 = vpop.eup %8523  ;;  %v2604_v39 = vpack.c.b16 %v2603_v29, %v2603_v29  ;;  %v2591_v29 = vrot.slane %v9655_v54, 2 }
 0x37d   :  { %v8526_v14 = vpop.eup %8525  ;;  %v2541_v8 = vadd.f32 1.0, %v8524_v43  ;;  %8527 = vpow2.f32 %v7184_v45 }
 0x37e   :  { %v2542_v60 = vadd.f32 1.0, %v8526_v14  ;;  %v2605_v59 = vrot.slane %v2604_v39, 3 }
 0x37f   :  { %8529 = vrcp.f32 %v2541_v8  ;;  %v2555_v1 = vand.u32 2147483648, %v2541_v8  ;;  %v2553_v3 = vand.u32 2147483647, %v2541_v8  ;;  %vm2549_vm6 = vweird.f32 %v2541_v8 }
 0x380   :  { %8531 = vrcp.f32 %v2542_v60  ;;  %v2513_v13 = vpop.f32.mrf.mxu2  ;;  %v2526_v25 = vpop.f32.mrf.mxu3  ;;  %2615 = vmatmul.bf16.vlgmr.msra.gmra.mxu0 %v2605_v59  ;;  %2628 = vmatmul.bf16.vlgmr.msra.gmra.mxu1 %v2605_v59  ;;  %v2570_v16 = vand.u32 2147483648, %v2542_v60  ;;  %v2568_v30 = vand.u32 2147483647, %v2542_v60  ;;  %vm2564_vm7 = vweird.f32 %v2542_v60 }
 0x381   :  { %2641 = vmatmul.bf16.vlgmr.msra.gmra.mxu2 %v2605_v59  ;;  %2654 = vmatmul.bf16.vlgmr.msra.gmra.mxu3 %v2605_v59  ;;  %v2556_v61 = vor.u32 1.1754944e-38, %v2555_v1  ;;  %vm2554_vm10 = vcmp.eq.f32.partialorder %v2553_v3, 8.507059e+37  ;;  %v10980_v3 = vld [vmem:[#allocation18_spill] sm:$0xff] }
 0x382   :  { %2867 = vmatpush.bf16.msra.mxu0 %v9035_v22  ;;  %2880 = vmatpush.bf16.msra.mxu1 %v9037_v23  ;;  %v2571_v45 = vor.u32 1.1754944e-38, %v2570_v16  ;;  %vm2569_vm11 = vcmp.eq.f32.partialorder %v2568_v30, 8.507059e+37  ;;  %v10978_v16 = vld [vmem:[#allocation16_spill] sm:$0xff] }
 0x383   :  { %v8528_v51 = vpop.eup %8527  ;;  %2893 = vmatpush.bf16.msra.mxu2 %v9039_v24  ;;  %2906 = vmatpush.bf16.msra.mxu3 %v9041_v28  ;;  %v10982_v30 = vld [vmem:[#allocation20_spill] sm:$0xff] }
 0x384   :  { %v9718_v4 = vadd.f32 1.0, %v8528_v51 }
 0x385   :  { %v8530_v9 = vpop.eup %8529 }
 0x386   :  { %v8532_v26 = vpop.eup %8531  ;;  %v2545_v32 = vmul.f32 %v8530_v9, %v2541_v8  ;;  %8533 = vrcp.f32 %v9718_v4  ;;  %2868 = vmatpush.bf16.msra.mxu0 %v9044_v34  ;;  %2881 = vmatpush.bf16.msra.mxu1 %v9048_v35  ;;  %vm2550_vm4 = vweird.f32 %v8530_v9  ;;  %vm2579_vm13 = vweird.f32 %v9718_v4 }
 0x387   :  { %v2560_v38 = vmul.f32 %v8532_v26, %v2542_v60  ;;  %8535 = vtanh.f32 %v2531_v50  ;;  %2894 = vmatpush.bf16.msra.mxu2 %v9050_v36  ;;  %2907 = vmatpush.bf16.msra.mxu3 %v9053_v40  ;;  %vm2565_vm5 = vweird.f32 %v8532_v26  ;;  %vm2551_vm8 = vmor %vm2549_vm6, %vm2550_vm4  ;;  %v2585_v50 = vand.u32 2147483648, %v9718_v4 }
 0x388   :  { %v2546_v44 = vsub.f32 1.0, %v2545_v32  ;;  %vm2566_vm9 = vmor %vm2564_vm7, %vm2565_vm5 }
 0x389   :  { %v2561_v12 = vsub.f32 1.0, %v2560_v38  ;;  %v2586_v38 = vor.u32 1.1754944e-38, %v2585_v50  ;;  %v11000_v50 = vld [vmem:[#allocation38_spill] sm:$0xff] }
 0x38a   :  { %v2547_v52 = vmul.f32 %v8530_v9, %v2546_v44  ;;  %2869 = vmatpush.bf16.msra.mxu0 %v9059_v46  ;;  %2882 = vmatpush.bf16.msra.mxu1 %v9064_v47 }
 0x38b   :  { %v2562_v31 = vmul.f32 %v8532_v26, %v2561_v12  ;;  %2895 = vmatpush.bf16.msra.mxu2 %v9066_v48  ;;  %2908 = vmatpush.bf16.msra.mxu3 %v9069_v2 }
 0x38c   :  { %v8534_v17 = vpop.eup %8533  ;;  %v2548_v0 = vadd.f32 %v8530_v9, %v2547_v52  ;;  %v10979_v52 = vld [vmem:[#allocation17_spill] sm:$0xff] }
 0x38d   :  { %v2575_v55 = vmul.f32 %v8534_v17, %v9718_v4  ;;  %v2563_v53 = vadd.f32 %v8532_v26, %v2562_v31  ;;  %v8536_v14 = vpop.eup %8535  ;;  %vm2580_vm12 = vweird.f32 %v8534_v17  ;;  %v10981_v31 = vld [vmem:[#allocation19_spill] sm:$0xff] }
 0x38e   :  { %v2552_v43 = vsel %vm2551_vm8, %v8530_v9, %v2548_v0  ;;  %2870 = vmatpush.bf16.msra.mxu0 %v9072_v56  ;;  %2883 = vmatpush.bf16.msra.mxu1 %v9076_v57  ;;  %vm2581_vm14 = vmor %vm2579_vm13, %vm2580_vm12  ;;  %v10984_v0 = vld [vmem:[#allocation22_spill] sm:$0xff] }
 0x38f   :  { %v2576_v8 = vsub.f32 1.0, %v2575_v55  ;;  %v2557_v60 = vsel %vm2554_vm10, %v2556_v61, %v2552_v43  ;;  %v2567_v39 = vsel %vm2566_vm9, %v8532_v26, %v2563_v53  ;;  %2896 = vmatpush.bf16.msra.mxu2 %v9078_v58  ;;  %2909 = vmatpush.bf16.msra.mxu3 %v9081_v62  ;;  %v2583_v26 = vand.u32 2147483647, %v9718_v4  ;;  %v10985_v55 = vld [vmem:[#allocation23_spill] sm:$0xff]  ;;  %v10986_v61 = vld [vmem:[#allocation24_spill] sm:$0xff]  ;;  %v10987_v53 = vld [vmem:[#allocation25_spill] sm:$0xff] }
 0x390   :  { %v2572_v13 = vsel %vm2569_vm11, %v2571_v45, %v2567_v39  ;;  %v2594_v25 = vmul.f32 %v8536_v14, %v2557_v60  ;;  %v10988_v45 = vld [vmem:[#allocation26_spill] sm:$0xff]  ;;  %v10989_v43 = vld [vmem:[#allocation27_spill] sm:$0xff]  ;;  %v10991_v14 = vld [vmem:[#allocation29_spill] sm:$0xff] }
 0x391   :  { %v2577_v59 = vmul.f32 %v8534_v17, %v2576_v8  ;;  %v2593_v51 = vmul.f32 %v2591_v29, %v2572_v13  ;;  %vm2584_vm15 = vcmp.eq.f32.partialorder %v2583_v26, 8.507059e+37  ;;  %v10990_v29 = vld [vmem:[#allocation28_spill] sm:$0xff]  ;;  %v10992_v8 = vld [vmem:[#allocation30_spill] sm:$0xff]  ;;  %v10993_v60 = vld [vmem:[#allocation31_spill] sm:$0xff] }
 0x392   :  { %2871 = vmatpush.bf16.msra.mxu0 %v9084_v5  ;;  %2884 = vmatpush.bf16.msra.mxu1 %v9088_v6  ;;  %v10994_v39 = vld [vmem:[#allocation32_spill] sm:$0xff]  ;;  %v10995_v13 = vld [vmem:[#allocation33_spill] sm:$0xff]  ;;  %v11001_v26 = vld [vmem:[#allocation39_spill] sm:$0xff] }
 0x393   :  { %v9740_v54 = vadd.f32 %v2594_v25, %v2593_v51  ;;  %v2578_v9 = vadd.f32 %v8534_v17, %v2577_v59  ;;  %2897 = vmatpush.bf16.msra.mxu2 %v9090_v7  ;;  %2910 = vmatpush.bf16.msra.mxu3 %v9093_v11  ;;  %v10996_v25 = vld [vmem:[#allocation34_spill] sm:$0xff]  ;;  %v10997_v59 = vld [vmem:[#allocation35_spill] sm:$0xff]  ;;  %v10998_v51 = vld [vmem:[#allocation36_spill] sm:$0xff] }
 0x395   :  { %8537 = vtanh.f32 %v9740_v54  ;;  %v2582_v32 = vsel %vm2581_vm14, %v8534_v17, %v2578_v9  ;;  %v10983_v17 = vld [vmem:[#allocation21_spill] sm:$0xff] }
 0x396   :  { %2872 = vmatpush.bf16.msra.mxu0 %v9096_v18  ;;  %2885 = vmatpush.bf16.msra.mxu1 %v9100_v19  ;;  %v2587_v12 = vsel %vm2584_vm15, %v2586_v38, %v2582_v32  ;;  %v10999_v9 = vld [vmem:[#allocation37_spill] sm:$0xff]  ;;  %v11002_v32 = vld [vmem:[#allocation40_spill] sm:$0xff] }
 0x397   :  { %2898 = vmatpush.bf16.msra.mxu2 %v9102_v20  ;;  %2911 = vmatpush.bf16.msra.mxu3 %v9105_v27  ;;  %v11003_v38 = vld [vmem:[#allocation41_spill] sm:$0xff] }
 0x39a   :  { %2873 = vmatpush.bf16.msra.mxu0 %v9108_v37  ;;  %2886 = vmatpush.bf16.msra.mxu1 %v9112_v41 }
 0x39b   :  { %v8538_v44 = vpop.eup %8537  ;;  %2899 = vmatpush.bf16.msra.mxu2 %v9114_v42  ;;  %2912 = vmatpush.bf16.msra.mxu3 %v9117_v49 }
 0x39c   :  { %v2597_v1 = vmul.f32 %v8538_v44, %v2587_v12  ;;  %v11004_v44 = vld [vmem:[#allocation42_spill] sm:$0xff]  ;;  %v11005_v12 = vld [vmem:[#allocation43_spill] sm:$0xff] }
 0x39e   :  { %v2600_v4 = vpack.c.bf16 %v2597_v1, %v2597_v1  ;;  %2874 = vmatpush.bf16.msra.mxu0 %v9120_v15  ;;  %2887 = vmatpush.bf16.msra.mxu1 %v9124_v63  ;;  %v11006_v1 = vld [vmem:[#allocation44_spill] sm:$0xff] }
 0x39f   :  { %2900 = vmatpush.bf16.msra.mxu2 %v10868_v21  ;;  %2913 = vmatpush.bf16.msra.mxu3 %v10869_v33 }
 0x3a0   :  { %2601 = vst [vmem:[#allocation2 + $0xc] sm:$0x1] %v2600_v4  ;;  %2737 = vmatmul.bf16.vlgmr.msrb.gmra.mxu0 %v2600_v4  ;;  %2750 = vmatmul.bf16.vlgmr.msrb.gmra.mxu1 %v2600_v4 }
 0x3a1   :  { %2763 = vmatmul.bf16.vlgmr.msrb.gmra.mxu2 %v2600_v4  ;;  %2776 = vmatmul.bf16.vlgmr.msrb.gmra.mxu3 %v2600_v4  ;;  %v11007_v4 = vld [vmem:[#allocation45_spill] sm:$0xff] }
 0x3a2   :  { %3006 = vmatpush.bf16.msrb.mxu0 %v10978_v16  ;;  %3019 = vmatpush.bf16.msrb.mxu1 %v10979_v52 }
 0x3a3   :  { %3032 = vmatpush.bf16.msrb.mxu2 %v10980_v3  ;;  %3045 = vmatpush.bf16.msrb.mxu3 %v10981_v31  ;;  %v11027_v3 = vld [vmem:[#allocation56_spill] sm:$0xff] }
 0x3a6   :  { %3007 = vmatpush.bf16.msrb.mxu0 %v10982_v30  ;;  %3020 = vmatpush.bf16.msrb.mxu1 %v10983_v17 }
 0x3a7   :  { %3033 = vmatpush.bf16.msrb.mxu2 %v10984_v0  ;;  %3046 = vmatpush.bf16.msrb.mxu3 %v10985_v55 }
 0x3aa   :  { %3008 = vmatpush.bf16.msrb.mxu0 %v10986_v61  ;;  %3021 = vmatpush.bf16.msrb.mxu1 %v10987_v53 }
 0x3ab   :  { %3034 = vmatpush.bf16.msrb.mxu2 %v10988_v45  ;;  %3047 = vmatpush.bf16.msrb.mxu3 %v10989_v43 }
 0x3ae   :  { %3009 = vmatpush.bf16.msrb.mxu0 %v10990_v29  ;;  %3022 = vmatpush.bf16.msrb.mxu1 %v10991_v14  ;;  %v11020_v14 = vld [vmem:[#allocation52_spill] sm:$0xff] }
 0x3af   :  { %3035 = vmatpush.bf16.msrb.mxu2 %v10992_v8  ;;  %3048 = vmatpush.bf16.msrb.mxu3 %v10993_v60 }
 0x3b2   :  { %3010 = vmatpush.bf16.msrb.mxu0 %v10994_v39  ;;  %3023 = vmatpush.bf16.msrb.mxu1 %v10995_v13  ;;  %v11014_v13 = vld [vmem:[#allocation50_spill] sm:$0xff]  ;;  %v11015_v39 = vld [vmem:[#allocation49_spill] sm:$0xff] }
 0x3b3   :  { %3036 = vmatpush.bf16.msrb.mxu2 %v10996_v25  ;;  %3049 = vmatpush.bf16.msrb.mxu3 %v10997_v59  ;;  %v11008_v59 = vld [vmem:[#allocation46_spill] sm:$0xff]  ;;  %v11012_v25 = vld [vmem:[#allocation48_spill] sm:$0xff] }
 0x3b6   :  { %3011 = vmatpush.bf16.msrb.mxu0 %v10998_v51  ;;  %3024 = vmatpush.bf16.msrb.mxu1 %v10999_v9  ;;  %v11009_v51 = vld [vmem:[#allocation47_spill] sm:$0xff]  ;;  %v11010_v9 = vld [vmem:[#allocation60_spill] sm:$0xff] }
 0x3b7   :  { %3037 = vmatpush.bf16.msrb.mxu2 %v11000_v50  ;;  %3050 = vmatpush.bf16.msrb.mxu3 %v11001_v26  ;;  %v11011_v50 = vperm.slane %v11010_v9, 0  ;;  %v11019_v8 = vperm.slane %v11010_v9, 2 }
 0x3b9   :  { %v526_v26 = vadd.f32 %v11012_v25, %v11011_v50  ;;  %v582_v25 = vadd.f32 %v11020_v14, %v11019_v8  ;;  %v11023_v14 = vperm.slane %v11010_v9, 3  ;;  %v11024_v8 = vld [vmem:[#allocation54_spill] sm:$0xff] }
 0x3ba   :  { %3012 = vmatpush.bf16.msrb.mxu0 %v11002_v32  ;;  %3025 = vmatpush.bf16.msrb.mxu1 %v11003_v38  ;;  %v11013_v32 = vperm.slane %v11010_v9, 1 }
 0x3bb   :  { %3038 = vmatpush.bf16.msrb.mxu2 %v11004_v44  ;;  %3051 = vmatpush.bf16.msrb.mxu3 %v11005_v12  ;;  %v9801_v44 = vadd.f32 %v11015_v39, %v526_v26  ;;  %v11017_v12 = vld [vmem:[#allocation51_spill] sm:$0xff] }
 0x3bc   :  { %v554_v38 = vadd.f32 %v11014_v13, %v11013_v32  ;;  %v11021_v13 = vld [vmem:[#allocation53_spill] sm:$0xff] }
 0x3bd   :  { %11016 = vst [vmem:[#allocation14_spill] sm:$0xff] %v9801_v44  ;;  %v9812_v32 = vadd.f32 %v11021_v13, %v582_v25 }
 0x3be   :  { %3013 = vmatpush.bf16.msrb.mxu0 %v11006_v1  ;;  %3026 = vmatpush.bf16.msrb.mxu1 %v11007_v4  ;;  %v9804_v60 = vadd.f32 %v11017_v12, %v554_v38 }
 0x3bf   :  { %3039 = vmatpush.bf16.msrb.mxu2 %v11008_v59  ;;  %3052 = vmatpush.bf16.msrb.mxu3 %v11009_v51  ;;  %11022 = vst [vmem:[#allocation61_spill] sm:$0xff] %v9812_v32 }
 0x3c0   :  { %11018 = vst [vmem:[#allocation15_spill] sm:$0xff] %v9804_v60 }
 0x3fd   :  { %v2616_v1 = vpop.f32.mrf.mxu0  ;;  %v2629_v4 = vpop.f32.mrf.mxu1 }
 0x3fe   :  { %v2659_v59 = vadd.f32 %v2616_v1, %v9801_v44  ;;  %v2660_v51 = vadd.f32 %v2629_v4, %v9804_v60 }
 0x400   :  { %v7185_v50 = vmul.f32 -1.442695, %v2659_v59  ;;  %v7186_v29 = vmul.f32 -1.442695, %v2660_v51  ;;  %v610_v59 = vadd.f32 %v11024_v8, %v11023_v14 }
 0x402   :  { %8539 = vpow2.f32 %v7185_v50  ;;  %v11025_v50 = vld [vmem:[#allocation55_spill] sm:$0xff] }
 0x403   :  { %8541 = vpow2.f32 %v7186_v29  ;;  %v9819_v13 = vadd.f32 %v11025_v50, %v610_v59 }
 0x404   :  { %v2642_v39 = vpop.f32.mrf.mxu2  ;;  %v2655_v26 = vpop.f32.mrf.mxu3 }
 0x405   :  { %v2661_v38 = vadd.f32 %v2642_v39, %v9812_v32  ;;  %v2618_v12 = vpop.f32.mrf.mxu0  ;;  %v2631_v43 = vpop.f32.mrf.mxu1  ;;  %11026 = vst [vmem:[#allocation62_spill] sm:$0xff] %v9819_v13 }
 0x407   :  { %v7187_v1 = vmul.f32 -1.442695, %v2661_v38  ;;  %v2662_v38 = vadd.f32 %v2655_v26, %v9819_v13  ;;  %v2722_v26 = vrot.slane %v9712_v10, 6 }
 0x408   :  { %v8540_v44 = vpop.eup %8539 }
 0x409   :  { %v8542_v4 = vpop.eup %8541  ;;  %v2672_v60 = vadd.f32 1.0, %v8540_v44  ;;  %8543 = vpow2.f32 %v7187_v1 }
 0x40a   :  { %v2673_v45 = vadd.f32 1.0, %v8542_v4 }
 0x40b   :  { %8545 = vrcp.f32 %v2672_v60  ;;  %v2684_v14 = vand.u32 2147483647, %v2672_v60  ;;  %v2686_v8 = vand.u32 2147483648, %v2672_v60  ;;  %vm2680_vm2 = vweird.f32 %v2672_v60 }
 0x40c   :  { %8547 = vrcp.f32 %v2673_v45  ;;  %v2644_v51 = vpop.f32.mrf.mxu2  ;;  %v2657_v29 = vpop.f32.mrf.mxu3  ;;  %v2699_v59 = vand.u32 2147483647, %v2673_v45  ;;  %vm2695_vm3 = vweird.f32 %v2673_v45 }
 0x40d   :  { %v2701_v51 = vand.u32 2147483648, %v2673_v45  ;;  %vm2685_vm6 = vcmp.eq.f32.partialorder %v2684_v14, 8.507059e+37 }
 0x40e   :  { %vm2700_vm7 = vcmp.eq.f32.partialorder %v2699_v59, 8.507059e+37 }
 0x40f   :  { %v8544_v25 = vpop.eup %8543  ;;  %v2702_v53 = vor.u32 1.1754944e-38, %v2701_v51 }
 0x410   :  { %v9821_v39 = vadd.f32 1.0, %v8544_v25 }
 0x411   :  { %v8546_v43 = vpop.eup %8545 }
 0x412   :  { %v8548_v44 = vpop.eup %8547  ;;  %v2676_v12 = vmul.f32 %v8546_v43, %v2672_v60  ;;  %8549 = vrcp.f32 %v9821_v39  ;;  %vm2681_vm0 = vweird.f32 %v8546_v43  ;;  %vm2710_vm9 = vweird.f32 %v9821_v39 }
 0x413   :  { %v2691_v9 = vmul.f32 %v8548_v44, %v2673_v45  ;;  %8551 = vtanh.f32 %v2662_v38  ;;  %vm2696_vm1 = vweird.f32 %v8548_v44  ;;  %vm2682_vm4 = vmor %vm2680_vm2, %vm2681_vm0 }
 0x414   :  { %v2677_v1 = vsub.f32 1.0, %v2676_v12  ;;  %v2687_v12 = vor.u32 1.1754944e-38, %v2686_v8  ;;  %vm2697_vm5 = vmor %vm2695_vm3, %vm2696_vm1 }
 0x415   :  { %v2692_v4 = vsub.f32 1.0, %v2691_v9 }
 0x416   :  { %v2678_v29 = vmul.f32 %v8546_v43, %v2677_v1 }
 0x417   :  { %v2693_v50 = vmul.f32 %v8548_v44, %v2692_v4 }
 0x418   :  { %v8550_v25 = vpop.eup %8549  ;;  %v2679_v32 = vadd.f32 %v8546_v43, %v2678_v29 }
 0x419   :  { %v2706_v13 = vmul.f32 %v8550_v25, %v9821_v39  ;;  %v2694_v9 = vadd.f32 %v8548_v44, %v2693_v50  ;;  %v8552_v4 = vpop.eup %8551  ;;  %v11028_v50 = vld [vmem:[#allocation57_spill] sm:$0xff]  ;;  %vm2711_vm8 = vweird.f32 %v8550_v25 }
 0x41a   :  { %v2683_v38 = vsel %vm2682_vm4, %v8546_v43, %v2679_v32  ;;  %vm2712_vm10 = vmor %vm2710_vm9, %vm2711_vm8 }
 0x41b   :  { %v2707_v55 = vsub.f32 1.0, %v2706_v13  ;;  %v2688_v0 = vsel %vm2685_vm6, %v2687_v12, %v2683_v38  ;;  %v2698_v29 = vsel %vm2697_vm5, %v8548_v44, %v2694_v9  ;;  %v2716_v13 = vand.u32 2147483648, %v9821_v39 }
 0x41c   :  { %v2703_v17 = vsel %vm2700_vm7, %v2702_v53, %v2698_v29  ;;  %v2725_v10 = vmul.f32 %v8552_v4, %v2688_v0 }
 0x41d   :  { %v2738_v1 = vpop.f32.mrf.mxu0  ;;  %v2751_v61 = vpop.f32.mrf.mxu1  ;;  %v2708_v30 = vmul.f32 %v8550_v25, %v2707_v55  ;;  %v2724_v31 = vmul.f32 %v2722_v26, %v2703_v17  ;;  %v2714_v17 = vand.u32 2147483647, %v9821_v39 }
 0x41e   :  { %v2785_v60 = vrot.slane %v2738_v1, 2  ;;  %v2786_v45 = vrot.slane %v2751_v61, 2 }
 0x41f   :  { %v9829_v51 = vadd.f32 %v2725_v10, %v2724_v31  ;;  %v2709_v14 = vadd.f32 %v8550_v25, %v2708_v30  ;;  %v11029_v31 = vld [vmem:[#allocation58_spill] sm:$0xff]  ;;  %v2717_v30 = vor.u32 1.1754944e-38, %v2716_v13  ;;  %vm2715_vm11 = vcmp.eq.f32.partialorder %v2714_v17, 8.507059e+37 }
 0x420   :  { %v2793_v8 = vadd.f32 %v2785_v60, %v11027_v3  ;;  %v2794_v52 = vadd.f32 %v2786_v45, %v11028_v50 }
 0x421   :  { %8553 = vtanh.f32 %v9829_v51 }
 0x422   :  { %v7188_v32 = vmul.f32 -1.442695, %v2793_v8  ;;  %v7189_v43 = vmul.f32 -1.442695, %v2794_v52  ;;  %v2713_v52 = vsel %vm2712_vm10, %v8550_v25, %v2709_v14  ;;  %v11030_v14 = vld [vmem:[#allocation59_spill] sm:$0xff] }
 0x423   :  { %v2718_v9 = vsel %vm2715_vm11, %v2717_v30, %v2713_v52 }
 0x424   :  { %v2764_v44 = vpop.f32.mrf.mxu2  ;;  %v2777_v53 = vpop.f32.mrf.mxu3  ;;  %8555 = vpow2.f32 %v7188_v32 }
 0x425   :  { %v2787_v0 = vrot.slane %v2764_v44, 2  ;;  %v2740_v55 = vpop.f32.mrf.mxu0  ;;  %v2753_v61 = vpop.f32.mrf.mxu1  ;;  %8557 = vpow2.f32 %v7189_v43  ;;  %v2788_v25 = vrot.slane %v2777_v53, 2 }
 0x427   :  { %v2795_v59 = vadd.f32 %v2787_v0, %v11029_v31  ;;  %v8554_v12 = vpop.eup %8553  ;;  %v2796_v13 = vadd.f32 %v2788_v25, %v11030_v14 }
 0x428   :  { %v2728_v1 = vmul.f32 %v8554_v12, %v2718_v9 }
 0x429   :  { %v7190_v26 = vmul.f32 -1.442695, %v2795_v59 }
 0x42a   :  { %v8556_v38 = vpop.eup %8555  ;;  %v2863_v45 = vpack.c.bf16 %v2728_v1, %v2728_v1 }
 0x42b   :  { %8559 = vpow2.f32 %v7190_v26  ;;  %v8558_v4 = vpop.eup %8557  ;;  %v2806_v29 = vadd.f32 1.0, %v8556_v38 }
 0x42c   :  { %v2766_v39 = vpop.f32.mrf.mxu2  ;;  %v2779_v60 = vpop.f32.mrf.mxu3  ;;  %v2807_v10 = vadd.f32 1.0, %v8558_v4  ;;  %2864 = vst [vmem:[#allocation2 + $0x8] sm:$0x1] %v2863_v45  ;;  %2875 = vmatmul.bf16.vlgmr.msra.gmra.mxu0 %v2863_v45  ;;  %2888 = vmatmul.bf16.vlgmr.msra.gmra.mxu1 %v2863_v45 }
 0x42d   :  { %8561 = vrcp.f32 %v2806_v29  ;;  %2901 = vmatmul.bf16.vlgmr.msra.gmra.mxu2 %v2863_v45  ;;  %2914 = vmatmul.bf16.vlgmr.msra.gmra.mxu3 %v2863_v45  ;;  %v2820_v61 = vand.u32 2147483648, %v2806_v29  ;;  %v2818_v30 = vand.u32 2147483647, %v2806_v29  ;;  %vm2814_vm14 = vweird.f32 %v2806_v29  ;;  %v11034_v60 = vld [vmem:[#allocation18_spill] sm:$0xff] }
 0x42e   :  { %8563 = vrcp.f32 %v2807_v10  ;;  %3149 = vmatpush.bf16.msra.mxu0 %v9035_v22  ;;  %3162 = vmatpush.bf16.msra.mxu1 %v9037_v23  ;;  %v2835_v59 = vand.u32 2147483648, %v2807_v10  ;;  %v2833_v9 = vand.u32 2147483647, %v2807_v10  ;;  %vm2829_vm15 = vweird.f32 %v2807_v10 }
 0x42f   :  { %3175 = vmatpush.bf16.msra.mxu2 %v9039_v24  ;;  %3188 = vmatpush.bf16.msra.mxu3 %v9041_v28  ;;  %v2821_v4 = vor.u32 1.1754944e-38, %v2820_v61  ;;  %vm2819_vm2 = vcmp.eq.f32.partialorder %v2818_v30, 8.507059e+37 }
 0x430   :  { %v2836_v45 = vor.u32 1.1754944e-38, %v2835_v59  ;;  %vm2834_vm3 = vcmp.eq.f32.partialorder %v2833_v9, 8.507059e+37 }
 0x431   :  { %v8560_v8 = vpop.eup %8559 }
 0x432   :  { %v9838_v32 = vadd.f32 1.0, %v8560_v8  ;;  %3150 = vmatpush.bf16.msra.mxu0 %v9044_v34  ;;  %3163 = vmatpush.bf16.msra.mxu1 %v9048_v35 }
 0x433   :  { %v8562_v43 = vpop.eup %8561  ;;  %3176 = vmatpush.bf16.msra.mxu2 %v9050_v36  ;;  %3189 = vmatpush.bf16.msra.mxu3 %v9053_v40 }
 0x434   :  { %8565 = vrcp.f32 %v9838_v32  ;;  %v8564_v44 = vpop.eup %8563  ;;  %v2810_v53 = vmul.f32 %v8562_v43, %v2806_v29  ;;  %vm2815_vm12 = vweird.f32 %v8562_v43  ;;  %vm2844_vm5 = vweird.f32 %v9838_v32 }
 0x435   :  { %v2825_v17 = vmul.f32 %v8564_v44, %v2807_v10  ;;  %8567 = vtanh.f32 %v2796_v13  ;;  %vm2830_vm13 = vweird.f32 %v8564_v44  ;;  %vm2816_vm0 = vmor %vm2814_vm14, %vm2815_vm12  ;;  %v2848_v59 = vand.u32 2147483647, %v9838_v32 }
 0x436   :  { %v2811_v0 = vsub.f32 1.0, %v2810_v53  ;;  %3151 = vmatpush.bf16.msra.mxu0 %v9059_v46  ;;  %3164 = vmatpush.bf16.msra.mxu1 %v9064_v47  ;;  %vm9853_vm1 = vmor %vm2829_vm15, %vm2830_vm13  ;;  %v2856_v53 = vrot.slane %v9740_v54, 2 }
 0x437   :  { %v2826_v55 = vsub.f32 1.0, %v2825_v17  ;;  %3177 = vmatpush.bf16.msra.mxu2 %v9066_v48  ;;  %3190 = vmatpush.bf16.msra.mxu3 %v9069_v2  ;;  %vm2849_vm7 = vcmp.eq.f32.partialorder %v2848_v59, 8.507059e+37  ;;  %v11048_v59 = vld [vmem:[#allocation32_spill] sm:$0xff] }
 0x438   :  { %v2812_v52 = vmul.f32 %v8562_v43, %v2811_v0 }
 0x439   :  { %v2827_v12 = vmul.f32 %v8564_v44, %v2826_v55 }
 0x43a   :  { %v8566_v26 = vpop.eup %8565  ;;  %v2813_v1 = vadd.f32 %v8562_v43, %v2812_v52  ;;  %3152 = vmatpush.bf16.msra.mxu0 %v9072_v56  ;;  %3165 = vmatpush.bf16.msra.mxu1 %v9076_v57 }
 0x43b   :  { %v2840_v38 = vmul.f32 %v8566_v26, %v9838_v32  ;;  %v2828_v39 = vadd.f32 %v8564_v44, %v2827_v12  ;;  %v8568_v13 = vpop.eup %8567  ;;  %3178 = vmatpush.bf16.msra.mxu2 %v9078_v58  ;;  %3191 = vmatpush.bf16.msra.mxu3 %v9081_v62  ;;  %vm2845_vm4 = vweird.f32 %v8566_v26 }
 0x43c   :  { %v2817_v8 = vsel %vm2816_vm0, %v8562_v43, %v2813_v1  ;;  %vm2846_vm6 = vmor %vm2844_vm5, %vm2845_vm4 }
 0x43d   :  { %v2841_v25 = vsub.f32 1.0, %v2840_v38  ;;  %v2822_v29 = vsel %vm2819_vm2, %v2821_v4, %v2817_v8  ;;  %v2832_v10 = vsel %vm9853_vm1, %v8564_v44, %v2828_v39  ;;  %v2850_v44 = vand.u32 2147483648, %v9838_v32  ;;  %v11033_v39 = vld [vmem:[#allocation17_spill] sm:$0xff] }
 0x43e   :  { %v2837_v0 = vsel %vm2834_vm3, %v2836_v45, %v2832_v10  ;;  %v2859_v43 = vmul.f32 %v8568_v13, %v2822_v29  ;;  %3153 = vmatpush.bf16.msra.mxu0 %v9084_v5  ;;  %3166 = vmatpush.bf16.msra.mxu1 %v9088_v6  ;;  %v11035_v45 = vld [vmem:[#allocation19_spill] sm:$0xff]  ;;  %v11037_v8 = vld [vmem:[#allocation21_spill] sm:$0xff]  ;;  %v11038_v13 = vld [vmem:[#allocation22_spill] sm:$0xff] }
 0x43f   :  { %v2842_v17 = vmul.f32 %v8566_v26, %v2841_v25  ;;  %v2858_v55 = vmul.f32 %v2856_v53, %v2837_v0  ;;  %3179 = vmatpush.bf16.msra.mxu2 %v9090_v7  ;;  %3192 = vmatpush.bf16.msra.mxu3 %v9093_v11  ;;  %v2851_v30 = vor.u32 1.1754944e-38, %v2850_v44  ;;  %v11036_v25 = vld [vmem:[#allocation20_spill] sm:$0xff]  ;;  %v11039_v53 = vld [vmem:[#allocation23_spill] sm:$0xff]  ;;  %v11041_v10 = vld [vmem:[#allocation25_spill] sm:$0xff] }
 0x440   :  { %v11040_v29 = vld [vmem:[#allocation24_spill] sm:$0xff]  ;;  %v11043_v0 = vld [vmem:[#allocation27_spill] sm:$0xff] }
 0x441   :  { %v9866_v61 = vadd.f32 %v2859_v43, %v2858_v55  ;;  %v2843_v54 = vadd.f32 %v8566_v26, %v2842_v17  ;;  %v11042_v17 = vld [vmem:[#allocation26_spill] sm:$0xff]  ;;  %v11044_v43 = vld [vmem:[#allocation28_spill] sm:$0xff]  ;;  %v11045_v55 = vld [vmem:[#allocation29_spill] sm:$0xff] }
 0x442   :  { %3154 = vmatpush.bf16.msra.mxu0 %v9096_v18  ;;  %3167 = vmatpush.bf16.msra.mxu1 %v9100_v19  ;;  %v11047_v44 = vld [vmem:[#allocation31_spill] sm:$0xff] }
 0x443   :  { %8569 = vtanh.f32 %v9866_v61  ;;  %3180 = vmatpush.bf16.msra.mxu2 %v9102_v20  ;;  %3193 = vmatpush.bf16.msra.mxu3 %v9105_v27  ;;  %v2847_v52 = vsel %vm2846_vm6, %v8566_v26, %v2843_v54  ;;  %v11046_v54 = vld [vmem:[#allocation30_spill] sm:$0xff] }
 0x444   :  { %v2852_v9 = vsel %vm2849_vm7, %v2851_v30, %v2847_v52  ;;  %v11049_v52 = vld [vmem:[#allocation33_spill] sm:$0xff]  ;;  %v11050_v30 = vld [vmem:[#allocation34_spill] sm:$0xff] }
 0x446   :  { %3155 = vmatpush.bf16.msra.mxu0 %v9108_v37  ;;  %3168 = vmatpush.bf16.msra.mxu1 %v9112_v41 }
 0x447   :  { %3181 = vmatpush.bf16.msra.mxu2 %v9114_v42  ;;  %3194 = vmatpush.bf16.msra.mxu3 %v9117_v49 }
 0x449   :  { %v8570_v12 = vpop.eup %8569 }
 0x44a   :  { %v2862_v32 = vmul.f32 %v8570_v12, %v2852_v9  ;;  %3156 = vmatpush.bf16.msra.mxu0 %v9120_v15  ;;  %3169 = vmatpush.bf16.msra.mxu1 %v9124_v63  ;;  %v11051_v12 = vld [vmem:[#allocation35_spill] sm:$0xff]  ;;  %v11052_v9 = vld [vmem:[#allocation36_spill] sm:$0xff] }
 0x44b   :  { %3182 = vmatpush.bf16.msra.mxu2 %v10868_v21  ;;  %3195 = vmatpush.bf16.msra.mxu3 %v10869_v33 }
 0x44c   :  { %v2865_v38 = vpack.c.bf16 %v2862_v32, %v2862_v32  ;;  %v11053_v32 = vld [vmem:[#allocation37_spill] sm:$0xff] }
 0x44e   :  { %2866 = vst [vmem:[#allocation2 + $0x4] sm:$0x8] %v2865_v38  ;;  %v3002_v26 = vunpack.c.l.b16 %v2865_v38  ;;  %v11054_v38 = vld [vmem:[#allocation38_spill] sm:$0xff] }
 0x450   :  { %v3003_v1 = vpack.c.b16 %v3002_v26, %v3002_v26  ;;  %v11055_v26 = vld [vmem:[#allocation39_spill] sm:$0xff] }
 0x452   :  { %v3004_v4 = vrot.slane %v3003_v1, 3  ;;  %v11056_v1 = vld [vmem:[#allocation40_spill] sm:$0xff] }
 0x454   :  { %3014 = vmatmul.bf16.vlgmr.msrb.gmra.mxu0 %v3004_v4  ;;  %3027 = vmatmul.bf16.vlgmr.msrb.gmra.mxu1 %v3004_v4 }
 0x455   :  { %3040 = vmatmul.bf16.vlgmr.msrb.gmra.mxu2 %v3004_v4  ;;  %3053 = vmatmul.bf16.vlgmr.msrb.gmra.mxu3 %v3004_v4  ;;  %v11057_v4 = vld [vmem:[#allocation41_spill] sm:$0xff] }
 0x456   :  { %3288 = vmatpush.bf16.msrb.mxu0 %v10978_v16  ;;  %3301 = vmatpush.bf16.msrb.mxu1 %v11033_v39 }
 0x457   :  { %3314 = vmatpush.bf16.msrb.mxu2 %v11034_v60  ;;  %3327 = vmatpush.bf16.msrb.mxu3 %v11035_v45 }
 0x45a   :  { %3289 = vmatpush.bf16.msrb.mxu0 %v11036_v25  ;;  %3302 = vmatpush.bf16.msrb.mxu1 %v11037_v8 }
 0x45b   :  { %3315 = vmatpush.bf16.msrb.mxu2 %v11038_v13  ;;  %3328 = vmatpush.bf16.msrb.mxu3 %v11039_v53 }
 0x45e   :  { %3290 = vmatpush.bf16.msrb.mxu0 %v11040_v29  ;;  %3303 = vmatpush.bf16.msrb.mxu1 %v11041_v10 }
 0x45f   :  { %3316 = vmatpush.bf16.msrb.mxu2 %v11042_v17  ;;  %3329 = vmatpush.bf16.msrb.mxu3 %v11043_v0 }
 0x462   :  { %3291 = vmatpush.bf16.msrb.mxu0 %v11044_v43  ;;  %3304 = vmatpush.bf16.msrb.mxu1 %v11045_v55  ;;  %v11064_v55 = vld [vmem:[#allocation14_spill] sm:$0xff]  ;;  %v11065_v43 = vld [vmem:[#allocation15_spill] sm:$0xff] }
 0x463   :  { %3317 = vmatpush.bf16.msrb.mxu2 %v11046_v54  ;;  %3330 = vmatpush.bf16.msrb.mxu3 %v11047_v44  ;;  %v11058_v44 = vld [vmem:[#allocation42_spill] sm:$0xff] }
 0x466   :  { %3292 = vmatpush.bf16.msrb.mxu0 %v11048_v59  ;;  %3305 = vmatpush.bf16.msrb.mxu1 %v11049_v52  ;;  %v11059_v59 = vld [vmem:[#allocation43_spill] sm:$0xff]  ;;  %v11060_v52 = vld [vmem:[#allocation44_spill] sm:$0xff] }
 0x467   :  { %3318 = vmatpush.bf16.msrb.mxu2 %v11050_v30  ;;  %3331 = vmatpush.bf16.msrb.mxu3 %v11051_v12  ;;  %v11061_v30 = vld [vmem:[#allocation45_spill] sm:$0xff]  ;;  %v11062_v12 = vld [vmem:[#allocation46_spill] sm:$0xff] }
 0x46a   :  { %3293 = vmatpush.bf16.msrb.mxu0 %v11052_v9  ;;  %3306 = vmatpush.bf16.msrb.mxu1 %v11053_v32  ;;  %v11063_v9 = vld [vmem:[#allocation47_spill] sm:$0xff] }
 0x46b   :  { %3319 = vmatpush.bf16.msrb.mxu2 %v11054_v38  ;;  %3332 = vmatpush.bf16.msrb.mxu3 %v11055_v26 }
 0x46e   :  { %3294 = vmatpush.bf16.msrb.mxu0 %v11056_v1  ;;  %3307 = vmatpush.bf16.msrb.mxu1 %v11057_v4 }
 0x46f   :  { %3320 = vmatpush.bf16.msrb.mxu2 %v11058_v44  ;;  %3333 = vmatpush.bf16.msrb.mxu3 %v11059_v59 }
 0x472   :  { %3295 = vmatpush.bf16.msrb.mxu0 %v11060_v52  ;;  %3308 = vmatpush.bf16.msrb.mxu1 %v11061_v30 }
 0x473   :  { %3321 = vmatpush.bf16.msrb.mxu2 %v11062_v12  ;;  %3334 = vmatpush.bf16.msrb.mxu3 %v11063_v9  ;;  %v11066_v12 = vld [vmem:[#allocation61_spill] sm:$0xff] }
 0x4a9   :  { %v2876_v32 = vpop.f32.mrf.mxu0  ;;  %v2889_v38 = vpop.f32.mrf.mxu1 }
 0x4aa   :  { %v2923_v54 = vrot.slane %v2876_v32, 6  ;;  %v2924_v26 = vrot.slane %v2889_v38, 6 }
 0x4ac   :  { %v2931_v1 = vadd.f32 %v2923_v54, %v11064_v55  ;;  %v2932_v4 = vadd.f32 %v2924_v26, %v11065_v43 }
 0x4ae   :  { %v7191_v0 = vmul.f32 -1.442695, %v2931_v1  ;;  %v7192_v44 = vmul.f32 -1.442695, %v2932_v4 }
 0x4b0   :  { %8571 = vpow2.f32 %v7191_v0  ;;  %v2902_v59 = vpop.f32.mrf.mxu2  ;;  %v2915_v17 = vpop.f32.mrf.mxu3 }
 0x4b1   :  { %8573 = vpow2.f32 %v7192_v44  ;;  %v2925_v52 = vrot.slane %v2902_v59, 6  ;;  %v2878_v30 = vpop.f32.mrf.mxu0  ;;  %v2891_v10 = vpop.f32.mrf.mxu1  ;;  %v2926_v26 = vrot.slane %v2915_v17, 6  ;;  %v11067_v44 = vld [vmem:[#allocation62_spill] sm:$0xff] }
 0x4b3   :  { %v2933_v29 = vadd.f32 %v2925_v52, %v11066_v12  ;;  %v2934_v59 = vadd.f32 %v2926_v26, %v11067_v44 }
 0x4b5   :  { %v7193_v9 = vmul.f32 -1.442695, %v2933_v29 }
 0x4b6   :  { %v8572_v53 = vpop.eup %8571 }
 0x4b7   :  { %v8574_v13 = vpop.eup %8573  ;;  %v2944_v32 = vadd.f32 1.0, %v8572_v53  ;;  %8575 = vpow2.f32 %v7193_v9 }
 0x4b8   :  { %v2945_v38 = vadd.f32 1.0, %v8574_v13  ;;  %v2904_v54 = vpop.f32.mrf.mxu2  ;;  %v2917_v55 = vpop.f32.mrf.mxu3 }
 0x4b9   :  { %8577 = vrcp.f32 %v2944_v32  ;;  %v2958_v43 = vand.u32 2147483648, %v2944_v32  ;;  %v2956_v55 = vand.u32 2147483647, %v2944_v32  ;;  %vm2952_vm10 = vweird.f32 %v2944_v32 }
 0x4ba   :  { %8579 = vrcp.f32 %v2945_v38  ;;  %v2973_v53 = vand.u32 2147483648, %v2945_v38  ;;  %v2971_v17 = vand.u32 2147483647, %v2945_v38  ;;  %vm2967_vm11 = vweird.f32 %v2945_v38 }
 0x4bb   :  { %v2959_v44 = vor.u32 1.1754944e-38, %v2958_v43  ;;  %vm2957_vm14 = vcmp.eq.f32.partialorder %v2956_v55, 8.507059e+37 }
 0x4bc   :  { %vm2972_vm15 = vcmp.eq.f32.partialorder %v2971_v17, 8.507059e+37 }
 0x4bd   :  { %v8576_v0 = vpop.eup %8575 }
 0x4be   :  { %v2946_v1 = vadd.f32 1.0, %v8576_v0 }
 0x4bf   :  { %v8578_v4 = vpop.eup %8577 }
 0x4c0   :  { %v8580_v30 = vpop.eup %8579  ;;  %v2948_v10 = vmul.f32 %v8578_v4, %v2944_v32  ;;  %8581 = vrcp.f32 %v2946_v1  ;;  %vm2953_vm8 = vweird.f32 %v8578_v4  ;;  %v2988_v43 = vand.u32 2147483648, %v2946_v1 }
 0x4c1   :  { %v2963_v52 = vmul.f32 %v8580_v30, %v2945_v38  ;;  %8583 = vtanh.f32 %v2934_v59  ;;  %vm2968_vm9 = vweird.f32 %v8580_v30  ;;  %vm2954_vm12 = vmor %vm2952_vm10, %vm2953_vm8  ;;  %vm2982_vm1 = vweird.f32 %v2946_v1 }
 0x4c2   :  { %v2949_v29 = vsub.f32 1.0, %v2948_v10  ;;  %v2994_v10 = vrot.slane %v9829_v51, 6  ;;  %vm2969_vm13 = vmor %vm2967_vm11, %vm2968_vm9 }
 0x4c3   :  { %v2964_v12 = vsub.f32 1.0, %v2963_v52  ;;  %v2974_v52 = vor.u32 1.1754944e-38, %v2973_v53 }
 0x4c4   :  { %v2950_v13 = vmul.f32 %v8578_v4, %v2949_v29 }
 0x4c5   :  { %v2965_v9 = vmul.f32 %v8580_v30, %v2964_v12 }
 0x4c6   :  { %v8582_v54 = vpop.eup %8581  ;;  %v2951_v0 = vadd.f32 %v8578_v4, %v2950_v13 }
 0x4c7   :  { %v2978_v26 = vmul.f32 %v8582_v54, %v2946_v1  ;;  %v2966_v8 = vadd.f32 %v8580_v30, %v2965_v9  ;;  %v8584_v29 = vpop.eup %8583  ;;  %vm2983_vm0 = vweird.f32 %v8582_v54 }
 0x4c8   :  { %v2955_v59 = vsel %vm2954_vm12, %v8578_v4, %v2951_v0  ;;  %v2986_v4 = vand.u32 2147483647, %v2946_v1  ;;  %vm2984_vm2 = vmor %vm2982_vm1, %vm2983_vm0 }
 0x4c9   :  { %v2979_v25 = vsub.f32 1.0, %v2978_v26  ;;  %v2960_v45 = vsel %vm2957_vm14, %v2959_v44, %v2955_v59  ;;  %v2970_v12 = vsel %vm2969_vm13, %v8580_v30, %v2966_v8 }
 0x4ca   :  { %v2975_v60 = vsel %vm2972_vm15, %v2974_v52, %v2970_v12  ;;  %v2997_v39 = vmul.f32 %v8584_v29, %v2960_v45  ;;  %vm2987_vm3 = vcmp.eq.f32.partialorder %v2986_v4, 8.507059e+37 }
 0x4cb   :  { %v2980_v13 = vmul.f32 %v8582_v54, %v2979_v25  ;;  %v2996_v32 = vmul.f32 %v2994_v10, %v2975_v60  ;;  %v2989_v60 = vor.u32 1.1754944e-38, %v2988_v43 }
 0x4cd   :  { %v9923_v38 = vadd.f32 %v2997_v39, %v2996_v32  ;;  %v2981_v16 = vadd.f32 %v8582_v54, %v2980_v13 }
 0x4cf   :  { %8585 = vtanh.f32 %v9923_v38  ;;  %v2985_v25 = vsel %vm2984_vm2, %v8582_v54, %v2981_v16 }
 0x4d0   :  { %v2990_v17 = vsel %vm2987_vm3, %v2989_v60, %v2985_v25 }
 0x4d1   :  { %v3015_v51 = vpop.f32.mrf.mxu0  ;;  %v3028_v53 = vpop.f32.mrf.mxu1 }
 0x4d2   :  { %v3062_v55 = vrot.slane %v3015_v51, 4  ;;  %v3063_v9 = vrot.slane %v3028_v53, 4 }
 0x4d4   :  { %v3070_v8 = vadd.f32 %v3062_v55, %v11027_v3  ;;  %v3071_v45 = vadd.f32 %v3063_v9, %v11028_v50 }
 0x4d5   :  { %v8586_v30 = vpop.eup %8585 }
 0x4d6   :  { %v7194_v39 = vmul.f32 -1.442695, %v3070_v8  ;;  %v7195_v44 = vmul.f32 -1.442695, %v3071_v45  ;;  %v3000_v10 = vmul.f32 %v8586_v30, %v2990_v17 }
 0x4d8   :  { %8587 = vpow2.f32 %v7194_v39  ;;  %v3041_v0 = vpop.f32.mrf.mxu2  ;;  %v3054_v26 = vpop.f32.mrf.mxu3  ;;  %v3140_v29 = vpack.c.bf16 %v3000_v10, %v3000_v10 }
 0x4d9   :  { %8589 = vpow2.f32 %v7195_v44  ;;  %v3064_v1 = vrot.slane %v3041_v0, 4  ;;  %v3017_v52 = vpop.f32.mrf.mxu0  ;;  %v3030_v59 = vpop.f32.mrf.mxu1  ;;  %v3065_v8 = vrot.slane %v3054_v26, 4 }
 0x4da   :  { %3141 = vst [vmem:[#allocation2 + $0x8] sm:$0x2] %v3140_v29  ;;  %v3145_v13 = vunpack.c.l.b16 %v3140_v29 }
 0x4db   :  { %v3072_v12 = vadd.f32 %v3064_v1, %v11029_v31  ;;  %v3073_v39 = vadd.f32 %v3065_v8, %v11030_v14  ;;  %v11082_v8 = vld [vmem:[#allocation30_spill] sm:$0xff] }
 0x4dc   :  { %v3146_v32 = vpack.c.b16 %v3145_v13, %v3145_v13 }
 0x4dd   :  { %v7196_v16 = vmul.f32 -1.442695, %v3072_v12 }
 0x4de   :  { %v8588_v54 = vpop.eup %8587  ;;  %v3147_v9 = vrot.slane %v3146_v32, 1  ;;  %v11075_v32 = vld [vmem:[#allocation23_spill] sm:$0xff] }
 0x4df   :  { %v8590_v43 = vpop.eup %8589  ;;  %v3083_v51 = vadd.f32 1.0, %v8588_v54  ;;  %8591 = vpow2.f32 %v7196_v16 }
 0x4e0   :  { %v3084_v53 = vadd.f32 1.0, %v8590_v43  ;;  %v3043_v4 = vpop.f32.mrf.mxu2  ;;  %v3056_v55 = vpop.f32.mrf.mxu3  ;;  %3157 = vmatmul.bf16.vlgmr.msra.gmra.mxu0 %v3147_v9  ;;  %3170 = vmatmul.bf16.vlgmr.msra.gmra.mxu1 %v3147_v9  ;;  %v11076_v43 = vld [vmem:[#allocation24_spill] sm:$0xff] }
 0x4e1   :  { %8593 = vrcp.f32 %v3083_v51  ;;  %3183 = vmatmul.bf16.vlgmr.msra.gmra.mxu2 %v3147_v9  ;;  %3196 = vmatmul.bf16.vlgmr.msra.gmra.mxu3 %v3147_v9  ;;  %v3095_v26 = vand.u32 2147483647, %v3083_v51  ;;  %vm3091_vm6 = vweird.f32 %v3083_v51  ;;  %v11079_v4 = vld [vmem:[#allocation27_spill] sm:$0xff]  ;;  %v11080_v55 = vld [vmem:[#allocation28_spill] sm:$0xff]  ;;  %v11081_v9 = vld [vmem:[#allocation29_spill] sm:$0xff] }
 0x4e2   :  { %8595 = vrcp.f32 %v3084_v53  ;;  %3431 = vmatpush.bf16.msra.mxu0 %v9035_v22  ;;  %3444 = vmatpush.bf16.msra.mxu1 %v9037_v23  ;;  %v3112_v17 = vand.u32 2147483648, %v3084_v53  ;;  %vm3106_vm7 = vweird.f32 %v3084_v53 }
 0x4e3   :  { %3457 = vmatpush.bf16.msra.mxu2 %v9039_v24  ;;  %3470 = vmatpush.bf16.msra.mxu3 %v9041_v28  ;;  %v3097_v28 = vand.u32 2147483648, %v3083_v51  ;;  %vm3096_vm10 = vcmp.eq.f32.partialorder %v3095_v26, 8.507059e+37  ;;  %v11095_v26 = vld [vmem:[#allocation43_spill] sm:$0xff] }
 0x4e5   :  { %v8592_v45 = vpop.eup %8591  ;;  %v3098_v1 = vor.u32 1.1754944e-38, %v3097_v28  ;;  %v11092_v28 = vld [vmem:[#allocation40_spill] sm:$0xff] }
 0x4e6   :  { %v9933_v25 = vadd.f32 1.0, %v8592_v45  ;;  %3432 = vmatpush.bf16.msra.mxu0 %v9044_v34  ;;  %3445 = vmatpush.bf16.msra.mxu1 %v9048_v35  ;;  %v3110_v35 = vand.u32 2147483647, %v3084_v53  ;;  %v11083_v45 = vld [vmem:[#allocation31_spill] sm:$0xff] }
 0x4e7   :  { %v8594_v60 = vpop.eup %8593  ;;  %3458 = vmatpush.bf16.msra.mxu2 %v9050_v36  ;;  %3471 = vmatpush.bf16.msra.mxu3 %v9053_v40 }
 0x4e8   :  { %v8596_v44 = vpop.eup %8595  ;;  %v3087_v30 = vmul.f32 %v8594_v60, %v3083_v51  ;;  %8597 = vrcp.f32 %v9933_v25  ;;  %vm3092_vm4 = vweird.f32 %v8594_v60  ;;  %vm3111_vm11 = vcmp.eq.f32.partialorder %v3110_v35, 8.507059e+37  ;;  %v11077_v51 = vld [vmem:[#allocation25_spill] sm:$0xff] }
 0x4e9   :  { %v3102_v22 = vmul.f32 %v8596_v44, %v3084_v53  ;;  %8599 = vtanh.f32 %v3073_v39  ;;  %vm3107_vm5 = vweird.f32 %v8596_v44  ;;  %vm3093_vm8 = vmor %vm3091_vm6, %vm3092_vm4  ;;  %vm3121_vm13 = vweird.f32 %v9933_v25  ;;  %v11078_v53 = vld [vmem:[#allocation26_spill] sm:$0xff]  ;;  %v11097_v35 = vld [vmem:[#allocation45_spill] sm:$0xff] }
 0x4ea   :  { %v3088_v23 = vsub.f32 1.0, %v3087_v30  ;;  %3433 = vmatpush.bf16.msra.mxu0 %v9059_v46  ;;  %3446 = vmatpush.bf16.msra.mxu1 %v9064_v47  ;;  %v3133_v46 = vrot.slane %v9866_v61, 2  ;;  %vm3108_vm9 = vmor %vm3106_vm7, %vm3107_vm5  ;;  %v3113_v47 = vor.u32 1.1754944e-38, %v3112_v17  ;;  %v11086_v39 = vld [vmem:[#allocation34_spill] sm:$0xff]  ;;  %v11088_v30 = vld [vmem:[#allocation36_spill] sm:$0xff] }
 0x4eb   :  { %v3103_v24 = vsub.f32 1.0, %v3102_v22  ;;  %3459 = vmatpush.bf16.msra.mxu2 %v9066_v48  ;;  %3472 = vmatpush.bf16.msra.mxu3 %v9069_v2  ;;  %v11089_v22 = vld [vmem:[#allocation37_spill] sm:$0xff] }
 0x4ec   :  { %v3089_v0 = vmul.f32 %v8594_v60, %v3088_v23  ;;  %v11090_v23 = vld [vmem:[#allocation38_spill] sm:$0xff]  ;;  %v11093_v17 = vld [vmem:[#allocation41_spill] sm:$0xff] }
 0x4ed   :  { %v3104_v34 = vmul.f32 %v8596_v44, %v3103_v24  ;;  %v11091_v24 = vld [vmem:[#allocation39_spill] sm:$0xff] }
 0x4ee   :  { %v8598_v36 = vpop.eup %8597  ;;  %v3090_v40 = vadd.f32 %v8594_v60, %v3089_v0  ;;  %3434 = vmatpush.bf16.msra.mxu0 %v9072_v56  ;;  %3447 = vmatpush.bf16.msra.mxu1 %v9076_v57  ;;  %v11094_v0 = vld [vmem:[#allocation42_spill] sm:$0xff] }
 0x4ef   :  { %v3117_v10 = vmul.f32 %v8598_v36, %v9933_v25  ;;  %v3105_v52 = vadd.f32 %v8596_v44, %v3104_v34  ;;  %v8600_v48 = vpop.eup %8599  ;;  %3460 = vmatpush.bf16.msra.mxu2 %v9078_v58  ;;  %3473 = vmatpush.bf16.msra.mxu3 %v9081_v62  ;;  %vm3122_vm12 = vweird.f32 %v8598_v36  ;;  %v3127_v58 = vand.u32 2147483648, %v9933_v25  ;;  %v11096_v34 = vld [vmem:[#allocation44_spill] sm:$0xff] }
 0x4f0   :  { %v3094_v59 = vsel %vm3093_vm8, %v8594_v60, %v3090_v40  ;;  %v3125_v62 = vand.u32 2147483647, %v9933_v25  ;;  %vm3123_vm14 = vmor %vm3121_vm13, %vm3122_vm12  ;;  %v11084_v25 = vld [vmem:[#allocation32_spill] sm:$0xff]  ;;  %v11085_v60 = vld [vmem:[#allocation33_spill] sm:$0xff] }
 0x4f1   :  { %v3118_v2 = vsub.f32 1.0, %v3117_v10  ;;  %v3099_v29 = vsel %vm3096_vm10, %v3098_v1, %v3094_v59  ;;  %v3109_v12 = vsel %vm3108_vm9, %v8596_v44, %v3105_v52  ;;  %v11087_v44 = vld [vmem:[#allocation35_spill] sm:$0xff] }
 0x4f2   :  { %v3114_v13 = vsel %vm3111_vm11, %v3113_v47, %v3109_v12  ;;  %v3136_v16 = vmul.f32 %v8600_v48, %v3099_v29  ;;  %3435 = vmatpush.bf16.msra.mxu0 %v9084_v5  ;;  %3448 = vmatpush.bf16.msra.mxu1 %v9088_v6  ;;  %v3128_v6 = vor.u32 1.1754944e-38, %v3127_v58  ;;  %vm3126_vm15 = vcmp.eq.f32.partialorder %v3125_v62, 8.507059e+37  ;;  %v11099_v40 = vld [vmem:[#allocation47_spill] sm:$0xff]  ;;  %v11100_v47 = vld [vmem:[#allocation14_spill] sm:$0xff]  ;;  %v11102_v58 = vld [vmem:[#allocation61_spill] sm:$0xff] }
 0x4f3   :  { %v3119_v61 = vmul.f32 %v8598_v36, %v3118_v2  ;;  %v3135_v54 = vmul.f32 %v3133_v46, %v3114_v13  ;;  %3461 = vmatpush.bf16.msra.mxu2 %v9090_v7  ;;  %3474 = vmatpush.bf16.msra.mxu3 %v9093_v11  ;;  %v11101_v48 = vld [vmem:[#allocation15_spill] sm:$0xff] }
 0x4f5   :  { %v9953_v56 = vadd.f32 %v3136_v16, %v3135_v54  ;;  %v3120_v57 = vadd.f32 %v8598_v36, %v3119_v61 }
 0x4f6   :  { %3436 = vmatpush.bf16.msra.mxu0 %v9096_v18  ;;  %3449 = vmatpush.bf16.msra.mxu1 %v9100_v19 }
 0x4f7   :  { %8601 = vtanh.f32 %v9953_v56  ;;  %3462 = vmatpush.bf16.msra.mxu2 %v9102_v20  ;;  %3475 = vmatpush.bf16.msra.mxu3 %v9105_v27  ;;  %v3124_v5 = vsel %vm3123_vm14, %v8598_v36, %v3120_v57  ;;  %v11098_v36 = vld [vmem:[#allocation46_spill] sm:$0xff] }
 0x4f8   :  { %v3129_v11 = vsel %vm3126_vm15, %v3128_v6, %v3124_v5 }
 0x4fa   :  { %3437 = vmatpush.bf16.msra.mxu0 %v9108_v37  ;;  %3450 = vmatpush.bf16.msra.mxu1 %v9112_v41  ;;  %v11068_v41 = vld [vmem:[#allocation16_spill] sm:$0xff] }
 0x4fb   :  { %3463 = vmatpush.bf16.msra.mxu2 %v9114_v42  ;;  %3476 = vmatpush.bf16.msra.mxu3 %v9117_v49  ;;  %v11069_v42 = vld [vmem:[#allocation17_spill] sm:$0xff]  ;;  %v11070_v49 = vld [vmem:[#allocation18_spill] sm:$0xff] }
 0x4fd   :  { %v8602_v7 = vpop.eup %8601 }
 0x4fe   :  { %v3139_v18 = vmul.f32 %v8602_v7, %v3129_v11  ;;  %3438 = vmatpush.bf16.msra.mxu0 %v9120_v15  ;;  %3451 = vmatpush.bf16.msra.mxu1 %v9124_v63  ;;  %v11071_v15 = vld [vmem:[#allocation19_spill] sm:$0xff]  ;;  %v11072_v63 = vld [vmem:[#allocation20_spill] sm:$0xff] }
 0x4ff   :  { %3464 = vmatpush.bf16.msra.mxu2 %v10868_v21  ;;  %3477 = vmatpush.bf16.msra.mxu3 %v10869_v33  ;;  %v11073_v21 = vld [vmem:[#allocation21_spill] sm:$0xff]  ;;  %v11074_v33 = vld [vmem:[#allocation22_spill] sm:$0xff] }
 0x500   :  { %v3142_v19 = vpack.c.bf16 %v3139_v18, %v3139_v18 }
 0x502   :  { %3143 = vst [vmem:[#allocation2 + $0x4] sm:$0x4] %v3142_v19  ;;  %v3284_v20 = vunpack.c.l.b16 %v3142_v19 }
 0x504   :  { %v3285_v27 = vpack.c.b16 %v3284_v20, %v3284_v20 }
 0x506   :  { %v3286_v37 = vrot.slane %v3285_v27, 2 }
 0x508   :  { %3296 = vmatmul.bf16.vlgmr.msrb.gmra.mxu0 %v3286_v37  ;;  %3309 = vmatmul.bf16.vlgmr.msrb.gmra.mxu1 %v3286_v37 }
 0x509   :  { %3322 = vmatmul.bf16.vlgmr.msrb.gmra.mxu2 %v3286_v37  ;;  %3335 = vmatmul.bf16.vlgmr.msrb.gmra.mxu3 %v3286_v37 }
 0x50a   :  { %3570 = vmatpush.bf16.msrb.mxu0 %v11068_v41  ;;  %3583 = vmatpush.bf16.msrb.mxu1 %v11069_v42 }
 0x50b   :  { %3596 = vmatpush.bf16.msrb.mxu2 %v11070_v49  ;;  %3609 = vmatpush.bf16.msrb.mxu3 %v11071_v15  ;;  %v11103_v49 = vld [vmem:[#allocation62_spill] sm:$0xff] }
 0x50e   :  { %3571 = vmatpush.bf16.msrb.mxu0 %v11072_v63  ;;  %3584 = vmatpush.bf16.msrb.mxu1 %v11073_v21 }
 0x50f   :  { %3597 = vmatpush.bf16.msrb.mxu2 %v11074_v33  ;;  %3610 = vmatpush.bf16.msrb.mxu3 %v11075_v32 }
 0x512   :  { %3572 = vmatpush.bf16.msrb.mxu0 %v11076_v43  ;;  %3585 = vmatpush.bf16.msrb.mxu1 %v11077_v51 }
 0x513   :  { %3598 = vmatpush.bf16.msrb.mxu2 %v11078_v53  ;;  %3611 = vmatpush.bf16.msrb.mxu3 %v11079_v4 }
 0x516   :  { %3573 = vmatpush.bf16.msrb.mxu0 %v11080_v55  ;;  %3586 = vmatpush.bf16.msrb.mxu1 %v11081_v9 }
 0x517   :  { %3599 = vmatpush.bf16.msrb.mxu2 %v11082_v8  ;;  %3612 = vmatpush.bf16.msrb.mxu3 %v11083_v45 }
 0x51a   :  { %3574 = vmatpush.bf16.msrb.mxu0 %v11084_v25  ;;  %3587 = vmatpush.bf16.msrb.mxu1 %v11085_v60 }
 0x51b   :  { %3600 = vmatpush.bf16.msrb.mxu2 %v11086_v39  ;;  %3613 = vmatpush.bf16.msrb.mxu3 %v11087_v44 }
 0x51e   :  { %3575 = vmatpush.bf16.msrb.mxu0 %v11088_v30  ;;  %3588 = vmatpush.bf16.msrb.mxu1 %v11089_v22  ;;  %v3276_v30 = vrot.slane %v9923_v38, 6 }
 0x51f   :  { %3601 = vmatpush.bf16.msrb.mxu2 %v11090_v23  ;;  %3614 = vmatpush.bf16.msrb.mxu3 %v11091_v24 }
 0x522   :  { %3576 = vmatpush.bf16.msrb.mxu0 %v11092_v28  ;;  %3589 = vmatpush.bf16.msrb.mxu1 %v11093_v17 }
 0x523   :  { %3602 = vmatpush.bf16.msrb.mxu2 %v11094_v0  ;;  %3615 = vmatpush.bf16.msrb.mxu3 %v11095_v26 }
 0x526   :  { %3577 = vmatpush.bf16.msrb.mxu0 %v11096_v34  ;;  %3590 = vmatpush.bf16.msrb.mxu1 %v11097_v35 }
 0x527   :  { %3603 = vmatpush.bf16.msrb.mxu2 %v11098_v36  ;;  %3616 = vmatpush.bf16.msrb.mxu3 %v11099_v40 }
 0x55d   :  { %v3158_v10 = vpop.f32.mrf.mxu0  ;;  %v3171_v1 = vpop.f32.mrf.mxu1 }
 0x55e   :  { %v3205_v52 = vrot.slane %v3158_v10, 4  ;;  %v3206_v46 = vrot.slane %v3171_v1, 4 }
 0x560   :  { %v3213_v59 = vadd.f32 %v3205_v52, %v11100_v47  ;;  %v3214_v2 = vadd.f32 %v3206_v46, %v11101_v48 }
 0x562   :  { %v7197_v29 = vmul.f32 -1.442695, %v3213_v59  ;;  %v7198_v12 = vmul.f32 -1.442695, %v3214_v2 }
 0x564   :  { %8603 = vpow2.f32 %v7197_v29  ;;  %v3184_v13 = vpop.f32.mrf.mxu2  ;;  %v3197_v16 = vpop.f32.mrf.mxu3 }
 0x565   :  { %8605 = vpow2.f32 %v7198_v12  ;;  %v3207_v61 = vrot.slane %v3184_v13, 4  ;;  %v3160_v54 = vpop.f32.mrf.mxu0  ;;  %v3173_v57 = vpop.f32.mrf.mxu1  ;;  %v3208_v27 = vrot.slane %v3197_v16, 4 }
 0x567   :  { %v3215_v62 = vadd.f32 %v3207_v61, %v11102_v58  ;;  %v3216_v15 = vadd.f32 %v3208_v27, %v11103_v49 }
 0x569   :  { %v7199_v5 = vmul.f32 -1.442695, %v3215_v62 }
 0x56a   :  { %v8604_v6 = vpop.eup %8603 }
 0x56b   :  { %v8606_v7 = vpop.eup %8605  ;;  %v3226_v11 = vadd.f32 1.0, %v8604_v6  ;;  %8607 = vpow2.f32 %v7199_v5 }
 0x56c   :  { %v3227_v18 = vadd.f32 1.0, %v8606_v7  ;;  %v3186_v19 = vpop.f32.mrf.mxu2  ;;  %v3199_v20 = vpop.f32.mrf.mxu3 }
 0x56d   :  { %8609 = vrcp.f32 %v3226_v11  ;;  %v3240_v51 = vand.u32 2147483648, %v3226_v11  ;;  %v3238_v55 = vand.u32 2147483647, %v3226_v11  ;;  %vm3234_vm2 = vweird.f32 %v3226_v11 }
 0x56e   :  { %8611 = vrcp.f32 %v3227_v18  ;;  %v3255_v53 = vand.u32 2147483648, %v3227_v18  ;;  %v3253_v8 = vand.u32 2147483647, %v3227_v18  ;;  %vm3249_vm3 = vweird.f32 %v3227_v18 }
 0x56f   :  { %v3241_v39 = vor.u32 1.1754944e-38, %v3240_v51  ;;  %vm3239_vm6 = vcmp.eq.f32.partialorder %v3238_v55, 8.507059e+37 }
 0x570   :  { %v3256_v22 = vor.u32 1.1754944e-38, %v3255_v53  ;;  %vm3254_vm7 = vcmp.eq.f32.partialorder %v3253_v8, 8.507059e+37 }
 0x571   :  { %v8608_v37 = vpop.eup %8607 }
 0x572   :  { %v3228_v41 = vadd.f32 1.0, %v8608_v37 }
 0x573   :  { %v8610_v42 = vpop.eup %8609 }
 0x574   :  { %v8612_v63 = vpop.eup %8611  ;;  %v3230_v21 = vmul.f32 %v8610_v42, %v3226_v11  ;;  %8613 = vrcp.f32 %v3228_v41  ;;  %vm3235_vm0 = vweird.f32 %v8610_v42  ;;  %v3270_v1 = vand.u32 2147483648, %v3228_v41 }
 0x575   :  { %v3245_v33 = vmul.f32 %v8612_v63, %v3227_v18  ;;  %8615 = vtanh.f32 %v3216_v15  ;;  %vm3250_vm1 = vweird.f32 %v8612_v63  ;;  %vm3236_vm4 = vmor %vm3234_vm2, %vm3235_vm0  ;;  %vm3264_vm9 = vweird.f32 %v3228_v41 }
 0x576   :  { %v3231_v32 = vsub.f32 1.0, %v3230_v21  ;;  %vm3251_vm5 = vmor %vm3249_vm3, %vm3250_vm1  ;;  %v3268_v46 = vand.u32 2147483647, %v3228_v41  ;;  %v3271_v16 = vor.u32 1.1754944e-38, %v3270_v1 }
 0x577   :  { %v3246_v43 = vsub.f32 1.0, %v3245_v33 }
 0x578   :  { %v3232_v4 = vmul.f32 %v8610_v42, %v3231_v32  ;;  %vm3269_vm11 = vcmp.eq.f32.partialorder %v3268_v46, 8.507059e+37 }
 0x579   :  { %v3247_v9 = vmul.f32 %v8612_v63, %v3246_v43 }
 0x57a   :  { %v8614_v45 = vpop.eup %8613  ;;  %v3233_v25 = vadd.f32 %v8610_v42, %v3232_v4 }
 0x57b   :  { %v3260_v60 = vmul.f32 %v8614_v45, %v3228_v41  ;;  %v3248_v44 = vadd.f32 %v8612_v63, %v3247_v9  ;;  %v8616_v24 = vpop.eup %8615  ;;  %vm3265_vm8 = vweird.f32 %v8614_v45 }
 0x57c   :  { %v3237_v23 = vsel %vm3236_vm4, %v8610_v42, %v3233_v25  ;;  %vm3266_vm10 = vmor %vm3264_vm9, %vm3265_vm8 }
 0x57d   :  { %v3261_v28 = vsub.f32 1.0, %v3260_v60  ;;  %v3242_v17 = vsel %vm3239_vm6, %v3241_v39, %v3237_v23  ;;  %v3252_v0 = vsel %vm3251_vm5, %v8612_v63, %v3248_v44 }
 0x57e   :  { %v3257_v26 = vsel %vm3254_vm7, %v3256_v22, %v3252_v0  ;;  %v3279_v34 = vmul.f32 %v8616_v24, %v3242_v17 }
 0x57f   :  { %v3262_v35 = vmul.f32 %v8614_v45, %v3261_v28  ;;  %v3278_v36 = vmul.f32 %v3276_v30, %v3257_v26 }
 0x581   :  { %v10010_v40 = vadd.f32 %v3279_v34, %v3278_v36  ;;  %v3263_v10 = vadd.f32 %v8614_v45, %v3262_v35 }
 0x583   :  { %8617 = vtanh.f32 %v10010_v40  ;;  %v3267_v13 = vsel %vm3266_vm10, %v8614_v45, %v3263_v10  ;;  %v3415_v10 = vrot.slane %v9953_v56, 2 }
 0x584   :  { %v3272_v62 = vsel %vm3269_vm11, %v3271_v16, %v3267_v13 }
 0x585   :  { %v3297_v38 = vpop.f32.mrf.mxu0  ;;  %v3310_v52 = vpop.f32.mrf.mxu1 }
 0x586   :  { %v3344_v59 = vrot.slane %v3297_v38, 6  ;;  %v3345_v2 = vrot.slane %v3310_v52, 6 }
 0x588   :  { %v3352_v29 = vadd.f32 %v3344_v59, %v11027_v3  ;;  %v3353_v12 = vadd.f32 %v3345_v2, %v11028_v50 }
 0x589   :  { %v8618_v57 = vpop.eup %8617 }
 0x58a   :  { %v7200_v61 = vmul.f32 -1.442695, %v3352_v29  ;;  %v7201_v54 = vmul.f32 -1.442695, %v3353_v12  ;;  %v3282_v7 = vmul.f32 %v8618_v57, %v3272_v62 }
 0x58c   :  { %8619 = vpow2.f32 %v7200_v61  ;;  %v3323_v5 = vpop.f32.mrf.mxu2  ;;  %v3336_v6 = vpop.f32.mrf.mxu3  ;;  %v3422_v20 = vpack.c.bf16 %v3282_v7, %v3282_v7 }
 0x58d   :  { %8621 = vpow2.f32 %v7201_v54  ;;  %v3346_v11 = vrot.slane %v3323_v5, 6  ;;  %v3299_v18 = vpop.f32.mrf.mxu0  ;;  %v3312_v19 = vpop.f32.mrf.mxu1  ;;  %v3347_v53 = vrot.slane %v3336_v6, 6 }
 0x58e   :  { %3423 = vst [vmem:[#allocation2 + $0x8] sm:$0x4] %v3422_v20  ;;  %v3427_v37 = vunpack.c.l.b16 %v3422_v20 }
 0x58f   :  { %v3354_v27 = vadd.f32 %v3346_v11, %v11029_v31  ;;  %v3355_v8 = vadd.f32 %v3347_v53, %v11030_v14  ;;  %v7317_v53 = vld [vmem:[#allocation7 + $0xd0] sm:$0xf0] }
 0x590   :  { %v3428_v15 = vpack.c.b16 %v3427_v37, %v3427_v37  ;;  %v7331_v37 = vld [vmem:[#allocation7 + $0xe0] sm:$0xf] }
 0x591   :  { %v7202_v41 = vmul.f32 -1.442695, %v3354_v27 }
 0x592   :  { %v8620_v42 = vpop.eup %8619  ;;  %v3429_v51 = vrot.slane %v3428_v15, 2 }
 0x593   :  { %v8622_v63 = vpop.eup %8621  ;;  %v3365_v21 = vadd.f32 1.0, %v8620_v42  ;;  %8623 = vpow2.f32 %v7202_v41  ;;  %v8239_v41 = vld [vmem:[#allocation7 + $0xec] sm:$0xf0]  ;;  %v8237_v42 = vld [vmem:[#allocation7 + $0xe4] sm:$0xf] }
 0x594   :  { %v3366_v33 = vadd.f32 1.0, %v8622_v63  ;;  %v3325_v32 = vpop.f32.mrf.mxu2  ;;  %v3338_v43 = vpop.f32.mrf.mxu3  ;;  %3439 = vmatmul.bf16.vlgmr.msra.gmra.mxu0 %v3429_v51  ;;  %3452 = vmatmul.bf16.vlgmr.msra.gmra.mxu1 %v3429_v51  ;;  %v7332_v15 = vor.u32 %v8239_v41, %v7331_v37  ;;  %v7333_v63 = vld [vmem:[#allocation7 + $0xf0] sm:$0xf0] }
 0x595   :  { %8625 = vrcp.f32 %v3365_v21  ;;  %3465 = vmatmul.bf16.vlgmr.msra.gmra.mxu2 %v3429_v51  ;;  %3478 = vmatmul.bf16.vlgmr.msra.gmra.mxu3 %v3429_v51  ;;  %v3379_v30 = vand.u32 2147483648, %v3365_v21  ;;  %v3377_v24 = vand.u32 2147483647, %v3365_v21  ;;  %vm3373_vm14 = vweird.f32 %v3365_v21  ;;  %v8235_v32 = vld [vmem:[#allocation7 + $0xcc] sm:$0xf0] }
 0x596   :  { %8627 = vrcp.f32 %v3366_v33  ;;  %v3394_v22 = vand.u32 2147483648, %v3366_v33  ;;  %v3392_v17 = vand.u32 2147483647, %v3366_v33  ;;  %vm3388_vm15 = vweird.f32 %v3366_v33  ;;  %4102 = vmatpush.bf16.msra.mxu0 %v7332_v15  ;;  %v8233_v43 = vld [vmem:[#allocation7 + $0xc4] sm:$0xf] }
 0x597   :  { %v3380_v35 = vor.u32 1.1754944e-38, %v3379_v30  ;;  %vm3378_vm2 = vcmp.eq.f32.partialorder %v3377_v24, 8.507059e+37  ;;  %v8225_v30 = vld [vmem:[#allocation7 + $0x84] sm:$0xf]  ;;  %v8236_v15 = vld [vmem:[#allocation7 + $0xd4] sm:$0xf0] }
 0x598   :  { %v3395_v1 = vor.u32 1.1754944e-38, %v3394_v22  ;;  %vm3393_vm3 = vcmp.eq.f32.partialorder %v3392_v17, 8.507059e+37  ;;  %v8223_v17 = vld [vmem:[#allocation7 + $0x6c] sm:$0xf0] }
 0x599   :  { %v8624_v4 = vpop.eup %8623 }
 0x59a   :  { %v3367_v55 = vadd.f32 1.0, %v8624_v4  ;;  %v7320_v4 = vor.u32 %v8233_v43, %v7317_v53  ;;  %v7325_v43 = vld [vmem:[#allocation7 + $0xd8] sm:$0xf0]  ;;  %v7459_v53 = vld [vmem:[#allocation7 + $0x1e0] sm:$0xf] }
 0x59b   :  { %v8626_v9 = vpop.eup %8625 }
 0x59c   :  { %v8628_v45 = vpop.eup %8627  ;;  %v3369_v25 = vmul.f32 %v8626_v9, %v3365_v21  ;;  %8629 = vrcp.f32 %v3367_v55  ;;  %vm3374_vm12 = vweird.f32 %v8626_v9  ;;  %v3409_v57 = vand.u32 2147483648, %v3367_v55 }
 0x59d   :  { %v3384_v60 = vmul.f32 %v8628_v45, %v3366_v33  ;;  %8631 = vtanh.f32 %v3355_v8  ;;  %vm3389_vm13 = vweird.f32 %v8628_v45  ;;  %vm3375_vm0 = vmor %vm3373_vm14, %vm3374_vm12  ;;  %vm3403_vm5 = vweird.f32 %v3367_v55  ;;  %v7315_v33 = vld [vmem:[#allocation7 + $0xc0] sm:$0xf]  ;;  %v8229_v8 = vld [vmem:[#allocation7 + $0xa4] sm:$0xf] }
 0x59e   :  { %v3370_v39 = vsub.f32 1.0, %v3369_v25  ;;  %vm3390_vm1 = vmor %vm3388_vm15, %vm3389_vm13  ;;  %v3407_v56 = vand.u32 2147483647, %v3367_v55  ;;  %v3410_v5 = vor.u32 1.1754944e-38, %v3409_v57  ;;  %v7336_v21 = vor.u32 %v8237_v42, %v7333_v63  ;;  %v7301_v25 = vld [vmem:[#allocation7 + $0xb0] sm:$0xf0] }
 0x59f   :  { %v3385_v44 = vsub.f32 1.0, %v3384_v60  ;;  %v7316_v51 = vor.u32 %v8235_v32, %v7315_v33  ;;  %v7304_v60 = vor.u32 %v8229_v8, %v7301_v25  ;;  %v8211_v57 = vld [vmem:[#allocation7 + $0xc] sm:$0xf0]  ;;  %v7323_v42 = vld [vmem:[#allocation7 + $0xc8] sm:$0xf] }
 0x5a0   :  { %v3371_v23 = vmul.f32 %v8626_v9, %v3370_v39  ;;  %vm3408_vm7 = vcmp.eq.f32.partialorder %v3407_v56, 8.507059e+37  ;;  %4130 = vmatpush.bf16.msra.mxu2 %v7336_v21  ;;  %v7283_v39 = vld [vmem:[#allocation7 + $0x80] sm:$0xf]  ;;  %v8209_v56 = vld [vmem:[#allocation7 + $0x4] sm:$0xf]  ;;  %v7324_v32 = vor.u32 %v8236_v15, %v7323_v42 }
 0x5a1   :  { %v3386_v28 = vmul.f32 %v8628_v45, %v3385_v44  ;;  %4103 = vmatpush.bf16.msra.mxu0 %v7316_v51  ;;  %v8227_v44 = vld [vmem:[#allocation7 + $0x8c] sm:$0xf0]  ;;  %v8234_v63 = vld [vmem:[#allocation7 + $0xcc] sm:$0xf]  ;;  %v7461_v25 = vld [vmem:[#allocation7 + $0x1f0] sm:$0xf0] }
 0x5a2   :  { %v8630_v0 = vpop.eup %8629  ;;  %v3372_v26 = vadd.f32 %v8626_v9, %v3371_v23  ;;  %v7284_v22 = vor.u32 %v8227_v44, %v7283_v39  ;;  %v7285_v23 = vld [vmem:[#allocation7 + $0x90] sm:$0xf0]  ;;  %v7328_v51 = vor.u32 %v8234_v63, %v7325_v43  ;;  %v7307_v39 = vld [vmem:[#allocation7 + $0xa8] sm:$0xf]  ;;  %v8232_v44 = vld [vmem:[#allocation7 + $0xb4] sm:$0xf0] }
 0x5a3   :  { %v3399_v34 = vmul.f32 %v8630_v0, %v3367_v55  ;;  %v3387_v36 = vadd.f32 %v8628_v45, %v3386_v28  ;;  %v8632_v52 = vpop.eup %8631  ;;  %vm3404_vm4 = vweird.f32 %v8630_v0  ;;  %v7299_v55 = vld [vmem:[#allocation7 + $0xa0] sm:$0xf]  ;;  %v7288_v24 = vor.u32 %v8225_v30, %v7285_v23  ;;  %v8230_v30 = vld [vmem:[#allocation7 + $0xac] sm:$0xf] }
 0x5a4   :  { %v3376_v38 = vsel %vm3375_vm0, %v8626_v9, %v3372_v26  ;;  %vm3405_vm6 = vmor %vm3403_vm5, %vm3404_vm4  ;;  %4131 = vmatpush.bf16.msra.mxu2 %v7320_v4  ;;  %v8231_v9 = vld [vmem:[#allocation7 + $0xac] sm:$0xf0]  ;;  %v7267_v28 = vld [vmem:[#allocation7 + $0x60] sm:$0xf] }
 0x5a5   :  { %v3400_v46 = vsub.f32 1.0, %v3399_v34  ;;  %v3381_v59 = vsel %vm3378_vm2, %v3380_v35, %v3376_v38  ;;  %v3391_v2 = vsel %vm3390_vm1, %v8628_v45, %v3387_v36  ;;  %v7300_v45 = vor.u32 %v8231_v9, %v7299_v55  ;;  %v7269_v34 = vld [vmem:[#allocation7 + $0x70] sm:$0xf0]  ;;  %v7251_v36 = vld [vmem:[#allocation7 + $0x40] sm:$0xf] }
 0x5a6   :  { %v3396_v29 = vsel %vm3393_vm3, %v3395_v1, %v3391_v2  ;;  %v3418_v12 = vmul.f32 %v8632_v52, %v3381_v59  ;;  %v7268_v26 = vor.u32 %v8223_v17, %v7267_v28  ;;  %v8217_v1 = vld [vmem:[#allocation7 + $0x44] sm:$0xf]  ;;  %v7253_v52 = vld [vmem:[#allocation7 + $0x50] sm:$0xf0]  ;;  %v7235_v59 = vld [vmem:[#allocation7 + $0x20] sm:$0xf] }
 0x5a7   :  { %v3401_v13 = vmul.f32 %v8630_v0, %v3400_v46  ;;  %v3417_v16 = vmul.f32 %v3415_v10, %v3396_v29  ;;  %4104 = vmatpush.bf16.msra.mxu0 %v7300_v45  ;;  %v8219_v10 = vld [vmem:[#allocation7 + $0x4c] sm:$0xf0]  ;;  %v7256_v46 = vor.u32 %v8217_v1, %v7253_v52  ;;  %v8213_v29 = vld [vmem:[#allocation7 + $0x24] sm:$0xf]  ;;  %v7309_v28 = vld [vmem:[#allocation7 + $0xb8] sm:$0xf0] }
 0x5a8   :  { %4132 = vmatpush.bf16.msra.mxu2 %v7304_v60  ;;  %v7252_v38 = vor.u32 %v8219_v10, %v7251_v36  ;;  %v8215_v2 = vld [vmem:[#allocation7 + $0x2c] sm:$0xf0]  ;;  %v8269_v55 = vld [vmem:[#allocation7 + $0x1e4] sm:$0xf]  ;;  %v7312_v17 = vor.u32 %v8230_v30, %v7309_v28  ;;  %v7445_v36 = vld [vmem:[#allocation7 + $0x1d0] sm:$0xf0] }
 0x5a9   :  { %v10018_v61 = vadd.f32 %v3418_v12, %v3417_v16  ;;  %v3402_v54 = vadd.f32 %v8630_v0, %v3401_v13  ;;  %v7236_v12 = vor.u32 %v8215_v2, %v7235_v59  ;;  %v7237_v13 = vld [vmem:[#allocation7 + $0x30] sm:$0xf0]  ;;  %v8271_v4 = vld [vmem:[#allocation7 + $0x1ec] sm:$0xf0]  ;;  %v7464_v60 = vor.u32 %v8269_v55, %v7461_v25  ;;  %v8228_v59 = vld [vmem:[#allocation7 + $0x94] sm:$0xf0] }
 0x5aa   :  { %v7240_v16 = vor.u32 %v8213_v29, %v7237_v13  ;;  %v7460_v45 = vor.u32 %v8271_v4, %v7459_v53  ;;  %v8226_v29 = vld [vmem:[#allocation7 + $0x8c] sm:$0xf]  ;;  %v7413_v53 = vld [vmem:[#allocation7 + $0x190] sm:$0xf0] }
 0x5ab   :  { %8633 = vtanh.f32 %v10018_v61  ;;  %v3406_v62 = vsel %vm3405_vm6, %v8630_v0, %v3402_v54  ;;  %4105 = vmatpush.bf16.msra.mxu0 %v7284_v22  ;;  %v8221_v0 = vld [vmem:[#allocation7 + $0x64] sm:$0xf]  ;;  %v7219_v54 = vld [vmem:[#allocation7] sm:$0xf]  ;;  %4144 = vmatpush.bf16.msra.mxu3 %v7464_v60  ;;  %v8218_v25 = vld [vmem:[#allocation7 + $0x4c] sm:$0xf] }
 0x5ac   :  { %v3411_v7 = vsel %vm3408_vm7, %v3410_v5, %v3406_v62  ;;  %4133 = vmatpush.bf16.msra.mxu2 %v7288_v24  ;;  %v7272_v35 = vor.u32 %v8221_v0, %v7269_v34  ;;  %v7220_v62 = vor.u32 %v8211_v57, %v7219_v54  ;;  %v7221_v5 = vld [vmem:[#allocation7 + $0x10] sm:$0xf0]  ;;  %4116 = vmatpush.bf16.msra.mxu1 %v7460_v45  ;;  %v7443_v0 = vld [vmem:[#allocation7 + $0x1c0] sm:$0xf]  ;;  %v8263_v57 = vld [vmem:[#allocation7 + $0x1ac] sm:$0xf0] }
 0x5ad   :  { %v7308_v24 = vor.u32 %v8232_v44, %v7307_v39  ;;  %v7427_v54 = vld [vmem:[#allocation7 + $0x1a0] sm:$0xf]  ;;  %v7261_v60 = vld [vmem:[#allocation7 + $0x58] sm:$0xf0] }
 0x5ae   :  { %v7264_v30 = vor.u32 %v8218_v25, %v7261_v60  ;;  %v7347_v25 = vld [vmem:[#allocation7 + $0x100] sm:$0xf] }
 0x5af   :  { %4106 = vmatpush.bf16.msra.mxu0 %v7268_v26  ;;  %v8267_v26 = vld [vmem:[#allocation7 + $0x1cc] sm:$0xf0] }
 0x5b0   :  { %4134 = vmatpush.bf16.msra.mxu2 %v7272_v35  ;;  %v7444_v35 = vor.u32 %v8267_v26, %v7443_v0  ;;  %v7397_v0 = vld [vmem:[#allocation7 + $0x170] sm:$0xf0]  ;;  %v7243_v26 = vld [vmem:[#allocation7 + $0x28] sm:$0xf] }
 0x5b1   :  { %v8634_v6 = vpop.eup %8633 }
 0x5b2   :  { %v3421_v11 = vmul.f32 %v8634_v6, %v3411_v7  ;;  %v7339_v6 = vld [vmem:[#allocation7 + $0xe8] sm:$0xf]  ;;  %v8240_v7 = vld [vmem:[#allocation7 + $0xf4] sm:$0xf0]  ;;  %4117 = vmatpush.bf16.msra.mxu1 %v7444_v35  ;;  %v8214_v35 = vld [vmem:[#allocation7 + $0x2c] sm:$0xf] }
 0x5b3   :  { %4107 = vmatpush.bf16.msra.mxu0 %v7252_v38 }
 0x5b4   :  { %v3424_v18 = vpack.c.bf16 %v3421_v11, %v3421_v11  ;;  %4135 = vmatpush.bf16.msra.mxu2 %v7256_v46  ;;  %v7224_v11 = vor.u32 %v8209_v56, %v7221_v5  ;;  %v7291_v46 = vld [vmem:[#allocation7 + $0x88] sm:$0xf]  ;;  %v8261_v56 = vld [vmem:[#allocation7 + $0x1a4] sm:$0xf]  ;;  %v7428_v5 = vor.u32 %v8263_v57, %v7427_v54  ;;  %v8212_v57 = vld [vmem:[#allocation7 + $0x14] sm:$0xf0] }
 0x5b5   :  { %v7292_v2 = vor.u32 %v8228_v59, %v7291_v46  ;;  %v8249_v59 = vld [vmem:[#allocation7 + $0x144] sm:$0xf]  ;;  %v7227_v54 = vld [vmem:[#allocation7 + $0x8] sm:$0xf] }
 0x5b6   :  { %3425 = vst [vmem:[#allocation2 + $0x4] sm:$0x2] %v3424_v18  ;;  %v3566_v19 = vunpack.c.l.b16 %v3424_v18  ;;  %v7340_v18 = vor.u32 %v8240_v7, %v7339_v6  ;;  %v7429_v6 = vld [vmem:[#allocation7 + $0x1b0] sm:$0xf0]  ;;  %4118 = vmatpush.bf16.msra.mxu1 %v7428_v5 }
 0x5b7   :  { %4108 = vmatpush.bf16.msra.mxu0 %v7236_v12  ;;  %v7293_v12 = vld [vmem:[#allocation7 + $0x98] sm:$0xf0] }
 0x5b8   :  { %v3567_v20 = vpack.c.b16 %v3566_v19, %v3566_v19  ;;  %4136 = vmatpush.bf16.msra.mxu2 %v7240_v16  ;;  %v8238_v19 = vld [vmem:[#allocation7 + $0xec] sm:$0xf]  ;;  %v7296_v16 = vor.u32 %v8226_v29, %v7293_v12 }
 0x5ba   :  { %v3568_v27 = vrot.slane %v3567_v20, 1  ;;  %v7341_v20 = vld [vmem:[#allocation7 + $0xf8] sm:$0xf0] }
 0x5bb   :  { %4109 = vmatpush.bf16.msra.mxu0 %v7220_v62 }
 0x5bc   :  { %3578 = vmatmul.bf16.vlgmr.msrb.gmra.mxu0 %v3568_v27  ;;  %3591 = vmatmul.bf16.vlgmr.msrb.gmra.mxu1 %v3568_v27 }
 0x5bd   :  { %3604 = vmatmul.bf16.vlgmr.msrb.gmra.mxu2 %v3568_v27  ;;  %3617 = vmatmul.bf16.vlgmr.msrb.gmra.mxu3 %v3568_v27  ;;  %v7344_v27 = vor.u32 %v8238_v19, %v7341_v20  ;;  %v8224_v19 = vld [vmem:[#allocation7 + $0x74] sm:$0xf0]  ;;  %v8222_v20 = vld [vmem:[#allocation7 + $0x6c] sm:$0xf] }
 0x5be   :  { %4137 = vmatpush.bf16.msra.mxu2 %v7224_v11  ;;  %v7432_v11 = vor.u32 %v8261_v56, %v7429_v6 }
 0x5bf   :  { %4158 = vmatpush.bf16.msrb.mxu0 %v7340_v18  ;;  %v7275_v18 = vld [vmem:[#allocation7 + $0x68] sm:$0xf] }
 0x5c2   :  { %4186 = vmatpush.bf16.msrb.mxu2 %v7344_v27 }
 0x5c3   :  { %4159 = vmatpush.bf16.msrb.mxu0 %v7324_v32  ;;  %v8259_v32 = vld [vmem:[#allocation7 + $0x18c] sm:$0xf0] }
 0x5c6   :  { %4187 = vmatpush.bf16.msrb.mxu2 %v7328_v51  ;;  %v8257_v51 = vld [vmem:[#allocation7 + $0x184] sm:$0xf] }
 0x5c7   :  { %4160 = vmatpush.bf16.msrb.mxu0 %v7308_v24  ;;  %v7416_v55 = vor.u32 %v8257_v51, %v7413_v53  ;;  %v8253_v24 = vld [vmem:[#allocation7 + $0x164] sm:$0xf] }
 0x5ca   :  { %4188 = vmatpush.bf16.msrb.mxu2 %v7312_v17 }
 0x5cb   :  { %4161 = vmatpush.bf16.msrb.mxu0 %v7292_v2  ;;  %v7381_v2 = vld [vmem:[#allocation7 + $0x150] sm:$0xf0] }
 0x5cc   :  { %v7384_v6 = vor.u32 %v8249_v59, %v7381_v2 }
 0x5ce   :  { %4189 = vmatpush.bf16.msrb.mxu2 %v7296_v16 }
 0x611   :  { %v3440_v37 = vpop.f32.mrf.mxu0  ;;  %v3453_v41 = vpop.f32.mrf.mxu1 }
 0x612   :  { %v3487_v21 = vrot.slane %v3440_v37, 2  ;;  %v3488_v33 = vrot.slane %v3453_v41, 2  ;;  %v7277_v41 = vld [vmem:[#allocation7 + $0x78] sm:$0xf0] }
 0x614   :  { %v3495_v9 = vadd.f32 %v3487_v21, %v11100_v47  ;;  %v3496_v8 = vadd.f32 %v3488_v33, %v11101_v48  ;;  %v8265_v47 = vld [vmem:[#allocation7 + $0x1c4] sm:$0xf]  ;;  %v7280_v21 = vor.u32 %v8222_v20, %v7277_v41  ;;  %v7411_v33 = vld [vmem:[#allocation7 + $0x180] sm:$0xf] }
 0x615   :  { %v7448_v52 = vor.u32 %v8265_v47, %v7445_v36  ;;  %v7412_v4 = vor.u32 %v8259_v32, %v7411_v33  ;;  %v7245_v36 = vld [vmem:[#allocation7 + $0x38] sm:$0xf0]  ;;  %v7363_v41 = vld [vmem:[#allocation7 + $0x120] sm:$0xf]  ;;  %v8245_v32 = vld [vmem:[#allocation7 + $0x124] sm:$0xf] }
 0x616   :  { %v7203_v22 = vmul.f32 -1.442695, %v3495_v9  ;;  %v7204_v23 = vmul.f32 -1.442695, %v3496_v8  ;;  %4190 = vmatpush.bf16.msrb.mxu2 %v7280_v21  ;;  %v7259_v9 = vld [vmem:[#allocation7 + $0x48] sm:$0xf]  ;;  %v7248_v16 = vor.u32 %v8214_v35, %v7245_v36 }
 0x617   :  { %4145 = vmatpush.bf16.msra.mxu3 %v7448_v52  ;;  %v8220_v8 = vld [vmem:[#allocation7 + $0x54] sm:$0xf0]  ;;  %4119 = vmatpush.bf16.msra.mxu1 %v7412_v4  ;;  %v8270_v36 = vld [vmem:[#allocation7 + $0x1ec] sm:$0xf] }
 0x618   :  { %8635 = vpow2.f32 %v7203_v22  ;;  %v3466_v48 = vpop.f32.mrf.mxu2  ;;  %v3479_v34 = vpop.f32.mrf.mxu3  ;;  %v7260_v45 = vor.u32 %v8220_v8, %v7259_v9  ;;  %v7395_v22 = vld [vmem:[#allocation7 + $0x160] sm:$0xf] }
 0x619   :  { %8637 = vpow2.f32 %v7204_v23  ;;  %v3489_v10 = vrot.slane %v3466_v48, 2  ;;  %v3442_v1 = vpop.f32.mrf.mxu0  ;;  %v3455_v38 = vpop.f32.mrf.mxu1  ;;  %v3490_v43 = vrot.slane %v3479_v34, 2  ;;  %v8255_v23 = vld [vmem:[#allocation7 + $0x16c] sm:$0xf0]  ;;  %v7400_v48 = vor.u32 %v8253_v24, %v7397_v0  ;;  %v8216_v34 = vld [vmem:[#allocation7 + $0x34] sm:$0xf0] }
 0x61a   :  { %v7396_v17 = vor.u32 %v8255_v23, %v7395_v22  ;;  %4191 = vmatpush.bf16.msrb.mxu2 %v7264_v30  ;;  %v7379_v1 = vld [vmem:[#allocation7 + $0x140] sm:$0xf]  ;;  %v8251_v38 = vld [vmem:[#allocation7 + $0x14c] sm:$0xf0]  ;;  %v8241_v30 = vld [vmem:[#allocation7 + $0x104] sm:$0xf] }
 0x61b   :  { %v3497_v13 = vadd.f32 %v3489_v10, %v11102_v58  ;;  %v7276_v58 = vor.u32 %v8224_v19, %v7275_v18  ;;  %4146 = vmatpush.bf16.msra.mxu3 %v7432_v11  ;;  %v3498_v44 = vadd.f32 %v3490_v43, %v11103_v49  ;;  %v7380_v5 = vor.u32 %v8251_v38, %v7379_v1  ;;  %v7229_v11 = vld [vmem:[#allocation7 + $0x18] sm:$0xf0]  ;;  %v7365_v43 = vld [vmem:[#allocation7 + $0x130] sm:$0xf0]  ;;  %v7467_v0 = vld [vmem:[#allocation7 + $0x1e8] sm:$0xf] }
 0x61c   :  { %4120 = vmatpush.bf16.msra.mxu1 %v7396_v17  ;;  %v7228_v19 = vor.u32 %v8212_v57, %v7227_v54  ;;  %v7368_v9 = vor.u32 %v8245_v32, %v7365_v43  ;;  %v7349_v17 = vld [vmem:[#allocation7 + $0x110] sm:$0xf0]  ;;  %v7451_v38 = vld [vmem:[#allocation7 + $0x1c8] sm:$0xf] }
 0x61d   :  { %v7205_v62 = vmul.f32 -1.442695, %v3497_v13  ;;  %4162 = vmatpush.bf16.msrb.mxu0 %v7276_v58  ;;  %v7244_v13 = vor.u32 %v8216_v34, %v7243_v26  ;;  %v8272_v26 = vld [vmem:[#allocation7 + $0x1f4] sm:$0xf0]  ;;  %v7352_v34 = vor.u32 %v8241_v30, %v7349_v17  ;;  %v8303_v17 = vld [vmem:[#allocation7 + $0x2ec] sm:$0xf0] }
 0x61e   :  { %v8636_v7 = vpop.eup %8635  ;;  %4192 = vmatpush.bf16.msrb.mxu2 %v7248_v16  ;;  %v7468_v35 = vor.u32 %v8272_v26, %v7467_v0  ;;  %v7387_v0 = vld [vmem:[#allocation7 + $0x148] sm:$0xf] }
 0x61f   :  { %v8638_v27 = vpop.eup %8637  ;;  %v10024_v37 = vadd.f32 1.0, %v8636_v7  ;;  %8639 = vpow2.f32 %v7205_v62  ;;  %4147 = vmatpush.bf16.msra.mxu3 %v7416_v55  ;;  %v8210_v7 = vld [vmem:[#allocation7 + $0xc] sm:$0xf] }
 0x620   :  { %v10026_v42 = vadd.f32 1.0, %v8638_v27  ;;  %v3468_v15 = vpop.f32.mrf.mxu2  ;;  %v3481_v63 = vpop.f32.mrf.mxu3  ;;  %v7232_v20 = vor.u32 %v8210_v7, %v7229_v11  ;;  %4121 = vmatpush.bf16.msra.mxu1 %v7380_v5  ;;  %v8264_v7 = vld [vmem:[#allocation7 + $0x1b4] sm:$0xf0]  ;;  %v8262_v11 = vld [vmem:[#allocation7 + $0x1ac] sm:$0xf] }
 0x621   :  { %8641 = vrcp.f32 %v10024_v37  ;;  %4163 = vmatpush.bf16.msrb.mxu0 %v7260_v45  ;;  %v3520_v46 = vand.u32 2147483647, %v10024_v37  ;;  %v3522_v12 = vand.u32 2147483648, %v10024_v37  ;;  %v8247_v15 = vld [vmem:[#allocation7 + $0x12c] sm:$0xf0]  ;;  %vm3516_vm11 = vweird.f32 %v10024_v37 }
 0x622   :  { %8643 = vrcp.f32 %v10026_v42  ;;  %v3537_v62 = vand.u32 2147483648, %v10026_v42  ;;  %v3535_v58 = vand.u32 2147483647, %v10026_v42  ;;  %vm3531_vm10 = vweird.f32 %v10026_v42  ;;  %4193 = vmatpush.bf16.msrb.mxu2 %v7232_v20 }
 0x623   :  { %4148 = vmatpush.bf16.msra.mxu3 %v7400_v48  ;;  %v7364_v33 = vor.u32 %v8247_v15, %v7363_v41  ;;  %v3523_v4 = vor.u32 1.1754944e-38, %v3522_v12  ;;  %vm3521_vm14 = vcmp.eq.f32.partialorder %v3520_v46, 8.507059e+37  ;;  %v8266_v46 = vld [vmem:[#allocation7 + $0x1cc] sm:$0xf] }
 0x624   :  { %v3538_v8 = vor.u32 1.1754944e-38, %v3537_v62  ;;  %vm3536_vm15 = vcmp.eq.f32.partialorder %v3535_v58, 8.507059e+37  ;;  %v7437_v58 = vld [vmem:[#allocation7 + $0x1b8] sm:$0xf0] }
 0x625   :  { %v8640_v39 = vpop.eup %8639  ;;  %4164 = vmatpush.bf16.msrb.mxu0 %v7244_v13  ;;  %4122 = vmatpush.bf16.msra.mxu1 %v7364_v33  ;;  %v7440_v15 = vor.u32 %v8262_v11, %v7437_v58  ;;  %v8258_v33 = vld [vmem:[#allocation7 + $0x18c] sm:$0xf]  ;;  %v7371_v11 = vld [vmem:[#allocation7 + $0x128] sm:$0xf] }
 0x626   :  { %v10031_v28 = vadd.f32 1.0, %v8640_v39 }
 0x627   :  { %v10033_v47 = vpop.eup %8641  ;;  %4149 = vmatpush.bf16.msra.mxu3 %v7384_v6  ;;  %v7435_v6 = vld [vmem:[#allocation7 + $0x1a8] sm:$0xf] }
 0x628   :  { %v10035_v49 = vpop.eup %8643  ;;  %v3512_v10 = vmul.f32 %v10033_v47, %v10024_v37  ;;  %8645 = vrcp.f32 %v10031_v28  ;;  %vm3517_vm8 = vweird.f32 %v10033_v47  ;;  %vm3546_vm1 = vweird.f32 %v10031_v28 }
 0x629   :  { %v3527_v52 = vmul.f32 %v10035_v49, %v10026_v42  ;;  %8647 = vtanh.f32 %v3498_v44  ;;  %vm3532_vm9 = vweird.f32 %v10035_v49  ;;  %vm3518_vm12 = vmor %vm3516_vm11, %vm3517_vm8  ;;  %v3558_v42 = vrot.slane %v10010_v40, 6  ;;  %4165 = vmatpush.bf16.msrb.mxu0 %v7228_v19  ;;  %v8243_v40 = vld [vmem:[#allocation7 + $0x10c] sm:$0xf0] }
 0x62a   :  { %v3513_v29 = vsub.f32 1.0, %v3512_v10  ;;  %vm10063_vm13 = vmor %vm3531_vm10, %vm3532_vm9  ;;  %v7348_v24 = vor.u32 %v8243_v40, %v7347_v25  ;;  %v7469_v10 = vld [vmem:[#allocation7 + $0x1f8] sm:$0xf0]  ;;  %v3552_v12 = vand.u32 2147483648, %v10031_v28  ;;  %v8256_v25 = vld [vmem:[#allocation7 + $0x174] sm:$0xf0] }
 0x62b   :  { %v3528_v56 = vsub.f32 1.0, %v3527_v52  ;;  %4150 = vmatpush.bf16.msra.mxu3 %v7368_v9  ;;  %v7472_v1 = vor.u32 %v8270_v36, %v7469_v10  ;;  %v8268_v52 = vld [vmem:[#allocation7 + $0x1d4] sm:$0xf0]  ;;  %v7405_v40 = vld [vmem:[#allocation7 + $0x178] sm:$0xf0] }
 0x62c   :  { %v3514_v18 = vmul.f32 %v10033_v47, %v3513_v29  ;;  %4123 = vmatpush.bf16.msra.mxu1 %v7348_v24  ;;  %v7452_v2 = vor.u32 %v8268_v52, %v7451_v38  ;;  %v7453_v29 = vld [vmem:[#allocation7 + $0x1d8] sm:$0xf0]  ;;  %v3553_v41 = vor.u32 1.1754944e-38, %v3552_v12  ;;  %v7588_v24 = vld [vmem:[#allocation7 + $0x2e0] sm:$0xf] }
 0x62d   :  { %v3529_v27 = vmul.f32 %v10035_v49, %v3528_v56  ;;  %v7456_v54 = vor.u32 %v8266_v46, %v7453_v29  ;;  %v3550_v56 = vand.u32 2147483647, %v10031_v28  ;;  %v8250_v10 = vld [vmem:[#allocation7 + $0x14c] sm:$0xf]  ;;  %v7572_v29 = vld [vmem:[#allocation7 + $0x2c0] sm:$0xf] }
 0x62e   :  { %v10050_v63 = vpop.eup %8645  ;;  %v3515_v21 = vadd.f32 %v10033_v47, %v3514_v18  ;;  %v8299_v12 = vld [vmem:[#allocation7 + $0x2cc] sm:$0xf0] }
 0x62f   :  { %v8648_v51 = vpop.eup %8647  ;;  %v3542_v53 = vmul.f32 %v10050_v63, %v10031_v28  ;;  %v3530_v55 = vadd.f32 %v10035_v49, %v3529_v27  ;;  %vm3547_vm0 = vweird.f32 %v10050_v63  ;;  %4151 = vmatpush.bf16.msra.mxu3 %v7352_v34  ;;  %v7436_v27 = vor.u32 %v8264_v7, %v7435_v6  ;;  %v7590_v34 = vld [vmem:[#allocation7 + $0x2f0] sm:$0xf0]  ;;  %v10103_v6 = vld [vmem:[#allocation7 + $0x2a0] sm:$0xf]  ;;  %v10105_v7 = vld [vmem:[#allocation7 + $0x2ac] sm:$0xf0] }
 0x630   :  { %v3519_v45 = vsel %vm3518_vm12, %v10033_v47, %v3515_v21  ;;  %4172 = vmatpush.bf16.msrb.mxu1 %v7468_v35  ;;  %vm10078_vm2 = vmor %vm3546_vm1, %vm3547_vm0  ;;  %vm3551_vm3 = vcmp.eq.f32.partialorder %v3550_v56, 8.507059e+37  ;;  %v8260_v21 = vld [vmem:[#allocation7 + $0x194] sm:$0xf0]  ;;  %v8297_v56 = vld [vmem:[#allocation7 + $0x2c4] sm:$0xf] }
 0x631   :  { %v3543_v60 = vsub.f32 1.0, %v3542_v53  ;;  %v3524_v39 = vsel %vm3521_vm14, %v3523_v4, %v3519_v45  ;;  %v3534_v44 = vsel %vm10063_vm13, %v10035_v49, %v3530_v55  ;;  %v7421_v53 = vld [vmem:[#allocation7 + $0x198] sm:$0xf0]  ;;  %v7403_v45 = vld [vmem:[#allocation7 + $0x168] sm:$0xf] }
 0x632   :  { %v3539_v22 = vsel %vm3536_vm15, %v3538_v8, %v3534_v44  ;;  %v3561_v23 = vmul.f32 %v8648_v51, %v3524_v39  ;;  %v7404_v39 = vor.u32 %v8256_v25, %v7403_v45  ;;  %v8254_v44 = vld [vmem:[#allocation7 + $0x16c] sm:$0xf]  ;;  %v8252_v35 = vld [vmem:[#allocation7 + $0x154] sm:$0xf0]  ;;  %v7357_v25 = vld [vmem:[#allocation7 + $0x118] sm:$0xf0] }
 0x633   :  { %v3544_v47 = vmul.f32 %v10050_v63, %v3543_v60  ;;  %v3560_v48 = vmul.f32 %v3558_v42, %v3539_v22  ;;  %4200 = vmatpush.bf16.msrb.mxu3 %v7472_v1  ;;  %v7424_v42 = vor.u32 %v8258_v33, %v7421_v53  ;;  %v7388_v36 = vor.u32 %v8252_v35, %v7387_v0  ;;  %v7389_v1 = vld [vmem:[#allocation7 + $0x158] sm:$0xf0]  ;;  %v8242_v45 = vld [vmem:[#allocation7 + $0x10c] sm:$0xf] }
 0x634   :  { %4173 = vmatpush.bf16.msrb.mxu1 %v7452_v2  ;;  %v7392_v38 = vor.u32 %v8250_v10, %v7389_v1  ;;  %v7360_v0 = vor.u32 %v8242_v45, %v7357_v25 }
 0x635   :  { %v3562_v49 = vadd.f32 %v3561_v23, %v3560_v48  ;;  %v3545_v59 = vadd.f32 %v10050_v63, %v3544_v47  ;;  %v7408_v23 = vor.u32 %v8254_v44, %v7405_v40  ;;  %v8301_v48 = vld [vmem:[#allocation7 + $0x2e4] sm:$0xf]  ;;  %v7542_v40 = vld [vmem:[#allocation7 + $0x290] sm:$0xf0] }
 0x636   :  { %v7593_v2 = vor.u32 %v8301_v48, %v7590_v34  ;;  %v8289_v44 = vld [vmem:[#allocation7 + $0x284] sm:$0xf] }
 0x637   :  { %8649 = vtanh.f32 %v3562_v49  ;;  %v3549_v18 = vsel %vm10078_vm2, %v10050_v63, %v3545_v59  ;;  %4201 = vmatpush.bf16.msrb.mxu3 %v7456_v54  ;;  %v7211_v49 = vld [vmem:[#allocation2] sm:$0xf]  ;;  %v7589_v59 = vor.u32 %v8303_v17, %v7588_v24  ;;  %v3685_v54 = vrot.slane %v10018_v61, 2 }
 0x638   :  { %v3554_v28 = vsel %vm3551_vm3, %v3553_v41, %v3549_v18  ;;  %4174 = vmatpush.bf16.msrb.mxu1 %v7436_v27  ;;  %v8246_v27 = vld [vmem:[#allocation7 + $0x12c] sm:$0xf]  ;;  %v7573_v41 = vor.u32 %v8299_v12, %v7572_v29 }
 0x639   :  { %v3579_v13 = vpop.f32.mrf.mxu0  ;;  %v3592_v16 = vpop.f32.mrf.mxu1 }
 0x63a   :  { %v3622_v62 = vadd.f32 %v3579_v13, %v11027_v3  ;;  %v3623_v5 = vadd.f32 %v3592_v16, %v11028_v50  ;;  %v7419_v50 = vld [vmem:[#allocation7 + $0x188] sm:$0xf] }
 0x63b   :  { %4202 = vmatpush.bf16.msrb.mxu3 %v7440_v15  ;;  %v7420_v63 = vor.u32 %v8260_v21, %v7419_v50  ;;  %v7373_v50 = vld [vmem:[#allocation7 + $0x138] sm:$0xf0] }
 0x63c   :  { %v7206_v19 = vmul.f32 -1.442695, %v3622_v62  ;;  %v7207_v20 = vmul.f32 -1.442695, %v3623_v5  ;;  %v7574_v62 = vld [vmem:[#allocation7 + $0x2d0] sm:$0xf0] }
 0x63d   :  { %v8650_v3 = vpop.eup %8649  ;;  %4175 = vmatpush.bf16.msrb.mxu1 %v7420_v63  ;;  %v7577_v15 = vor.u32 %v8297_v56, %v7574_v62 }
 0x63e   :  { %8651 = vpow2.f32 %v7206_v19  ;;  %v3564_v32 = vmul.f32 %v8650_v3, %v3554_v28  ;;  %v8293_v19 = vld [vmem:[#allocation7 + $0x2a4] sm:$0xf]  ;;  %v7558_v3 = vld [vmem:[#allocation7 + $0x2b0] sm:$0xf0]  ;;  %v7540_v28 = vld [vmem:[#allocation7 + $0x280] sm:$0xf] }
 0x63f   :  { %8653 = vpow2.f32 %v7207_v20  ;;  %4203 = vmatpush.bf16.msrb.mxu3 %v7424_v42  ;;  %v8248_v20 = vld [vmem:[#allocation7 + $0x134] sm:$0xf0]  ;;  %v7557_v42 = vor.u32 %v10105_v7, %v10103_v6  ;;  %v8283_v7 = vld [vmem:[#allocation7 + $0x24c] sm:$0xf0] }
 0x640   :  { %v3605_v43 = vpop.f32.mrf.mxu2  ;;  %v3618_v51 = vpop.f32.mrf.mxu3  ;;  %v3692_v37 = vpack.c.bf16 %v3564_v32, %v3564_v32  ;;  %v8291_v32 = vld [vmem:[#allocation7 + $0x28c] sm:$0xf0] }
 0x641   :  { %v3624_v4 = vadd.f32 %v3605_v43, %v11029_v31  ;;  %v3581_v55 = vpop.f32.mrf.mxu0  ;;  %v3594_v9 = vpop.f32.mrf.mxu1  ;;  %4176 = vmatpush.bf16.msrb.mxu1 %v7404_v39  ;;  %v3625_v16 = vadd.f32 %v3618_v51, %v11030_v14  ;;  %v7372_v43 = vor.u32 %v8248_v20, %v7371_v11  ;;  %v7541_v17 = vor.u32 %v8291_v32, %v7540_v28  ;;  %v8281_v11 = vld [vmem:[#allocation7 + $0x244] sm:$0xf]  ;;  %v7492_v20 = vld [vmem:[#allocation7 + $0x220] sm:$0xf]  ;;  %v8275_v32 = vld [vmem:[#allocation7 + $0x20c] sm:$0xf0] }
 0x642   :  { %3693 = vst [vmem:[#allocation2 + $0x8] sm:$0x8] %v3692_v37  ;;  %v7355_v55 = vld [vmem:[#allocation7 + $0x108] sm:$0xf]  ;;  %v7561_v37 = vor.u32 %v8293_v19, %v7558_v3 }
 0x643   :  { %v7208_v8 = vmul.f32 -1.442695, %v3624_v4  ;;  %4204 = vmatpush.bf16.msrb.mxu3 %v7408_v23  ;;  %v7376_v4 = vor.u32 %v8246_v27, %v7373_v50 }
 0x644   :  { %v8652_v60 = vpop.eup %8651 }
 0x645   :  { %v8654_v30 = vpop.eup %8653  ;;  %v10089_v22 = vadd.f32 1.0, %v8652_v60  ;;  %8655 = vpow2.f32 %v7208_v8  ;;  %4177 = vmatpush.bf16.msrb.mxu1 %v7388_v36  ;;  %v8244_v8 = vld [vmem:[#allocation7 + $0x114] sm:$0xf0]  ;;  %v7545_v36 = vor.u32 %v8289_v44, %v7542_v40  ;;  %v8298_v44 = vld [vmem:[#allocation7 + $0x2cc] sm:$0xf] }
 0x646   :  { %v10091_v31 = vadd.f32 1.0, %v8654_v30  ;;  %v7356_v30 = vor.u32 %v8244_v8, %v7355_v55  ;;  %v8302_v55 = vld [vmem:[#allocation7 + $0x2ec] sm:$0xf]  ;;  %v7582_v40 = vld [vmem:[#allocation7 + $0x2d8] sm:$0xf0] }
 0x647   :  { %8657 = vrcp.f32 %v10089_v22  ;;  %4205 = vmatpush.bf16.msrb.mxu3 %v7392_v38  ;;  %v3647_v33 = vand.u32 2147483647, %v10089_v22  ;;  %v3649_v53 = vand.u32 2147483648, %v10089_v22  ;;  %vm3643_vm6 = vweird.f32 %v10089_v22 }
 0x648   :  { %8659 = vrcp.f32 %v10091_v31  ;;  %v3607_v26 = vpop.f32.mrf.mxu2  ;;  %v3620_v47 = vpop.f32.mrf.mxu3  ;;  %v3664_v63 = vand.u32 2147483648, %v10091_v31  ;;  %v3662_v39 = vand.u32 2147483647, %v10091_v31  ;;  %vm3658_vm7 = vweird.f32 %v10091_v31 }
 0x649   :  { %v8208_v46 = vld [vmem:[#allocation2 + $0x4] sm:$0xf0]  ;;  %4178 = vmatpush.bf16.msrb.mxu1 %v7372_v43  ;;  %v3650_v47 = vor.u32 1.1754944e-38, %v3649_v53  ;;  %vm3648_vm10 = vcmp.eq.f32.partialorder %v3647_v33, 8.507059e+37  ;;  %v7476_v33 = vld [vmem:[#allocation7 + $0x200] sm:$0xf] }
 0x64a   :  { %v10099_v57 = vor.u32 %v8208_v46, %v7211_v49  ;;  %v3665_v35 = vor.u32 1.1754944e-38, %v3664_v63  ;;  %vm3663_vm11 = vcmp.eq.f32.partialorder %v3662_v39, 8.507059e+37  ;;  %v7524_v49 = vld [vmem:[#allocation7 + $0x260] sm:$0xf]  ;;  %v8287_v46 = vld [vmem:[#allocation7 + $0x26c] sm:$0xf0] }
 0x64b   :  { %v8656_v52 = vpop.eup %8655  ;;  %4206 = vmatpush.bf16.msrb.mxu3 %v7376_v4  ;;  %v7525_v56 = vor.u32 %v8287_v46, %v7524_v49  ;;  %v7478_v63 = vld [vmem:[#allocation7 + $0x210] sm:$0xf0]  ;;  %v7596_v53 = vld [vmem:[#allocation7 + $0x2e8] sm:$0xf]  ;;  %v8304_v4 = vld [vmem:[#allocation7 + $0x2f4] sm:$0xf0] }
 0x64c   :  { %v10095_v13 = vadd.f32 1.0, %v8656_v52  ;;  %4110 = vmatmul.bf16.vlgmr.msra.gmra.mxu0 %v10099_v57  ;;  %4138 = vmatmul.bf16.vlgmr.msra.gmra.mxu2 %v10099_v57  ;;  %v7597_v45 = vor.u32 %v8304_v4, %v7596_v53  ;;  %v8300_v39 = vld [vmem:[#allocation7 + $0x2d4] sm:$0xf0]  ;;  %v8331_v49 = vld [vmem:[#allocation7 + $0x3cc] sm:$0xf0] }
 0x64d   :  { %v10101_v5 = vpop.eup %8657  ;;  %4610 = vmatpush.bf16.msra.mxu0 %v7589_v59  ;;  %4636 = vmatpush.bf16.msra.mxu2 %v7593_v2  ;;  %v8285_v59 = vld [vmem:[#allocation7 + $0x264] sm:$0xf]  ;;  %v7526_v2 = vld [vmem:[#allocation7 + $0x270] sm:$0xf0]  ;;  %v7652_v4 = vld [vmem:[#allocation7 + $0x360] sm:$0xf] }
 0x64e   :  { %v10107_v18 = vpop.eup %8659  ;;  %v3639_v14 = vmul.f32 %v10101_v5, %v10089_v22  ;;  %8661 = vrcp.f32 %v10095_v13  ;;  %vm3644_vm4 = vweird.f32 %v10101_v5  ;;  %4179 = vmatpush.bf16.msrb.mxu1 %v7356_v30  ;;  %v7529_v62 = vor.u32 %v8285_v59, %v7526_v2  ;;  %v7716_v30 = vld [vmem:[#allocation7 + $0x3e0] sm:$0xf]  ;;  %v8329_v59 = vld [vmem:[#allocation7 + $0x3c4] sm:$0xf]  ;;  %v7702_v2 = vld [vmem:[#allocation7 + $0x3d0] sm:$0xf0] }
 0x64f   :  { %v3654_v58 = vmul.f32 %v10107_v18, %v10091_v31  ;;  %8663 = vtanh.f32 %v3625_v16  ;;  %vm3659_vm5 = vweird.f32 %v10107_v18  ;;  %vm3645_vm8 = vmor %vm3643_vm6, %vm3644_vm4  ;;  %4207 = vmatpush.bf16.msrb.mxu3 %v7360_v0  ;;  %vm3673_vm13 = vweird.f32 %v10095_v13  ;;  %v8333_v0 = vld [vmem:[#allocation7 + $0x3e4] sm:$0xf] }
 0x650   :  { %v3640_v21 = vsub.f32 1.0, %v3639_v14  ;;  %vm3660_vm9 = vmor %vm3658_vm7, %vm3659_vm5  ;;  %v3679_v14 = vand.u32 2147483648, %v10095_v13  ;;  %v3677_v61 = vand.u32 2147483647, %v10095_v13 }
 0x651   :  { %v3655_v51 = vsub.f32 1.0, %v3654_v58  ;;  %4611 = vmatpush.bf16.msra.mxu0 %v7573_v41  ;;  %4637 = vmatpush.bf16.msra.mxu2 %v7577_v15  ;;  %v8279_v58 = vld [vmem:[#allocation7 + $0x22c] sm:$0xf0]  ;;  %v8277_v41 = vld [vmem:[#allocation7 + $0x224] sm:$0xf] }
 0x652   :  { %v3641_v9 = vmul.f32 %v10101_v5, %v3640_v21  ;;  %v7494_v15 = vld [vmem:[#allocation7 + $0x230] sm:$0xf0]  ;;  %v3680_v3 = vor.u32 1.1754944e-38, %v3679_v14  ;;  %vm3678_vm15 = vcmp.eq.f32.partialorder %v3677_v61, 8.507059e+37  ;;  %v8325_v14 = vld [vmem:[#allocation7 + $0x3a4] sm:$0xf] }
 0x653   :  { %v3656_v60 = vmul.f32 %v10107_v18, %v3655_v51  ;;  %v7497_v21 = vor.u32 %v8277_v41, %v7494_v15  ;;  %v8273_v51 = vld [vmem:[#allocation7 + $0x204] sm:$0xf]  ;;  %v7686_v61 = vld [vmem:[#allocation7 + $0x3b0] sm:$0xf0]  ;;  %v7668_v15 = vld [vmem:[#allocation7 + $0x380] sm:$0xf] }
 0x654   :  { %v10126_v23 = vpop.eup %8661  ;;  %v3642_v24 = vadd.f32 %v10101_v5, %v3641_v9  ;;  %v7598_v9 = vld [vmem:[#allocation7 + $0x2f8] sm:$0xf0]  ;;  %v7481_v8 = vor.u32 %v8273_v51, %v7478_v63  ;;  %v7689_v41 = vor.u32 %v8325_v14, %v7686_v61  ;;  %v7604_v14 = vld [vmem:[#allocation7 + $0x300] sm:$0xf]  ;;  %v8307_v61 = vld [vmem:[#allocation7 + $0x30c] sm:$0xf0] }
 0x655   :  { %v3669_v26 = vmul.f32 %v10126_v23, %v10095_v13  ;;  %v3657_v48 = vadd.f32 %v10107_v18, %v3656_v60  ;;  %v8664_v34 = vpop.eup %8663  ;;  %4612 = vmatpush.bf16.msra.mxu0 %v7557_v42  ;;  %4638 = vmatpush.bf16.msra.mxu2 %v7561_v37  ;;  %vm3674_vm12 = vweird.f32 %v10126_v23  ;;  %v7493_v13 = vor.u32 %v8279_v58, %v7492_v20  ;;  %v7580_v60 = vld [vmem:[#allocation7 + $0x2c8] sm:$0xf]  ;;  %v8286_v20 = vld [vmem:[#allocation7 + $0x26c] sm:$0xf]  ;;  %v7518_v51 = vld [vmem:[#allocation7 + $0x258] sm:$0xf0] }
 0x656   :  { %v3646_v22 = vsel %vm3645_vm8, %v10101_v5, %v3642_v24  ;;  %v7508_v5 = vld [vmem:[#allocation7 + $0x240] sm:$0xf]  ;;  %vm3675_vm14 = vmor %vm3673_vm13, %vm3674_vm12  ;;  %v7477_v37 = vor.u32 %v8275_v32, %v7476_v33  ;;  %v7601_v25 = vor.u32 %v8302_v55, %v7598_v9  ;;  %v7581_v24 = vor.u32 %v8300_v39, %v7580_v60  ;;  %v7516_v33 = vld [vmem:[#allocation7 + $0x248] sm:$0xf] }
 0x657   :  { %v3670_v31 = vsub.f32 1.0, %v3669_v26  ;;  %v3651_v10 = vsel %vm3648_vm10, %v3650_v47, %v3646_v22  ;;  %v3661_v1 = vsel %vm3660_vm9, %v10107_v18, %v3657_v48  ;;  %v7510_v18 = vld [vmem:[#allocation7 + $0x250] sm:$0xf0]  ;;  %v7564_v47 = vld [vmem:[#allocation7 + $0x2a8] sm:$0xf] }
 0x658   :  { %v3666_v38 = vsel %vm3663_vm11, %v3665_v35, %v3661_v1  ;;  %v3688_v52 = vmul.f32 %v8664_v34, %v3651_v10  ;;  %v7513_v19 = vor.u32 %v8281_v11, %v7510_v18  ;;  %v7718_v26 = vld [vmem:[#allocation7 + $0x3f0] sm:$0xf0]  ;;  %v8296_v48 = vld [vmem:[#allocation7 + $0x2b4] sm:$0xf0]  ;;  %v8294_v34 = vld [vmem:[#allocation7 + $0x2ac] sm:$0xf] }
 0x659   :  { %v3671_v29 = vmul.f32 %v10126_v23, %v3670_v31  ;;  %v3687_v12 = vmul.f32 %v3685_v54, %v3666_v38  ;;  %4613 = vmatpush.bf16.msra.mxu0 %v7541_v17  ;;  %4639 = vmatpush.bf16.msra.mxu2 %v7545_v36  ;;  %v7509_v54 = vor.u32 %v8283_v7, %v7508_v5  ;;  %v7566_v35 = vld [vmem:[#allocation7 + $0x2b8] sm:$0xf0]  ;;  %v7700_v1 = vld [vmem:[#allocation7 + $0x3c0] sm:$0xf]  ;;  %v8327_v7 = vld [vmem:[#allocation7 + $0x3ac] sm:$0xf0] }
 0x65a   :  { %v7585_v17 = vor.u32 %v8298_v44, %v7582_v40  ;;  %v7213_v22 = vld [vmem:[#allocation2 + $0x8] sm:$0xf0]  ;;  %v7721_v10 = vor.u32 %v8333_v0, %v7718_v26  ;;  %v7569_v46 = vor.u32 %v8294_v34, %v7566_v35  ;;  %v7705_v5 = vor.u32 %v8329_v59, %v7702_v2  ;;  %v8284_v32 = vld [vmem:[#allocation7 + $0x254] sm:$0xf0]  ;;  %v8319_v55 = vld [vmem:[#allocation7 + $0x36c] sm:$0xf0] }
 0x65b   :  { %v3689_v16 = vadd.f32 %v3688_v52, %v3687_v12  ;;  %v3672_v6 = vadd.f32 %v10126_v23, %v3671_v29  ;;  %v7565_v52 = vor.u32 %v8296_v48, %v7564_v47  ;;  %v7548_v29 = vld [vmem:[#allocation7 + $0x288] sm:$0xf]  ;;  %v8292_v12 = vld [vmem:[#allocation7 + $0x294] sm:$0xf0]  ;;  %v7517_v9 = vor.u32 %v8284_v32, %v7516_v33  ;;  %v8278_v60 = vld [vmem:[#allocation7 + $0x22c] sm:$0xf] }
 0x65c   :  { %4166 = vmatmul.bf16.vlgmr.msrb.gmra.mxu0 %v10099_v57  ;;  %4194 = vmatmul.bf16.vlgmr.msrb.gmra.mxu2 %v10099_v57  ;;  %v7549_v11 = vor.u32 %v8292_v12, %v7548_v29  ;;  %v7502_v39 = vld [vmem:[#allocation7 + $0x238] sm:$0xf0]  ;;  %v7653_v44 = vor.u32 %v8319_v55, %v7652_v4  ;;  %v7638_v26 = vld [vmem:[#allocation7 + $0x350] sm:$0xf0]  ;;  %v7484_v47 = vld [vmem:[#allocation7 + $0x208] sm:$0xf]  ;;  %v7605_v33 = vor.u32 %v8307_v61, %v7604_v14 }
 0x65d   :  { %8665 = vtanh.f32 %v3689_v16  ;;  %4614 = vmatpush.bf16.msra.mxu0 %v7525_v56  ;;  %4640 = vmatpush.bf16.msra.mxu2 %v7529_v62  ;;  %v3676_v27 = vsel %vm3675_vm14, %v10126_v23, %v3672_v6  ;;  %v8335_v23 = vld [vmem:[#allocation7 + $0x3ec] sm:$0xf0]  ;;  %v8290_v16 = vld [vmem:[#allocation7 + $0x28c] sm:$0xf]  ;;  %v7550_v56 = vld [vmem:[#allocation7 + $0x298] sm:$0xf0]  ;;  %v7701_v62 = vor.u32 %v8331_v49, %v7700_v1  ;;  %v7505_v0 = vor.u32 %v8278_v60, %v7502_v39 }
 0x65e   :  { %v3681_v50 = vsel %vm3678_vm15, %v3680_v3, %v3676_v27  ;;  %v7717_v31 = vor.u32 %v8335_v23, %v7716_v30  ;;  %v7684_v6 = vld [vmem:[#allocation7 + $0x3a0] sm:$0xf]  ;;  %v7553_v18 = vor.u32 %v8290_v16, %v7550_v56  ;;  %v7534_v27 = vld [vmem:[#allocation7 + $0x278] sm:$0xf0]  ;;  %v8323_v3 = vld [vmem:[#allocation7 + $0x38c] sm:$0xf0] }
 0x65f   :  { %v7685_v58 = vor.u32 %v8327_v7, %v7684_v6  ;;  %v7669_v63 = vor.u32 %v8323_v3, %v7668_v15  ;;  %v7636_v30 = vld [vmem:[#allocation7 + $0x340] sm:$0xf]  ;;  %v8315_v23 = vld [vmem:[#allocation7 + $0x34c] sm:$0xf0]  ;;  %v8276_v48 = vld [vmem:[#allocation7 + $0x214] sm:$0xf0] }
 0x660   :  { %v8274_v34 = vld [vmem:[#allocation7 + $0x20c] sm:$0xf]  ;;  %v7486_v35 = vld [vmem:[#allocation7 + $0x218] sm:$0xf0]  ;;  %v7637_v1 = vor.u32 %v8315_v23, %v7636_v30  ;;  %v8311_v2 = vld [vmem:[#allocation7 + $0x32c] sm:$0xf0] }
 0x661   :  { %4615 = vmatpush.bf16.msra.mxu0 %v7509_v54  ;;  %4641 = vmatpush.bf16.msra.mxu2 %v7513_v19  ;;  %v7532_v54 = vld [vmem:[#allocation7 + $0x268] sm:$0xf]  ;;  %v8288_v19 = vld [vmem:[#allocation7 + $0x274] sm:$0xf0]  ;;  %v7489_v59 = vor.u32 %v8274_v34, %v7486_v35  ;;  %v8309_v29 = vld [vmem:[#allocation7 + $0x324] sm:$0xf] }
 0x662   :  { %v7622_v12 = vld [vmem:[#allocation7 + $0x330] sm:$0xf0]  ;;  %v7836_v6 = vld [vmem:[#allocation8 + $0xc8] sm:$0xf]  ;;  %v8364_v7 = vld [vmem:[#allocation8 + $0xd4] sm:$0xf0] }
 0x663   :  { %v8666_v28 = vpop.eup %8665  ;;  %v8334_v15 = vld [vmem:[#allocation7 + $0x3ec] sm:$0xf]  ;;  %v7726_v3 = vld [vmem:[#allocation7 + $0x3f8] sm:$0xf0]  ;;  %v7692_v39 = vld [vmem:[#allocation7 + $0x3a8] sm:$0xf] }
 0x664   :  { %v3691_v43 = vmul.f32 %v8666_v28, %v3681_v50  ;;  %v7533_v28 = vor.u32 %v8288_v19, %v7532_v54  ;;  %v7537_v50 = vor.u32 %v8286_v20, %v7534_v27  ;;  %v8305_v54 = vld [vmem:[#allocation7 + $0x304] sm:$0xf]  ;;  %v7606_v19 = vld [vmem:[#allocation7 + $0x310] sm:$0xf0]  ;;  %v7724_v20 = vld [vmem:[#allocation7 + $0x3e8] sm:$0xf] }
 0x665   :  { %4616 = vmatpush.bf16.msra.mxu0 %v7493_v13  ;;  %4642 = vmatpush.bf16.msra.mxu2 %v7497_v21  ;;  %v8321_v13 = vld [vmem:[#allocation7 + $0x384] sm:$0xf]  ;;  %v7670_v21 = vld [vmem:[#allocation7 + $0x390] sm:$0xf0]  ;;  %v8336_v27 = vld [vmem:[#allocation7 + $0x3f4] sm:$0xf0]  ;;  %v7609_v32 = vor.u32 %v8305_v54, %v7606_v19 }
 0x666   :  { %v3694_v42 = vpack.c.bf16 %v3691_v43, %v3691_v43  ;;  %v8282_v43 = vld [vmem:[#allocation7 + $0x24c] sm:$0xf]  ;;  %v7673_v53 = vor.u32 %v8321_v13, %v7670_v21  ;;  %v7820_v13 = vld [vmem:[#allocation8 + $0xa8] sm:$0xf]  ;;  %v8360_v21 = vld [vmem:[#allocation8 + $0xb4] sm:$0xf0] }
 0x667   :  { %v10175_v55 = vor.u32 %v8360_v21, %v7820_v13  ;;  %v8326_v23 = vld [vmem:[#allocation7 + $0x3ac] sm:$0xf]  ;;  %v7676_v35 = vld [vmem:[#allocation7 + $0x388] sm:$0xf]  ;;  %v8343_v14 = vld [vmem:[#allocation8 + $0x2c] sm:$0xf0] }
 0x668   :  { %3695 = vst [vmem:[#allocation2 + $0x4] sm:$0x1] %v3694_v42  ;;  %v7521_v42 = vor.u32 %v8282_v43, %v7518_v51  ;;  %v7725_v43 = vor.u32 %v8336_v27, %v7724_v20  ;;  %v7729_v51 = vor.u32 %v8334_v15, %v7726_v3  ;;  %v7756_v61 = vld [vmem:[#allocation8 + $0x28] sm:$0xf]  ;;  %v8344_v54 = vld [vmem:[#allocation8 + $0x34] sm:$0xf0] }
 0x669   :  { %4617 = vmatpush.bf16.msra.mxu0 %v7477_v37  ;;  %4643 = vmatpush.bf16.msra.mxu2 %v7481_v8  ;;  %v8317_v37 = vld [vmem:[#allocation7 + $0x364] sm:$0xf]  ;;  %v7654_v8 = vld [vmem:[#allocation7 + $0x370] sm:$0xf0]  ;;  %v7644_v27 = vld [vmem:[#allocation7 + $0x348] sm:$0xf] }
 0x66a   :  { %v7657_v40 = vor.u32 %v8317_v37, %v7654_v8  ;;  %v7796_v37 = vld [vmem:[#allocation8 + $0x80] sm:$0xf]  ;;  %v8355_v8 = vld [vmem:[#allocation8 + $0x8c] sm:$0xf0]  ;;  %v8316_v15 = vld [vmem:[#allocation7 + $0x354] sm:$0xf0] }
 0x66b   :  { %v8314_v3 = vld [vmem:[#allocation7 + $0x34c] sm:$0xf]  ;;  %v7646_v13 = vld [vmem:[#allocation7 + $0x358] sm:$0xf0]  ;;  %v7732_v21 = vld [vmem:[#allocation8] sm:$0xf] }
 0x66c   :  { %4618 = vmatmul.bf16.vlgmr.msra.gmra.mxu0 %v10099_v57  ;;  %4644 = vmatmul.bf16.vlgmr.msra.gmra.mxu2 %v10099_v57 }
 0x66d   :  { %4662 = vmatpush.bf16.msrb.mxu0 %v7597_v45  ;;  %4688 = vmatpush.bf16.msrb.mxu2 %v7601_v25  ;;  %v7500_v45 = vld [vmem:[#allocation7 + $0x228] sm:$0xf]  ;;  %v8280_v25 = vld [vmem:[#allocation7 + $0x234] sm:$0xf0] }
 0x66f   :  { %v8207_v36 = vld [vmem:[#allocation2 + $0x4] sm:$0xf] }
 0x670   :  { %v10153_v38 = vor.u32 %v8207_v36, %v7213_v22  ;;  %v7844_v22 = vld [vmem:[#allocation8 + $0xe0] sm:$0xf]  ;;  %v8367_v36 = vld [vmem:[#allocation8 + $0xec] sm:$0xf0] }
 0x671   :  { %4663 = vmatpush.bf16.msrb.mxu0 %v7581_v24  ;;  %4689 = vmatpush.bf16.msrb.mxu2 %v7585_v17  ;;  %v8313_v24 = vld [vmem:[#allocation7 + $0x344] sm:$0xf]  ;;  %v7501_v17 = vor.u32 %v8280_v25, %v7500_v45  ;;  %v10159_v16 = vor.u32 %v8367_v36, %v7844_v22  ;;  %v7804_v45 = vld [vmem:[#allocation8 + $0x88] sm:$0xf]  ;;  %v8356_v25 = vld [vmem:[#allocation8 + $0x94] sm:$0xf0] }
 0x672   :  { %4124 = vmatmul.bf16.vlgmr.msra.gmra.mxu1 %v10153_v38  ;;  %4152 = vmatmul.bf16.vlgmr.msra.gmra.mxu3 %v10153_v38  ;;  %v7641_v49 = vor.u32 %v8313_v24, %v7638_v26  ;;  %v10181_v30 = vor.u32 %v8356_v25, %v7804_v45  ;;  %v7694_v24 = vld [vmem:[#allocation7 + $0x3b8] sm:$0xf0]  ;;  %v7788_v26 = vld [vmem:[#allocation8 + $0x68] sm:$0xf]  ;;  %v8324_v22 = vld [vmem:[#allocation7 + $0x394] sm:$0xf0] }
 0x673   :  { %4623 = vmatpush.bf16.msra.mxu1 %v7717_v31  ;;  %4649 = vmatpush.bf16.msra.mxu3 %v7721_v10  ;;  %v7852_v31 = vld [vmem:[#allocation8 + $0xe8] sm:$0xf]  ;;  %v8368_v10 = vld [vmem:[#allocation8 + $0xf4] sm:$0xf0]  ;;  %v7697_v34 = vor.u32 %v8326_v23, %v7694_v24  ;;  %v7959_v24 = vld [vmem:[#allocation8 + $0x1c0] sm:$0xf] }
 0x674   :  { %v10161_v56 = vor.u32 %v8368_v10, %v7852_v31  ;;  %v8322_v10 = vld [vmem:[#allocation7 + $0x38c] sm:$0xf] }
 0x675   :  { %4664 = vmatpush.bf16.msrb.mxu0 %v7565_v52  ;;  %4690 = vmatpush.bf16.msrb.mxu2 %v7569_v46  ;;  %v7620_v52 = vld [vmem:[#allocation7 + $0x320] sm:$0xf]  ;;  %v7485_v46 = vor.u32 %v8276_v48, %v7484_v47  ;;  %v8352_v47 = vld [vmem:[#allocation8 + $0x74] sm:$0xf0] }
 0x676   :  { %v10189_v31 = vor.u32 %v8352_v47, %v7788_v26  ;;  %v8396_v26 = vld [vmem:[#allocation8 + $0x1d4] sm:$0xf0] }
 0x677   :  { %4624 = vmatpush.bf16.msra.mxu1 %v7701_v62  ;;  %4650 = vmatpush.bf16.msra.mxu3 %v7705_v5  ;;  %v7828_v62 = vld [vmem:[#allocation8 + $0xc0] sm:$0xf]  ;;  %v8363_v5 = vld [vmem:[#allocation8 + $0xcc] sm:$0xf0] }
 0x679   :  { %4665 = vmatpush.bf16.msrb.mxu0 %v7549_v11  ;;  %4691 = vmatpush.bf16.msrb.mxu2 %v7553_v18  ;;  %v7621_v11 = vor.u32 %v8311_v2, %v7620_v52  ;;  %v7625_v18 = vor.u32 %v8309_v29, %v7622_v12  ;;  %v8347_v52 = vld [vmem:[#allocation8 + $0x4c] sm:$0xf0]  ;;  %v7677_v2 = vor.u32 %v8324_v22, %v7676_v35  ;;  %v7660_v12 = vld [vmem:[#allocation7 + $0x368] sm:$0xf]  ;;  %v8308_v35 = vld [vmem:[#allocation7 + $0x314] sm:$0xf0] }
 0x67a   :  { %v8306_v22 = vld [vmem:[#allocation7 + $0x30c] sm:$0xf] }
 0x67b   :  { %4625 = vmatpush.bf16.msra.mxu1 %v7685_v58  ;;  %4651 = vmatpush.bf16.msra.mxu3 %v7689_v41  ;;  %v10165_v58 = vor.u32 %v8363_v5, %v7828_v62  ;;  %v10167_v41 = vor.u32 %v8364_v7, %v7836_v6  ;;  %v8320_v62 = vld [vmem:[#allocation7 + $0x374] sm:$0xf0]  ;;  %v8318_v7 = vld [vmem:[#allocation7 + $0x36c] sm:$0xf] }
 0x67c   :  { %v7661_v19 = vor.u32 %v8320_v62, %v7660_v12  ;;  %v8391_v12 = vld [vmem:[#allocation8 + $0x1ac] sm:$0xf0]  ;;  %v7951_v62 = vld [vmem:[#allocation8 + $0x1a8] sm:$0xf] }
 0x67d   :  { %4666 = vmatpush.bf16.msrb.mxu0 %v7533_v28  ;;  %4692 = vmatpush.bf16.msrb.mxu2 %v7537_v50  ;;  %v7812_v28 = vld [vmem:[#allocation8 + $0xa0] sm:$0xf]  ;;  %v8359_v50 = vld [vmem:[#allocation8 + $0xac] sm:$0xf0] }
 0x67e   :  { %v10173_v4 = vor.u32 %v8359_v50, %v7812_v28  ;;  %v10201_v50 = vor.u32 %v8344_v54, %v7756_v61 }
 0x67f   :  { %4626 = vmatpush.bf16.msra.mxu1 %v7669_v63  ;;  %4652 = vmatpush.bf16.msra.mxu3 %v7673_v53  ;;  %v7708_v63 = vld [vmem:[#allocation7 + $0x3c8] sm:$0xf]  ;;  %v8332_v53 = vld [vmem:[#allocation7 + $0x3d4] sm:$0xf0] }
 0x681   :  { %4667 = vmatpush.bf16.msrb.mxu0 %v7517_v9  ;;  %4693 = vmatpush.bf16.msrb.mxu2 %v7521_v42  ;;  %v8330_v9 = vld [vmem:[#allocation7 + $0x3cc] sm:$0xf]  ;;  %v7710_v42 = vld [vmem:[#allocation7 + $0x3d8] sm:$0xf0] }
 0x682   :  { %4180 = vmatmul.bf16.vlgmr.msrb.gmra.mxu1 %v10153_v38  ;;  %4208 = vmatmul.bf16.vlgmr.msrb.gmra.mxu3 %v10153_v38  ;;  %v7713_v60 = vor.u32 %v8330_v9, %v7710_v42  ;;  %v8400_v9 = vld [vmem:[#allocation8 + $0x1f4] sm:$0xf0]  ;;  %v7645_v42 = vor.u32 %v8316_v15, %v7644_v27 }
 0x683   :  { %4627 = vmatpush.bf16.msra.mxu1 %v7653_v44  ;;  %4653 = vmatpush.bf16.msra.mxu3 %v7657_v40  ;;  %v8328_v44 = vld [vmem:[#allocation7 + $0x3b4] sm:$0xf0]  ;;  %v10179_v40 = vor.u32 %v8355_v8, %v7796_v37  ;;  %v7649_v37 = vor.u32 %v8314_v3, %v7646_v13  ;;  %v7628_v8 = vld [vmem:[#allocation7 + $0x328] sm:$0xf]  ;;  %v8362_v3 = vld [vmem:[#allocation8 + $0xcc] sm:$0xf] }
 0x684   :  { %v7693_v48 = vor.u32 %v8328_v44, %v7692_v39  ;;  %v7630_v39 = vld [vmem:[#allocation7 + $0x338] sm:$0xf0] }
 0x685   :  { %4668 = vmatpush.bf16.msrb.mxu0 %v7501_v17  ;;  %4694 = vmatpush.bf16.msrb.mxu2 %v7505_v0  ;;  %v7780_v17 = vld [vmem:[#allocation8 + $0x60] sm:$0xf]  ;;  %v8351_v0 = vld [vmem:[#allocation8 + $0x6c] sm:$0xf0]  ;;  %v7838_v13 = vld [vmem:[#allocation8 + $0xd8] sm:$0xf0] }
 0x686   :  { %v10187_v36 = vor.u32 %v8351_v0, %v7780_v17  ;;  %v8395_v17 = vld [vmem:[#allocation8 + $0x1cc] sm:$0xf0]  ;;  %v7967_v0 = vld [vmem:[#allocation8 + $0x1c8] sm:$0xf] }
 0x687   :  { %4628 = vmatpush.bf16.msra.mxu1 %v7637_v1  ;;  %4654 = vmatpush.bf16.msra.mxu3 %v7641_v49  ;;  %v7678_v1 = vld [vmem:[#allocation7 + $0x398] sm:$0xf0]  ;;  %v7764_v49 = vld [vmem:[#allocation8 + $0x40] sm:$0xf] }
 0x688   :  { %v7681_v29 = vor.u32 %v8322_v10, %v7678_v1  ;;  %v10193_v5 = vor.u32 %v8347_v52, %v7764_v49  ;;  %v7614_v10 = vld [vmem:[#allocation7 + $0x318] sm:$0xf0]  ;;  %v8365_v1 = vld [vmem:[#allocation8 + $0xe4] sm:$0xf]  ;;  %v7846_v49 = vld [vmem:[#allocation8 + $0xf0] sm:$0xf0]  ;;  %v7960_v52 = vor.u32 %v8395_v17, %v7959_v24 }
 0x689   :  { %4669 = vmatpush.bf16.msrb.mxu0 %v7485_v46  ;;  %4695 = vmatpush.bf16.msrb.mxu2 %v7489_v59  ;;  %v7772_v46 = vld [vmem:[#allocation8 + $0x48] sm:$0xf]  ;;  %v8348_v59 = vld [vmem:[#allocation8 + $0x54] sm:$0xf0]  ;;  %v10213_v61 = vor.u32 %v8365_v1, %v7846_v49 }
 0x68a   :  { %v10195_v6 = vor.u32 %v8348_v59, %v7772_v46  ;;  %v7968_v46 = vor.u32 %v8396_v26, %v7967_v0  ;;  %v8366_v59 = vld [vmem:[#allocation8 + $0xec] sm:$0xf]  ;;  %v8353_v0 = vld [vmem:[#allocation8 + $0x84] sm:$0xf]  ;;  %v7798_v26 = vld [vmem:[#allocation8 + $0x90] sm:$0xf0] }
 0x68b   :  { %4629 = vmatpush.bf16.msra.mxu1 %v7621_v11  ;;  %4655 = vmatpush.bf16.msra.mxu3 %v7625_v18  ;;  %v7662_v11 = vld [vmem:[#allocation7 + $0x378] sm:$0xf0]  ;;  %v7748_v18 = vld [vmem:[#allocation8 + $0x20] sm:$0xf]  ;;  %v8380_v1 = vld [vmem:[#allocation8 + $0x154] sm:$0xf0]  ;;  %v10233_v49 = vor.u32 %v8353_v0, %v7798_v26 }
 0x68c   :  { %4670 = vmatmul.bf16.vlgmr.msrb.gmra.mxu0 %v10099_v57  ;;  %4696 = vmatmul.bf16.vlgmr.msrb.gmra.mxu2 %v10099_v57  ;;  %v7709_v57 = vor.u32 %v8332_v53, %v7708_v63  ;;  %v7665_v20 = vor.u32 %v8318_v7, %v7662_v11  ;;  %v10199_v28 = vor.u32 %v8343_v14, %v7748_v18  ;;  %v8399_v63 = vld [vmem:[#allocation8 + $0x1ec] sm:$0xf0]  ;;  %v7983_v53 = vld [vmem:[#allocation8 + $0x1e8] sm:$0xf]  ;;  %v8392_v7 = vld [vmem:[#allocation8 + $0x1b4] sm:$0xf0] }
 0x68d   :  { %4939 = vmatpush.bf16.msra.mxu0 %v10159_v16  ;;  %4965 = vmatpush.bf16.msra.mxu2 %v10161_v56  ;;  %v7984_v23 = vor.u32 %v8400_v9, %v7983_v53  ;;  %v7617_v18 = vor.u32 %v8306_v22, %v7614_v10  ;;  %v11108_v14 = vmov 0   ;;  %v7952_v15 = vor.u32 %v8392_v7, %v7951_v62  ;;  %v8357_v53 = vld [vmem:[#allocation8 + $0xa4] sm:$0xf]  ;;  %v7814_v9 = vld [vmem:[#allocation8 + $0xb0] sm:$0xf0] }
 0x68e   :  { %v10227_v24 = vor.u32 %v8357_v53, %v7814_v9  ;;  %v8379_v22 = vld [vmem:[#allocation8 + $0x14c] sm:$0xf0]  ;;  %v7903_v10 = vld [vmem:[#allocation8 + $0x148] sm:$0xf]  ;;  %v7790_v62 = vld [vmem:[#allocation8 + $0x78] sm:$0xf0] }
 0x68f   :  { %4630 = vmatpush.bf16.msra.mxu1 %v7605_v33  ;;  %4656 = vmatpush.bf16.msra.mxu3 %v7609_v32  ;;  %v8339_v33 = vld [vmem:[#allocation8 + $0xc] sm:$0xf0]  ;;  %v7740_v32 = vld [vmem:[#allocation8 + $0x8] sm:$0xf]  ;;  %v7879_v7 = vld [vmem:[#allocation8 + $0x120] sm:$0xf] }
 0x690   :  { %v10205_v45 = vor.u32 %v8339_v33, %v7732_v21  ;;  %v7927_v21 = vld [vmem:[#allocation8 + $0x180] sm:$0xf]  ;;  %v8387_v33 = vld [vmem:[#allocation8 + $0x18c] sm:$0xf0]  ;;  %v7871_v9 = vld [vmem:[#allocation8 + $0x108] sm:$0xf] }
 0x691   :  { %4940 = vmatpush.bf16.msra.mxu0 %v10165_v58  ;;  %4966 = vmatpush.bf16.msra.mxu2 %v10167_v41  ;;  %v8371_v53 = vld [vmem:[#allocation8 + $0x10c] sm:$0xf0]  ;;  %v7758_v0 = vld [vmem:[#allocation8 + $0x38] sm:$0xf0] }
 0x692   :  { %4631 = vmatmul.bf16.vlgmr.msra.gmra.mxu1 %v10153_v38  ;;  %4657 = vmatmul.bf16.vlgmr.msra.gmra.mxu3 %v10153_v38 }
 0x693   :  { %4675 = vmatpush.bf16.msrb.mxu1 %v7725_v43  ;;  %4701 = vmatpush.bf16.msrb.mxu3 %v7729_v51  ;;  %v8340_v43 = vld [vmem:[#allocation8 + $0x14] sm:$0xf0]  ;;  %v7975_v51 = vld [vmem:[#allocation8 + $0x1e0] sm:$0xf] }
 0x694   :  { %v10207_v25 = vor.u32 %v8340_v43, %v7740_v32  ;;  %v7976_v44 = vor.u32 %v8399_v63, %v7975_v51  ;;  %v7935_v32 = vld [vmem:[#allocation8 + $0x188] sm:$0xf]  ;;  %v8388_v43 = vld [vmem:[#allocation8 + $0x194] sm:$0xf0]  ;;  %v10221_v63 = vor.u32 %v8362_v3, %v7838_v13  ;;  %v7766_v3 = vld [vmem:[#allocation8 + $0x50] sm:$0xf0] }
 0x695   :  { %4941 = vmatpush.bf16.msra.mxu0 %v10173_v4  ;;  %4967 = vmatpush.bf16.msra.mxu2 %v10175_v55 }
 0x697   :  { %4676 = vmatpush.bf16.msrb.mxu1 %v7709_v57  ;;  %4702 = vmatpush.bf16.msrb.mxu3 %v7713_v60  ;;  %v8312_v57 = vld [vmem:[#allocation7 + $0x334] sm:$0xf0]  ;;  %v8310_v60 = vld [vmem:[#allocation7 + $0x32c] sm:$0xf] }
 0x698   :  { %v7629_v47 = vor.u32 %v8312_v57, %v7628_v8  ;;  %v8358_v8 = vld [vmem:[#allocation8 + $0xac] sm:$0xf]  ;;  %v7822_v57 = vld [vmem:[#allocation8 + $0xb8] sm:$0xf0] }
 0x699   :  { %4942 = vmatpush.bf16.msra.mxu0 %v10179_v40  ;;  %4968 = vmatpush.bf16.msra.mxu2 %v10181_v30  ;;  %v10229_v17 = vor.u32 %v8358_v8, %v7822_v57  ;;  %v8341_v57 = vld [vmem:[#allocation8 + $0x24] sm:$0xf] }
 0x69b   :  { %4677 = vmatpush.bf16.msrb.mxu1 %v7693_v48  ;;  %4703 = vmatpush.bf16.msrb.mxu3 %v7697_v34  ;;  %v7633_v48 = vor.u32 %v8310_v60, %v7630_v39  ;;  %v7612_v34 = vld [vmem:[#allocation7 + $0x308] sm:$0xf]  ;;  %v7911_v60 = vld [vmem:[#allocation8 + $0x160] sm:$0xf]  ;;  %v8383_v39 = vld [vmem:[#allocation8 + $0x16c] sm:$0xf0] }
 0x69c   :  { %v7613_v11 = vor.u32 %v8308_v35, %v7612_v34  ;;  %v8354_v34 = vld [vmem:[#allocation8 + $0x8c] sm:$0xf]  ;;  %v7806_v35 = vld [vmem:[#allocation8 + $0x98] sm:$0xf0] }
 0x69d   :  { %4943 = vmatpush.bf16.msra.mxu0 %v10187_v36  ;;  %4969 = vmatpush.bf16.msra.mxu2 %v10189_v31 }
 0x69f   :  { %4678 = vmatpush.bf16.msrb.mxu1 %v7677_v2  ;;  %4704 = vmatpush.bf16.msrb.mxu3 %v7681_v29  ;;  %v7854_v2 = vld [vmem:[#allocation8 + $0xf8] sm:$0xf0]  ;;  %v7943_v29 = vld [vmem:[#allocation8 + $0x1a0] sm:$0xf] }
 0x6a0   :  { %v10215_v54 = vor.u32 %v8366_v59, %v7854_v2  ;;  %v7944_v27 = vor.u32 %v8391_v12, %v7943_v29  ;;  %v7782_v59 = vld [vmem:[#allocation8 + $0x70] sm:$0xf0]  ;;  %v7904_v29 = vor.u32 %v8380_v1, %v7903_v10  ;;  %v8350_v12 = vld [vmem:[#allocation8 + $0x6c] sm:$0xf] }
 0x6a1   :  { %4944 = vmatpush.bf16.msra.mxu0 %v10193_v5  ;;  %4970 = vmatpush.bf16.msra.mxu2 %v10195_v6  ;;  %v7977_v10 = vld [vmem:[#allocation8 + $0x1f0] sm:$0xf0]  ;;  %v8398_v1 = vld [vmem:[#allocation8 + $0x1ec] sm:$0xf] }
 0x6a3   :  { %4679 = vmatpush.bf16.msrb.mxu1 %v7661_v19  ;;  %4705 = vmatpush.bf16.msrb.mxu3 %v7665_v20  ;;  %v8361_v19 = vld [vmem:[#allocation8 + $0xc4] sm:$0xf]  ;;  %v7830_v20 = vld [vmem:[#allocation8 + $0xd0] sm:$0xf0] }
 0x6a4   :  { %v10219_v51 = vor.u32 %v8361_v19, %v7830_v20  ;;  %v8376_v19 = vld [vmem:[#allocation8 + $0x134] sm:$0xf0] }
 0x6a5   :  { %4945 = vmatpush.bf16.msra.mxu0 %v10199_v28  ;;  %4971 = vmatpush.bf16.msra.mxu2 %v10201_v50 }
 0x6a7   :  { %4680 = vmatpush.bf16.msrb.mxu1 %v7645_v42  ;;  %4706 = vmatpush.bf16.msrb.mxu3 %v7649_v37  ;;  %v7928_v42 = vor.u32 %v8387_v33, %v7927_v21  ;;  %v7936_v37 = vor.u32 %v8388_v43, %v7935_v32  ;;  %v8346_v33 = vld [vmem:[#allocation8 + $0x4c] sm:$0xf]  ;;  %v7774_v32 = vld [vmem:[#allocation8 + $0x58] sm:$0xf0]  ;;  %v7863_v43 = vld [vmem:[#allocation8 + $0x100] sm:$0xf] }
 0x6a8   :  { %v10247_v8 = vor.u32 %v8346_v33, %v7774_v32  ;;  %v8390_v33 = vld [vmem:[#allocation8 + $0x1ac] sm:$0xf]  ;;  %v7953_v32 = vld [vmem:[#allocation8 + $0x1b8] sm:$0xf0] }
 0x6a9   :  { %4946 = vmatpush.bf16.msra.mxu0 %v10205_v45  ;;  %4972 = vmatpush.bf16.msra.mxu2 %v10207_v25 }
 0x6ab   :  { %4681 = vmatpush.bf16.msrb.mxu1 %v7629_v47  ;;  %4707 = vmatpush.bf16.msrb.mxu3 %v7633_v48  ;;  %v7912_v47 = vor.u32 %v8383_v39, %v7911_v60  ;;  %v7864_v60 = vor.u32 %v8371_v53, %v7863_v43  ;;  %v7956_v53 = vor.u32 %v8390_v33, %v7953_v32 }
 0x6ac   :  { %4947 = vmatmul.bf16.vlgmr.msra.gmra.mxu0 %v11108_v14  ;;  %4973 = vmatmul.bf16.vlgmr.msra.gmra.mxu2 %v11108_v14 }
 0x6ad   :  { %5218 = vmatpush.bf16.msrb.mxu0 %v7976_v44  ;;  %5244 = vmatpush.bf16.msrb.mxu2 %v7984_v23  ;;  %v7919_v44 = vld [vmem:[#allocation8 + $0x168] sm:$0xf]  ;;  %v8384_v23 = vld [vmem:[#allocation8 + $0x174] sm:$0xf0] }
 0x6ae   :  { %v7920_v48 = vor.u32 %v8384_v23, %v7919_v44  ;;  %v7750_v44 = vld [vmem:[#allocation8 + $0x30] sm:$0xf0]  ;;  %v8342_v23 = vld [vmem:[#allocation8 + $0x2c] sm:$0xf] }
 0x6af   :  { %4682 = vmatpush.bf16.msrb.mxu1 %v7613_v11  ;;  %4708 = vmatpush.bf16.msrb.mxu3 %v7617_v18  ;;  %v8375_v11 = vld [vmem:[#allocation8 + $0x12c] sm:$0xf0]  ;;  %v7887_v18 = vld [vmem:[#allocation8 + $0x128] sm:$0xf]  ;;  %v10251_v26 = vor.u32 %v8341_v57, %v7750_v44  ;;  %v8386_v57 = vld [vmem:[#allocation8 + $0x18c] sm:$0xf] }
 0x6b0   :  { %v7880_v13 = vor.u32 %v8375_v11, %v7879_v7  ;;  %v7888_v21 = vor.u32 %v8376_v19, %v7887_v18  ;;  %v7961_v7 = vld [vmem:[#allocation8 + $0x1d0] sm:$0xf0]  ;;  %v8394_v11 = vld [vmem:[#allocation8 + $0x1cc] sm:$0xf]  ;;  %v7969_v18 = vld [vmem:[#allocation8 + $0x1d8] sm:$0xf0] }
 0x6b1   :  { %5219 = vmatpush.bf16.msrb.mxu0 %v7960_v52  ;;  %5245 = vmatpush.bf16.msrb.mxu2 %v7968_v46  ;;  %v10235_v52 = vor.u32 %v8354_v34, %v7806_v35  ;;  %v8349_v46 = vld [vmem:[#allocation8 + $0x64] sm:$0xf]  ;;  %v7734_v34 = vld [vmem:[#allocation8 + $0x10] sm:$0xf0]  ;;  %v8338_v35 = vld [vmem:[#allocation8 + $0xc] sm:$0xf] }
 0x6b2   :  { %4683 = vmatmul.bf16.vlgmr.msrb.gmra.mxu1 %v10153_v38  ;;  %4709 = vmatmul.bf16.vlgmr.msrb.gmra.mxu3 %v10153_v38  ;;  %v7895_v38 = vld [vmem:[#allocation8 + $0x140] sm:$0xf]  ;;  %v10239_v20 = vor.u32 %v8349_v46, %v7782_v59  ;;  %v7985_v46 = vld [vmem:[#allocation8 + $0x1f8] sm:$0xf0] }
 0x6b3   :  { %4952 = vmatpush.bf16.msra.mxu1 %v10213_v61  ;;  %4978 = vmatpush.bf16.msra.mxu3 %v10215_v54  ;;  %v7896_v2 = vor.u32 %v8379_v22, %v7895_v38  ;;  %v7742_v38 = vld [vmem:[#allocation8 + $0x18] sm:$0xf0]  ;;  %v8397_v22 = vld [vmem:[#allocation8 + $0x1e4] sm:$0xf] }
 0x6b5   :  { %5220 = vmatpush.bf16.msrb.mxu0 %v7944_v27  ;;  %5246 = vmatpush.bf16.msrb.mxu2 %v7952_v15  ;;  %v10241_v27 = vor.u32 %v8350_v12, %v7790_v62  ;;  %v8345_v15 = vld [vmem:[#allocation8 + $0x44] sm:$0xf]  ;;  %v7988_v12 = vor.u32 %v8398_v1, %v7985_v46  ;;  %v7897_v46 = vld [vmem:[#allocation8 + $0x150] sm:$0xf0] }
 0x6b6   :  { %v8393_v62 = vld [vmem:[#allocation8 + $0x1c4] sm:$0xf] }
 0x6b7   :  { %4953 = vmatpush.bf16.msra.mxu1 %v10219_v51  ;;  %4979 = vmatpush.bf16.msra.mxu3 %v10221_v63  ;;  %v7964_v19 = vor.u32 %v8393_v62, %v7961_v7  ;;  %v8377_v1 = vld [vmem:[#allocation8 + $0x144] sm:$0xf] }
 0x6b8   :  { %v7900_v7 = vor.u32 %v8377_v1, %v7897_v46 }
 0x6b9   :  { %5221 = vmatpush.bf16.msrb.mxu0 %v7928_v42  ;;  %5247 = vmatpush.bf16.msrb.mxu2 %v7936_v37  ;;  %v8372_v42 = vld [vmem:[#allocation8 + $0x114] sm:$0xf0]  ;;  %v10245_v37 = vor.u32 %v8345_v15, %v7766_v3  ;;  %v7972_v15 = vor.u32 %v8394_v11, %v7969_v18  ;;  %v8389_v3 = vld [vmem:[#allocation8 + $0x1a4] sm:$0xf] }
 0x6ba   :  { %v7872_v39 = vor.u32 %v8372_v42, %v7871_v9  ;;  %v8385_v9 = vld [vmem:[#allocation8 + $0x184] sm:$0xf]  ;;  %v7929_v42 = vld [vmem:[#allocation8 + $0x190] sm:$0xf0] }
 0x6bb   :  { %4954 = vmatpush.bf16.msra.mxu1 %v10227_v24  ;;  %4980 = vmatpush.bf16.msra.mxu3 %v10229_v17  ;;  %v7932_v44 = vor.u32 %v8385_v9, %v7929_v42  ;;  %v8373_v18 = vld [vmem:[#allocation8 + $0x124] sm:$0xf]  ;;  %v8370_v9 = vld [vmem:[#allocation8 + $0x10c] sm:$0xf]  ;;  %v7873_v42 = vld [vmem:[#allocation8 + $0x118] sm:$0xf0] }
 0x6bd   :  { %5222 = vmatpush.bf16.msrb.mxu0 %v7912_v47  ;;  %5248 = vmatpush.bf16.msrb.mxu2 %v7920_v48  ;;  %v10253_v47 = vor.u32 %v8342_v23, %v7758_v0  ;;  %v8337_v48 = vld [vmem:[#allocation8 + $0x4] sm:$0xf] }
 0x6be   :  { %v10259_v59 = vor.u32 %v8337_v48, %v7734_v34  ;;  %v8381_v0 = vld [vmem:[#allocation8 + $0x164] sm:$0xf]  ;;  %v7913_v34 = vld [vmem:[#allocation8 + $0x170] sm:$0xf0] }
 0x6bf   :  { %4955 = vmatpush.bf16.msra.mxu1 %v10233_v49  ;;  %4981 = vmatpush.bf16.msra.mxu3 %v10235_v52 }
 0x6c1   :  { %5223 = vmatpush.bf16.msrb.mxu0 %v7896_v2  ;;  %5249 = vmatpush.bf16.msrb.mxu2 %v7904_v29  ;;  %v10261_v2 = vor.u32 %v8338_v35, %v7742_v38  ;;  %v7980_v29 = vor.u32 %v8397_v22, %v7977_v10  ;;  %v8382_v35 = vld [vmem:[#allocation8 + $0x16c] sm:$0xf]  ;;  %v7921_v38 = vld [vmem:[#allocation8 + $0x178] sm:$0xf0]  ;;  %v7916_v22 = vor.u32 %v8381_v0, %v7913_v34 }
 0x6c2   :  { %v7924_v10 = vor.u32 %v8382_v35, %v7921_v38  ;;  %v7876_v0 = vor.u32 %v8370_v9, %v7873_v42 }
 0x6c3   :  { %4956 = vmatpush.bf16.msra.mxu1 %v10239_v20  ;;  %4982 = vmatpush.bf16.msra.mxu3 %v10241_v27 }
 0x6c5   :  { %5224 = vmatpush.bf16.msrb.mxu0 %v7880_v13  ;;  %5250 = vmatpush.bf16.msrb.mxu2 %v7888_v21  ;;  %v7945_v21 = vld [vmem:[#allocation8 + $0x1b0] sm:$0xf0] }
 0x6c6   :  { %v7948_v43 = vor.u32 %v8389_v3, %v7945_v21  ;;  %v8374_v3 = vld [vmem:[#allocation8 + $0x12c] sm:$0xf]  ;;  %v7889_v21 = vld [vmem:[#allocation8 + $0x138] sm:$0xf0] }
 0x6c7   :  { %4957 = vmatpush.bf16.msra.mxu1 %v10245_v37  ;;  %4983 = vmatpush.bf16.msra.mxu3 %v10247_v8  ;;  %v7892_v32 = vor.u32 %v8374_v3, %v7889_v21 }
 0x6c9   :  { %5225 = vmatpush.bf16.msrb.mxu0 %v7864_v60  ;;  %5251 = vmatpush.bf16.msrb.mxu2 %v7872_v39  ;;  %v10269_v13 = vpop.f32.mrf.mxu0  ;;  %v7937_v60 = vld [vmem:[#allocation8 + $0x198] sm:$0xf0] }
 0x6ca   :  { %v7940_v23 = vor.u32 %v8386_v57, %v7937_v60  ;;  %v10298_v57 = vld [vmem:[%s10683_s6] sm:$0xf] }
 0x6cb   :  { %4958 = vmatpush.bf16.msra.mxu1 %v10251_v26  ;;  %4984 = vmatpush.bf16.msra.mxu3 %v10253_v47  ;;  %11111 = vst [vmem:[#allocation60_spill] sm:$0xff] %v10298_v57  ;;  %v3767_v38 = vperm.slane %v10298_v57, 3 }
 0x6cc   :  { %5226 = vmatmul.bf16.vlgmr.msrb.gmra.mxu0 %v11108_v14  ;;  %5252 = vmatmul.bf16.vlgmr.msrb.gmra.mxu2 %v11108_v14 }
 0x6cd   :  { %5350 = vmatpush.bf16.msra.mxu0 %v10159_v16  ;;  %5376 = vmatpush.bf16.msra.mxu2 %v10161_v56 }
 0x6cf   :  { %4959 = vmatpush.bf16.msra.mxu1 %v10259_v59  ;;  %4985 = vmatpush.bf16.msra.mxu3 %v10261_v2  ;;  %v10277_v39 = vpop.f32.mrf.mxu2 }
 0x6d1   :  { %5351 = vmatpush.bf16.msra.mxu0 %v10165_v58  ;;  %5377 = vmatpush.bf16.msra.mxu2 %v10167_v41  ;;  %v10279_v48 = vpop.f32.mrf.mxu0 }
 0x6d2   :  { %4960 = vmatmul.bf16.vlgmr.msra.gmra.mxu1 %v11108_v14  ;;  %4986 = vmatmul.bf16.vlgmr.msra.gmra.mxu3 %v11108_v14  ;;  %11109 = vst [vmem:[#allocation63_spill] sm:$0xff] %v10279_v48 }
 0x6d3   :  { %5231 = vmatpush.bf16.msrb.mxu1 %v7980_v29  ;;  %5257 = vmatpush.bf16.msrb.mxu3 %v7988_v12  ;;  %v8378_v29 = vld [vmem:[#allocation8 + $0x14c] sm:$0xf]  ;;  %v7905_v12 = vld [vmem:[#allocation8 + $0x158] sm:$0xf0] }
 0x6d4   :  { %v7908_v11 = vor.u32 %v8378_v29, %v7905_v12 }
 0x6d5   :  { %5352 = vmatpush.bf16.msra.mxu0 %v10173_v4  ;;  %5378 = vmatpush.bf16.msra.mxu2 %v10175_v55 }
 0x6d7   :  { %5232 = vmatpush.bf16.msrb.mxu1 %v7964_v19  ;;  %5258 = vmatpush.bf16.msrb.mxu3 %v7972_v15  ;;  %v10285_v62 = vpop.f32.mrf.mxu2  ;;  %v7881_v15 = vld [vmem:[#allocation8 + $0x130] sm:$0xf0] }
 0x6d8   :  { %11110 = vst [vmem:[#allocation64_spill] sm:$0xff] %v10285_v62  ;;  %v7884_v33 = vor.u32 %v8373_v18, %v7881_v15 }
 0x6d9   :  { %5353 = vmatpush.bf16.msra.mxu0 %v10179_v40  ;;  %5379 = vmatpush.bf16.msra.mxu2 %v10181_v30  ;;  %v10287_v19 = vpop.f32.mrf.mxu0 }
 0x6db   :  { %5233 = vmatpush.bf16.msrb.mxu1 %v7948_v43  ;;  %5259 = vmatpush.bf16.msrb.mxu3 %v7956_v53  ;;  %v8369_v43 = vld [vmem:[#allocation8 + $0x104] sm:$0xf]  ;;  %v7865_v53 = vld [vmem:[#allocation8 + $0x110] sm:$0xf0] }
 0x6dd   :  { %5354 = vmatpush.bf16.msra.mxu0 %v10187_v36  ;;  %5380 = vmatpush.bf16.msra.mxu2 %v10189_v31 }
 0x6df   :  { %5234 = vmatpush.bf16.msrb.mxu1 %v7932_v44  ;;  %5260 = vmatpush.bf16.msrb.mxu3 %v7940_v23  ;;  %v4195_v60 = vpop.f32.mrf.mxu2  ;;  %v10790_v44 = vperm.slane %v10298_v57, 2  ;;  %v7868_v23 = vor.u32 %v8369_v43, %v7865_v53 }
 0x6e1   :  { %5355 = vmatpush.bf16.msra.mxu0 %v10193_v5  ;;  %5381 = vmatpush.bf16.msra.mxu2 %v10195_v6  ;;  %v4169_v34 = vpop.f32.mrf.mxu0 }
 0x6e2   :  { %v4170_v35 = vadd.f32 %v4169_v34, %v10790_v44 }
 0x6e3   :  { %5235 = vmatpush.bf16.msrb.mxu1 %v7916_v22  ;;  %5261 = vmatpush.bf16.msrb.mxu3 %v7924_v10  ;;  %v10789_v10 = vperm.slane %v10298_v57, 0 }
 0x6e5   :  { %5356 = vmatpush.bf16.msra.mxu0 %v10199_v28  ;;  %5382 = vmatpush.bf16.msra.mxu2 %v10201_v50  ;;  %v4112_v29 = vadd.f32 %v10269_v13, %v10789_v10 }
 0x6e7   :  { %5236 = vmatpush.bf16.msrb.mxu1 %v7900_v7  ;;  %5262 = vmatpush.bf16.msrb.mxu3 %v7908_v11  ;;  %v4197_v22 = vpop.f32.mrf.mxu2 }
 0x6e8   :  { %v4198_v1 = vadd.f32 %v4197_v22, %v3767_v38 }
 0x6e9   :  { %5357 = vmatpush.bf16.msra.mxu0 %v10205_v45  ;;  %5383 = vmatpush.bf16.msra.mxu2 %v10207_v25  ;;  %v4619_v46 = vpop.f32.mrf.mxu0 }
 0x6eb   :  { %5237 = vmatpush.bf16.msrb.mxu1 %v7884_v33  ;;  %5263 = vmatpush.bf16.msrb.mxu3 %v7892_v32  ;;  %v4196_v32 = vadd.f32 %v4195_v60, %v3767_v38  ;;  %v7473_v38 = vld [vmem:[%s10683_s6 + $0x4] sm:$0xf] }
 0x6ed   :  { %5488 = vmatpush.bf16.msrb.mxu0 %v10159_v16  ;;  %5514 = vmatpush.bf16.msrb.mxu2 %v10161_v56 }
 0x6ef   :  { %5238 = vmatpush.bf16.msrb.mxu1 %v7868_v23  ;;  %5264 = vmatpush.bf16.msrb.mxu3 %v7876_v0  ;;  %v4125_v12 = vpop.f32.mrf.mxu1  ;;  %v4645_v11 = vpop.f32.mrf.mxu2 }
 0x6f0   :  { %v10323_v7 = vadd.f32 %v4125_v12, %v4112_v29 }
 0x6f1   :  { %5489 = vmatpush.bf16.msrb.mxu0 %v10165_v58  ;;  %5515 = vmatpush.bf16.msrb.mxu2 %v10167_v41  ;;  %v4620_v33 = vpop.f32.mrf.mxu0 }
 0x6f2   :  { %5239 = vmatmul.bf16.vlgmr.msrb.gmra.mxu1 %v11108_v14  ;;  %5265 = vmatmul.bf16.vlgmr.msrb.gmra.mxu3 %v11108_v14  ;;  %v10788_v14 = vperm.slane %v10298_v57, 1 }
 0x6f3   :  { %5363 = vmatpush.bf16.msra.mxu1 %v10213_v61  ;;  %5389 = vmatpush.bf16.msra.mxu3 %v10215_v54 }
 0x6f4   :  { %v4140_v13 = vadd.f32 %v10277_v39, %v10788_v14 }
 0x6f5   :  { %5490 = vmatpush.bf16.msrb.mxu0 %v10173_v4  ;;  %5516 = vmatpush.bf16.msrb.mxu2 %v10175_v55  ;;  %v4153_v18 = vpop.f32.mrf.mxu3 }
 0x6f6   :  { %v10334_v15 = vadd.f32 %v4153_v18, %v4140_v13 }
 0x6f7   :  { %5364 = vmatpush.bf16.msra.mxu1 %v10219_v51  ;;  %5390 = vmatpush.bf16.msra.mxu3 %v10221_v63  ;;  %v10336_v3 = vpop.f32.mrf.mxu1  ;;  %v4646_v9 = vpop.f32.mrf.mxu2 }
 0x6f8   :  { %11112 = vst [vmem:[#allocation48_spill] sm:$0xff] %v10334_v15 }
 0x6f9   :  { %5491 = vmatpush.bf16.msrb.mxu0 %v10179_v40  ;;  %5517 = vmatpush.bf16.msrb.mxu2 %v10181_v30  ;;  %11113 = vst [vmem:[#allocation50_spill] sm:$0xff] %v10336_v3 }
 0x6fb   :  { %5365 = vmatpush.bf16.msra.mxu1 %v10227_v24  ;;  %5391 = vmatpush.bf16.msra.mxu3 %v10229_v17 }
 0x6fd   :  { %5492 = vmatpush.bf16.msrb.mxu0 %v10187_v36  ;;  %5518 = vmatpush.bf16.msrb.mxu2 %v10189_v31  ;;  %v10346_v39 = vpop.f32.mrf.mxu3 }
 0x6fe   :  { %11114 = vst [vmem:[#allocation49_spill] sm:$0xff] %v10346_v39 }
 0x6ff   :  { %5366 = vmatpush.bf16.msra.mxu1 %v10233_v49  ;;  %5392 = vmatpush.bf16.msra.mxu3 %v10235_v52  ;;  %v10348_v21 = vpop.f32.mrf.mxu1 }
 0x701   :  { %5493 = vmatpush.bf16.msrb.mxu0 %v10193_v5  ;;  %5519 = vmatpush.bf16.msrb.mxu2 %v10195_v6 }
 0x703   :  { %5367 = vmatpush.bf16.msra.mxu1 %v10239_v20  ;;  %5393 = vmatpush.bf16.msra.mxu3 %v10241_v27 }
 0x705   :  { %5494 = vmatpush.bf16.msrb.mxu0 %v10199_v28  ;;  %5520 = vmatpush.bf16.msrb.mxu2 %v10201_v50  ;;  %v4209_v43 = vpop.f32.mrf.mxu3 }
 0x706   :  { %v10356_v53 = vadd.f32 %v4209_v43, %v4196_v32 }
 0x707   :  { %5368 = vmatpush.bf16.msra.mxu1 %v10245_v37  ;;  %5394 = vmatpush.bf16.msra.mxu3 %v10247_v8  ;;  %v4183_v42 = vpop.f32.mrf.mxu1 }
 0x708   :  { %11115 = vst [vmem:[#allocation51_spill] sm:$0xff] %v10356_v53  ;;  %v10358_v23 = vadd.f32 %v4183_v42, %v4170_v35  ;;  %v4282_v35 = vperm.slane %v7473_v38, 0 }
 0x709   :  { %5495 = vmatpush.bf16.msrb.mxu0 %v10205_v45  ;;  %5521 = vmatpush.bf16.msrb.mxu2 %v10207_v25  ;;  %v4671_v0 = vpop.f32.mrf.mxu0 }
 0x70a   :  { %11116 = vst [vmem:[#allocation52_spill] sm:$0xff] %v10358_v23  ;;  %v4621_v12 = vadd.f32 %v4620_v33, %v4282_v35  ;;  %v4284_v35 = vperm.slane %v7473_v38, 2  ;;  %v11118_v23 = vperm.slane %v10298_v57, 2 }
 0x70b   :  { %5369 = vmatpush.bf16.msra.mxu1 %v10251_v26  ;;  %5395 = vmatpush.bf16.msra.mxu3 %v10253_v47 }
 0x70d   :  { %v4211_v60 = vpop.f32.mrf.mxu3 }
 0x70e   :  { %v10364_v34 = vadd.f32 %v4211_v60, %v4198_v1  ;;  %v4283_v1 = vperm.slane %v7473_v38, 1 }
 0x70f   :  { %5370 = vmatpush.bf16.msra.mxu1 %v10259_v59  ;;  %5396 = vmatpush.bf16.msra.mxu3 %v10261_v2  ;;  %v4697_v22 = vpop.f32.mrf.mxu2  ;;  %v4632_v46 = vpop.f32.mrf.mxu1 }
 0x710   :  { %11117 = vst [vmem:[#allocation53_spill] sm:$0xff] %v10364_v34  ;;  %v4647_v18 = vadd.f32 %v4646_v9, %v4283_v1  ;;  %v4285_v1 = vperm.slane %v7473_v38, 3 }
 0x711   :  { %v4672_v43 = vpop.f32.mrf.mxu0 }
 0x712   :  { %v4673_v9 = vadd.f32 %v4672_v43, %v4284_v35 }
 0x713   :  { %5501 = vmatpush.bf16.msrb.mxu1 %v10213_v61  ;;  %5527 = vmatpush.bf16.msrb.mxu3 %v10215_v54 }
 0x715   :  { %v4658_v29 = vpop.f32.mrf.mxu3 }
 0x717   :  { %5502 = vmatpush.bf16.msrb.mxu1 %v10219_v51  ;;  %5528 = vmatpush.bf16.msrb.mxu3 %v10221_v63  ;;  %v4633_v11 = vpop.f32.mrf.mxu1  ;;  %v4698_v33 = vpop.f32.mrf.mxu2 }
 0x718   :  { %v4634_v13 = vadd.f32 %v4633_v11, %v4621_v12 }
 0x71b   :  { %5503 = vmatpush.bf16.msrb.mxu1 %v10227_v24  ;;  %5529 = vmatpush.bf16.msrb.mxu3 %v10229_v17 }
 0x71d   :  { %v4659_v32 = vpop.f32.mrf.mxu3 }
 0x71e   :  { %v10377_v42 = vadd.f32 %v4659_v32, %v4647_v18  ;;  %v4699_v18 = vadd.f32 %v4698_v33, %v4285_v1 }
 0x71f   :  { %5504 = vmatpush.bf16.msrb.mxu1 %v10233_v49  ;;  %5530 = vmatpush.bf16.msrb.mxu3 %v10235_v52 }
 0x723   :  { %5505 = vmatpush.bf16.msrb.mxu1 %v10239_v20  ;;  %5531 = vmatpush.bf16.msrb.mxu3 %v10241_v27 }
 0x727   :  { %5506 = vmatpush.bf16.msrb.mxu1 %v10245_v37  ;;  %5532 = vmatpush.bf16.msrb.mxu3 %v10247_v8 }
 0x729   :  { %v4948_v0 = vpop.f32.mrf.mxu0 }
 0x72a   :  { %v4991_v14 = vadd.f32 %v4948_v0, %v10323_v7 }
 0x72b   :  { %5507 = vmatpush.bf16.msrb.mxu1 %v10251_v26  ;;  %5533 = vmatpush.bf16.msrb.mxu3 %v10253_v47 }
 0x72c   :  { %v7858_v32 = vmul.f32 -1.442695, %v4991_v14 }
 0x72e   :  { %8667 = vpow2.f32 %v7858_v32 }
 0x72f   :  { %5508 = vmatpush.bf16.msrb.mxu1 %v10259_v59  ;;  %5534 = vmatpush.bf16.msrb.mxu3 %v10261_v2  ;;  %v4684_v60 = vpop.f32.mrf.mxu1  ;;  %v4974_v22 = vpop.f32.mrf.mxu2 }
 0x730   :  { %v4168_v60 = vadd.f32 %v10287_v19, %v11118_v23 }
 0x731   :  { %v4950_v46 = vpop.f32.mrf.mxu0 }
 0x732   :  { %v10388_v46 = vadd.f32 %v10348_v21, %v4168_v60 }
 0x734   :  { %11119 = vst [vmem:[#allocation54_spill] sm:$0xff] %v10388_v46  ;;  %v4993_v43 = vadd.f32 %v4974_v22, %v10388_v46  ;;  %v8668_v35 = vpop.eup %8667 }
 0x735   :  { %v4710_v29 = vpop.f32.mrf.mxu3 }
 0x736   :  { %v7860_v0 = vmul.f32 -1.442695, %v4993_v43 }
 0x737   :  { %v4685_v12 = vpop.f32.mrf.mxu1  ;;  %v4976_v11 = vpop.f32.mrf.mxu2 }
 0x738   :  { %v4686_v10 = vadd.f32 %v4685_v12, %v4673_v9  ;;  %v5004_v9 = vadd.f32 1.0, %v8668_v35  ;;  %8669 = vpow2.f32 %v7860_v0 }
 0x73a   :  { %8671 = vrcp.f32 %v5004_v9  ;;  %vm5012_vm1 = vweird.f32 %v5004_v9 }
 0x73d   :  { %v4711_v44 = vpop.f32.mrf.mxu3 }
 0x73e   :  { %v10382_v34 = vadd.f32 %v4711_v44, %v4699_v18  ;;  %v8670_v22 = vpop.eup %8669 }
 0x73f   :  { %v10392_v35 = vadd.f32 1.0, %v8670_v22 }
 0x740   :  { %v8672_v32 = vpop.eup %8671 }
 0x741   :  { %vm5013_vm0 = vweird.f32 %v8672_v32  ;;  %vm5042_vm9 = vweird.f32 %v10392_v35 }
 0x742   :  { %vm10405_vm2 = vmor %vm5012_vm1, %vm5013_vm0 }
 0x749   :  { %v5227_v38 = vpop.f32.mrf.mxu0 }
 0x74a   :  { %v5274_v29 = vrot.slane %v5227_v38, 2  ;;  %v5008_v38 = vmul.f32 %v8672_v32, %v5004_v9 }
 0x74c   :  { %v5282_v33 = vadd.f32 %v5274_v29, %v4634_v13 }
 0x74e   :  { %v7989_v14 = vmul.f32 -1.442695, %v5282_v33  ;;  %v5009_v33 = vsub.f32 1.0, %v5008_v38  ;;  %v5018_v38 = vand.u32 2147483648, %v5004_v9 }
 0x74f   :  { %v4961_v44 = vpop.f32.mrf.mxu1  ;;  %v5253_v12 = vpop.f32.mrf.mxu2 }
 0x750   :  { %v4992_v11 = vadd.f32 %v4961_v44, %v10334_v15  ;;  %v5276_v19 = vrot.slane %v5253_v12, 2  ;;  %8673 = vpow2.f32 %v7989_v14  ;;  %v5010_v12 = vmul.f32 %v8672_v32, %v5009_v33 }
 0x751   :  { %v5229_v23 = vpop.f32.mrf.mxu0  ;;  %v5016_v33 = vand.u32 2147483647, %v5004_v9 }
 0x752   :  { %v7859_v1 = vmul.f32 -1.442695, %v4992_v11  ;;  %v5284_v21 = vadd.f32 %v5276_v19, %v4686_v10  ;;  %v5011_v22 = vadd.f32 %v8672_v32, %v5010_v12 }
 0x753   :  { %vm5017_vm6 = vcmp.eq.f32.partialorder %v5016_v33, 8.507059e+37 }
 0x754   :  { %8675 = vpow2.f32 %v7859_v1  ;;  %v5015_v12 = vsel %vm10405_vm2, %v8672_v32, %v5011_v22 }
 0x755   :  { %v4987_v18 = vpop.f32.mrf.mxu3  ;;  %8677 = vrcp.f32 %v10392_v35 }
 0x756   :  { %v8674_v13 = vpop.eup %8673  ;;  %v4994_v14 = vadd.f32 %v4987_v18, %v10356_v53 }
 0x757   :  { %v4963_v60 = vpop.f32.mrf.mxu1  ;;  %v5255_v43 = vpop.f32.mrf.mxu2  ;;  %v10395_v44 = vadd.f32 1.0, %v8674_v13 }
 0x759   :  { %vm5303_vm13 = vweird.f32 %v10395_v44 }
 0x75a   :  { %v8676_v29 = vpop.eup %8675 }
 0x75b   :  { %v5005_v0 = vadd.f32 1.0, %v8676_v29  ;;  %v10399_v11 = vpop.eup %8677 }
 0x75c   :  { %v5038_v1 = vmul.f32 %v10399_v11, %v10392_v35  ;;  %vm5043_vm8 = vweird.f32 %v10399_v11 }
 0x75d   :  { %8679 = vrcp.f32 %v5005_v0  ;;  %v4989_v10 = vpop.f32.mrf.mxu3  ;;  %v5033_v13 = vand.u32 2147483648, %v5005_v0  ;;  %vm5027_vm4 = vweird.f32 %v5005_v0  ;;  %vm5044_vm10 = vmor %vm5042_vm9, %vm5043_vm8 }
 0x75e   :  { %8681 = vrcp.f32 %v10395_v44  ;;  %v5031_v10 = vand.u32 2147483647, %v5005_v0  ;;  %v5039_v39 = vsub.f32 1.0, %v5038_v1 }
 0x75f   :  { %8683 = vtanh.f32 %v4994_v14  ;;  %v5034_v48 = vor.u32 1.1754944e-38, %v5033_v13 }
 0x760   :  { %vm5032_vm7 = vcmp.eq.f32.partialorder %v5031_v10, 8.507059e+37  ;;  %v5040_v53 = vmul.f32 %v10399_v11, %v5039_v39  ;;  %v5309_v10 = vand.u32 2147483648, %v10395_v44 }
 0x763   :  { %v8680_v19 = vpop.eup %8679 }
 0x764   :  { %v5023_v23 = vmul.f32 %v8680_v19, %v5005_v0  ;;  %v10403_v43 = vpop.eup %8681  ;;  %vm5028_vm3 = vweird.f32 %v8680_v19 }
 0x765   :  { %v5299_v14 = vmul.f32 %v10403_v43, %v10395_v44  ;;  %v8684_v62 = vpop.eup %8683  ;;  %vm5029_vm5 = vmor %vm5027_vm4, %vm5028_vm3  ;;  %vm5304_vm11 = vweird.f32 %v10403_v43 }
 0x766   :  { %v5024_v60 = vsub.f32 1.0, %v5023_v23  ;;  %v7991_v23 = vmul.f32 -1.442695, %v5284_v21  ;;  %vm5305_vm14 = vmor %vm5303_vm13, %vm5304_vm11 }
 0x767   :  { %v5300_v32 = vsub.f32 1.0, %v5299_v14 }
 0x768   :  { %v5025_v29 = vmul.f32 %v8680_v19, %v5024_v60  ;;  %v5019_v60 = vor.u32 1.1754944e-38, %v5018_v38  ;;  %8685 = vpow2.f32 %v7991_v23 }
 0x76a   :  { %v5026_v3 = vadd.f32 %v8680_v19, %v5025_v29  ;;  %v5020_v1 = vsel %vm5017_vm6, %v5019_v60, %v5015_v12  ;;  %v5307_v12 = vand.u32 2147483647, %v10395_v44 }
 0x76b   :  { %v5054_v15 = vmul.f32 %v8684_v62, %v5020_v1  ;;  %v5046_v62 = vand.u32 2147483647, %v10392_v35  ;;  %v5310_v1 = vor.u32 1.1754944e-38, %v5309_v10 }
 0x76c   :  { %v5030_v57 = vsel %vm5029_vm5, %v8680_v19, %v5026_v3  ;;  %v5041_v3 = vadd.f32 %v10399_v11, %v5040_v53  ;;  %v5048_v19 = vand.u32 2147483648, %v10392_v35  ;;  %vm5308_vm15 = vcmp.eq.f32.partialorder %v5307_v12, 8.507059e+37 }
 0x76d   :  { %v5035_v46 = vsel %vm5032_vm7, %v5034_v48, %v5030_v57  ;;  %v5301_v48 = vmul.f32 %v10403_v43, %v5300_v32  ;;  %vm5047_vm12 = vcmp.eq.f32.partialorder %v5046_v62, 8.507059e+37 }
 0x76e   :  { %v5053_v22 = vmul.f32 0.0, %v5035_v46  ;;  %v5045_v53 = vsel %vm5044_vm10, %v10399_v11, %v5041_v3  ;;  %v5049_v38 = vor.u32 1.1754944e-38, %v5048_v19 }
 0x76f   :  { %v5240_v9 = vpop.f32.mrf.mxu1  ;;  %v5302_v29 = vadd.f32 %v10403_v43, %v5301_v48 }
 0x770   :  { %v5275_v18 = vrot.slane %v5240_v9, 2  ;;  %v10415_v0 = vadd.f32 %v5054_v15, %v5053_v22  ;;  %v8686_v15 = vpop.eup %8685  ;;  %v5050_v14 = vsel %vm5047_vm12, %v5049_v38, %v5045_v53 }
 0x771   :  { %v10428_v33 = vadd.f32 1.0, %v8686_v15  ;;  %v5306_v60 = vsel %vm5305_vm14, %v10403_v43, %v5302_v29 }
 0x772   :  { %v5283_v21 = vadd.f32 %v5275_v18, %v10377_v42  ;;  %8687 = vtanh.f32 %v10415_v0  ;;  %v5311_v22 = vsel %vm5308_vm15, %v5310_v1, %v5306_v60 }
 0x773   :  { %v5339_v12 = vand.u32 2147483648, %v10428_v33  ;;  %vm5333_vm5 = vweird.f32 %v10428_v33 }
 0x774   :  { %v7990_v13 = vmul.f32 -1.442695, %v5283_v21 }
 0x775   :  { %v5266_v39 = vpop.f32.mrf.mxu3 }
 0x776   :  { %8689 = vpow2.f32 %v7990_v13  ;;  %v5277_v57 = vrot.slane %v5266_v39, 2 }
 0x777   :  { %v5242_v42 = vpop.f32.mrf.mxu1 }
 0x778   :  { %v5285_v46 = vadd.f32 %v5277_v57, %v10382_v34  ;;  %v8688_v35 = vpop.eup %8687 }
 0x779   :  { %v5057_v11 = vmul.f32 %v8688_v35, %v5050_v14  ;;  %v5337_v14 = vand.u32 2147483647, %v10428_v33 }
 0x77a   :  { %8691 = vtanh.f32 %v5285_v46 }
 0x77b   :  { %8693 = vrcp.f32 %v10428_v33  ;;  %v5349_v18 = vpack.c.bf16 %v5057_v11, %v5057_v11  ;;  %v5340_v11 = vor.u32 1.1754944e-38, %v5339_v12  ;;  %vm5338_vm7 = vcmp.eq.f32.partialorder %v5337_v14, 8.507059e+37 }
 0x77c   :  { %v8690_v34 = vpop.eup %8689 }
 0x77d   :  { %v5296_v23 = vadd.f32 1.0, %v8690_v34  ;;  %v5268_v9 = vpop.f32.mrf.mxu3  ;;  %5358 = vmatmul.bf16.vlgmr.msra.gmra.mxu0 %v5349_v18  ;;  %5371 = vmatmul.bf16.vlgmr.msra.gmra.mxu1 %v5349_v18 }
 0x77e   :  { %5384 = vmatmul.bf16.vlgmr.msra.gmra.mxu2 %v5349_v18  ;;  %5397 = vmatmul.bf16.vlgmr.msra.gmra.mxu3 %v5349_v18 }
 0x77f   :  { %8695 = vrcp.f32 %v5296_v23  ;;  %5626 = vmatpush.bf16.msra.mxu0 %v10159_v16  ;;  %5639 = vmatpush.bf16.msra.mxu1 %v10213_v61  ;;  %v5324_v39 = vand.u32 2147483648, %v5296_v23  ;;  %v5322_v62 = vand.u32 2147483647, %v5296_v23  ;;  %vm5318_vm1 = vweird.f32 %v5296_v23 }
 0x780   :  { %v8692_v32 = vpop.eup %8691  ;;  %5652 = vmatpush.bf16.msra.mxu2 %v10161_v56  ;;  %5665 = vmatpush.bf16.msra.mxu3 %v10215_v54 }
 0x781   :  { %v5345_v21 = vmul.f32 %v8692_v32, %v5311_v22  ;;  %v8694_v44 = vpop.eup %8693  ;;  %v5325_v42 = vor.u32 1.1754944e-38, %v5324_v39  ;;  %vm5323_vm3 = vcmp.eq.f32.partialorder %v5322_v62, 8.507059e+37 }
 0x782   :  { %v5329_v3 = vmul.f32 %v8694_v44, %v10428_v33  ;;  %vm5334_vm4 = vweird.f32 %v8694_v44 }
 0x783   :  { %5627 = vmatpush.bf16.msra.mxu0 %v10165_v58  ;;  %5640 = vmatpush.bf16.msra.mxu1 %v10219_v51  ;;  %vm5335_vm6 = vmor %vm5333_vm5, %vm5334_vm4 }
 0x784   :  { %5653 = vmatpush.bf16.msra.mxu2 %v10167_v41  ;;  %5666 = vmatpush.bf16.msra.mxu3 %v10221_v63  ;;  %v5330_v57 = vsub.f32 1.0, %v5329_v3 }
 0x785   :  { %v8696_v43 = vpop.eup %8695 }
 0x786   :  { %v5314_v13 = vmul.f32 %v8696_v43, %v5296_v23  ;;  %vm5319_vm0 = vweird.f32 %v8696_v43  ;;  %v5331_v53 = vmul.f32 %v8694_v44, %v5330_v57  ;;  %v11123_v57 = vld [vmem:[#allocation54_spill] sm:$0xff] }
 0x787   :  { %5628 = vmatpush.bf16.msra.mxu0 %v10173_v4  ;;  %5641 = vmatpush.bf16.msra.mxu1 %v10227_v24  ;;  %vm5320_vm2 = vmor %vm5318_vm1, %vm5319_vm0 }
 0x788   :  { %v5315_v19 = vsub.f32 1.0, %v5314_v13  ;;  %5654 = vmatpush.bf16.msra.mxu2 %v10175_v55  ;;  %5667 = vmatpush.bf16.msra.mxu3 %v10229_v17  ;;  %v5332_v35 = vadd.f32 %v8694_v44, %v5331_v53 }
 0x78a   :  { %v5316_v48 = vmul.f32 %v8696_v43, %v5315_v19  ;;  %v5336_v34 = vsel %vm5335_vm6, %v8694_v44, %v5332_v35 }
 0x78b   :  { %5629 = vmatpush.bf16.msra.mxu0 %v10179_v40  ;;  %5642 = vmatpush.bf16.msra.mxu1 %v10233_v49  ;;  %v5341_v60 = vsel %vm5338_vm7, %v5340_v11, %v5336_v34 }
 0x78c   :  { %v5317_v15 = vadd.f32 %v8696_v43, %v5316_v48  ;;  %5655 = vmatpush.bf16.msra.mxu2 %v10181_v30  ;;  %5668 = vmatpush.bf16.msra.mxu3 %v10235_v52 }
 0x78e   :  { %v5321_v46 = vsel %vm5320_vm2, %v8696_v43, %v5317_v15 }
 0x78f   :  { %v5326_v38 = vsel %vm5323_vm3, %v5325_v42, %v5321_v46  ;;  %5630 = vmatpush.bf16.msra.mxu0 %v10187_v36  ;;  %5643 = vmatpush.bf16.msra.mxu1 %v10239_v20 }
 0x790   :  { %v5344_v29 = vmul.f32 0.0, %v5326_v38  ;;  %5656 = vmatpush.bf16.msra.mxu2 %v10189_v31  ;;  %5669 = vmatpush.bf16.msra.mxu3 %v10241_v27 }
 0x792   :  { %v5346_v10 = vadd.f32 %v5345_v21, %v5344_v29  ;;  %v11122_v21 = vld [vmem:[#allocation48_spill] sm:$0xff] }
 0x793   :  { %5631 = vmatpush.bf16.msra.mxu0 %v10193_v5  ;;  %5644 = vmatpush.bf16.msra.mxu1 %v10245_v37 }
 0x794   :  { %8697 = vtanh.f32 %v5346_v10  ;;  %5657 = vmatpush.bf16.msra.mxu2 %v10195_v6  ;;  %5670 = vmatpush.bf16.msra.mxu3 %v10247_v8 }
 0x797   :  { %5632 = vmatpush.bf16.msra.mxu0 %v10199_v28  ;;  %5645 = vmatpush.bf16.msra.mxu1 %v10251_v26 }
 0x798   :  { %5658 = vmatpush.bf16.msra.mxu2 %v10201_v50  ;;  %5671 = vmatpush.bf16.msra.mxu3 %v10253_v47 }
 0x79a   :  { %v8698_v23 = vpop.eup %8697 }
 0x79b   :  { %v10467_v33 = vmul.f32 %v8698_v23, %v5341_v60  ;;  %5633 = vmatpush.bf16.msra.mxu0 %v10205_v45  ;;  %5646 = vmatpush.bf16.msra.mxu1 %v10259_v59  ;;  %v11124_v23 = vld [vmem:[#allocation51_spill] sm:$0xff] }
 0x79c   :  { %5659 = vmatpush.bf16.msra.mxu2 %v10207_v25  ;;  %5672 = vmatpush.bf16.msra.mxu3 %v10261_v2 }
 0x7fa   :  { %v5359_v9 = vpop.f32.mrf.mxu0  ;;  %v5372_v1 = vpop.f32.mrf.mxu1 }
 0x7fb   :  { %v5406_v18 = vrot.slane %v5359_v9, 6  ;;  %v5407_v32 = vrot.slane %v5372_v1, 6 }
 0x7fd   :  { %v5414_v22 = vadd.f32 %v5406_v18, %v10323_v7  ;;  %v5415_v44 = vadd.f32 %v5407_v32, %v11122_v21 }
 0x7ff   :  { %v7992_v43 = vmul.f32 -1.442695, %v5414_v22  ;;  %v7993_v13 = vmul.f32 -1.442695, %v5415_v44 }
 0x801   :  { %8699 = vpow2.f32 %v7992_v43  ;;  %v5385_v3 = vpop.f32.mrf.mxu2  ;;  %v5398_v19 = vpop.f32.mrf.mxu3 }
 0x802   :  { %8701 = vpow2.f32 %v7993_v13  ;;  %v5408_v39 = vrot.slane %v5385_v3, 6  ;;  %v5361_v48 = vpop.f32.mrf.mxu0  ;;  %v5374_v62 = vpop.f32.mrf.mxu1  ;;  %v5409_v12 = vrot.slane %v5398_v19, 6 }
 0x804   :  { %v5416_v15 = vadd.f32 %v5408_v39, %v11123_v57  ;;  %v5417_v60 = vadd.f32 %v5409_v12, %v11124_v23 }
 0x806   :  { %v7994_v42 = vmul.f32 -1.442695, %v5416_v15 }
 0x807   :  { %v8700_v46 = vpop.eup %8699 }
 0x808   :  { %v8702_v53 = vpop.eup %8701  ;;  %v5427_v38 = vadd.f32 1.0, %v8700_v46  ;;  %8703 = vpow2.f32 %v7994_v42 }
 0x809   :  { %v5428_v29 = vadd.f32 1.0, %v8702_v53  ;;  %v5387_v10 = vpop.f32.mrf.mxu2  ;;  %v5400_v35 = vpop.f32.mrf.mxu3  ;;  %v5477_v53 = vrot.slane %v10415_v0, 6 }
 0x80a   :  { %8705 = vrcp.f32 %v5427_v38  ;;  %v5441_v44 = vand.u32 2147483648, %v5427_v38  ;;  %v5439_v3 = vand.u32 2147483647, %v5427_v38  ;;  %vm5435_vm10 = vweird.f32 %v5427_v38 }
 0x80b   :  { %8707 = vrcp.f32 %v5428_v29  ;;  %v5456_v43 = vand.u32 2147483648, %v5428_v29  ;;  %v5454_v19 = vand.u32 2147483647, %v5428_v29  ;;  %vm5450_vm11 = vweird.f32 %v5428_v29 }
 0x80c   :  { %v5442_v42 = vor.u32 1.1754944e-38, %v5441_v44  ;;  %vm5440_vm14 = vcmp.eq.f32.partialorder %v5439_v3, 8.507059e+37 }
 0x80d   :  { %v5457_v10 = vor.u32 1.1754944e-38, %v5456_v43  ;;  %vm5455_vm15 = vcmp.eq.f32.partialorder %v5454_v19, 8.507059e+37 }
 0x80e   :  { %v8704_v14 = vpop.eup %8703 }
 0x80f   :  { %v5429_v34 = vadd.f32 1.0, %v8704_v14 }
 0x810   :  { %v8706_v11 = vpop.eup %8705 }
 0x811   :  { %v8708_v9 = vpop.eup %8707  ;;  %v5431_v1 = vmul.f32 %v8706_v11, %v5427_v38  ;;  %8709 = vrcp.f32 %v5429_v34  ;;  %vm5436_vm8 = vweird.f32 %v8706_v11  ;;  %v5471_v44 = vand.u32 2147483648, %v5429_v34 }
 0x812   :  { %v5446_v18 = vmul.f32 %v8708_v9, %v5428_v29  ;;  %8711 = vtanh.f32 %v5417_v60  ;;  %vm5451_vm9 = vweird.f32 %v8708_v9  ;;  %vm5437_vm12 = vmor %vm5435_vm10, %vm5436_vm8  ;;  %vm5465_vm1 = vweird.f32 %v5429_v34 }
 0x813   :  { %v5432_v32 = vsub.f32 1.0, %v5431_v1  ;;  %vm5452_vm13 = vmor %vm5450_vm11, %vm5451_vm9  ;;  %v5469_v0 = vand.u32 2147483647, %v5429_v34  ;;  %v5472_v43 = vor.u32 1.1754944e-38, %v5471_v44 }
 0x814   :  { %v5447_v22 = vsub.f32 1.0, %v5446_v18 }
 0x815   :  { %v5433_v13 = vmul.f32 %v8706_v11, %v5432_v32  ;;  %vm5470_vm3 = vcmp.eq.f32.partialorder %v5469_v0, 8.507059e+37 }
 0x816   :  { %v5448_v39 = vmul.f32 %v8708_v9, %v5447_v22 }
 0x817   :  { %v8710_v48 = vpop.eup %8709  ;;  %v5434_v62 = vadd.f32 %v8706_v11, %v5433_v13 }
 0x818   :  { %v5461_v15 = vmul.f32 %v8710_v48, %v5429_v34  ;;  %v5449_v46 = vadd.f32 %v8708_v9, %v5448_v39  ;;  %v8712_v12 = vpop.eup %8711  ;;  %vm5466_vm0 = vweird.f32 %v8710_v48 }
 0x819   :  { %v5438_v35 = vsel %vm5437_vm12, %v8706_v11, %v5434_v62  ;;  %vm5467_vm2 = vmor %vm5465_vm1, %vm5466_vm0 }
 0x81a   :  { %v5462_v14 = vsub.f32 1.0, %v5461_v15  ;;  %v5443_v60 = vsel %vm5440_vm14, %v5442_v42, %v5438_v35  ;;  %v5453_v1 = vsel %vm5452_vm13, %v8708_v9, %v5449_v46 }
 0x81b   :  { %v5458_v18 = vsel %vm5455_vm15, %v5457_v10, %v5453_v1  ;;  %v5480_v32 = vmul.f32 %v8712_v12, %v5443_v60 }
 0x81c   :  { %v5463_v22 = vmul.f32 %v8710_v48, %v5462_v14  ;;  %v5479_v38 = vmul.f32 %v5477_v53, %v5458_v18 }
 0x81e   :  { %v10478_v29 = vadd.f32 %v5480_v32, %v5479_v38  ;;  %v5464_v13 = vadd.f32 %v8710_v48, %v5463_v22 }
 0x820   :  { %8713 = vtanh.f32 %v10478_v29  ;;  %v5468_v11 = vsel %vm5467_vm2, %v8710_v48, %v5464_v13 }
 0x821   :  { %v5473_v9 = vsel %vm5470_vm3, %v5472_v43, %v5468_v11 }
 0x826   :  { %v8714_v3 = vpop.eup %8713 }
 0x827   :  { %v5483_v39 = vmul.f32 %v8714_v3, %v5473_v9 }
 0x829   :  { %v5484_v19 = vpack.c.bf16 %v5483_v39, %v5483_v39 }
 0x82b   :  { %v5486_v62 = vrot.slane %v5484_v19, 1 }
 0x82d   :  { %5496 = vmatmul.bf16.vlgmr.msrb.gmra.mxu0 %v5486_v62  ;;  %5509 = vmatmul.bf16.vlgmr.msrb.gmra.mxu1 %v5486_v62 }
 0x82e   :  { %5522 = vmatmul.bf16.vlgmr.msrb.gmra.mxu2 %v5486_v62  ;;  %5535 = vmatmul.bf16.vlgmr.msrb.gmra.mxu3 %v5486_v62 }
 0x82f   :  { %5764 = vmatpush.bf16.msrb.mxu0 %v10159_v16  ;;  %5777 = vmatpush.bf16.msrb.mxu1 %v10213_v61 }
 0x830   :  { %5790 = vmatpush.bf16.msrb.mxu2 %v10161_v56  ;;  %5803 = vmatpush.bf16.msrb.mxu3 %v10215_v54 }
 0x833   :  { %5765 = vmatpush.bf16.msrb.mxu0 %v10165_v58  ;;  %5778 = vmatpush.bf16.msrb.mxu1 %v10219_v51 }
 0x834   :  { %5791 = vmatpush.bf16.msrb.mxu2 %v10167_v41  ;;  %5804 = vmatpush.bf16.msrb.mxu3 %v10221_v63 }
 0x837   :  { %5766 = vmatpush.bf16.msrb.mxu0 %v10173_v4  ;;  %5779 = vmatpush.bf16.msrb.mxu1 %v10227_v24 }
 0x838   :  { %5792 = vmatpush.bf16.msrb.mxu2 %v10175_v55  ;;  %5805 = vmatpush.bf16.msrb.mxu3 %v10229_v17 }
 0x83b   :  { %5767 = vmatpush.bf16.msrb.mxu0 %v10179_v40  ;;  %5780 = vmatpush.bf16.msrb.mxu1 %v10233_v49 }
 0x83c   :  { %5793 = vmatpush.bf16.msrb.mxu2 %v10181_v30  ;;  %5806 = vmatpush.bf16.msrb.mxu3 %v10235_v52 }
 0x83f   :  { %5768 = vmatpush.bf16.msrb.mxu0 %v10187_v36  ;;  %5781 = vmatpush.bf16.msrb.mxu1 %v10239_v20 }
 0x840   :  { %5794 = vmatpush.bf16.msrb.mxu2 %v10189_v31  ;;  %5807 = vmatpush.bf16.msrb.mxu3 %v10241_v27 }
 0x843   :  { %5769 = vmatpush.bf16.msrb.mxu0 %v10193_v5  ;;  %5782 = vmatpush.bf16.msrb.mxu1 %v10245_v37 }
 0x844   :  { %5795 = vmatpush.bf16.msrb.mxu2 %v10195_v6  ;;  %5808 = vmatpush.bf16.msrb.mxu3 %v10247_v8 }
 0x847   :  { %5770 = vmatpush.bf16.msrb.mxu0 %v10199_v28  ;;  %5783 = vmatpush.bf16.msrb.mxu1 %v10251_v26 }
 0x848   :  { %5796 = vmatpush.bf16.msrb.mxu2 %v10201_v50  ;;  %5809 = vmatpush.bf16.msrb.mxu3 %v10253_v47 }
 0x84b   :  { %5771 = vmatpush.bf16.msrb.mxu0 %v10205_v45  ;;  %5784 = vmatpush.bf16.msrb.mxu1 %v10259_v59 }
 0x84c   :  { %5797 = vmatpush.bf16.msrb.mxu2 %v10207_v25  ;;  %5810 = vmatpush.bf16.msrb.mxu3 %v10261_v2 }
 0x8aa   :  { %v5497_v34 = vpop.f32.mrf.mxu0  ;;  %v5510_v48 = vpop.f32.mrf.mxu1 }
 0x8ab   :  { %v5544_v15 = vrot.slane %v5497_v34, 4  ;;  %v5545_v42 = vrot.slane %v5510_v48, 4 }
 0x8ad   :  { %v5552_v46 = vadd.f32 %v5544_v15, %v10323_v7  ;;  %v5553_v53 = vadd.f32 %v5545_v42, %v11122_v21 }
 0x8af   :  { %v7995_v10 = vmul.f32 -1.442695, %v5552_v46  ;;  %v7996_v35 = vmul.f32 -1.442695, %v5553_v53 }
 0x8b1   :  { %8715 = vpow2.f32 %v7995_v10  ;;  %v5523_v12 = vpop.f32.mrf.mxu2  ;;  %v5536_v14 = vpop.f32.mrf.mxu3 }
 0x8b2   :  { %8717 = vpow2.f32 %v7996_v35  ;;  %v5546_v60 = vrot.slane %v5523_v12, 4  ;;  %v5499_v1 = vpop.f32.mrf.mxu0  ;;  %v5512_v18 = vpop.f32.mrf.mxu1  ;;  %v5547_v3 = vrot.slane %v5536_v14, 4 }
 0x8b4   :  { %v5554_v32 = vadd.f32 %v5546_v60, %v11123_v57  ;;  %v5555_v62 = vadd.f32 %v5547_v3, %v11124_v23 }
 0x8b6   :  { %v7997_v22 = vmul.f32 -1.442695, %v5554_v32 }
 0x8b7   :  { %v8716_v38 = vpop.eup %8715 }
 0x8b8   :  { %v8718_v13 = vpop.eup %8717  ;;  %v5565_v44 = vadd.f32 1.0, %v8716_v38  ;;  %8719 = vpow2.f32 %v7997_v22 }
 0x8b9   :  { %v5566_v0 = vadd.f32 1.0, %v8718_v13  ;;  %v5525_v11 = vpop.f32.mrf.mxu2  ;;  %v5538_v43 = vpop.f32.mrf.mxu3  ;;  %v5615_v13 = vrot.slane %v10478_v29, 6 }
 0x8ba   :  { %8721 = vrcp.f32 %v5565_v44  ;;  %v5579_v53 = vand.u32 2147483648, %v5565_v44  ;;  %v5577_v12 = vand.u32 2147483647, %v5565_v44  ;;  %vm5573_vm6 = vweird.f32 %v5565_v44 }
 0x8bb   :  { %8723 = vrcp.f32 %v5566_v0  ;;  %v5594_v10 = vand.u32 2147483648, %v5566_v0  ;;  %v5592_v14 = vand.u32 2147483647, %v5566_v0  ;;  %vm5588_vm7 = vweird.f32 %v5566_v0 }
 0x8bc   :  { %v5580_v22 = vor.u32 1.1754944e-38, %v5579_v53  ;;  %vm5578_vm10 = vcmp.eq.f32.partialorder %v5577_v12, 8.507059e+37 }
 0x8bd   :  { %v5595_v11 = vor.u32 1.1754944e-38, %v5594_v10  ;;  %vm5593_vm11 = vcmp.eq.f32.partialorder %v5592_v14, 8.507059e+37 }
 0x8be   :  { %v8720_v9 = vpop.eup %8719 }
 0x8bf   :  { %v5567_v39 = vadd.f32 1.0, %v8720_v9 }
 0x8c0   :  { %v8722_v19 = vpop.eup %8721 }
 0x8c1   :  { %v8724_v34 = vpop.eup %8723  ;;  %v5569_v48 = vmul.f32 %v8722_v19, %v5565_v44  ;;  %8725 = vrcp.f32 %v5567_v39  ;;  %vm5574_vm4 = vweird.f32 %v8722_v19  ;;  %v5609_v53 = vand.u32 2147483648, %v5567_v39 }
 0x8c2   :  { %v5584_v15 = vmul.f32 %v8724_v34, %v5566_v0  ;;  %8727 = vtanh.f32 %v5555_v62  ;;  %vm5589_vm5 = vweird.f32 %v8724_v34  ;;  %vm5575_vm8 = vmor %vm5573_vm6, %vm5574_vm4  ;;  %vm5603_vm13 = vweird.f32 %v5567_v39 }
 0x8c3   :  { %v5570_v42 = vsub.f32 1.0, %v5569_v48  ;;  %vm5590_vm9 = vmor %vm5588_vm7, %vm5589_vm5  ;;  %v5607_v29 = vand.u32 2147483647, %v5567_v39  ;;  %v5610_v10 = vor.u32 1.1754944e-38, %v5609_v53 }
 0x8c4   :  { %v5585_v46 = vsub.f32 1.0, %v5584_v15 }
 0x8c5   :  { %v5571_v35 = vmul.f32 %v8722_v19, %v5570_v42  ;;  %vm5608_vm15 = vcmp.eq.f32.partialorder %v5607_v29, 8.507059e+37 }
 0x8c6   :  { %v5586_v60 = vmul.f32 %v8724_v34, %v5585_v46 }
 0x8c7   :  { %v8726_v1 = vpop.eup %8725  ;;  %v5572_v18 = vadd.f32 %v8722_v19, %v5571_v35 }
 0x8c8   :  { %v5599_v32 = vmul.f32 %v8726_v1, %v5567_v39  ;;  %v5587_v38 = vadd.f32 %v8724_v34, %v5586_v60  ;;  %v8728_v3 = vpop.eup %8727  ;;  %vm5604_vm12 = vweird.f32 %v8726_v1 }
 0x8c9   :  { %v5576_v43 = vsel %vm5575_vm8, %v8722_v19, %v5572_v18  ;;  %vm5605_vm14 = vmor %vm5603_vm13, %vm5604_vm12 }
 0x8ca   :  { %v5600_v9 = vsub.f32 1.0, %v5599_v32  ;;  %v5581_v62 = vsel %vm5578_vm10, %v5580_v22, %v5576_v43  ;;  %v5591_v48 = vsel %vm5590_vm9, %v8724_v34, %v5587_v38 }
 0x8cb   :  { %v5596_v15 = vsel %vm5593_vm11, %v5595_v11, %v5591_v48  ;;  %v5618_v42 = vmul.f32 %v8728_v3, %v5581_v62 }
 0x8cc   :  { %v5601_v46 = vmul.f32 %v8726_v1, %v5600_v9  ;;  %v5617_v44 = vmul.f32 %v5615_v13, %v5596_v15 }
 0x8ce   :  { %v10518_v0 = vadd.f32 %v5618_v42, %v5617_v44  ;;  %v5602_v35 = vadd.f32 %v8726_v1, %v5601_v46 }
 0x8d0   :  { %8729 = vtanh.f32 %v10518_v0  ;;  %v5606_v19 = vsel %vm5605_vm14, %v8726_v1, %v5602_v35 }
 0x8d1   :  { %v5611_v34 = vsel %vm5608_vm15, %v5610_v10, %v5606_v19 }
 0x8d6   :  { %v8730_v12 = vpop.eup %8729 }
 0x8d7   :  { %v5621_v60 = vmul.f32 %v8730_v12, %v5611_v34 }
 0x8d9   :  { %v5622_v14 = vpack.c.bf16 %v5621_v60, %v5621_v60 }
 0x8db   :  { %v5624_v18 = vrot.slane %v5622_v14, 2 }
 0x8dd   :  { %5634 = vmatmul.bf16.vlgmr.msra.gmra.mxu0 %v5624_v18  ;;  %5647 = vmatmul.bf16.vlgmr.msra.gmra.mxu1 %v5624_v18 }
 0x8de   :  { %5660 = vmatmul.bf16.vlgmr.msra.gmra.mxu2 %v5624_v18  ;;  %5673 = vmatmul.bf16.vlgmr.msra.gmra.mxu3 %v5624_v18 }
 0x8df   :  { %5887 = vmatpush.bf16.msra.mxu0 %v10159_v16  ;;  %5900 = vmatpush.bf16.msra.mxu1 %v10213_v61 }
 0x8e0   :  { %5913 = vmatpush.bf16.msra.mxu2 %v10161_v56  ;;  %5926 = vmatpush.bf16.msra.mxu3 %v10215_v54 }
 0x8e3   :  { %5888 = vmatpush.bf16.msra.mxu0 %v10165_v58  ;;  %5901 = vmatpush.bf16.msra.mxu1 %v10219_v51 }
 0x8e4   :  { %5914 = vmatpush.bf16.msra.mxu2 %v10167_v41  ;;  %5927 = vmatpush.bf16.msra.mxu3 %v10221_v63 }
 0x8e7   :  { %5889 = vmatpush.bf16.msra.mxu0 %v10173_v4  ;;  %5902 = vmatpush.bf16.msra.mxu1 %v10227_v24 }
 0x8e8   :  { %5915 = vmatpush.bf16.msra.mxu2 %v10175_v55  ;;  %5928 = vmatpush.bf16.msra.mxu3 %v10229_v17 }
 0x8eb   :  { %5890 = vmatpush.bf16.msra.mxu0 %v10179_v40  ;;  %5903 = vmatpush.bf16.msra.mxu1 %v10233_v49 }
 0x8ec   :  { %5916 = vmatpush.bf16.msra.mxu2 %v10181_v30  ;;  %5929 = vmatpush.bf16.msra.mxu3 %v10235_v52 }
 0x8ef   :  { %5891 = vmatpush.bf16.msra.mxu0 %v10187_v36  ;;  %5904 = vmatpush.bf16.msra.mxu1 %v10239_v20 }
 0x8f0   :  { %5917 = vmatpush.bf16.msra.mxu2 %v10189_v31  ;;  %5930 = vmatpush.bf16.msra.mxu3 %v10241_v27 }
 0x8f3   :  { %5892 = vmatpush.bf16.msra.mxu0 %v10193_v5  ;;  %5905 = vmatpush.bf16.msra.mxu1 %v10245_v37 }
 0x8f4   :  { %5918 = vmatpush.bf16.msra.mxu2 %v10195_v6  ;;  %5931 = vmatpush.bf16.msra.mxu3 %v10247_v8 }
 0x8f7   :  { %5893 = vmatpush.bf16.msra.mxu0 %v10199_v28  ;;  %5906 = vmatpush.bf16.msra.mxu1 %v10251_v26 }
 0x8f8   :  { %5919 = vmatpush.bf16.msra.mxu2 %v10201_v50  ;;  %5932 = vmatpush.bf16.msra.mxu3 %v10253_v47 }
 0x8fb   :  { %5894 = vmatpush.bf16.msra.mxu0 %v10205_v45  ;;  %5907 = vmatpush.bf16.msra.mxu1 %v10259_v59 }
 0x8fc   :  { %5920 = vmatpush.bf16.msra.mxu2 %v10207_v25  ;;  %5933 = vmatpush.bf16.msra.mxu3 %v10261_v2 }
 0x95a   :  { %v5635_v39 = vpop.f32.mrf.mxu0  ;;  %v5648_v1 = vpop.f32.mrf.mxu1 }
 0x95b   :  { %v5682_v32 = vrot.slane %v5635_v39, 2  ;;  %v5683_v22 = vrot.slane %v5648_v1, 2 }
 0x95d   :  { %v5690_v38 = vadd.f32 %v5682_v32, %v10323_v7  ;;  %v5691_v13 = vadd.f32 %v5683_v22, %v11122_v21 }
 0x95f   :  { %v7998_v11 = vmul.f32 -1.442695, %v5690_v38  ;;  %v7999_v43 = vmul.f32 -1.442695, %v5691_v13 }
 0x961   :  { %8731 = vpow2.f32 %v7998_v11  ;;  %v5661_v3 = vpop.f32.mrf.mxu2  ;;  %v5674_v9 = vpop.f32.mrf.mxu3 }
 0x962   :  { %8733 = vpow2.f32 %v7999_v43  ;;  %v5684_v62 = vrot.slane %v5661_v3, 2  ;;  %v5637_v48 = vpop.f32.mrf.mxu0  ;;  %v5650_v15 = vpop.f32.mrf.mxu1  ;;  %v5685_v21 = vrot.slane %v5674_v9, 2 }
 0x963   :  { %v5753_v15 = vrot.slane %v10518_v0, 6 }
 0x964   :  { %v5692_v42 = vadd.f32 %v5684_v62, %v11123_v57  ;;  %v5693_v60 = vadd.f32 %v5685_v21, %v11124_v23 }
 0x966   :  { %v8000_v46 = vmul.f32 -1.442695, %v5692_v42 }
 0x967   :  { %v8732_v44 = vpop.eup %8731 }
 0x968   :  { %v8734_v35 = vpop.eup %8733  ;;  %v5703_v53 = vadd.f32 1.0, %v8732_v44  ;;  %8735 = vpow2.f32 %v8000_v46 }
 0x969   :  { %v5704_v29 = vadd.f32 1.0, %v8734_v35  ;;  %v5663_v7 = vpop.f32.mrf.mxu2  ;;  %v5676_v19 = vpop.f32.mrf.mxu3 }
 0x96a   :  { %8737 = vrcp.f32 %v5703_v53  ;;  %v5717_v32 = vand.u32 2147483648, %v5703_v53  ;;  %v5715_v13 = vand.u32 2147483647, %v5703_v53  ;;  %vm5711_vm2 = vweird.f32 %v5703_v53 }
 0x96b   :  { %8739 = vrcp.f32 %v5704_v29  ;;  %v5732_v22 = vand.u32 2147483648, %v5704_v29  ;;  %v5730_v43 = vand.u32 2147483647, %v5704_v29  ;;  %vm5726_vm3 = vweird.f32 %v5704_v29 }
 0x96c   :  { %v5718_v62 = vor.u32 1.1754944e-38, %v5717_v32  ;;  %vm5716_vm6 = vcmp.eq.f32.partialorder %v5715_v13, 8.507059e+37 }
 0x96d   :  { %v5733_v42 = vor.u32 1.1754944e-38, %v5732_v22  ;;  %vm5731_vm7 = vcmp.eq.f32.partialorder %v5730_v43, 8.507059e+37 }
 0x96e   :  { %v8736_v10 = vpop.eup %8735 }
 0x96f   :  { %v5705_v12 = vadd.f32 1.0, %v8736_v10 }
 0x970   :  { %v8738_v34 = vpop.eup %8737 }
 0x971   :  { %v8740_v14 = vpop.eup %8739  ;;  %v5707_v18 = vmul.f32 %v8738_v34, %v5703_v53  ;;  %8741 = vrcp.f32 %v5705_v12  ;;  %vm5712_vm0 = vweird.f32 %v8738_v34  ;;  %vm5741_vm9 = vweird.f32 %v5705_v12 }
 0x972   :  { %v5722_v57 = vmul.f32 %v8740_v14, %v5704_v29  ;;  %8743 = vtanh.f32 %v5693_v60  ;;  %vm5727_vm1 = vweird.f32 %v8740_v14  ;;  %vm5713_vm4 = vmor %vm5711_vm2, %vm5712_vm0  ;;  %v5745_v0 = vand.u32 2147483647, %v5705_v12 }
 0x973   :  { %v5708_v39 = vsub.f32 1.0, %v5707_v18  ;;  %vm5728_vm5 = vmor %vm5726_vm3, %vm5727_vm1 }
 0x974   :  { %v5723_v1 = vsub.f32 1.0, %v5722_v57  ;;  %v5747_v57 = vand.u32 2147483648, %v5705_v12  ;;  %vm5746_vm11 = vcmp.eq.f32.partialorder %v5745_v0, 8.507059e+37 }
 0x975   :  { %v5709_v38 = vmul.f32 %v8738_v34, %v5708_v39 }
 0x976   :  { %v5724_v11 = vmul.f32 %v8740_v14, %v5723_v1  ;;  %v5748_v39 = vor.u32 1.1754944e-38, %v5747_v57 }
 0x977   :  { %v8742_v3 = vpop.eup %8741  ;;  %v5710_v9 = vadd.f32 %v8738_v34, %v5709_v38 }
 0x978   :  { %v5737_v23 = vmul.f32 %v8742_v3, %v5705_v12  ;;  %v5725_v48 = vadd.f32 %v8740_v14, %v5724_v11  ;;  %v8744_v44 = vpop.eup %8743  ;;  %vm5742_vm8 = vweird.f32 %v8742_v3  ;;  %v11125_v12 = vld [vmem:[#allocation60_spill] sm:$0xff]  ;;  %v11127_v11 = vld [vmem:[#allocation63_spill] sm:$0xff] }
 0x979   :  { %v5714_v46 = vsel %vm5713_vm4, %v8738_v34, %v5710_v9  ;;  %vm5743_vm10 = vmor %vm5741_vm9, %vm5742_vm8  ;;  %v11126_v13 = vperm.slane %v11125_v12, 0  ;;  %v11129_v9 = vld [vmem:[#allocation64_spill] sm:$0xff] }
 0x97a   :  { %v5738_v35 = vsub.f32 1.0, %v5737_v23  ;;  %v5719_v7 = vsel %vm5716_vm6, %v5718_v62, %v5714_v46  ;;  %v5729_v19 = vsel %vm5728_vm5, %v8740_v14, %v5725_v48  ;;  %v11130_v62 = vld [vmem:[#allocation50_spill] sm:$0xff] }
 0x97b   :  { %v5734_v21 = vsel %vm5731_vm7, %v5733_v42, %v5729_v19  ;;  %v5756_v10 = vmul.f32 %v8744_v44, %v5719_v7  ;;  %v4114_v43 = vadd.f32 %v11127_v11, %v11126_v13 }
 0x97c   :  { %v5739_v60 = vmul.f32 %v8742_v3, %v5738_v35  ;;  %v5755_v53 = vmul.f32 %v5753_v15, %v5734_v21  ;;  %v11131_v15 = vld [vmem:[#allocation49_spill] sm:$0xff] }
 0x97d   :  { %v10600_v48 = vadd.f32 %v11130_v62, %v4114_v43  ;;  %v11133_v43 = vld [vmem:[#allocation53_spill] sm:$0xff] }
 0x97e   :  { %v10558_v29 = vadd.f32 %v5756_v10, %v5755_v53  ;;  %v5740_v18 = vadd.f32 %v8742_v3, %v5739_v60  ;;  %v11132_v53 = vld [vmem:[#allocation52_spill] sm:$0xff] }
 0x980   :  { %8745 = vtanh.f32 %v10558_v29  ;;  %v5744_v34 = vsel %vm5743_vm10, %v8742_v3, %v5740_v18  ;;  %v11128_v3 = vperm.slane %v11125_v12, 1 }
 0x981   :  { %v5749_v14 = vsel %vm5746_vm11, %v5748_v39, %v5744_v34 }
 0x982   :  { %v4142_v23 = vadd.f32 %v11129_v9, %v11128_v3 }
 0x984   :  { %v10603_v42 = vadd.f32 %v11131_v15, %v4142_v23 }
 0x986   :  { %v8746_v1 = vpop.eup %8745 }
 0x987   :  { %v5759_v32 = vmul.f32 %v8746_v1, %v5749_v14 }
 0x989   :  { %v5760_v22 = vpack.c.bf16 %v5759_v32, %v5759_v32 }
 0x98b   :  { %v5762_v38 = vrot.slane %v5760_v22, 3 }
 0x98d   :  { %5772 = vmatmul.bf16.vlgmr.msrb.gmra.mxu0 %v5762_v38  ;;  %5785 = vmatmul.bf16.vlgmr.msrb.gmra.mxu1 %v5762_v38 }
 0x98e   :  { %5798 = vmatmul.bf16.vlgmr.msrb.gmra.mxu2 %v5762_v38  ;;  %5811 = vmatmul.bf16.vlgmr.msrb.gmra.mxu3 %v5762_v38 }
 0x98f   :  { %6025 = vmatpush.bf16.msrb.mxu0 %v10159_v16  ;;  %6038 = vmatpush.bf16.msrb.mxu1 %v10213_v61 }
 0x990   :  { %6051 = vmatpush.bf16.msrb.mxu2 %v10161_v56  ;;  %6064 = vmatpush.bf16.msrb.mxu3 %v10215_v54 }
 0x993   :  { %6026 = vmatpush.bf16.msrb.mxu0 %v10165_v58  ;;  %6039 = vmatpush.bf16.msrb.mxu1 %v10219_v51 }
 0x994   :  { %6052 = vmatpush.bf16.msrb.mxu2 %v10167_v41  ;;  %6065 = vmatpush.bf16.msrb.mxu3 %v10221_v63 }
 0x997   :  { %6027 = vmatpush.bf16.msrb.mxu0 %v10173_v4  ;;  %6040 = vmatpush.bf16.msrb.mxu1 %v10227_v24 }
 0x998   :  { %6053 = vmatpush.bf16.msrb.mxu2 %v10175_v55  ;;  %6066 = vmatpush.bf16.msrb.mxu3 %v10229_v17 }
 0x99b   :  { %6028 = vmatpush.bf16.msrb.mxu0 %v10179_v40  ;;  %6041 = vmatpush.bf16.msrb.mxu1 %v10233_v49 }
 0x99c   :  { %6054 = vmatpush.bf16.msrb.mxu2 %v10181_v30  ;;  %6067 = vmatpush.bf16.msrb.mxu3 %v10235_v52 }
 0x99f   :  { %6029 = vmatpush.bf16.msrb.mxu0 %v10187_v36  ;;  %6042 = vmatpush.bf16.msrb.mxu1 %v10239_v20 }
 0x9a0   :  { %6055 = vmatpush.bf16.msrb.mxu2 %v10189_v31  ;;  %6068 = vmatpush.bf16.msrb.mxu3 %v10241_v27 }
 0x9a3   :  { %6030 = vmatpush.bf16.msrb.mxu0 %v10193_v5  ;;  %6043 = vmatpush.bf16.msrb.mxu1 %v10245_v37 }
 0x9a4   :  { %6056 = vmatpush.bf16.msrb.mxu2 %v10195_v6  ;;  %6069 = vmatpush.bf16.msrb.mxu3 %v10247_v8 }
 0x9a7   :  { %6031 = vmatpush.bf16.msrb.mxu0 %v10199_v28  ;;  %6044 = vmatpush.bf16.msrb.mxu1 %v10251_v26 }
 0x9a8   :  { %6057 = vmatpush.bf16.msrb.mxu2 %v10201_v50  ;;  %6070 = vmatpush.bf16.msrb.mxu3 %v10253_v47 }
 0x9ab   :  { %6032 = vmatpush.bf16.msrb.mxu0 %v10205_v45  ;;  %6045 = vmatpush.bf16.msrb.mxu1 %v10259_v59 }
 0x9ac   :  { %6058 = vmatpush.bf16.msrb.mxu2 %v10207_v25  ;;  %6071 = vmatpush.bf16.msrb.mxu3 %v10261_v2 }
 0xa0a   :  { %v5773_v46 = vpop.f32.mrf.mxu0  ;;  %v5786_v44 = vpop.f32.mrf.mxu1 }
 0xa0b   :  { %v5816_v35 = vadd.f32 %v5773_v46, %v10600_v48  ;;  %v5817_v7 = vadd.f32 %v5786_v44, %v10603_v42 }
 0xa0d   :  { %v8001_v19 = vmul.f32 -1.442695, %v5816_v35  ;;  %v8002_v21 = vmul.f32 -1.442695, %v5817_v7 }
 0xa0f   :  { %8747 = vpow2.f32 %v8001_v19 }
 0xa10   :  { %8749 = vpow2.f32 %v8002_v21 }
 0xa11   :  { %v5799_v10 = vpop.f32.mrf.mxu2  ;;  %v5812_v60 = vpop.f32.mrf.mxu3 }
 0xa12   :  { %v5818_v18 = vadd.f32 %v5799_v10, %v11132_v53  ;;  %v5775_v57 = vpop.f32.mrf.mxu0  ;;  %v5788_v0 = vpop.f32.mrf.mxu1  ;;  %v5819_v3 = vadd.f32 %v5812_v60, %v11133_v43 }
 0xa14   :  { %v8003_v34 = vmul.f32 -1.442695, %v5818_v18 }
 0xa15   :  { %v8748_v39 = vpop.eup %8747 }
 0xa16   :  { %v8750_v1 = vpop.eup %8749  ;;  %v5829_v14 = vadd.f32 1.0, %v8748_v39  ;;  %8751 = vpow2.f32 %v8003_v34 }
 0xa17   :  { %v5830_v32 = vadd.f32 1.0, %v8750_v1 }
 0xa18   :  { %8753 = vrcp.f32 %v5829_v14  ;;  %v5843_v44 = vand.u32 2147483648, %v5829_v14  ;;  %v5841_v19 = vand.u32 2147483647, %v5829_v14  ;;  %vm5837_vm14 = vweird.f32 %v5829_v14 }
 0xa19   :  { %8755 = vrcp.f32 %v5830_v32  ;;  %v5801_v22 = vpop.f32.mrf.mxu2  ;;  %v5814_v38 = vpop.f32.mrf.mxu3  ;;  %v5858_v35 = vand.u32 2147483648, %v5830_v32  ;;  %v5856_v10 = vand.u32 2147483647, %v5830_v32  ;;  %vm5852_vm15 = vweird.f32 %v5830_v32 }
 0xa1a   :  { %v5844_v0 = vor.u32 1.1754944e-38, %v5843_v44  ;;  %vm5842_vm2 = vcmp.eq.f32.partialorder %v5841_v19, 8.507059e+37  ;;  %v5879_v22 = vrot.slane %v10558_v29, 6 }
 0xa1b   :  { %v5859_v39 = vor.u32 1.1754944e-38, %v5858_v35  ;;  %vm5857_vm3 = vcmp.eq.f32.partialorder %v5856_v10, 8.507059e+37 }
 0xa1c   :  { %v8752_v12 = vpop.eup %8751 }
 0xa1d   :  { %v5831_v13 = vadd.f32 1.0, %v8752_v12 }
 0xa1e   :  { %v8754_v11 = vpop.eup %8753 }
 0xa1f   :  { %v8756_v9 = vpop.eup %8755  ;;  %v5833_v23 = vmul.f32 %v8754_v11, %v5829_v14  ;;  %8757 = vrcp.f32 %v5831_v13  ;;  %vm5838_vm12 = vweird.f32 %v8754_v11  ;;  %vm5867_vm5 = vweird.f32 %v5831_v13 }
 0xa20   :  { %v5848_v62 = vmul.f32 %v8756_v9, %v5830_v32  ;;  %8759 = vtanh.f32 %v5819_v3  ;;  %vm5853_vm13 = vweird.f32 %v8756_v9  ;;  %vm5839_vm0 = vmor %vm5837_vm14, %vm5838_vm12 }
 0xa21   :  { %v5834_v15 = vsub.f32 1.0, %v5833_v23  ;;  %vm5854_vm1 = vmor %vm5852_vm15, %vm5853_vm13 }
 0xa22   :  { %v5849_v46 = vsub.f32 1.0, %v5848_v62 }
 0xa23   :  { %v5835_v7 = vmul.f32 %v8754_v11, %v5834_v15 }
 0xa24   :  { %v5850_v21 = vmul.f32 %v8756_v9, %v5849_v46 }
 0xa25   :  { %v8758_v18 = vpop.eup %8757  ;;  %v5836_v57 = vadd.f32 %v8754_v11, %v5835_v7  ;;  %v5873_v7 = vand.u32 2147483648, %v5831_v13 }
 0xa26   :  { %v5863_v60 = vmul.f32 %v8758_v18, %v5831_v13  ;;  %v5851_v34 = vadd.f32 %v8756_v9, %v5850_v21  ;;  %v8760_v38 = vpop.eup %8759  ;;  %vm5868_vm4 = vweird.f32 %v8758_v18 }
 0xa27   :  { %v5840_v1 = vsel %vm5839_vm0, %v8754_v11, %v5836_v57  ;;  %v5871_v11 = vand.u32 2147483647, %v5831_v13  ;;  %vm5869_vm6 = vmor %vm5867_vm5, %vm5868_vm4  ;;  %v5874_v35 = vor.u32 1.1754944e-38, %v5873_v7 }
 0xa28   :  { %v5864_v12 = vsub.f32 1.0, %v5863_v60  ;;  %v5845_v3 = vsel %vm5842_vm2, %v5844_v0, %v5840_v1  ;;  %v5855_v23 = vsel %vm5854_vm1, %v8756_v9, %v5851_v34 }
 0xa29   :  { %v5860_v62 = vsel %vm5857_vm3, %v5859_v39, %v5855_v23  ;;  %v5882_v15 = vmul.f32 %v8760_v38, %v5845_v3  ;;  %vm5872_vm7 = vcmp.eq.f32.partialorder %v5871_v11, 8.507059e+37 }
 0xa2a   :  { %v5865_v46 = vmul.f32 %v8758_v18, %v5864_v12  ;;  %v5881_v14 = vmul.f32 %v5879_v22, %v5860_v62 }
 0xa2c   :  { %v10610_v32 = vadd.f32 %v5882_v15, %v5881_v14  ;;  %v5866_v44 = vadd.f32 %v8758_v18, %v5865_v46 }
 0xa2e   :  { %8761 = vtanh.f32 %v10610_v32  ;;  %v5870_v29 = vsel %vm5869_vm6, %v8758_v18, %v5866_v44  ;;  %v6014_v12 = vrot.slane %v10610_v32, 6 }
 0xa2f   :  { %v5875_v9 = vsel %vm5872_vm7, %v5874_v35, %v5870_v29 }
 0xa34   :  { %v8762_v19 = vpop.eup %8761 }
 0xa35   :  { %v5885_v21 = vmul.f32 %v8762_v19, %v5875_v9 }
 0xa37   :  { %v5886_v10 = vpack.c.bf16 %v5885_v21, %v5885_v21 }
 0xa39   :  { %5895 = vmatmul.bf16.vlgmr.msra.gmra.mxu0 %v5886_v10  ;;  %5908 = vmatmul.bf16.vlgmr.msra.gmra.mxu1 %v5886_v10 }
 0xa3a   :  { %5921 = vmatmul.bf16.vlgmr.msra.gmra.mxu2 %v5886_v10  ;;  %5934 = vmatmul.bf16.vlgmr.msra.gmra.mxu3 %v5886_v10 }
 0xa3b   :  { %6163 = vmatpush.bf16.msra.mxu0 %v10159_v16  ;;  %6176 = vmatpush.bf16.msra.mxu1 %v10213_v61 }
 0xa3c   :  { %6189 = vmatpush.bf16.msra.mxu2 %v10161_v56  ;;  %6202 = vmatpush.bf16.msra.mxu3 %v10215_v54 }
 0xa3f   :  { %6164 = vmatpush.bf16.msra.mxu0 %v10165_v58  ;;  %6177 = vmatpush.bf16.msra.mxu1 %v10219_v51 }
 0xa40   :  { %6190 = vmatpush.bf16.msra.mxu2 %v10167_v41  ;;  %6203 = vmatpush.bf16.msra.mxu3 %v10221_v63 }
 0xa43   :  { %6165 = vmatpush.bf16.msra.mxu0 %v10173_v4  ;;  %6178 = vmatpush.bf16.msra.mxu1 %v10227_v24 }
 0xa44   :  { %6191 = vmatpush.bf16.msra.mxu2 %v10175_v55  ;;  %6204 = vmatpush.bf16.msra.mxu3 %v10229_v17 }
 0xa47   :  { %6166 = vmatpush.bf16.msra.mxu0 %v10179_v40  ;;  %6179 = vmatpush.bf16.msra.mxu1 %v10233_v49 }
 0xa48   :  { %6192 = vmatpush.bf16.msra.mxu2 %v10181_v30  ;;  %6205 = vmatpush.bf16.msra.mxu3 %v10235_v52 }
 0xa4b   :  { %6167 = vmatpush.bf16.msra.mxu0 %v10187_v36  ;;  %6180 = vmatpush.bf16.msra.mxu1 %v10239_v20 }
 0xa4c   :  { %6193 = vmatpush.bf16.msra.mxu2 %v10189_v31  ;;  %6206 = vmatpush.bf16.msra.mxu3 %v10241_v27 }
 0xa4f   :  { %6168 = vmatpush.bf16.msra.mxu0 %v10193_v5  ;;  %6181 = vmatpush.bf16.msra.mxu1 %v10245_v37 }
 0xa50   :  { %6194 = vmatpush.bf16.msra.mxu2 %v10195_v6  ;;  %6207 = vmatpush.bf16.msra.mxu3 %v10247_v8 }
 0xa53   :  { %6169 = vmatpush.bf16.msra.mxu0 %v10199_v28  ;;  %6182 = vmatpush.bf16.msra.mxu1 %v10251_v26 }
 0xa54   :  { %6195 = vmatpush.bf16.msra.mxu2 %v10201_v50  ;;  %6208 = vmatpush.bf16.msra.mxu3 %v10253_v47 }
 0xa57   :  { %6170 = vmatpush.bf16.msra.mxu0 %v10205_v45  ;;  %6183 = vmatpush.bf16.msra.mxu1 %v10259_v59 }
 0xa58   :  { %6196 = vmatpush.bf16.msra.mxu2 %v10207_v25  ;;  %6209 = vmatpush.bf16.msra.mxu3 %v10261_v2 }
 0xab6   :  { %v5896_v16 = vpop.f32.mrf.mxu0  ;;  %v5909_v56 = vpop.f32.mrf.mxu1 }
 0xab7   :  { %v5943_v58 = vrot.slane %v5896_v16, 6  ;;  %v5944_v41 = vrot.slane %v5909_v56, 6 }
 0xab9   :  { %v5951_v4 = vadd.f32 %v5943_v58, %v10600_v48  ;;  %v5952_v55 = vadd.f32 %v5944_v41, %v10603_v42 }
 0xabb   :  { %v8004_v40 = vmul.f32 -1.442695, %v5951_v4  ;;  %v8005_v30 = vmul.f32 -1.442695, %v5952_v55 }
 0xabd   :  { %8763 = vpow2.f32 %v8004_v40  ;;  %v5922_v36 = vpop.f32.mrf.mxu2  ;;  %v5935_v31 = vpop.f32.mrf.mxu3 }
 0xabe   :  { %8765 = vpow2.f32 %v8005_v30  ;;  %v5945_v5 = vrot.slane %v5922_v36, 6  ;;  %v5898_v6 = vpop.f32.mrf.mxu0  ;;  %v5911_v28 = vpop.f32.mrf.mxu1  ;;  %v5946_v17 = vrot.slane %v5935_v31, 6 }
 0xabf   :  { %v6329_v6 = vld [vmem:[#allocation10 + $0xf8] sm:$0xff] }
 0xac0   :  { %v5953_v50 = vadd.f32 %v5945_v5, %v11132_v53  ;;  %v5954_v27 = vadd.f32 %v5946_v17, %v11133_v43  ;;  %v6326_v17 = vld [vmem:[#allocation10 + $0xe0] sm:$0xff] }
 0xac2   :  { %v8006_v45 = vmul.f32 -1.442695, %v5953_v50 }
 0xac3   :  { %v8764_v25 = vpop.eup %8763 }
 0xac4   :  { %v8766_v61 = vpop.eup %8765  ;;  %v5964_v54 = vadd.f32 1.0, %v8764_v25  ;;  %8767 = vpow2.f32 %v8006_v45  ;;  %v6328_v45 = vld [vmem:[#allocation10 + $0xf0] sm:$0xff]  ;;  %v6327_v25 = vld [vmem:[#allocation10 + $0xe8] sm:$0xff] }
 0xac5   :  { %v5965_v51 = vadd.f32 1.0, %v8766_v61  ;;  %v5924_v63 = vpop.f32.mrf.mxu2  ;;  %v5937_v24 = vpop.f32.mrf.mxu3 }
 0xac6   :  { %8769 = vrcp.f32 %v5964_v54  ;;  %v5978_v2 = vand.u32 2147483648, %v5964_v54  ;;  %v5976_v57 = vand.u32 2147483647, %v5964_v54  ;;  %vm5972_vm10 = vweird.f32 %v5964_v54 }
 0xac7   :  { %8771 = vrcp.f32 %v5965_v51  ;;  %v5993_v13 = vand.u32 2147483648, %v5965_v51  ;;  %v5991_v0 = vand.u32 2147483647, %v5965_v51  ;;  %vm5987_vm11 = vweird.f32 %v5965_v51 }
 0xac8   :  { %v5979_v22 = vor.u32 1.1754944e-38, %v5978_v2  ;;  %vm5977_vm14 = vcmp.eq.f32.partialorder %v5976_v57, 8.507059e+37 }
 0xac9   :  { %v5994_v3 = vor.u32 1.1754944e-38, %v5993_v13  ;;  %vm5992_vm15 = vcmp.eq.f32.partialorder %v5991_v0, 8.507059e+37  ;;  %v6321_v0 = vld [vmem:[#allocation10 + $0xb8] sm:$0xff] }
 0xaca   :  { %v8768_v49 = vpop.eup %8767 }
 0xacb   :  { %v5966_v52 = vadd.f32 1.0, %v8768_v49 }
 0xacc   :  { %v8770_v20 = vpop.eup %8769 }
 0xacd   :  { %v8772_v37 = vpop.eup %8771  ;;  %v5968_v8 = vmul.f32 %v8770_v20, %v5964_v54  ;;  %8773 = vrcp.f32 %v5966_v52  ;;  %vm5973_vm8 = vweird.f32 %v8770_v20  ;;  %v6008_v9 = vand.u32 2147483648, %v5966_v52 }
 0xace   :  { %v5983_v26 = vmul.f32 %v8772_v37, %v5965_v51  ;;  %8775 = vtanh.f32 %v5954_v27  ;;  %vm5988_vm9 = vweird.f32 %v8772_v37  ;;  %vm5974_vm12 = vmor %vm5972_vm10, %vm5973_vm8  ;;  %vm6002_vm1 = vweird.f32 %v5966_v52  ;;  %v6324_v27 = vld [vmem:[#allocation10 + $0xd0] sm:$0xff] }
 0xacf   :  { %v5969_v47 = vsub.f32 1.0, %v5968_v8  ;;  %vm5989_vm13 = vmor %vm5987_vm11, %vm5988_vm9  ;;  %v6006_v32 = vand.u32 2147483647, %v5966_v52  ;;  %v6009_v10 = vor.u32 1.1754944e-38, %v6008_v9 }
 0xad0   :  { %v5984_v59 = vsub.f32 1.0, %v5983_v26 }
 0xad1   :  { %v5970_v18 = vmul.f32 %v8770_v20, %v5969_v47  ;;  %vm6007_vm3 = vcmp.eq.f32.partialorder %v6006_v32, 8.507059e+37  ;;  %v6323_v47 = vld [vmem:[#allocation10 + $0xc8] sm:$0xff]  ;;  %v6316_v32 = vld [vmem:[#allocation10 + $0x90] sm:$0xff] }
 0xad2   :  { %v5985_v60 = vmul.f32 %v8772_v37, %v5984_v59 }
 0xad3   :  { %v8774_v34 = vpop.eup %8773  ;;  %v5971_v39 = vadd.f32 %v8770_v20, %v5970_v18  ;;  %v6322_v18 = vld [vmem:[#allocation10 + $0xc0] sm:$0xff] }
 0xad4   :  { %v5998_v1 = vmul.f32 %v8774_v34, %v5966_v52  ;;  %v5986_v38 = vadd.f32 %v8772_v37, %v5985_v60  ;;  %v8776_v62 = vpop.eup %8775  ;;  %vm6003_vm0 = vweird.f32 %v8774_v34  ;;  %v6325_v52 = vld [vmem:[#allocation10 + $0xd8] sm:$0xff] }
 0xad5   :  { %v5975_v23 = vsel %vm5974_vm12, %v8770_v20, %v5971_v39  ;;  %vm6004_vm2 = vmor %vm6002_vm1, %vm6003_vm0 }
 0xad6   :  { %v5999_v15 = vsub.f32 1.0, %v5998_v1  ;;  %v5980_v46 = vsel %vm5977_vm14, %v5979_v22, %v5975_v23  ;;  %v5990_v14 = vsel %vm5989_vm13, %v8772_v37, %v5986_v38  ;;  %v6319_v38 = vld [vmem:[#allocation10 + $0xa8] sm:$0xff] }
 0xad7   :  { %v5995_v44 = vsel %vm5992_vm15, %v5994_v3, %v5990_v14  ;;  %v6017_v7 = vmul.f32 %v8776_v62, %v5980_v46  ;;  %v6318_v62 = vld [vmem:[#allocation10 + $0xa0] sm:$0xff] }
 0xad8   :  { %v6000_v11 = vmul.f32 %v8774_v34, %v5999_v15  ;;  %v6016_v29 = vmul.f32 %v6014_v12, %v5995_v44  ;;  %v6317_v44 = vld [vmem:[#allocation10 + $0x98] sm:$0xff] }
 0xada   :  { %v10650_v35 = vadd.f32 %v6017_v7, %v6016_v29  ;;  %v6001_v19 = vadd.f32 %v8774_v34, %v6000_v11 }
 0xadc   :  { %8777 = vtanh.f32 %v10650_v35  ;;  %v6005_v21 = vsel %vm6004_vm2, %v8774_v34, %v6001_v19  ;;  %v6320_v34 = vld [vmem:[#allocation10 + $0xb0] sm:$0xff] }
 0xadd   :  { %v6010_v56 = vsel %vm6007_vm3, %v6009_v10, %v6005_v21 }
 0xae2   :  { %v8778_v16 = vpop.eup %8777 }
 0xae3   :  { %v6020_v58 = vmul.f32 %v8778_v16, %v6010_v56 }
 0xae5   :  { %v6021_v41 = vpack.c.bf16 %v6020_v58, %v6020_v58 }
 0xae7   :  { %v6023_v4 = vrot.slane %v6021_v41, 1  ;;  %v6315_v41 = vld [vmem:[#allocation10 + $0x88] sm:$0xff] }
 0xae9   :  { %6033 = vmatmul.bf16.vlgmr.msrb.gmra.mxu0 %v6023_v4  ;;  %6046 = vmatmul.bf16.vlgmr.msrb.gmra.mxu1 %v6023_v4 }
 0xaea   :  { %6059 = vmatmul.bf16.vlgmr.msrb.gmra.mxu2 %v6023_v4  ;;  %6072 = vmatmul.bf16.vlgmr.msrb.gmra.mxu3 %v6023_v4  ;;  %v6152_v4 = vrot.slane %v10650_v35, 6 }
 0xaeb   :  { %6333 = vmatpush.msrb.mxu0 %v6329_v6  ;;  %v6314_v6 = vld [vmem:[#allocation10 + $0x80] sm:$0xff] }
 0xaed   :  { %6334 = vmatpush.msrb.mxu0 %v6328_v45 }
 0xaef   :  { %6335 = vmatpush.msrb.mxu0 %v6327_v25 }
 0xaf1   :  { %6336 = vmatpush.msrb.mxu0 %v6326_v17 }
 0xaf3   :  { %6337 = vmatpush.msrb.mxu0 %v6325_v52 }
 0xaf5   :  { %6338 = vmatpush.msrb.mxu0 %v6324_v27 }
 0xaf7   :  { %6339 = vmatpush.msrb.mxu0 %v6323_v47  ;;  %v6310_v47 = vld [vmem:[#allocation10 + $0x68] sm:$0xff] }
 0xaf9   :  { %6340 = vmatpush.msrb.mxu0 %v6322_v18  ;;  %v6306_v18 = vld [vmem:[#allocation10 + $0x48] sm:$0xff] }
 0xafb   :  { %6341 = vmatpush.msrb.mxu0 %v6321_v0  ;;  %v6305_v0 = vld [vmem:[#allocation10 + $0x40] sm:$0xff] }
 0xafd   :  { %6342 = vmatpush.msrb.mxu0 %v6320_v34 }
 0xaff   :  { %6343 = vmatpush.msrb.mxu0 %v6319_v38  ;;  %v6303_v38 = vld [vmem:[#allocation10 + $0x30] sm:$0xff] }
 0xb01   :  { %6344 = vmatpush.msrb.mxu0 %v6318_v62  ;;  %v6301_v62 = vld [vmem:[#allocation10 + $0x20] sm:$0xff] }
 0xb03   :  { %6345 = vmatpush.msrb.mxu0 %v6317_v44 }
 0xb05   :  { %6346 = vmatpush.msrb.mxu0 %v6316_v32 }
 0xb07   :  { %6347 = vmatpush.msrb.mxu0 %v6315_v41 }
 0xb09   :  { %6348 = vmatpush.msrb.mxu0 %v6314_v6 }
 0xb66   :  { %v6034_v55 = vpop.f32.mrf.mxu0  ;;  %v6047_v40 = vpop.f32.mrf.mxu1 }
 0xb67   :  { %v6081_v30 = vrot.slane %v6034_v55, 4  ;;  %v6082_v36 = vrot.slane %v6047_v40, 4 }
 0xb69   :  { %v6089_v31 = vadd.f32 %v6081_v30, %v10600_v48  ;;  %v6090_v5 = vadd.f32 %v6082_v36, %v10603_v42 }
 0xb6b   :  { %v8007_v28 = vmul.f32 -1.442695, %v6089_v31  ;;  %v8008_v50 = vmul.f32 -1.442695, %v6090_v5 }
 0xb6d   :  { %8779 = vpow2.f32 %v8007_v28  ;;  %v6060_v61 = vpop.f32.mrf.mxu2  ;;  %v6073_v54 = vpop.f32.mrf.mxu3 }
 0xb6e   :  { %8781 = vpow2.f32 %v8008_v50  ;;  %v6083_v51 = vrot.slane %v6060_v61, 4  ;;  %v6036_v63 = vpop.f32.mrf.mxu0  ;;  %v6049_v24 = vpop.f32.mrf.mxu1  ;;  %v6084_v57 = vrot.slane %v6073_v54, 4 }
 0xb70   :  { %v6091_v49 = vadd.f32 %v6083_v51, %v11132_v53  ;;  %v6092_v22 = vadd.f32 %v6084_v57, %v11133_v43 }
 0xb72   :  { %v8009_v20 = vmul.f32 -1.442695, %v6091_v49 }
 0xb73   :  { %v8780_v37 = vpop.eup %8779 }
 0xb74   :  { %v8782_v8 = vpop.eup %8781  ;;  %v6102_v26 = vadd.f32 1.0, %v8780_v37  ;;  %8783 = vpow2.f32 %v8009_v20  ;;  %v6331_v37 = vrot.slane %v10467_v33, 6 }
 0xb75   :  { %v6103_v59 = vadd.f32 1.0, %v8782_v8  ;;  %v6062_v2 = vpop.f32.mrf.mxu2  ;;  %v6075_v13 = vpop.f32.mrf.mxu3  ;;  %v6312_v8 = vld [vmem:[#allocation10 + $0x78] sm:$0xff] }
 0xb76   :  { %8785 = vrcp.f32 %v6102_v26  ;;  %v6116_v14 = vand.u32 2147483648, %v6102_v26  ;;  %v6114_v29 = vand.u32 2147483647, %v6102_v26  ;;  %vm6110_vm6 = vweird.f32 %v6102_v26  ;;  %6356 = vmatpush.msrb.mxu1 %v6312_v8  ;;  %v6308_v2 = vld [vmem:[#allocation10 + $0x58] sm:$0xff]  ;;  %v6307_v13 = vld [vmem:[#allocation10 + $0x50] sm:$0xff] }
 0xb77   :  { %8787 = vrcp.f32 %v6103_v59  ;;  %v6131_v7 = vand.u32 2147483648, %v6103_v59  ;;  %v6129_v9 = vand.u32 2147483647, %v6103_v59  ;;  %vm6125_vm7 = vweird.f32 %v6103_v59 }
 0xb78   :  { %v6117_v56 = vor.u32 1.1754944e-38, %v6116_v14  ;;  %vm6115_vm10 = vcmp.eq.f32.partialorder %v6114_v29, 8.507059e+37 }
 0xb79   :  { %v6132_v55 = vor.u32 1.1754944e-38, %v6131_v7  ;;  %vm6130_vm11 = vcmp.eq.f32.partialorder %v6129_v9, 8.507059e+37 }
 0xb7a   :  { %v8784_v60 = vpop.eup %8783 }
 0xb7b   :  { %v10656_v39 = vadd.f32 1.0, %v8784_v60 }
 0xb7c   :  { %v8786_v1 = vpop.eup %8785 }
 0xb7d   :  { %v8788_v12 = vpop.eup %8787  ;;  %v6106_v3 = vmul.f32 %v8786_v1, %v6102_v26  ;;  %8789 = vrcp.f32 %v10656_v39  ;;  %vm6111_vm4 = vweird.f32 %v8786_v1  ;;  %v6146_v54 = vand.u32 2147483648, %v10656_v39  ;;  %v6311_v26 = vld [vmem:[#allocation10 + $0x70] sm:$0xff] }
 0xb7e   :  { %v6121_v23 = vmul.f32 %v8788_v12, %v6103_v59  ;;  %8791 = vtanh.f32 %v6092_v22  ;;  %vm6126_vm5 = vweird.f32 %v8788_v12  ;;  %vm6112_vm8 = vmor %vm6110_vm6, %vm6111_vm4  ;;  %vm6140_vm13 = vweird.f32 %v10656_v39  ;;  %6357 = vmatpush.msrb.mxu1 %v6311_v26  ;;  %v6309_v59 = vld [vmem:[#allocation10 + $0x60] sm:$0xff] }
 0xb7f   :  { %v6107_v15 = vsub.f32 1.0, %v6106_v3  ;;  %vm6127_vm9 = vmor %vm6125_vm7, %vm6126_vm5  ;;  %v6144_v51 = vand.u32 2147483647, %v10656_v39  ;;  %v6147_v24 = vor.u32 1.1754944e-38, %v6146_v54 }
 0xb80   :  { %v6122_v46 = vsub.f32 1.0, %v6121_v23  ;;  %6358 = vmatpush.msrb.mxu1 %v6310_v47  ;;  %v6302_v23 = vld [vmem:[#allocation10 + $0x28] sm:$0xff] }
 0xb81   :  { %v6108_v11 = vmul.f32 %v8786_v1, %v6107_v15  ;;  %vm6145_vm15 = vcmp.eq.f32.partialorder %v6144_v51, 8.507059e+37 }
 0xb82   :  { %v6123_v19 = vmul.f32 %v8788_v12, %v6122_v46  ;;  %6359 = vmatpush.msrb.mxu1 %v6309_v59 }
 0xb83   :  { %v8790_v21 = vpop.eup %8789  ;;  %v6109_v10 = vadd.f32 %v8786_v1, %v6108_v11  ;;  %v6300_v11 = vld [vmem:[#allocation10 + $0x18] sm:$0xff] }
 0xb84   :  { %v6136_v16 = vmul.f32 %v8790_v21, %v10656_v39  ;;  %v6124_v58 = vadd.f32 %v8788_v12, %v6123_v19  ;;  %v8792_v30 = vpop.eup %8791  ;;  %vm6141_vm12 = vweird.f32 %v8790_v21  ;;  %6360 = vmatpush.msrb.mxu1 %v6308_v2  ;;  %v6304_v39 = vld [vmem:[#allocation10 + $0x38] sm:$0xff]  ;;  %v6298_v19 = vld [vmem:[#allocation10 + $0x8] sm:$0xff] }
 0xb85   :  { %v6113_v40 = vsel %vm6112_vm8, %v8786_v1, %v6109_v10  ;;  %vm6142_vm14 = vmor %vm6140_vm13, %vm6141_vm12  ;;  %v6297_v10 = vld [vmem:[#allocation10] sm:$0xff] }
 0xb86   :  { %v6137_v36 = vsub.f32 1.0, %v6136_v16  ;;  %v6118_v31 = vsel %vm6115_vm10, %v6117_v56, %v6113_v40  ;;  %v6128_v5 = vsel %vm6127_vm9, %v8788_v12, %v6124_v58  ;;  %6361 = vmatpush.msrb.mxu1 %v6307_v13 }
 0xb87   :  { %v6133_v28 = vsel %vm6130_vm11, %v6132_v55, %v6128_v5  ;;  %v6155_v50 = vmul.f32 %v8792_v30, %v6118_v31 }
 0xb88   :  { %v6138_v45 = vmul.f32 %v8790_v21, %v6137_v36  ;;  %v6154_v25 = vmul.f32 %v6152_v4, %v6133_v28  ;;  %6362 = vmatpush.msrb.mxu1 %v6306_v18 }
 0xb8a   :  { %v10662_v61 = vadd.f32 %v6155_v50, %v6154_v25  ;;  %v6139_v35 = vadd.f32 %v8790_v21, %v6138_v45  ;;  %6363 = vmatpush.msrb.mxu1 %v6305_v0 }
 0xb8c   :  { %8793 = vtanh.f32 %v10662_v61  ;;  %v6143_v63 = vsel %vm6142_vm14, %v8790_v21, %v6139_v35  ;;  %6364 = vmatpush.msrb.mxu1 %v6304_v39 }
 0xb8d   :  { %v6148_v49 = vsel %vm6145_vm15, %v6147_v24, %v6143_v63 }
 0xb8e   :  { %6365 = vmatpush.msrb.mxu1 %v6303_v38 }
 0xb90   :  { %6366 = vmatpush.msrb.mxu1 %v6302_v23 }
 0xb92   :  { %v8794_v17 = vpop.eup %8793  ;;  %6367 = vmatpush.msrb.mxu1 %v6301_v62 }
 0xb93   :  { %v6158_v52 = vmul.f32 %v8794_v17, %v6148_v49  ;;  %v6290_v49 = vrot.slane %v10662_v61, 6 }
 0xb94   :  { %6368 = vmatpush.msrb.mxu1 %v6300_v11 }
 0xb95   :  { %v6159_v20 = vpack.c.bf16 %v6158_v52, %v6158_v52 }
 0xb97   :  { %v6161_v27 = vrot.slane %v6159_v20, 2 }
 0xb99   :  { %6171 = vmatmul.bf16.vlgmr.msra.gmra.mxu0 %v6161_v27  ;;  %6184 = vmatmul.bf16.vlgmr.msra.gmra.mxu1 %v6161_v27 }
 0xb9a   :  { %6197 = vmatmul.bf16.vlgmr.msra.gmra.mxu2 %v6161_v27  ;;  %6210 = vmatmul.bf16.vlgmr.msra.gmra.mxu3 %v6161_v27 }
 0xba9   :  { %6349 = vmatmul.f32.vlgmr.msrb.gmra.mxu0 %v6331_v37 }
 0xc16   :  { %v6172_v57 = vpop.f32.mrf.mxu0  ;;  %v6185_v60 = vpop.f32.mrf.mxu1 }
 0xc17   :  { %v6219_v34 = vrot.slane %v6172_v57, 2  ;;  %v6220_v33 = vrot.slane %v6185_v60, 2 }
 0xc19   :  { %v6227_v1 = vadd.f32 %v6219_v34, %v10600_v48  ;;  %v6228_v22 = vadd.f32 %v6220_v33, %v10603_v42  ;;  %v6299_v42 = vld [vmem:[#allocation10 + $0x10] sm:$0xff] }
 0xc1a   :  { %6369 = vmatpush.msrb.mxu1 %v6299_v42 }
 0xc1b   :  { %v8010_v12 = vmul.f32 -1.442695, %v6227_v1  ;;  %v8011_v3 = vmul.f32 -1.442695, %v6228_v22 }
 0xc1c   :  { %6370 = vmatpush.msrb.mxu1 %v6298_v19 }
 0xc1d   :  { %8795 = vpow2.f32 %v8010_v12  ;;  %v6198_v15 = vpop.f32.mrf.mxu2  ;;  %v6211_v46 = vpop.f32.mrf.mxu3 }
 0xc1e   :  { %8797 = vpow2.f32 %v8011_v3  ;;  %v6221_v14 = vrot.slane %v6198_v15, 2  ;;  %v6174_v44 = vpop.f32.mrf.mxu0  ;;  %v6187_v7 = vpop.f32.mrf.mxu1  ;;  %6371 = vmatpush.msrb.mxu1 %v6297_v10  ;;  %v6222_v41 = vrot.slane %v6211_v46, 2 }
 0xc20   :  { %v6229_v48 = vadd.f32 %v6221_v14, %v11132_v53  ;;  %v6230_v40 = vadd.f32 %v6222_v41, %v11133_v43 }
 0xc22   :  { %v8012_v29 = vmul.f32 -1.442695, %v6229_v48 }
 0xc23   :  { %v8796_v9 = vpop.eup %8795 }
 0xc24   :  { %v8798_v32 = vpop.eup %8797  ;;  %v6240_v21 = vadd.f32 1.0, %v8796_v9  ;;  %8799 = vpow2.f32 %v8012_v29 }
 0xc25   :  { %v6241_v16 = vadd.f32 1.0, %v8798_v32  ;;  %v6200_v56 = vpop.f32.mrf.mxu2  ;;  %v6213_v58 = vpop.f32.mrf.mxu3 }
 0xc26   :  { %8801 = vrcp.f32 %v6240_v21  ;;  %v6254_v28 = vand.u32 2147483648, %v6240_v21  ;;  %v6252_v25 = vand.u32 2147483647, %v6240_v21  ;;  %vm6248_vm2 = vweird.f32 %v6240_v21  ;;  %v6350_v38 = vpop.f32.mrf.mxu0 }
 0xc27   :  { %8803 = vrcp.f32 %v6241_v16  ;;  %v6269_v50 = vand.u32 2147483648, %v6241_v16  ;;  %v6267_v54 = vand.u32 2147483647, %v6241_v16  ;;  %vm6263_vm3 = vweird.f32 %v6241_v16 }
 0xc28   :  { %v6255_v24 = vor.u32 1.1754944e-38, %v6254_v28  ;;  %vm6253_vm6 = vcmp.eq.f32.partialorder %v6252_v25, 8.507059e+37 }
 0xc29   :  { %v6270_v52 = vor.u32 1.1754944e-38, %v6269_v50  ;;  %vm6268_vm7 = vcmp.eq.f32.partialorder %v6267_v54, 8.507059e+37 }
 0xc2a   :  { %v8800_v4 = vpop.eup %8799 }
 0xc2b   :  { %v6242_v53 = vadd.f32 1.0, %v8800_v4 }
 0xc2c   :  { %v8802_v55 = vpop.eup %8801 }
 0xc2d   :  { %v8804_v30 = vpop.eup %8803  ;;  %v6244_v36 = vmul.f32 %v8802_v55, %v6240_v21  ;;  %8805 = vrcp.f32 %v6242_v53  ;;  %vm6249_vm0 = vweird.f32 %v8802_v55  ;;  %v6284_v60 = vand.u32 2147483648, %v6242_v53 }
 0xc2e   :  { %v6259_v31 = vmul.f32 %v8804_v30, %v6241_v16  ;;  %8807 = vtanh.f32 %v6230_v40  ;;  %vm6264_vm1 = vweird.f32 %v8804_v30  ;;  %vm6250_vm4 = vmor %vm6248_vm2, %vm6249_vm0  ;;  %vm6278_vm9 = vweird.f32 %v6242_v53 }
 0xc2f   :  { %v6245_v5 = vsub.f32 1.0, %v6244_v36  ;;  %vm6265_vm5 = vmor %vm6263_vm3, %vm6264_vm1  ;;  %v6282_v61 = vand.u32 2147483647, %v6242_v53  ;;  %v6285_v34 = vor.u32 1.1754944e-38, %v6284_v60 }
 0xc30   :  { %v6260_v6 = vsub.f32 1.0, %v6259_v31 }
 0xc31   :  { %v6246_v45 = vmul.f32 %v8802_v55, %v6245_v5  ;;  %vm6283_vm11 = vcmp.eq.f32.partialorder %v6282_v61, 8.507059e+37 }
 0xc32   :  { %v6261_v35 = vmul.f32 %v8804_v30, %v6260_v6 }
 0xc33   :  { %v8806_v51 = vpop.eup %8805  ;;  %v6247_v63 = vadd.f32 %v8802_v55, %v6246_v45 }
 0xc34   :  { %v6274_v43 = vmul.f32 %v8806_v51, %v6242_v53  ;;  %v6262_v17 = vadd.f32 %v8804_v30, %v6261_v35  ;;  %v8808_v27 = vpop.eup %8807  ;;  %vm6279_vm8 = vweird.f32 %v8806_v51 }
 0xc35   :  { %v6251_v20 = vsel %vm6250_vm4, %v8802_v55, %v6247_v63  ;;  %vm6280_vm10 = vmor %vm6278_vm9, %vm6279_vm8 }
 0xc36   :  { %v6275_v37 = vsub.f32 1.0, %v6274_v43  ;;  %v6256_v8 = vsel %vm6253_vm6, %v6255_v24, %v6251_v20  ;;  %v6266_v26 = vsel %vm6265_vm5, %v8804_v30, %v6262_v17 }
 0xc37   :  { %v6271_v47 = vsel %vm6268_vm7, %v6270_v52, %v6266_v26  ;;  %v6293_v59 = vmul.f32 %v8808_v27, %v6256_v8 }
 0xc38   :  { %v6276_v2 = vmul.f32 %v8806_v51, %v6275_v37  ;;  %v6292_v13 = vmul.f32 %v6290_v49, %v6271_v47 }
 0xc3a   :  { %v6294_v18 = vadd.f32 %v6293_v59, %v6292_v13  ;;  %v6277_v57 = vadd.f32 %v8806_v51, %v6276_v2 }
 0xc3c   :  { %8809 = vtanh.f32 %v6294_v18  ;;  %v6281_v0 = vsel %vm6280_vm10, %v8806_v51, %v6277_v57 }
 0xc3d   :  { %v6286_v39 = vsel %vm6283_vm11, %v6285_v34, %v6281_v0 }
 0xc42   :  { %v8810_v33 = vpop.eup %8809 }
 0xc43   :  { %v6296_v1 = vmul.f32 %v8810_v33, %v6286_v39 }
 0xc45   :  { %v6354_v22 = vrot.slane %v6296_v1, 6 }
 0xc47   :  { %6372 = vmatmul.f32.vlgmr.msrb.gmra.mxu1 %v6354_v22 }
 0xcc4   :  { %v6373_v12 = vpop.f32.mrf.mxu1 }
 0xcc5   :  { %v6374_v3 = vadd.f32 %v6373_v12, %v6350_v38 }
 0xcc7   :  { %6376 = vst [vmem:[%s10685_s8] sm:$0x3] %v6374_v3 }
 0xcc8   :  { %6381 = vsyncpa [#allocation4], 1 }
 0xcc9   :  { %6382 = vsyncpa [#allocation6], 1 }
 0xcca   :  { %6383 = vsyncpa [#allocation9], 1 }

</bundles_post_ra>
